<compile_context>
chip_gen: v7x
topology: tpu7x:2x2x1
jax: 0.10.0
libtpu: 0.0.40
codegen_flags: <defaults>
</compile_context>

<pallas_src>
import functools

import jax
import jax.numpy as jnp
from jax import lax
from jax.experimental import pallas as pl
from jax.experimental.pallas import tpu as pltpu


# ----------------------------------------------------------------------------------
# Kernel
# ----------------------------------------------------------------------------------
def _csres_kernel(x_ref, a1_ref, b1_ref, a2_ref, b2_ref,
                  fc1w_ref, fc1b_ref, fc2wt_ref, fc2bt_ref,
                  samean_ref, samaxsel_ref, asa_ref, sab_ref,
                  y_ref,
                  *, H, W, Cin, Cout, B_blk):
    WCin = W * Cin
    WCout = W * Cout
    M = B_blk * H
    mid = fc2wt_ref.shape[0]

    # Row index within each image; masks on row shifts implement the conv's vertical zero
    # padding AND prevent cross-image leakage in the batched-M layout.
    r_mod = lax.broadcasted_iota(jnp.int32, (M, 1), 0) % H

    def row_shift(v, d):
        # result[i] = v[i + d], zero-filled at the global ends (|d| <= 3, static).
        if d == 0:
            return v
        rows, cols = v.shape
        z = jnp.zeros((abs(d), cols), v.dtype)
        if d > 0:
            return jnp.concatenate([v[d:, :], z], axis=0)
        return jnp.concatenate([z, v[:rows + d, :]], axis=0)

    def vshift(v, d):
        if d == 0:
            return v
        shifted = row_shift(v, d)
        valid = jnp.logical_and(r_mod + d >= 0, r_mod + d <= H - 1)
        return jnp.where(valid, shifted, jnp.zeros_like(shifted))

    def conv3x3(v, a_ref, bias):
        # 3 accumulating MXU dots, one per vertical tap; horizontal taps and horizontal
        # zero padding are folded into the banded weight slabs (K = W*Cin each).
        out = jnp.dot(v, a_ref[WCin:2 * WCin, :], preferred_element_type=jnp.float32)
        out = out + jnp.dot(vshift(v, -1), a_ref[0:WCin, :],
                            preferred_element_type=jnp.float32)
        out = out + jnp.dot(vshift(v, +1), a_ref[2 * WCin:3 * WCin, :],
                            preferred_element_type=jnp.float32)
        return out + bias

    # All B_blk images stacked along M: one lane-dense (M, W*C) activation slab.
    x_all = x_ref[...].reshape(M, WCin)

    # ---------------- conv1: 3x3, Cin->Cin, padding=1 -------------------------------
    out1 = conv3x3(x_all, a1_ref, b1_ref[...])
    # F.leaky_relu(out, True): positional True == negative_slope=1.0 -> identity (no-op).

    # ---------------- conv2: 3x3, Cin->Cout, padding=1 ------------------------------
    out2 = conv3x3(out1, a2_ref, b2_ref[...])                        # (M, W*Cout)

    # ---------------- channel attention (per image) ---------------------------------
    out2_3d = out2.reshape(B_blk, H, WCout)
    row_mean = jnp.mean(out2_3d, axis=1)                             # (B_blk, W*Cout)
    row_max = jnp.max(out2_3d, axis=1)
    # Fold the W copies of each channel with a full-width lane roll tree (XLU + VPU).
    # The covered lane set is a full coset, so the roll direction does not matter.
    step = Cout
    while step < WCout:
        row_mean = row_mean + pltpu.roll(row_mean, shift=step, axis=1)
        row_max = jnp.maximum(row_max, pltpu.roll(row_max, shift=step, axis=1))
        step *= 2
    avg_ch = row_mean[:, 0:Cout] * (1.0 / W)                         # (B_blk, Cout)
    max_ch = row_max[:, 0:Cout]
    stacked = jnp.concatenate([avg_ch, max_ch], axis=0)              # (2*B_blk, Cout)
    hid = jnp.maximum(
        jnp.dot(stacked, fc1w_ref[...], preferred_element_type=jnp.float32)
        + fc1b_ref[...], 0.0)                                        # (2*B_blk, mid)
    hsum = hid[0:B_blk, :] + hid[B_blk:2 * B_blk, :]                 # (B_blk, mid)
    # mlp(avg)+mlp(max) = (hid_avg+hid_max) @ fc2w + 2*fc2b; K=mid is tiny, so do it as
    # `mid` broadcast FMAs on the VPU instead of an MXU dot.
    logits = 2.0 * fc2bt_ref[...]
    for k in range(mid):
        logits = logits + hsum[:, k:k + 1] * fc2wt_ref[k:k + 1, :]
    ca = jax.nn.sigmoid(logits)                                      # (B_blk, W*Cout)
    out3 = (out2_3d * ca[:, None, :]).reshape(M, WCout)

    # ---------------- spatial attention ----------------------------------------------
    # Per-pixel channel max: log2(Cout)-step lane roll tree; after the tree lane w*Cout
    # holds the max of channel block w.  (jnp.roll(x, -s): result[j] = x[j + s].)
    m = out3
    step = 1
    while step < Cout:
        m = jnp.maximum(m, jnp.roll(m, -step, axis=1))
        step *= 2
    # Per-pixel channel mean via one dot against a block-diagonal averaging matrix, and
    # the max compacted into lanes [W, 2W) via a 0/1 selection dot.
    stats = (jnp.dot(out3, samean_ref[...], preferred_element_type=jnp.float32)
             + jnp.dot(m, samaxsel_ref[...], preferred_element_type=jnp.float32))   # (M, 2W)
    # 7x7 SA conv = 7 accumulating dots (one per vertical tap); horizontal taps/padding
    # and the broadcast over channels are folded into the banded weight `asa`.
    sa_logits = sab_ref[...]
    for kh in range(7):
        sa_logits = sa_logits + jnp.dot(
            vshift(stats, kh - 3), asa_ref[kh * 2 * W:(kh + 1) * 2 * W, :],
            preferred_element_type=jnp.float32)
    out4 = out3 * jax.nn.sigmoid(sa_logits)                          # (M, W*Cout)

    # ------------------------- residual; full-width store ----------------------------
    y_ref[...] = (x_all + out4).reshape(B_blk, H, WCout)


# ----------------------------------------------------------------------------------
# Wrapper-side banded / pooling matrices (horizontal taps + padding folded into matmuls)
# ----------------------------------------------------------------------------------
def _conv_band_matrix(w_hwio, out_w):
    """(KH,KW,Cin,Cout) SAME conv -> (KH*out_w*Cin, out_w*Cout) banded matrix for the flat
    (.., W*C) layout.  Vertical taps are handled by row shifts in the kernel; slab kh is
    rows [kh*out_w*Cin, (kh+1)*out_w*Cin)."""
    kh, kw, cin, cout = w_hwio.shape
    pad = (kw - 1) // 2
    q = jnp.arange(out_w)[:, None, None]          # input column
    wo = jnp.arange(out_w)[None, :, None]         # output column
    k = jnp.arange(kw)[None, None, :]
    taps = (q == wo + k - pad).astype(w_hwio.dtype)               # (out_w, out_w, kw)
    a = jnp.einsum("qwk,hkio->hqiwo", taps, w_hwio)               # (kh, q, cin, w, cout)
    return a.reshape(kh * out_w * cin, out_w * cout)


def _sa_band_matrix(w_sa, out_w, cout):
    """(7,7,2) spatial-attention conv -> (7*2*out_w, out_w*cout) banded matrix.  Slab kh is
    rows [kh*2W, (kh+1)*2W): lanes [0:W) mean plane, [W:2W) max plane; the weight is
    broadcast along cout so the sigmoid gate comes out lane-dense."""
    kh, kw, csa = w_sa.shape
    pad = (kw - 1) // 2
    q = jnp.arange(out_w)[:, None, None]
    wo = jnp.arange(out_w)[None, :, None]
    k = jnp.arange(kw)[None, None, :]
    taps = (q == wo + k - pad).astype(w_sa.dtype)                 # (out_w, out_w, kw)
    a = jnp.einsum("qwk,hkc->hcqw", taps, w_sa)                   # (kh, 2, q, w)
    a = a.reshape(kh, csa * out_w, out_w)
    a = jnp.broadcast_to(a[..., None], (kh, csa * out_w, out_w, cout))
    return a.reshape(kh * csa * out_w, out_w * cout)


def _sa_stat_matrices(out_w, cout):
    """Block-diagonal channel-mean matrix and 0/1 max-selection matrix, both (W*Cout, 2W):
    stats = out3 @ mean_m + rolled_max @ sel_m -> per-pixel [mean | max], lane-dense."""
    wc = out_w * cout
    rows = jnp.arange(wc)
    cols = jnp.arange(out_w)
    mean_m = (rows[:, None] // cout == cols[None, :]).astype(jnp.float32) / cout
    sel_m = (rows[:, None] == (cols * cout)[None, :]).astype(jnp.float32)
    z = jnp.zeros((wc, out_w), jnp.float32)
    return (jnp.concatenate([mean_m, z], axis=1),
            jnp.concatenate([z, sel_m], axis=1))


def _images_per_step(batch, H, target_rows=128):
    """Largest divisor of batch whose stacked row count (b_blk*H) stays <= target_rows.
    No minimum-grid-steps requirement: the grid is a serial loop on v5e/v6e, so fewer,
    fatter steps are strictly better there (on v7x callers may prefer an even step count)."""
    cap = max(1, target_rows // max(H, 1))
    best = 1
    for cand in range(1, min(cap, batch) + 1):
        if batch % cand == 0:
            best = cand
    return best


# ----------------------------------------------------------------------------------
# Public wrapper (NCHW in / NCHW out, matching the PyTorch module)
# ----------------------------------------------------------------------------------
def csres_block_pallas(x_nchw, p, *, target_rows=128):
    B, Cin, H, W = x_nchw.shape
    Cout = p["w2"].shape[-1]
    mid = p["fc1w"].shape[-1]
    assert Cin == Cout, "residual add requires in_channel == out_channel"
    assert (Cout & (Cout - 1)) == 0 and (W & (W - 1)) == 0, "roll trees assume power-of-two W, C"

    # NCHW -> lane-dense flat NHWC (B, H, W*C).
    x = jnp.transpose(x_nchw, (0, 2, 3, 1)).astype(jnp.float32).reshape(B, H, W * Cin)

    a1 = _conv_band_matrix(p["w1"].astype(jnp.float32), W)        # (3*W*Cin, W*Cin)
    a2 = _conv_band_matrix(p["w2"].astype(jnp.float32), W)        # (3*W*Cin, W*Cout)
    asa = _sa_band_matrix(p["saw"].astype(jnp.float32), W, Cout)  # (7*2*W,   W*Cout)
    samean, samaxsel = _sa_stat_matrices(W, Cout)                 # (W*Cout, 2*W) each

    b1t = jnp.tile(p["b1"].astype(jnp.float32), (1, W))           # (1, W*Cin)
    b2t = jnp.tile(p["b2"].astype(jnp.float32), (1, W))           # (1, W*Cout)
    fc2wt = jnp.tile(p["fc2w"].astype(jnp.float32), (1, W))       # (mid, W*Cout)
    fc2bt = jnp.tile(p["fc2b"].astype(jnp.float32), (1, W))       # (1, W*Cout)
    sabt = jnp.broadcast_to(p["sab"].astype(jnp.float32).reshape(1, 1), (1, W * Cout))

    b_blk = _images_per_step(B, H, target_rows)
    grid = (B // b_blk,)

    kernel = functools.partial(_csres_kernel, H=H, W=W, Cin=Cin, Cout=Cout, B_blk=b_blk)
    # Constant (weight) operands use the same block every step.
    const = lambda shape: pl.BlockSpec(shape, lambda b: (0, 0))

    out_flat = pl.pallas_call(
        kernel,
        out_shape=jax.ShapeDtypeStruct((B, H, W * Cout), jnp.float32),
        grid_spec=pltpu.PrefetchScalarGridSpec(
            num_scalar_prefetch=0,
            grid=grid,
            in_specs=[
                pl.BlockSpec((b_blk, H, W * Cin), lambda b: (b, 0, 0)),   # x (flat NHWC)
                const(a1.shape),                                          # conv1 banded weights
                const((1, W * Cin)),                                      # conv1 bias (tiled)
                const(a2.shape),                                          # conv2 banded weights
                const((1, W * Cout)),                                     # conv2 bias (tiled)
                const((Cout, mid)),                                       # CA fc1 W
                const((1, mid)),                                          # CA fc1 b
                const((mid, W * Cout)),                                   # CA fc2 W (tiled)
                const((1, W * Cout)),                                     # CA fc2 b (tiled)
                const((W * Cout, 2 * W)),                                 # SA channel-mean matrix
                const((W * Cout, 2 * W)),                                 # SA max-selection matrix
                const(asa.shape),                                         # SA banded 7x7 weights
                const((1, W * Cout)),                                     # SA bias (broadcast)
            ],
            out_specs=pl.BlockSpec((b_blk, H, W * Cout), lambda b: (b, 0, 0)),
        ),
        compiler_params=pltpu.CompilerParams(
            dimension_semantics=("parallel",),          # independent image blocks (v7x megacore)
            vmem_limit_bytes=32 * 1024 * 1024,
        ),
    )(x, a1, b1t, a2, b2t,
      p["fc1w"].astype(jnp.float32), p["fc1b"].astype(jnp.float32),
      fc2wt, fc2bt, samean, samaxsel, asa, sabt)

    return jnp.transpose(out_flat.reshape(B, H, W, Cout), (0, 3, 1, 2))   # -> NCHW


# ----------------------------------------------------------------------------------
# Pure-JAX reference (XLA convs) for correctness checking
# ----------------------------------------------------------------------------------
def csres_block_ref(x_nchw, p):
    x = jnp.transpose(x_nchw, (0, 2, 3, 1)).astype(jnp.float32)
    dn = ("NHWC", "HWIO", "NHWC")
    out = lax.conv_general_dilated(x, p["w1"], (1, 1), "SAME",
                                   dimension_numbers=dn) + p["b1"]
    # leaky_relu with negative_slope=1.0 is the identity.
    out = lax.conv_general_dilated(out, p["w2"], (1, 1), "SAME",
                                   dimension_numbers=dn) + p["b2"]
    avg = jnp.mean(out, axis=(1, 2))
    mx = jnp.max(out, axis=(1, 2))
    mlp = lambda v: jnp.maximum(v @ p["fc1w"] + p["fc1b"], 0.0) @ p["fc2w"] + p["fc2b"]
    ca = jax.nn.sigmoid(mlp(avg) + mlp(mx))
    out = out * ca[:, None, None, :]
    avg_s = jnp.mean(out, axis=-1, keepdims=True)
    max_s = jnp.max(out, axis=-1, keepdims=True)
    sa_in = jnp.concatenate([avg_s, max_s], axis=-1)
    sa = jax.nn.sigmoid(lax.conv_general_dilated(sa_in, p["saw"][..., None], (1, 1), "SAME",
                                                 dimension_numbers=dn) + p["sab"])
    out = out * sa
    return jnp.transpose(x + out, (0, 3, 1, 2))


def init_params(key, in_channel, out_channel, reduction=16):
    mid = max(out_channel // reduction, 1)
    ks = jax.random.split(key, 10)
    s = 0.1
    return {
        "w1": s * jax.random.normal(ks[0], (3, 3, in_channel, in_channel), jnp.float32),
        "b1": s * jax.random.normal(ks[1], (1, in_channel), jnp.float32),
        "w2": s * jax.random.normal(ks[2], (3, 3, in_channel, out_channel), jnp.float32),
        "b2": s * jax.random.normal(ks[3], (1, out_channel), jnp.float32),
        "fc1w": s * jax.random.normal(ks[4], (out_channel, mid), jnp.float32),
        "fc1b": s * jax.random.normal(ks[5], (1, mid), jnp.float32),
        "fc2w": s * jax.random.normal(ks[6], (mid, out_channel), jnp.float32),
        "fc2b": s * jax.random.normal(ks[7], (1, out_channel), jnp.float32),
        "saw": s * jax.random.normal(ks[8], (7, 7, 2), jnp.float32),   # 7x7 SA conv, (kh, kw, in=2)
        "sab": s * jax.random.normal(ks[9], (1,), jnp.float32),
    }


if __name__ == "__main__":
    B, C, H, W = 2, 32, 16, 16          # channel=32 so that channel//16 = 2 in the CA MLP
    key = jax.random.PRNGKey(0)
    k_param, k_x = jax.random.split(key)
    params = init_params(k_param, C, C)
    x = jax.random.normal(k_x, (B, C, H, W), jnp.float32)   # NCHW, as in PyTorch

    y = csres_block_pallas(x, params)
    jax.block_until_ready(y)

    y_ref = csres_block_ref(x, params)
    err = float(jnp.max(jnp.abs(y - y_ref)))
    if not jnp.allclose(y, y_ref, atol=2e-2, rtol=2e-2):
        raise AssertionError(f"Pallas kernel mismatch vs reference, max abs err = {err}")
    print("KERNEL_OK")
</pallas_src>

<mosaic_0001>
module attributes {stable_mosaic.version = 11 : i64} {
  func.func @_csres_kernel(%arg0: i32, %arg1: memref<2x16x512xf32, #tpu.memory_space<vmem>>, %arg2: memref<1536x512xf32, #tpu.memory_space<vmem>>, %arg3: memref<1x512xf32, #tpu.memory_space<vmem>>, %arg4: memref<1536x512xf32, #tpu.memory_space<vmem>>, %arg5: memref<1x512xf32, #tpu.memory_space<vmem>>, %arg6: memref<32x2xf32, #tpu.memory_space<vmem>>, %arg7: memref<1x2xf32, #tpu.memory_space<vmem>>, %arg8: memref<2x512xf32, #tpu.memory_space<vmem>>, %arg9: memref<1x512xf32, #tpu.memory_space<vmem>>, %arg10: memref<512x32xf32, #tpu.memory_space<vmem>>, %arg11: memref<512x32xf32, #tpu.memory_space<vmem>>, %arg12: memref<224x512xf32, #tpu.memory_space<vmem>>, %arg13: memref<1x512xf32, #tpu.memory_space<vmem>>, %arg14: memref<2x16x512xf32, #tpu.memory_space<vmem>>) attributes {dimension_semantics = [#tpu.dimension_semantics<parallel>], iteration_bounds = array<i64: 1>, scalar_prefetch = 0 : i64, scratch_operands = 0 : i64, tpu.core_type = #tpu.core_type<tc>, window_params = [{transform_indices = @transform_0, window_bounds = array<i64: 2, 16, 512>}, {pipeline_mode = #tpu.pipeline_mode<synchronous>, transform_indices = @transform_1, window_bounds = array<i64: 1536, 512>}, {pipeline_mode = #tpu.pipeline_mode<synchronous>, transform_indices = @transform_2, window_bounds = array<i64: 1, 512>}, {pipeline_mode = #tpu.pipeline_mode<synchronous>, transform_indices = @transform_3, window_bounds = array<i64: 1536, 512>}, {pipeline_mode = #tpu.pipeline_mode<synchronous>, transform_indices = @transform_4, window_bounds = array<i64: 1, 512>}, {pipeline_mode = #tpu.pipeline_mode<synchronous>, transform_indices = @transform_5, window_bounds = array<i64: 32, 2>}, {pipeline_mode = #tpu.pipeline_mode<synchronous>, transform_indices = @transform_6, window_bounds = array<i64: 1, 2>}, {pipeline_mode = #tpu.pipeline_mode<synchronous>, transform_indices = @transform_7, window_bounds = array<i64: 2, 512>}, {pipeline_mode = #tpu.pipeline_mode<synchronous>, transform_indices = @transform_8, window_bounds = array<i64: 1, 512>}, {pipeline_mode = #tpu.pipeline_mode<synchronous>, transform_indices = @transform_9, window_bounds = array<i64: 512, 32>}, {pipeline_mode = #tpu.pipeline_mode<synchronous>, transform_indices = @transform_10, window_bounds = array<i64: 512, 32>}, {pipeline_mode = #tpu.pipeline_mode<synchronous>, transform_indices = @transform_11, window_bounds = array<i64: 224, 512>}, {pipeline_mode = #tpu.pipeline_mode<synchronous>, transform_indices = @transform_12, window_bounds = array<i64: 1, 512>}, {transform_indices = @transform_13, window_bounds = array<i64: 2, 16, 512>}]} {
    %0 = tpu.iota {dimensions = array<i32: 0>} : vector<32x1xi32>
    %c16_i32 = arith.constant 16 : i32
    %c0_i32 = arith.constant 0 : i32
    %1 = arith.cmpi eq, %c16_i32, %c0_i32 : i32
    %c1_i32 = arith.constant 1 : i32
    %2 = arith.select %1, %c1_i32, %c16_i32 : i32
    %3 = vector.broadcast %2 : i32 to vector<32x1xi32>
    %4 = arith.remsi %0, %3 : vector<32x1xi32>
    %c0_i32_0 = arith.constant 0 : i32
    %5 = vector.broadcast %c0_i32_0 : i32 to vector<32x1xi32>
    %6 = arith.cmpi ne, %4, %5 : vector<32x1xi32>
    %c0_i32_1 = arith.constant 0 : i32
    %7 = vector.broadcast %c0_i32_1 : i32 to vector<32x1xi32>
    %8 = arith.cmpi slt, %4, %7 : vector<32x1xi32>
    %c0_i32_2 = arith.constant 0 : i32
    %9 = arith.cmpi slt, %2, %c0_i32_2 : i32
    %10 = vector.broadcast %9 : i1 to vector<32x1xi1>
    %11 = vector.broadcast %10 : vector<32x1xi1> to vector<32x1xi1>
    %12 = arith.xori %8, %11 : vector<32x1xi1>
    %13 = arith.andi %12, %6 : vector<32x1xi1>
    %14 = vector.broadcast %2 : i32 to vector<32x1xi32>
    %15 = arith.addi %4, %14 : vector<32x1xi32>
    %16 = arith.select %13, %15, %4 : vector<32x1xi1>, vector<32x1xi32>
    %c0 = arith.constant 0 : index
    %c0_3 = arith.constant 0 : index
    %c0_4 = arith.constant 0 : index
    %17 = vector.load %arg1[%c0, %c0_3, %c0_4] : memref<2x16x512xf32, #tpu.memory_space<vmem>>, vector<2x16x512xf32>
    %18 = vector.shape_cast %17 : vector<2x16x512xf32> to vector<32x512xf32>
    %c0_5 = arith.constant 0 : index
    %c0_6 = arith.constant 0 : index
    %19 = vector.load %arg3[%c0_5, %c0_6] : memref<1x512xf32, #tpu.memory_space<vmem>>, vector<1x512xf32>
    %c512 = arith.constant 512 : index
    %c0_7 = arith.constant 0 : index
    %20 = vector.load %arg2[%c512, %c0_7] : memref<1536x512xf32, #tpu.memory_space<vmem>>, vector<512x512xf32>
    %cst = arith.constant dense<0.000000e+00> : vector<32x512xf32>
    %21 = tpu.matmul %18, %20, %cst {dimension_numbers = #tpu.dot_dimension_numbers<[1], [0], [0], [1], [0, 0, 1, 1], [], []>} : vector<32x512xf32>, vector<512x512xf32>, vector<32x512xf32> -> vector<32x512xf32>
    %cst_8 = arith.constant 0.000000e+00 : f32
    %22 = vector.broadcast %cst_8 : f32 to vector<1x512xf32>
    %23 = vector.extract_strided_slice %18 {offsets = [0, 0], sizes = [31, 512], strides = [1, 1]} : vector<32x512xf32> to vector<31x512xf32>
    %24 = tpu.concatenate %22, %23 in 0 : vector<1x512xf32>, vector<31x512xf32> -> vector<32x512xf32>
    %c-1_i32 = arith.constant -1 : i32
    %25 = vector.broadcast %c-1_i32 : i32 to vector<32x1xi32>
    %26 = arith.addi %16, %25 : vector<32x1xi32>
    %c0_i32_9 = arith.constant 0 : i32
    %27 = vector.broadcast %c0_i32_9 : i32 to vector<32x1xi32>
    %28 = arith.cmpi sge, %26, %27 : vector<32x1xi32>
    %c-1_i32_10 = arith.constant -1 : i32
    %29 = vector.broadcast %c-1_i32_10 : i32 to vector<32x1xi32>
    %30 = arith.addi %16, %29 : vector<32x1xi32>
    %c15_i32 = arith.constant 15 : i32
    %31 = vector.broadcast %c15_i32 : i32 to vector<32x1xi32>
    %32 = arith.cmpi sle, %30, %31 : vector<32x1xi32>
    %33 = arith.andi %28, %32 : vector<32x1xi1>
    %cst_11 = arith.constant 0.000000e+00 : f32
    %34 = vector.broadcast %cst_11 : f32 to vector<32x512xf32>
    %35 = vector.shape_cast %33 : vector<32x1xi1> to vector<32x1xi1>
    %36 = vector.broadcast %35 : vector<32x1xi1> to vector<32x512xi1>
    %37 = arith.select %36, %24, %34 : vector<32x512xi1>, vector<32x512xf32>
    %c0_12 = arith.constant 0 : index
    %c0_13 = arith.constant 0 : index
    %38 = vector.load %arg2[%c0_12, %c0_13] : memref<1536x512xf32, #tpu.memory_space<vmem>>, vector<512x512xf32>
    %cst_14 = arith.constant dense<0.000000e+00> : vector<32x512xf32>
    %39 = tpu.matmul %37, %38, %cst_14 {dimension_numbers = #tpu.dot_dimension_numbers<[1], [0], [0], [1], [0, 0, 1, 1], [], []>} : vector<32x512xf32>, vector<512x512xf32>, vector<32x512xf32> -> vector<32x512xf32>
    %40 = arith.addf %21, %39 : vector<32x512xf32>
    %cst_15 = arith.constant 0.000000e+00 : f32
    %41 = vector.broadcast %cst_15 : f32 to vector<1x512xf32>
    %42 = vector.extract_strided_slice %18 {offsets = [1, 0], sizes = [31, 512], strides = [1, 1]} : vector<32x512xf32> to vector<31x512xf32>
    %43 = tpu.concatenate %42, %41 in 0 : vector<31x512xf32>, vector<1x512xf32> -> vector<32x512xf32>
    %c1_i32_16 = arith.constant 1 : i32
    %44 = vector.broadcast %c1_i32_16 : i32 to vector<32x1xi32>
    %45 = arith.addi %16, %44 : vector<32x1xi32>
    %c0_i32_17 = arith.constant 0 : i32
    %46 = vector.broadcast %c0_i32_17 : i32 to vector<32x1xi32>
    %47 = arith.cmpi sge, %45, %46 : vector<32x1xi32>
    %c1_i32_18 = arith.constant 1 : i32
    %48 = vector.broadcast %c1_i32_18 : i32 to vector<32x1xi32>
    %49 = arith.addi %16, %48 : vector<32x1xi32>
    %c15_i32_19 = arith.constant 15 : i32
    %50 = vector.broadcast %c15_i32_19 : i32 to vector<32x1xi32>
    %51 = arith.cmpi sle, %49, %50 : vector<32x1xi32>
    %52 = arith.andi %47, %51 : vector<32x1xi1>
    %cst_20 = arith.constant 0.000000e+00 : f32
    %53 = vector.broadcast %cst_20 : f32 to vector<32x512xf32>
    %54 = vector.shape_cast %52 : vector<32x1xi1> to vector<32x1xi1>
    %55 = vector.broadcast %54 : vector<32x1xi1> to vector<32x512xi1>
    %56 = arith.select %55, %43, %53 : vector<32x512xi1>, vector<32x512xf32>
    %c1024 = arith.constant 1024 : index
    %c0_21 = arith.constant 0 : index
    %57 = vector.load %arg2[%c1024, %c0_21] : memref<1536x512xf32, #tpu.memory_space<vmem>>, vector<512x512xf32>
    %cst_22 = arith.constant dense<0.000000e+00> : vector<32x512xf32>
    %58 = tpu.matmul %56, %57, %cst_22 {dimension_numbers = #tpu.dot_dimension_numbers<[1], [0], [0], [1], [0, 0, 1, 1], [], []>} : vector<32x512xf32>, vector<512x512xf32>, vector<32x512xf32> -> vector<32x512xf32>
    %59 = arith.addf %40, %58 : vector<32x512xf32>
    %60 = vector.broadcast %19 : vector<1x512xf32> to vector<32x512xf32>
    %61 = arith.addf %59, %60 : vector<32x512xf32>
    %c0_23 = arith.constant 0 : index
    %c0_24 = arith.constant 0 : index
    %62 = vector.load %arg5[%c0_23, %c0_24] : memref<1x512xf32, #tpu.memory_space<vmem>>, vector<1x512xf32>
    %c512_25 = arith.constant 512 : index
    %c0_26 = arith.constant 0 : index
    %63 = vector.load %arg4[%c512_25, %c0_26] : memref<1536x512xf32, #tpu.memory_space<vmem>>, vector<512x512xf32>
    %cst_27 = arith.constant dense<0.000000e+00> : vector<32x512xf32>
    %64 = tpu.matmul %61, %63, %cst_27 {dimension_numbers = #tpu.dot_dimension_numbers<[1], [0], [0], [1], [0, 0, 1, 1], [], []>} : vector<32x512xf32>, vector<512x512xf32>, vector<32x512xf32> -> vector<32x512xf32>
    %cst_28 = arith.constant 0.000000e+00 : f32
    %65 = vector.broadcast %cst_28 : f32 to vector<1x512xf32>
    %66 = vector.extract_strided_slice %61 {offsets = [0, 0], sizes = [31, 512], strides = [1, 1]} : vector<32x512xf32> to vector<31x512xf32>
    %67 = tpu.concatenate %65, %66 in 0 : vector<1x512xf32>, vector<31x512xf32> -> vector<32x512xf32>
    %c-1_i32_29 = arith.constant -1 : i32
    %68 = vector.broadcast %c-1_i32_29 : i32 to vector<32x1xi32>
    %69 = arith.addi %16, %68 : vector<32x1xi32>
    %c0_i32_30 = arith.constant 0 : i32
    %70 = vector.broadcast %c0_i32_30 : i32 to vector<32x1xi32>
    %71 = arith.cmpi sge, %69, %70 : vector<32x1xi32>
    %c-1_i32_31 = arith.constant -1 : i32
    %72 = vector.broadcast %c-1_i32_31 : i32 to vector<32x1xi32>
    %73 = arith.addi %16, %72 : vector<32x1xi32>
    %c15_i32_32 = arith.constant 15 : i32
    %74 = vector.broadcast %c15_i32_32 : i32 to vector<32x1xi32>
    %75 = arith.cmpi sle, %73, %74 : vector<32x1xi32>
    %76 = arith.andi %71, %75 : vector<32x1xi1>
    %cst_33 = arith.constant 0.000000e+00 : f32
    %77 = vector.broadcast %cst_33 : f32 to vector<32x512xf32>
    %78 = vector.shape_cast %76 : vector<32x1xi1> to vector<32x1xi1>
    %79 = vector.broadcast %78 : vector<32x1xi1> to vector<32x512xi1>
    %80 = arith.select %79, %67, %77 : vector<32x512xi1>, vector<32x512xf32>
    %c0_34 = arith.constant 0 : index
    %c0_35 = arith.constant 0 : index
    %81 = vector.load %arg4[%c0_34, %c0_35] : memref<1536x512xf32, #tpu.memory_space<vmem>>, vector<512x512xf32>
    %cst_36 = arith.constant dense<0.000000e+00> : vector<32x512xf32>
    %82 = tpu.matmul %80, %81, %cst_36 {dimension_numbers = #tpu.dot_dimension_numbers<[1], [0], [0], [1], [0, 0, 1, 1], [], []>} : vector<32x512xf32>, vector<512x512xf32>, vector<32x512xf32> -> vector<32x512xf32>
    %83 = arith.addf %64, %82 : vector<32x512xf32>
    %cst_37 = arith.constant 0.000000e+00 : f32
    %84 = vector.broadcast %cst_37 : f32 to vector<1x512xf32>
    %85 = vector.extract_strided_slice %61 {offsets = [1, 0], sizes = [31, 512], strides = [1, 1]} : vector<32x512xf32> to vector<31x512xf32>
    %86 = tpu.concatenate %85, %84 in 0 : vector<31x512xf32>, vector<1x512xf32> -> vector<32x512xf32>
    %c1_i32_38 = arith.constant 1 : i32
    %87 = vector.broadcast %c1_i32_38 : i32 to vector<32x1xi32>
    %88 = arith.addi %16, %87 : vector<32x1xi32>
    %c0_i32_39 = arith.constant 0 : i32
    %89 = vector.broadcast %c0_i32_39 : i32 to vector<32x1xi32>
    %90 = arith.cmpi sge, %88, %89 : vector<32x1xi32>
    %c1_i32_40 = arith.constant 1 : i32
    %91 = vector.broadcast %c1_i32_40 : i32 to vector<32x1xi32>
    %92 = arith.addi %16, %91 : vector<32x1xi32>
    %c15_i32_41 = arith.constant 15 : i32
    %93 = vector.broadcast %c15_i32_41 : i32 to vector<32x1xi32>
    %94 = arith.cmpi sle, %92, %93 : vector<32x1xi32>
    %95 = arith.andi %90, %94 : vector<32x1xi1>
    %cst_42 = arith.constant 0.000000e+00 : f32
    %96 = vector.broadcast %cst_42 : f32 to vector<32x512xf32>
    %97 = vector.shape_cast %95 : vector<32x1xi1> to vector<32x1xi1>
    %98 = vector.broadcast %97 : vector<32x1xi1> to vector<32x512xi1>
    %99 = arith.select %98, %86, %96 : vector<32x512xi1>, vector<32x512xf32>
    %c1024_43 = arith.constant 1024 : index
    %c0_44 = arith.constant 0 : index
    %100 = vector.load %arg4[%c1024_43, %c0_44] : memref<1536x512xf32, #tpu.memory_space<vmem>>, vector<512x512xf32>
    %cst_45 = arith.constant dense<0.000000e+00> : vector<32x512xf32>
    %101 = tpu.matmul %99, %100, %cst_45 {dimension_numbers = #tpu.dot_dimension_numbers<[1], [0], [0], [1], [0, 0, 1, 1], [], []>} : vector<32x512xf32>, vector<512x512xf32>, vector<32x512xf32> -> vector<32x512xf32>
    %102 = arith.addf %83, %101 : vector<32x512xf32>
    %103 = vector.broadcast %62 : vector<1x512xf32> to vector<32x512xf32>
    %104 = arith.addf %102, %103 : vector<32x512xf32>
    %105 = vector.shape_cast %104 : vector<32x512xf32> to vector<2x16x512xf32>
    %cst_46 = arith.constant dense<0.000000e+00> : vector<2x512xf32>
    %106 = vector.multi_reduction <add>, %105, %cst_46 [1] : vector<2x16x512xf32> to vector<2x512xf32>
    %cst_47 = arith.constant 1.600000e+01 : f32
    %107 = vector.broadcast %cst_47 : f32 to vector<2x512xf32>
    %108 = arith.divf %106, %107 : vector<2x512xf32>
    %cst_48 = arith.constant dense<0xFF800000> : vector<2x512xf32>
    %109 = vector.multi_reduction <maximumf>, %105, %cst_48 [1] : vector<2x16x512xf32> to vector<2x512xf32>
    %c32_i32 = arith.constant 32 : i32
    %110 = tpu.dynamic_rotate %108 by %c32_i32 dim 1 : vector<2x512xf32>, i32 -> vector<2x512xf32>
    %111 = arith.addf %108, %110 : vector<2x512xf32>
    %c32_i32_49 = arith.constant 32 : i32
    %112 = tpu.dynamic_rotate %109 by %c32_i32_49 dim 1 : vector<2x512xf32>, i32 -> vector<2x512xf32>
    %113 = arith.maximumf %109, %112 : vector<2x512xf32>
    %c64_i32 = arith.constant 64 : i32
    %114 = tpu.dynamic_rotate %111 by %c64_i32 dim 1 : vector<2x512xf32>, i32 -> vector<2x512xf32>
    %115 = arith.addf %111, %114 : vector<2x512xf32>
    %c64_i32_50 = arith.constant 64 : i32
    %116 = tpu.dynamic_rotate %113 by %c64_i32_50 dim 1 : vector<2x512xf32>, i32 -> vector<2x512xf32>
    %117 = arith.maximumf %113, %116 : vector<2x512xf32>
    %c128_i32 = arith.constant 128 : i32
    %118 = tpu.dynamic_rotate %115 by %c128_i32 dim 1 : vector<2x512xf32>, i32 -> vector<2x512xf32>
    %119 = arith.addf %115, %118 : vector<2x512xf32>
    %c128_i32_51 = arith.constant 128 : i32
    %120 = tpu.dynamic_rotate %117 by %c128_i32_51 dim 1 : vector<2x512xf32>, i32 -> vector<2x512xf32>
    %121 = arith.maximumf %117, %120 : vector<2x512xf32>
    %c256_i32 = arith.constant 256 : i32
    %122 = tpu.dynamic_rotate %119 by %c256_i32 dim 1 : vector<2x512xf32>, i32 -> vector<2x512xf32>
    %123 = arith.addf %119, %122 : vector<2x512xf32>
    %c256_i32_52 = arith.constant 256 : i32
    %124 = tpu.dynamic_rotate %121 by %c256_i32_52 dim 1 : vector<2x512xf32>, i32 -> vector<2x512xf32>
    %125 = arith.maximumf %121, %124 : vector<2x512xf32>
    %126 = vector.extract_strided_slice %123 {offsets = [0, 0], sizes = [2, 32], strides = [1, 1]} : vector<2x512xf32> to vector<2x32xf32>
    %cst_53 = arith.constant 6.250000e-02 : f32
    %127 = vector.broadcast %cst_53 : f32 to vector<2x32xf32>
    %128 = arith.mulf %126, %127 : vector<2x32xf32>
    %129 = vector.extract_strided_slice %125 {offsets = [0, 0], sizes = [2, 32], strides = [1, 1]} : vector<2x512xf32> to vector<2x32xf32>
    %130 = tpu.concatenate %128, %129 in 0 : vector<2x32xf32>, vector<2x32xf32> -> vector<4x32xf32>
    %c0_54 = arith.constant 0 : index
    %c0_55 = arith.constant 0 : index
    %131 = vector.load %arg6[%c0_54, %c0_55] : memref<32x2xf32, #tpu.memory_space<vmem>>, vector<32x2xf32>
    %cst_56 = arith.constant dense<0.000000e+00> : vector<4x2xf32>
    %132 = tpu.matmul %130, %131, %cst_56 {dimension_numbers = #tpu.dot_dimension_numbers<[1], [0], [0], [1], [0, 0, 1, 1], [], []>} : vector<4x32xf32>, vector<32x2xf32>, vector<4x2xf32> -> vector<4x2xf32>
    %c0_57 = arith.constant 0 : index
    %c0_58 = arith.constant 0 : index
    %133 = vector.load %arg7[%c0_57, %c0_58] : memref<1x2xf32, #tpu.memory_space<vmem>>, vector<1x2xf32>
    %134 = vector.broadcast %133 : vector<1x2xf32> to vector<4x2xf32>
    %135 = arith.addf %132, %134 : vector<4x2xf32>
    %cst_59 = arith.constant 0.000000e+00 : f32
    %136 = vector.broadcast %cst_59 : f32 to vector<4x2xf32>
    %137 = arith.maximumf %135, %136 : vector<4x2xf32>
    %138 = vector.extract_strided_slice %137 {offsets = [0, 0], sizes = [2, 2], strides = [1, 1]} : vector<4x2xf32> to vector<2x2xf32>
    %139 = vector.extract_strided_slice %137 {offsets = [2, 0], sizes = [2, 2], strides = [1, 1]} : vector<4x2xf32> to vector<2x2xf32>
    %140 = arith.addf %138, %139 : vector<2x2xf32>
    %c0_60 = arith.constant 0 : index
    %c0_61 = arith.constant 0 : index
    %141 = vector.load %arg9[%c0_60, %c0_61] : memref<1x512xf32, #tpu.memory_space<vmem>>, vector<1x512xf32>
    %cst_62 = arith.constant 2.000000e+00 : f32
    %142 = vector.broadcast %cst_62 : f32 to vector<1x512xf32>
    %143 = arith.mulf %142, %141 : vector<1x512xf32>
    %144 = vector.extract_strided_slice %140 {offsets = [0, 0], sizes = [2, 1], strides = [1, 1]} : vector<2x2xf32> to vector<2x1xf32>
    %c0_63 = arith.constant 0 : index
    %c0_64 = arith.constant 0 : index
    %145 = vector.load %arg8[%c0_63, %c0_64] : memref<2x512xf32, #tpu.memory_space<vmem>>, vector<1x512xf32>
    %146 = vector.broadcast %144 : vector<2x1xf32> to vector<2x512xf32>
    %147 = vector.broadcast %145 : vector<1x512xf32> to vector<2x512xf32>
    %148 = arith.mulf %146, %147 : vector<2x512xf32>
    %149 = vector.broadcast %143 : vector<1x512xf32> to vector<2x512xf32>
    %150 = arith.addf %149, %148 : vector<2x512xf32>
    %151 = vector.extract_strided_slice %140 {offsets = [0, 1], sizes = [2, 1], strides = [1, 1]} : vector<2x2xf32> to vector<2x1xf32>
    %c1 = arith.constant 1 : index
    %c0_65 = arith.constant 0 : index
    %152 = vector.load %arg8[%c1, %c0_65] : memref<2x512xf32, #tpu.memory_space<vmem>>, vector<1x512xf32>
    %153 = vector.broadcast %151 : vector<2x1xf32> to vector<2x512xf32>
    %154 = vector.broadcast %152 : vector<1x512xf32> to vector<2x512xf32>
    %155 = arith.mulf %153, %154 : vector<2x512xf32>
    %156 = arith.addf %150, %155 : vector<2x512xf32>
    %157 = arith.negf %156 : vector<2x512xf32>
    %158 = math.exp %157 : vector<2x512xf32>
    %cst_66 = arith.constant 1.000000e+00 : f32
    %159 = vector.broadcast %cst_66 : f32 to vector<2x512xf32>
    %160 = arith.addf %159, %158 : vector<2x512xf32>
    %161 = arith.divf %159, %160 : vector<2x512xf32>
    %162 = vector.shape_cast %161 : vector<2x512xf32> to vector<2x1x512xf32>
    %163 = vector.broadcast %162 : vector<2x1x512xf32> to vector<2x16x512xf32>
    %164 = arith.mulf %105, %163 : vector<2x16x512xf32>
    %165 = vector.shape_cast %164 : vector<2x16x512xf32> to vector<32x512xf32>
    %166 = vector.extract_strided_slice %165 {offsets = [0, 1], sizes = [32, 511], strides = [1, 1]} : vector<32x512xf32> to vector<32x511xf32>
    %167 = vector.extract_strided_slice %165 {offsets = [0, 0], sizes = [32, 1], strides = [1, 1]} : vector<32x512xf32> to vector<32x1xf32>
    %168 = tpu.concatenate %166, %167 in 1 : vector<32x511xf32>, vector<32x1xf32> -> vector<32x512xf32>
    %169 = arith.maximumf %165, %168 : vector<32x512xf32>
    %170 = vector.extract_strided_slice %169 {offsets = [0, 2], sizes = [32, 510], strides = [1, 1]} : vector<32x512xf32> to vector<32x510xf32>
    %171 = vector.extract_strided_slice %169 {offsets = [0, 0], sizes = [32, 2], strides = [1, 1]} : vector<32x512xf32> to vector<32x2xf32>
    %172 = tpu.concatenate %170, %171 in 1 : vector<32x510xf32>, vector<32x2xf32> -> vector<32x512xf32>
    %173 = arith.maximumf %169, %172 : vector<32x512xf32>
    %174 = vector.extract_strided_slice %173 {offsets = [0, 4], sizes = [32, 508], strides = [1, 1]} : vector<32x512xf32> to vector<32x508xf32>
    %175 = vector.extract_strided_slice %173 {offsets = [0, 0], sizes = [32, 4], strides = [1, 1]} : vector<32x512xf32> to vector<32x4xf32>
    %176 = tpu.concatenate %174, %175 in 1 : vector<32x508xf32>, vector<32x4xf32> -> vector<32x512xf32>
    %177 = arith.maximumf %173, %176 : vector<32x512xf32>
    %178 = vector.extract_strided_slice %177 {offsets = [0, 8], sizes = [32, 504], strides = [1, 1]} : vector<32x512xf32> to vector<32x504xf32>
    %179 = vector.extract_strided_slice %177 {offsets = [0, 0], sizes = [32, 8], strides = [1, 1]} : vector<32x512xf32> to vector<32x8xf32>
    %180 = tpu.concatenate %178, %179 in 1 : vector<32x504xf32>, vector<32x8xf32> -> vector<32x512xf32>
    %181 = arith.maximumf %177, %180 : vector<32x512xf32>
    %182 = vector.extract_strided_slice %181 {offsets = [0, 16], sizes = [32, 496], strides = [1, 1]} : vector<32x512xf32> to vector<32x496xf32>
    %183 = vector.extract_strided_slice %181 {offsets = [0, 0], sizes = [32, 16], strides = [1, 1]} : vector<32x512xf32> to vector<32x16xf32>
    %184 = tpu.concatenate %182, %183 in 1 : vector<32x496xf32>, vector<32x16xf32> -> vector<32x512xf32>
    %185 = arith.maximumf %181, %184 : vector<32x512xf32>
    %c0_67 = arith.constant 0 : index
    %c0_68 = arith.constant 0 : index
    %186 = vector.load %arg10[%c0_67, %c0_68] : memref<512x32xf32, #tpu.memory_space<vmem>>, vector<512x32xf32>
    %cst_69 = arith.constant dense<0.000000e+00> : vector<32x32xf32>
    %187 = tpu.matmul %165, %186, %cst_69 {dimension_numbers = #tpu.dot_dimension_numbers<[1], [0], [0], [1], [0, 0, 1, 1], [], []>} : vector<32x512xf32>, vector<512x32xf32>, vector<32x32xf32> -> vector<32x32xf32>
    %c0_70 = arith.constant 0 : index
    %c0_71 = arith.constant 0 : index
    %188 = vector.load %arg11[%c0_70, %c0_71] : memref<512x32xf32, #tpu.memory_space<vmem>>, vector<512x32xf32>
    %cst_72 = arith.constant dense<0.000000e+00> : vector<32x32xf32>
    %189 = tpu.matmul %185, %188, %cst_72 {dimension_numbers = #tpu.dot_dimension_numbers<[1], [0], [0], [1], [0, 0, 1, 1], [], []>} : vector<32x512xf32>, vector<512x32xf32>, vector<32x32xf32> -> vector<32x32xf32>
    %190 = arith.addf %187, %189 : vector<32x32xf32>
    %c0_73 = arith.constant 0 : index
    %c0_74 = arith.constant 0 : index
    %191 = vector.load %arg13[%c0_73, %c0_74] : memref<1x512xf32, #tpu.memory_space<vmem>>, vector<1x512xf32>
    %cst_75 = arith.constant 0.000000e+00 : f32
    %192 = vector.broadcast %cst_75 : f32 to vector<3x32xf32>
    %193 = vector.extract_strided_slice %190 {offsets = [0, 0], sizes = [29, 32], strides = [1, 1]} : vector<32x32xf32> to vector<29x32xf32>
    %194 = tpu.concatenate %192, %193 in 0 : vector<3x32xf32>, vector<29x32xf32> -> vector<32x32xf32>
    %c-3_i32 = arith.constant -3 : i32
    %195 = vector.broadcast %c-3_i32 : i32 to vector<32x1xi32>
    %196 = arith.addi %16, %195 : vector<32x1xi32>
    %c0_i32_76 = arith.constant 0 : i32
    %197 = vector.broadcast %c0_i32_76 : i32 to vector<32x1xi32>
    %198 = arith.cmpi sge, %196, %197 : vector<32x1xi32>
    %c-3_i32_77 = arith.constant -3 : i32
    %199 = vector.broadcast %c-3_i32_77 : i32 to vector<32x1xi32>
    %200 = arith.addi %16, %199 : vector<32x1xi32>
    %c15_i32_78 = arith.constant 15 : i32
    %201 = vector.broadcast %c15_i32_78 : i32 to vector<32x1xi32>
    %202 = arith.cmpi sle, %200, %201 : vector<32x1xi32>
    %203 = arith.andi %198, %202 : vector<32x1xi1>
    %cst_79 = arith.constant 0.000000e+00 : f32
    %204 = vector.broadcast %cst_79 : f32 to vector<32x32xf32>
    %205 = vector.shape_cast %203 : vector<32x1xi1> to vector<32x1xi1>
    %206 = vector.broadcast %205 : vector<32x1xi1> to vector<32x32xi1>
    %207 = arith.select %206, %194, %204 : vector<32x32xi1>, vector<32x32xf32>
    %c0_80 = arith.constant 0 : index
    %c0_81 = arith.constant 0 : index
    %208 = vector.load %arg12[%c0_80, %c0_81] : memref<224x512xf32, #tpu.memory_space<vmem>>, vector<32x512xf32>
    %cst_82 = arith.constant dense<0.000000e+00> : vector<32x512xf32>
    %209 = tpu.matmul %207, %208, %cst_82 {dimension_numbers = #tpu.dot_dimension_numbers<[1], [0], [0], [1], [0, 0, 1, 1], [], []>} : vector<32x32xf32>, vector<32x512xf32>, vector<32x512xf32> -> vector<32x512xf32>
    %210 = vector.broadcast %191 : vector<1x512xf32> to vector<32x512xf32>
    %211 = arith.addf %210, %209 : vector<32x512xf32>
    %cst_83 = arith.constant 0.000000e+00 : f32
    %212 = vector.broadcast %cst_83 : f32 to vector<2x32xf32>
    %213 = vector.extract_strided_slice %190 {offsets = [0, 0], sizes = [30, 32], strides = [1, 1]} : vector<32x32xf32> to vector<30x32xf32>
    %214 = tpu.concatenate %212, %213 in 0 : vector<2x32xf32>, vector<30x32xf32> -> vector<32x32xf32>
    %c-2_i32 = arith.constant -2 : i32
    %215 = vector.broadcast %c-2_i32 : i32 to vector<32x1xi32>
    %216 = arith.addi %16, %215 : vector<32x1xi32>
    %c0_i32_84 = arith.constant 0 : i32
    %217 = vector.broadcast %c0_i32_84 : i32 to vector<32x1xi32>
    %218 = arith.cmpi sge, %216, %217 : vector<32x1xi32>
    %c-2_i32_85 = arith.constant -2 : i32
    %219 = vector.broadcast %c-2_i32_85 : i32 to vector<32x1xi32>
    %220 = arith.addi %16, %219 : vector<32x1xi32>
    %c15_i32_86 = arith.constant 15 : i32
    %221 = vector.broadcast %c15_i32_86 : i32 to vector<32x1xi32>
    %222 = arith.cmpi sle, %220, %221 : vector<32x1xi32>
    %223 = arith.andi %218, %222 : vector<32x1xi1>
    %cst_87 = arith.constant 0.000000e+00 : f32
    %224 = vector.broadcast %cst_87 : f32 to vector<32x32xf32>
    %225 = vector.shape_cast %223 : vector<32x1xi1> to vector<32x1xi1>
    %226 = vector.broadcast %225 : vector<32x1xi1> to vector<32x32xi1>
    %227 = arith.select %226, %214, %224 : vector<32x32xi1>, vector<32x32xf32>
    %c32 = arith.constant 32 : index
    %c0_88 = arith.constant 0 : index
    %228 = vector.load %arg12[%c32, %c0_88] : memref<224x512xf32, #tpu.memory_space<vmem>>, vector<32x512xf32>
    %cst_89 = arith.constant dense<0.000000e+00> : vector<32x512xf32>
    %229 = tpu.matmul %227, %228, %cst_89 {dimension_numbers = #tpu.dot_dimension_numbers<[1], [0], [0], [1], [0, 0, 1, 1], [], []>} : vector<32x32xf32>, vector<32x512xf32>, vector<32x512xf32> -> vector<32x512xf32>
    %230 = arith.addf %211, %229 : vector<32x512xf32>
    %cst_90 = arith.constant 0.000000e+00 : f32
    %231 = vector.broadcast %cst_90 : f32 to vector<1x32xf32>
    %232 = vector.extract_strided_slice %190 {offsets = [0, 0], sizes = [31, 32], strides = [1, 1]} : vector<32x32xf32> to vector<31x32xf32>
    %233 = tpu.concatenate %231, %232 in 0 : vector<1x32xf32>, vector<31x32xf32> -> vector<32x32xf32>
    %c-1_i32_91 = arith.constant -1 : i32
    %234 = vector.broadcast %c-1_i32_91 : i32 to vector<32x1xi32>
    %235 = arith.addi %16, %234 : vector<32x1xi32>
    %c0_i32_92 = arith.constant 0 : i32
    %236 = vector.broadcast %c0_i32_92 : i32 to vector<32x1xi32>
    %237 = arith.cmpi sge, %235, %236 : vector<32x1xi32>
    %c-1_i32_93 = arith.constant -1 : i32
    %238 = vector.broadcast %c-1_i32_93 : i32 to vector<32x1xi32>
    %239 = arith.addi %16, %238 : vector<32x1xi32>
    %c15_i32_94 = arith.constant 15 : i32
    %240 = vector.broadcast %c15_i32_94 : i32 to vector<32x1xi32>
    %241 = arith.cmpi sle, %239, %240 : vector<32x1xi32>
    %242 = arith.andi %237, %241 : vector<32x1xi1>
    %cst_95 = arith.constant 0.000000e+00 : f32
    %243 = vector.broadcast %cst_95 : f32 to vector<32x32xf32>
    %244 = vector.shape_cast %242 : vector<32x1xi1> to vector<32x1xi1>
    %245 = vector.broadcast %244 : vector<32x1xi1> to vector<32x32xi1>
    %246 = arith.select %245, %233, %243 : vector<32x32xi1>, vector<32x32xf32>
    %c64 = arith.constant 64 : index
    %c0_96 = arith.constant 0 : index
    %247 = vector.load %arg12[%c64, %c0_96] : memref<224x512xf32, #tpu.memory_space<vmem>>, vector<32x512xf32>
    %cst_97 = arith.constant dense<0.000000e+00> : vector<32x512xf32>
    %248 = tpu.matmul %246, %247, %cst_97 {dimension_numbers = #tpu.dot_dimension_numbers<[1], [0], [0], [1], [0, 0, 1, 1], [], []>} : vector<32x32xf32>, vector<32x512xf32>, vector<32x512xf32> -> vector<32x512xf32>
    %249 = arith.addf %230, %248 : vector<32x512xf32>
    %c96 = arith.constant 96 : index
    %c0_98 = arith.constant 0 : index
    %250 = vector.load %arg12[%c96, %c0_98] : memref<224x512xf32, #tpu.memory_space<vmem>>, vector<32x512xf32>
    %cst_99 = arith.constant dense<0.000000e+00> : vector<32x512xf32>
    %251 = tpu.matmul %190, %250, %cst_99 {dimension_numbers = #tpu.dot_dimension_numbers<[1], [0], [0], [1], [0, 0, 1, 1], [], []>} : vector<32x32xf32>, vector<32x512xf32>, vector<32x512xf32> -> vector<32x512xf32>
    %252 = arith.addf %249, %251 : vector<32x512xf32>
    %cst_100 = arith.constant 0.000000e+00 : f32
    %253 = vector.broadcast %cst_100 : f32 to vector<1x32xf32>
    %254 = vector.extract_strided_slice %190 {offsets = [1, 0], sizes = [31, 32], strides = [1, 1]} : vector<32x32xf32> to vector<31x32xf32>
    %255 = tpu.concatenate %254, %253 in 0 : vector<31x32xf32>, vector<1x32xf32> -> vector<32x32xf32>
    %c1_i32_101 = arith.constant 1 : i32
    %256 = vector.broadcast %c1_i32_101 : i32 to vector<32x1xi32>
    %257 = arith.addi %16, %256 : vector<32x1xi32>
    %c0_i32_102 = arith.constant 0 : i32
    %258 = vector.broadcast %c0_i32_102 : i32 to vector<32x1xi32>
    %259 = arith.cmpi sge, %257, %258 : vector<32x1xi32>
    %c1_i32_103 = arith.constant 1 : i32
    %260 = vector.broadcast %c1_i32_103 : i32 to vector<32x1xi32>
    %261 = arith.addi %16, %260 : vector<32x1xi32>
    %c15_i32_104 = arith.constant 15 : i32
    %262 = vector.broadcast %c15_i32_104 : i32 to vector<32x1xi32>
    %263 = arith.cmpi sle, %261, %262 : vector<32x1xi32>
    %264 = arith.andi %259, %263 : vector<32x1xi1>
    %cst_105 = arith.constant 0.000000e+00 : f32
    %265 = vector.broadcast %cst_105 : f32 to vector<32x32xf32>
    %266 = vector.shape_cast %264 : vector<32x1xi1> to vector<32x1xi1>
    %267 = vector.broadcast %266 : vector<32x1xi1> to vector<32x32xi1>
    %268 = arith.select %267, %255, %265 : vector<32x32xi1>, vector<32x32xf32>
    %c128 = arith.constant 128 : index
    %c0_106 = arith.constant 0 : index
    %269 = vector.load %arg12[%c128, %c0_106] : memref<224x512xf32, #tpu.memory_space<vmem>>, vector<32x512xf32>
    %cst_107 = arith.constant dense<0.000000e+00> : vector<32x512xf32>
    %270 = tpu.matmul %268, %269, %cst_107 {dimension_numbers = #tpu.dot_dimension_numbers<[1], [0], [0], [1], [0, 0, 1, 1], [], []>} : vector<32x32xf32>, vector<32x512xf32>, vector<32x512xf32> -> vector<32x512xf32>
    %271 = arith.addf %252, %270 : vector<32x512xf32>
    %cst_108 = arith.constant 0.000000e+00 : f32
    %272 = vector.broadcast %cst_108 : f32 to vector<2x32xf32>
    %273 = vector.extract_strided_slice %190 {offsets = [2, 0], sizes = [30, 32], strides = [1, 1]} : vector<32x32xf32> to vector<30x32xf32>
    %274 = tpu.concatenate %273, %272 in 0 : vector<30x32xf32>, vector<2x32xf32> -> vector<32x32xf32>
    %c2_i32 = arith.constant 2 : i32
    %275 = vector.broadcast %c2_i32 : i32 to vector<32x1xi32>
    %276 = arith.addi %16, %275 : vector<32x1xi32>
    %c0_i32_109 = arith.constant 0 : i32
    %277 = vector.broadcast %c0_i32_109 : i32 to vector<32x1xi32>
    %278 = arith.cmpi sge, %276, %277 : vector<32x1xi32>
    %c2_i32_110 = arith.constant 2 : i32
    %279 = vector.broadcast %c2_i32_110 : i32 to vector<32x1xi32>
    %280 = arith.addi %16, %279 : vector<32x1xi32>
    %c15_i32_111 = arith.constant 15 : i32
    %281 = vector.broadcast %c15_i32_111 : i32 to vector<32x1xi32>
    %282 = arith.cmpi sle, %280, %281 : vector<32x1xi32>
    %283 = arith.andi %278, %282 : vector<32x1xi1>
    %cst_112 = arith.constant 0.000000e+00 : f32
    %284 = vector.broadcast %cst_112 : f32 to vector<32x32xf32>
    %285 = vector.shape_cast %283 : vector<32x1xi1> to vector<32x1xi1>
    %286 = vector.broadcast %285 : vector<32x1xi1> to vector<32x32xi1>
    %287 = arith.select %286, %274, %284 : vector<32x32xi1>, vector<32x32xf32>
    %c160 = arith.constant 160 : index
    %c0_113 = arith.constant 0 : index
    %288 = vector.load %arg12[%c160, %c0_113] : memref<224x512xf32, #tpu.memory_space<vmem>>, vector<32x512xf32>
    %cst_114 = arith.constant dense<0.000000e+00> : vector<32x512xf32>
    %289 = tpu.matmul %287, %288, %cst_114 {dimension_numbers = #tpu.dot_dimension_numbers<[1], [0], [0], [1], [0, 0, 1, 1], [], []>} : vector<32x32xf32>, vector<32x512xf32>, vector<32x512xf32> -> vector<32x512xf32>
    %290 = arith.addf %271, %289 : vector<32x512xf32>
    %cst_115 = arith.constant 0.000000e+00 : f32
    %291 = vector.broadcast %cst_115 : f32 to vector<3x32xf32>
    %292 = vector.extract_strided_slice %190 {offsets = [3, 0], sizes = [29, 32], strides = [1, 1]} : vector<32x32xf32> to vector<29x32xf32>
    %293 = tpu.concatenate %292, %291 in 0 : vector<29x32xf32>, vector<3x32xf32> -> vector<32x32xf32>
    %c3_i32 = arith.constant 3 : i32
    %294 = vector.broadcast %c3_i32 : i32 to vector<32x1xi32>
    %295 = arith.addi %16, %294 : vector<32x1xi32>
    %c0_i32_116 = arith.constant 0 : i32
    %296 = vector.broadcast %c0_i32_116 : i32 to vector<32x1xi32>
    %297 = arith.cmpi sge, %295, %296 : vector<32x1xi32>
    %c3_i32_117 = arith.constant 3 : i32
    %298 = vector.broadcast %c3_i32_117 : i32 to vector<32x1xi32>
    %299 = arith.addi %16, %298 : vector<32x1xi32>
    %c15_i32_118 = arith.constant 15 : i32
    %300 = vector.broadcast %c15_i32_118 : i32 to vector<32x1xi32>
    %301 = arith.cmpi sle, %299, %300 : vector<32x1xi32>
    %302 = arith.andi %297, %301 : vector<32x1xi1>
    %cst_119 = arith.constant 0.000000e+00 : f32
    %303 = vector.broadcast %cst_119 : f32 to vector<32x32xf32>
    %304 = vector.shape_cast %302 : vector<32x1xi1> to vector<32x1xi1>
    %305 = vector.broadcast %304 : vector<32x1xi1> to vector<32x32xi1>
    %306 = arith.select %305, %293, %303 : vector<32x32xi1>, vector<32x32xf32>
    %c192 = arith.constant 192 : index
    %c0_120 = arith.constant 0 : index
    %307 = vector.load %arg12[%c192, %c0_120] : memref<224x512xf32, #tpu.memory_space<vmem>>, vector<32x512xf32>
    %cst_121 = arith.constant dense<0.000000e+00> : vector<32x512xf32>
    %308 = tpu.matmul %306, %307, %cst_121 {dimension_numbers = #tpu.dot_dimension_numbers<[1], [0], [0], [1], [0, 0, 1, 1], [], []>} : vector<32x32xf32>, vector<32x512xf32>, vector<32x512xf32> -> vector<32x512xf32>
    %309 = arith.addf %290, %308 : vector<32x512xf32>
    %310 = arith.negf %309 : vector<32x512xf32>
    %311 = math.exp %310 : vector<32x512xf32>
    %cst_122 = arith.constant 1.000000e+00 : f32
    %312 = vector.broadcast %cst_122 : f32 to vector<32x512xf32>
    %313 = arith.addf %312, %311 : vector<32x512xf32>
    %314 = arith.divf %312, %313 : vector<32x512xf32>
    %315 = arith.mulf %165, %314 : vector<32x512xf32>
    %316 = arith.addf %18, %315 : vector<32x512xf32>
    %317 = vector.shape_cast %316 : vector<32x512xf32> to vector<2x16x512xf32>
    %c0_123 = arith.constant 0 : index
    %c0_124 = arith.constant 0 : index
    %c0_125 = arith.constant 0 : index
    %318 = vector.load %arg14[%c0_123, %c0_124, %c0_125] : memref<2x16x512xf32, #tpu.memory_space<vmem>>, vector<2x16x512xf32>
    tpu.vector_store %arg14[%c0_123, %c0_124, %c0_125], %317 {strides = array<i32>} : memref<2x16x512xf32, #tpu.memory_space<vmem>>, vector<2x16x512xf32>,
    return
  }
  func.func @transform_0(%arg0: i32) -> (i32, i32, i32) {
    %c0_i32 = arith.constant 0 : i32
    %c0_i32_0 = arith.constant 0 : i32
    %c0_i32_1 = arith.constant 0 : i32
    return %arg0, %c0_i32, %c0_i32_0 : i32, i32, i32
  }
  func.func @transform_1(%arg0: i32) -> (i32, i32) {
    %c0_i32 = arith.constant 0 : i32
    %c0_i32_0 = arith.constant 0 : i32
    %c0_i32_1 = arith.constant 0 : i32
    return %c0_i32, %c0_i32_0 : i32, i32
  }
  func.func @transform_2(%arg0: i32) -> (i32, i32) {
    %c0_i32 = arith.constant 0 : i32
    %c0_i32_0 = arith.constant 0 : i32
    %c0_i32_1 = arith.constant 0 : i32
    return %c0_i32, %c0_i32_0 : i32, i32
  }
  func.func @transform_3(%arg0: i32) -> (i32, i32) {
    %c0_i32 = arith.constant 0 : i32
    %c0_i32_0 = arith.constant 0 : i32
    %c0_i32_1 = arith.constant 0 : i32
    return %c0_i32, %c0_i32_0 : i32, i32
  }
  func.func @transform_4(%arg0: i32) -> (i32, i32) {
    %c0_i32 = arith.constant 0 : i32
    %c0_i32_0 = arith.constant 0 : i32
    %c0_i32_1 = arith.constant 0 : i32
    return %c0_i32, %c0_i32_0 : i32, i32
  }
  func.func @transform_5(%arg0: i32) -> (i32, i32) {
    %c0_i32 = arith.constant 0 : i32
    %c0_i32_0 = arith.constant 0 : i32
    %c0_i32_1 = arith.constant 0 : i32
    return %c0_i32, %c0_i32_0 : i32, i32
  }
  func.func @transform_6(%arg0: i32) -> (i32, i32) {
    %c0_i32 = arith.constant 0 : i32
    %c0_i32_0 = arith.constant 0 : i32
    %c0_i32_1 = arith.constant 0 : i32
    return %c0_i32, %c0_i32_0 : i32, i32
  }
  func.func @transform_7(%arg0: i32) -> (i32, i32) {
    %c0_i32 = arith.constant 0 : i32
    %c0_i32_0 = arith.constant 0 : i32
    %c0_i32_1 = arith.constant 0 : i32
    return %c0_i32, %c0_i32_0 : i32, i32
  }
  func.func @transform_8(%arg0: i32) -> (i32, i32) {
    %c0_i32 = arith.constant 0 : i32
    %c0_i32_0 = arith.constant 0 : i32
    %c0_i32_1 = arith.constant 0 : i32
    return %c0_i32, %c0_i32_0 : i32, i32
  }
  func.func @transform_9(%arg0: i32) -> (i32, i32) {
    %c0_i32 = arith.constant 0 : i32
    %c0_i32_0 = arith.constant 0 : i32
    %c0_i32_1 = arith.constant 0 : i32
    return %c0_i32, %c0_i32_0 : i32, i32
  }
  func.func @transform_10(%arg0: i32) -> (i32, i32) {
    %c0_i32 = arith.constant 0 : i32
    %c0_i32_0 = arith.constant 0 : i32
    %c0_i32_1 = arith.constant 0 : i32
    return %c0_i32, %c0_i32_0 : i32, i32
  }
  func.func @transform_11(%arg0: i32) -> (i32, i32) {
    %c0_i32 = arith.constant 0 : i32
    %c0_i32_0 = arith.constant 0 : i32
    %c0_i32_1 = arith.constant 0 : i32
    return %c0_i32, %c0_i32_0 : i32, i32
  }
  func.func @transform_12(%arg0: i32) -> (i32, i32) {
    %c0_i32 = arith.constant 0 : i32
    %c0_i32_0 = arith.constant 0 : i32
    %c0_i32_1 = arith.constant 0 : i32
    return %c0_i32, %c0_i32_0 : i32, i32
  }
  func.func @transform_13(%arg0: i32) -> (i32, i32, i32) {
    %c0_i32 = arith.constant 0 : i32
    %c0_i32_0 = arith.constant 0 : i32
    %c0_i32_1 = arith.constant 0 : i32
    return %arg0, %c0_i32, %c0_i32_0 : i32, i32, i32
  }
}

</mosaic_0001>

<bundles_post_ra>
// kernel: tpu_custom_call.1
= control target key start
LH: loop header
LB: loop body
LE: loop exit
PB: predicated region body
PF: predicated region fallthrough
CT: control target
= control target key end

     0   :  { %18 = vsyncpa [#allocation3], 0  ;;  %s13208_s0 = inlined_call_operand.hbm [shape: f32[2,16,512], index: 0, kind: input, shape index: {}]   ;;  %s13209_s1 = inlined_call_operand.hbm [shape: f32[1536,512], index: 1, kind: input, shape index: {}]   ;;  %s13210_s2 = inlined_call_operand.hbm [shape: f32[1,512], index: 2, kind: input, shape index: {}]   ;;  %s13211_s3 = inlined_call_operand.hbm [shape: f32[1536,512], index: 3, kind: input, shape index: {}]   ;;  %s13212_s4 = inlined_call_operand.hbm [shape: f32[1,512], index: 4, kind: input, shape index: {}]   ;;  %s13213_s5 = inlined_call_operand.vmem [shape: f32[32,2], index: 5, kind: input, shape index: {}]   ;;  %s13214_s6 = inlined_call_operand.hbm [shape: f32[1,2], index: 6, kind: input, shape index: {}]   ;;  %s13215_s7 = inlined_call_operand.hbm [shape: f32[2,512], index: 7, kind: input, shape index: {}]   ;;  %s13216_s8 = inlined_call_operand.hbm [shape: f32[1,512], index: 8, kind: input, shape index: {}]   ;;  %s13217_s9 = inlined_call_operand.vmem [shape: f32[512,32], index: 9, kind: input, shape index: {}]   ;;  %s13218_s10 = inlined_call_operand.vmem [shape: f32[512,32], index: 10, kind: input, shape index: {}]   ;;  %s13219_s11 = inlined_call_operand.hbm [shape: f32[224,512], index: 11, kind: input, shape index: {}]   ;;  %s13220_s12 = inlined_call_operand.hbm [shape: f32[1,512], index: 12, kind: input, shape index: {}]   ;;  %s13221_s13 = inlined_call_operand.hbm [shape: f32[2,16,512], index: 13, kind: output, shape index: {}]  }
   0x1   :  { %19 = vsyncpa [#allocation6], 0 }
   0x2   :  { %20 = vsyncpa [#allocation9], 0 }
   0x3   :  { %21 = vsyncpa [#allocation12], 0 }
   0x4   :  { %22 = vsyncpa [#allocation15], 0 }
   0x5   :  { %23 = vsyncpa [#allocation18], 0 }
   0x6   :  { %24 = vsyncpa [#allocation4], 0  ;;  %s10971_s25 = smov [#allocation5]   ;;  %s10972_s27 = smov [#allocation8]  }
   0x7   :  { %s42_s26 = sshll.u32 %s10971_s25, 4  ;;  %s64_s28 = sshll.u32 %s10972_s27, 4  ;;  %s43_s26 = int_to_ptr.vmem [resolvable:$true] %s42_s26  ;;  %s11066_s28 = int_to_ptr.vmem [resolvable:$true] %s64_s28 }
   0x8   :  { %s10715_s14 = scalar_lea.hbm %s13209_s1, 98304 }
   0x9   :  { %p10716_p0 = scmp.ne.s32.totalorder %s13209_s1, %s10715_s14  ;;  %p10719_p1 = scmp.lt.u32.totalorder %s10715_s14, %s13209_s1 }
   0xb   :  { %p10721_p2 = pnand %p10719_p1, %p10716_p0 }
   0xd   :  { %10724 = shalt.err (!%p10721_p2)
}
   0xe   :  { %s10725_s19 = scalar_lea.vmem %s43_s26, 98304  ;;  %p10730_p4 = scmp.lt.s32.totalorder %s43_s26, %s43_s26 }
   0xf   :  { %p10726_p3 = scmp.ne.s32.totalorder %s43_s26, %s10725_s19  ;;  %p10731_p5 = scmp.lt.s32.totalorder %s10725_s19, %s10725_s19 }
  0x11   :  { %p10732_p6 = por %p10731_p5, %p10730_p4 }
  0x13   :  { %p10733_p7 = pnand %p10732_p6, %p10726_p3 }
  0x15   :  { %10736 = shalt.err (!%p10733_p7)
}
  0x16   :  { %s10973_s20 = smov 512   ;;  %s10974_s21 = smov 32  }
  0x17   :  { %48 = dma.hbm_to_vmem [thread:$0]  %s13209_s1, 98304, %s43_s26, [#allocation6], %s10973_s20, %s10973_s20, %s10974_s21  }
  0x18   :  { %s10737_s27 = scalar_lea.hbm %s13211_s3, 98304 }
  0x19   :  { %p10738_p8 = scmp.ne.s32.totalorder %s13211_s3, %s10737_s27  ;;  %p10741_p9 = scmp.lt.u32.totalorder %s10737_s27, %s13211_s3 }
  0x1b   :  { %p10743_p10 = pnand %p10741_p9, %p10738_p8 }
  0x1d   :  { %10746 = shalt.err (!%p10743_p10)
}
  0x1e   :  { %s10747_s16 = scalar_lea.vmem %s11066_s28, 98304  ;;  %p10752_p12 = scmp.lt.s32.totalorder %s11066_s28, %s11066_s28 }
  0x1f   :  { %p10748_p11 = scmp.ne.s32.totalorder %s11066_s28, %s10747_s16  ;;  %p10753_p13 = scmp.lt.s32.totalorder %s10747_s16, %s10747_s16 }
  0x21   :  { %p10754_p0 = por %p10753_p13, %p10752_p12 }
  0x23   :  { %p10755_p1 = pnand %p10754_p0, %p10748_p11 }
  0x25   :  { %10758 = shalt.err (!%p10755_p1)
}
  0x26   :  { %70 = dma.hbm_to_vmem [thread:$0]  %s13211_s3, 98304, %s11066_s28, [#allocation9], %s10973_s20, %s10973_s20, %s10974_s21  }
  0x27   :  { %s10975_s17 = smov [#allocation11]   ;;  %s10976_s19 = smov [#allocation14]  }
  0x28   :  { %s89_s18 = sshll.u32 %s10975_s17, 4  ;;  %s109_s22 = sshll.u32 %s10976_s19, 4  ;;  %s90_s18 = int_to_ptr.vmem [resolvable:$true] %s89_s18  ;;  %s110_s22 = int_to_ptr.vmem [resolvable:$true] %s109_s22 }
  0x29   :  { %s10759_s25 = scalar_lea.hbm %s13214_s6, 16 }
  0x2a   :  { %p10760_p2 = scmp.ne.s32.totalorder %s13214_s6, %s10759_s25  ;;  %p10763_p3 = scmp.lt.u32.totalorder %s10759_s25, %s13214_s6 }
  0x2c   :  { %p10765_p4 = pnand %p10763_p3, %p10760_p2 }
  0x2e   :  { %10768 = shalt.err (!%p10765_p4)
}
  0x2f   :  { %s10769_s3 = scalar_lea.vmem %s90_s18, 16  ;;  %s10773_s28 = scalar_lea.vmem %s90_s18, 32 }
  0x30   :  { %p10770_p5 = scmp.ne.s32.totalorder %s90_s18, %s10769_s3  ;;  %p10774_p6 = scmp.lt.s32.totalorder %s90_s18, %s90_s18 }
  0x31   :  { %p10775_p7 = scmp.lt.s32.totalorder %s10773_s28, %s10769_s3 }
  0x33   :  { %p10776_p8 = por %p10775_p7, %p10774_p6 }
  0x35   :  { %p10777_p9 = pnand %p10776_p8, %p10770_p5 }
  0x37   :  { %10780 = shalt.err (!%p10777_p9)
}
  0x38   :  { %92 = dma.hbm_to_vmem [thread:$0]  %s13214_s6, 16, %s90_s18, [#allocation12]  }
  0x39   :  { %s10781_s17 = scalar_lea.hbm %s13216_s8, 64 }
  0x3a   :  { %p10782_p10 = scmp.ne.s32.totalorder %s13216_s8, %s10781_s17  ;;  %p10785_p11 = scmp.lt.u32.totalorder %s10781_s17, %s13216_s8 }
  0x3c   :  { %p10787_p12 = pnand %p10785_p11, %p10782_p10 }
  0x3e   :  { %10790 = shalt.err (!%p10787_p12)
}
  0x3f   :  { %s10791_s27 = scalar_lea.vmem %s110_s22, 64  ;;  %p10796_p0 = scmp.lt.s32.totalorder %s110_s22, %s110_s22 }
  0x40   :  { %p10792_p13 = scmp.ne.s32.totalorder %s110_s22, %s10791_s27  ;;  %p10797_p1 = scmp.lt.s32.totalorder %s10791_s27, %s10791_s27 }
  0x42   :  { %p10798_p2 = por %p10797_p1, %p10796_p0 }
  0x44   :  { %p10799_p3 = pnand %p10798_p2, %p10792_p13 }
  0x46   :  { %10802 = shalt.err (!%p10799_p3)
}
  0x47   :  { %112 = dma.hbm_to_vmem [thread:$0]  %s13216_s8, 64, %s110_s22, [#allocation15]  }
  0x48   :  { %s10977_s29 = smov [#allocation2]   ;;  %s10978_s14 = smov [#allocation7]  }
  0x49   :  { %s30_s30 = sshll.u32 %s10977_s29, 4  ;;  %s55_s3 = sshll.u32 %s10978_s14, 4  ;;  %s31_s30 = int_to_ptr.vmem [resolvable:$true] %s30_s30  ;;  %s56_s3 = int_to_ptr.vmem [resolvable:$true] %s55_s3 }
  0x4a   :  { %s10803_s16 = scalar_lea.hbm %s13208_s0, 2048 }
  0x4b   :  { %p10804_p4 = scmp.ne.s32.totalorder %s13208_s0, %s10803_s16  ;;  %p10807_p5 = scmp.lt.u32.totalorder %s10803_s16, %s13208_s0 }
  0x4d   :  { %p10809_p6 = pnand %p10807_p5, %p10804_p4 }
  0x4f   :  { %10812 = shalt.err (!%p10809_p6)
}
  0x50   :  { %s10813_s8 = scalar_lea.vmem %s31_s30, 2048  ;;  %p10818_p8 = scmp.lt.s32.totalorder %s31_s30, %s31_s30 }
  0x51   :  { %p10814_p7 = scmp.ne.s32.totalorder %s31_s30, %s10813_s8  ;;  %p10819_p9 = scmp.lt.s32.totalorder %s10813_s8, %s10813_s8 }
  0x53   :  { %p10820_p10 = por %p10819_p9, %p10818_p8 }
  0x55   :  { %p10821_p11 = pnand %p10820_p10, %p10814_p7 }
  0x57   :  { %10824 = shalt.err (!%p10821_p11)
}
  0x58   :  { %36 = dma.hbm_to_vmem [thread:$0]  %s13208_s0, 2048, %s31_s30, [#allocation3], %s10973_s20, %s10973_s20, %s10974_s21  }
  0x59   :  { %s10825_s27 = scalar_lea.hbm %s13210_s2, 64 }
  0x5a   :  { %p10826_p12 = scmp.ne.s32.totalorder %s13210_s2, %s10825_s27  ;;  %p10829_p13 = scmp.lt.u32.totalorder %s10825_s27, %s13210_s2 }
  0x5c   :  { %p10831_p0 = pnand %p10829_p13, %p10826_p12 }
  0x5e   :  { %10834 = shalt.err (!%p10831_p0)
}
  0x5f   :  { %s10835_s28 = scalar_lea.vmem %s56_s3, 64  ;;  %p10840_p2 = scmp.lt.s32.totalorder %s56_s3, %s56_s3 }
  0x60   :  { %p10836_p1 = scmp.ne.s32.totalorder %s56_s3, %s10835_s28  ;;  %p10841_p3 = scmp.lt.s32.totalorder %s10835_s28, %s10835_s28 }
  0x62   :  { %p10842_p4 = por %p10841_p3, %p10840_p2 }
  0x64   :  { %p10843_p5 = pnand %p10842_p4, %p10836_p1 }
  0x66   :  { %10846 = shalt.err (!%p10843_p5)
}
  0x67   :  { %58 = dma.hbm_to_vmem [thread:$0]  %s13210_s2, 64, %s56_s3, [#allocation6]  }
  0x68   :  { %s10979_s15 = smov [#allocation10]   ;;  %s10980_s1 = smov [#allocation13]  }
  0x69   :  { %s77_s16 = sshll.u32 %s10979_s15, 4  ;;  %s99_s26 = sshll.u32 %s10980_s1, 4  ;;  %s78_s16 = int_to_ptr.vmem [resolvable:$true] %s77_s16  ;;  %s100_s26 = int_to_ptr.vmem [resolvable:$true] %s99_s26 }
  0x6a   :  { %s10847_s8 = scalar_lea.hbm %s13212_s4, 64 }
  0x6b   :  { %p10848_p6 = scmp.ne.s32.totalorder %s13212_s4, %s10847_s8  ;;  %p10851_p7 = scmp.lt.u32.totalorder %s10847_s8, %s13212_s4 }
  0x6d   :  { %p10853_p8 = pnand %p10851_p7, %p10848_p6 }
  0x6f   :  { %10856 = shalt.err (!%p10853_p8)
}
  0x70   :  { %s10857_s2 = scalar_lea.vmem %s78_s16, 64  ;;  %p10862_p10 = scmp.lt.s32.totalorder %s78_s16, %s78_s16 }
  0x71   :  { %p10858_p9 = scmp.ne.s32.totalorder %s78_s16, %s10857_s2  ;;  %p10863_p11 = scmp.lt.s32.totalorder %s10857_s2, %s10857_s2 }
  0x73   :  { %p10864_p12 = por %p10863_p11, %p10862_p10 }
  0x75   :  { %p10865_p13 = pnand %p10864_p12, %p10858_p9 }
  0x77   :  { %10868 = shalt.err (!%p10865_p13)
}
  0x78   :  { %80 = dma.hbm_to_vmem [thread:$0]  %s13212_s4, 64, %s78_s16, [#allocation9]  }
  0x79   :  { %s10869_s29 = scalar_lea.hbm %s13215_s7, 128 }
  0x7a   :  { %p10870_p0 = scmp.ne.s32.totalorder %s13215_s7, %s10869_s29  ;;  %p10873_p1 = scmp.lt.u32.totalorder %s10869_s29, %s13215_s7 }
  0x7c   :  { %p10875_p2 = pnand %p10873_p1, %p10870_p0 }
  0x7e   :  { %10878 = shalt.err (!%p10875_p2)
}
  0x7f   :  { %s10879_s15 = scalar_lea.vmem %s100_s26, 128  ;;  %p10884_p4 = scmp.lt.s32.totalorder %s100_s26, %s100_s26 }
  0x80   :  { %p10880_p3 = scmp.ne.s32.totalorder %s100_s26, %s10879_s15  ;;  %p10885_p5 = scmp.lt.s32.totalorder %s10879_s15, %s10879_s15 }
  0x82   :  { %p10886_p6 = por %p10885_p5, %p10884_p4 }
  0x84   :  { %p10887_p7 = pnand %p10886_p6, %p10880_p3 }
  0x86   :  { %10890 = shalt.err (!%p10887_p7)
}
  0x87   :  { %102 = dma.hbm_to_vmem [thread:$0]  %s13215_s7, 128, %s100_s26, [#allocation12]  }
  0x88   :  { %s10981_s1 = smov [#allocation16]   ;;  %s10982_s19 = smov [#allocation17]  }
  0x89   :  { %s122_s17 = sshll.u32 %s10981_s1, 4  ;;  %s135_s8 = sshll.u32 %s10982_s19, 4  ;;  %s123_s17 = int_to_ptr.vmem [resolvable:$true] %s122_s17  ;;  %s136_s8 = int_to_ptr.vmem [resolvable:$true] %s135_s8 }
  0x8a   :  { %s10891_s24 = scalar_lea.hbm %s13219_s11, 14336 }
  0x8b   :  { %p10892_p8 = scmp.ne.s32.totalorder %s13219_s11, %s10891_s24  ;;  %p10895_p9 = scmp.lt.u32.totalorder %s10891_s24, %s13219_s11 }
  0x8d   :  { %p10897_p10 = pnand %p10895_p9, %p10892_p8 }
  0x8f   :  { %10900 = shalt.err (!%p10897_p10)
}
  0x90   :  { %s10901_s7 = scalar_lea.vmem %s123_s17, 14336  ;;  %p10906_p12 = scmp.lt.s32.totalorder %s123_s17, %s123_s17 }
  0x91   :  { %p10902_p11 = scmp.ne.s32.totalorder %s123_s17, %s10901_s7  ;;  %p10907_p13 = scmp.lt.s32.totalorder %s10901_s7, %s10901_s7 }
  0x93   :  { %p10908_p0 = por %p10907_p13, %p10906_p12 }
  0x95   :  { %p10909_p1 = pnand %p10908_p0, %p10902_p11 }
  0x97   :  { %10912 = shalt.err (!%p10909_p1)
}
  0x98   :  { %128 = dma.hbm_to_vmem [thread:$0]  %s13219_s11, 14336, %s123_s17, [#allocation15], %s10973_s20, %s10973_s20, %s10974_s21  }
  0x99   :  { %s10913_s14 = scalar_lea.hbm %s13220_s12, 64 }
  0x9a   :  { %p10914_p2 = scmp.ne.s32.totalorder %s13220_s12, %s10913_s14  ;;  %p10917_p3 = scmp.lt.u32.totalorder %s10913_s14, %s13220_s12 }
  0x9c   :  { %p10919_p4 = pnand %p10917_p3, %p10914_p2 }
  0x9e   :  { %10922 = shalt.err (!%p10919_p4)
}
  0x9f   :  { %s10923_s4 = scalar_lea.vmem %s136_s8, 64  ;;  %p10928_p6 = scmp.lt.s32.totalorder %s136_s8, %s136_s8 }
  0xa0   :  { %p10924_p5 = scmp.ne.s32.totalorder %s136_s8, %s10923_s4  ;;  %p10929_p7 = scmp.lt.s32.totalorder %s10923_s4, %s10923_s4 }
  0xa2   :  { %p10930_p8 = por %p10929_p7, %p10928_p6 }
  0xa4   :  { %p10931_p9 = pnand %p10930_p8, %p10924_p5 }
  0xa6   :  { %10934 = shalt.err (!%p10931_p9)
}
  0xa7   :  { %138 = dma.hbm_to_vmem [thread:$0]  %s13220_s12, 64, %s136_s8, [#allocation18]  }
  0xa8   :  { %10957 = dma.done.wait [#allocation3], 2048  }
  0xa9   :  { %10958 = vsyncadd [#allocation3], 4294965248 }
  0xaa   :  { %10959 = dma.done.wait [#allocation6], 98368  }
  0xab   :  { %10960 = vsyncadd [#allocation6], 4294868928 }
  0xac   :  { %10961 = dma.done.wait [#allocation9], 98368  }
  0xad   :  { %10962 = vsyncadd [#allocation9], 4294868928 }
  0xae   :  { %10963 = dma.done.wait [#allocation12], 144  }
  0xaf   :  { %10964 = vsyncadd [#allocation12], 4294967152 }
  0xb0   :  { %10965 = dma.done.wait [#allocation15], 14400  }
  0xb1   :  { %10966 = vsyncadd [#allocation15], 4294952896 }
  0xb2   :  { %10967 = dma.done.wait [#allocation18], 64  }
  0xb3   :  { %10968 = vsyncadd [#allocation18], 4294967232  ;;  %v601_v0 = vld [vmem:[#allocation5 + $0x8] sm:$0xff]  ;;  %v603_v2 = vld [vmem:[#allocation5 + $0x18] sm:$0xff]  ;;  %vm511_vm0 = vcmask 1040384   ;;  %vm1568_vm3 = vcmask 1046528  }
  0xb4   :  { %v605_v1 = vld [vmem:[#allocation5 + $0x28] sm:$0xff]  ;;  %v607_v4 = vld [vmem:[#allocation5 + $0x38] sm:$0xff]  ;;  %v600_v5 = vld [vmem:[#allocation5] sm:$0xff]  ;;  %vm4485_vm6 = vcmask 1041409   ;;  %s10983_s12 = smov 64   ;;  %vm10985_vm8 = vmmov 0  }
  0xb5   :  { %v8311_v3 = vpack.c.bf16 %v605_v1, %v601_v0  ;;  %v604_v6 = vld [vmem:[#allocation5 + $0x20] sm:$0xff]  ;;  %v8439_v7 = vpack.c.bf16 %v607_v4, %v603_v2  ;;  %v602_v9 = vld [vmem:[#allocation5 + $0x10] sm:$0xff]  ;;  %v609_v11 = vld [vmem:[#allocation5 + $0x48] sm:$0xff]  ;;  %vm4763_vm10 = vcmask 1043459   ;;  %vm4766_vm11 = vcmask 1041408   ;;  %s10991_s2 = smov 126  }
  0xb6   :  { %v8313_v8 = vpack.c.bf16 %v604_v6, %v600_v5  ;;  %v606_v10 = vld [vmem:[#allocation5 + $0x30] sm:$0xff]  ;;  %v613_v13 = vld [vmem:[#allocation5 + $0x68] sm:$0xff]  ;;  %v611_v14 = vld [vmem:[#allocation5 + $0x58] sm:$0xff]  ;;  %vm4779_vm12 = vcmask 261120   ;;  %vm5115_vm13 = vcmask 1039360   ;;  %vm5216_vm14 = vcmask 1031168  }
  0xb7   :  { %8312 = vmatprep.subr.bf16.mxu0 %v8311_v3  ;;  %v8441_v12 = vpack.c.bf16 %v606_v10, %v602_v9  ;;  %v615_v15 = vld [vmem:[#allocation5 + $0x78] sm:$0xff]  ;;  %8440 = vmatprep.subr.bf16.mxu1 %v8439_v7  ;;  %v8315_v16 = vpack.c.bf16 %v613_v13, %v609_v11  ;;  %v608_v18 = vld [vmem:[#allocation5 + $0x40] sm:$0xff]  ;;  %v610_v20 = vld [vmem:[#allocation5 + $0x50] sm:$0xff]  ;;  %s10992_s3 = smov 124   ;;  %vm5317_vm15 = vcmask 1014784   ;;  %s10993_s27 = smov 120  }
  0xb8   :  { %8314 = vmatpush1.bf16.msra.mxu0 %v8313_v8  ;;  %v8443_v17 = vpack.c.bf16 %v615_v15, %v611_v14  ;;  %v612_v19 = vld [vmem:[#allocation5 + $0x60] sm:$0xff]  ;;  %v614_v22 = vld [vmem:[#allocation5 + $0x70] sm:$0xff]  ;;  %v617_v23 = vld [vmem:[#allocation5 + $0x88] sm:$0xff]  ;;  %s10994_s28 = smov 112  }
  0xb9   :  { %8442 = vmatpush1.bf16.msra.mxu1 %v8441_v12  ;;  %v8317_v21 = vpack.c.bf16 %v612_v19, %v608_v18  ;;  %v621_v24 = vld [vmem:[#allocation5 + $0xa8] sm:$0xff]  ;;  %8316 = vmatprep.subr.bf16.mxu0 %v8315_v16  ;;  %v8445_v25 = vpack.c.bf16 %v614_v22, %v610_v20  ;;  %v619_v27 = vld [vmem:[#allocation5 + $0x98] sm:$0xff]  ;;  %v616_v29 = vld [vmem:[#allocation5 + $0x80] sm:$0xff] }
  0xba   :  { %8444 = vmatprep.subr.bf16.mxu1 %v8443_v17  ;;  %v8319_v26 = vpack.c.bf16 %v621_v24, %v617_v23  ;;  %v623_v28 = vld [vmem:[#allocation5 + $0xb8] sm:$0xff]  ;;  %v620_v31 = vld [vmem:[#allocation5 + $0xa0] sm:$0xff]  ;;  %v618_v32 = vld [vmem:[#allocation5 + $0x90] sm:$0xff] }
  0xbb   :  { %v8447_v30 = vpack.c.bf16 %v623_v28, %v619_v27  ;;  %v622_v33 = vld [vmem:[#allocation5 + $0xb0] sm:$0xff]  ;;  %v8321_v34 = vpack.c.bf16 %v620_v31, %v616_v29  ;;  %v625_v35 = vld [vmem:[#allocation5 + $0xc8] sm:$0xff]  ;;  %v627_v37 = vld [vmem:[#allocation5 + $0xd8] sm:$0xff] }
  0xbc   :  { %8318 = vmatpush1.bf16.msra.mxu0 %v8317_v21  ;;  %v629_v36 = vld [vmem:[#allocation5 + $0xe8] sm:$0xff]  ;;  %v8449_v38 = vpack.c.bf16 %v622_v33, %v618_v32  ;;  %v631_v40 = vld [vmem:[#allocation5 + $0xf8] sm:$0xff]  ;;  %v624_v41 = vld [vmem:[#allocation5 + $0xc0] sm:$0xff] }
  0xbd   :  { %8446 = vmatpush1.bf16.msra.mxu1 %v8445_v25  ;;  %8320 = vmatprep.subr.bf16.mxu0 %v8319_v26  ;;  %v8323_v39 = vpack.c.bf16 %v629_v36, %v625_v35  ;;  %v628_v42 = vld [vmem:[#allocation5 + $0xe0] sm:$0xff]  ;;  %v8451_v43 = vpack.c.bf16 %v631_v40, %v627_v37  ;;  %v626_v44 = vld [vmem:[#allocation5 + $0xd0] sm:$0xff]  ;;  %v633_v46 = vld [vmem:[#allocation5 + $0x108] sm:$0xff] }
  0xbe   :  { %8448 = vmatprep.subr.bf16.mxu1 %v8447_v30  ;;  %v630_v45 = vld [vmem:[#allocation5 + $0xf0] sm:$0xff]  ;;  %v637_v47 = vld [vmem:[#allocation5 + $0x128] sm:$0xff]  ;;  %v635_v48 = vld [vmem:[#allocation5 + $0x118] sm:$0xff]  ;;  %v8325_v50 = vpack.c.bf16 %v628_v42, %v624_v41 }
  0xbf   :  { %v639_v49 = vld [vmem:[#allocation5 + $0x138] sm:$0xff]  ;;  %v8453_v51 = vpack.c.bf16 %v630_v45, %v626_v44  ;;  %v8327_v52 = vpack.c.bf16 %v637_v47, %v633_v46  ;;  %v632_v53 = vld [vmem:[#allocation5 + $0x100] sm:$0xff]  ;;  %v634_v55 = vld [vmem:[#allocation5 + $0x110] sm:$0xff] }
  0xc0   :  { %8322 = vmatpush1.bf16.msra.mxu0 %v8321_v34  ;;  %v636_v54 = vld [vmem:[#allocation5 + $0x120] sm:$0xff]  ;;  %v8455_v56 = vpack.c.bf16 %v639_v49, %v635_v48  ;;  %v638_v57 = vld [vmem:[#allocation5 + $0x130] sm:$0xff]  ;;  %v641_v58 = vld [vmem:[#allocation5 + $0x148] sm:$0xff]  ;;  %v13222_v34 = vlaneseq }
  0xc1   :  { %8450 = vmatpush1.bf16.msra.mxu1 %v8449_v38  ;;  %8324 = vmatprep.subr.bf16.mxu0 %v8323_v39  ;;  %v645_v59 = vld [vmem:[#allocation5 + $0x168] sm:$0xff]  ;;  %v643_v60 = vld [vmem:[#allocation5 + $0x158] sm:$0xff]  ;;  %v8329_v62 = vpack.c.bf16 %v636_v54, %v632_v53  ;;  %v8457_v63 = vpack.c.bf16 %v638_v57, %v634_v55  ;;  %v640_v1 = vld [vmem:[#allocation5 + $0x140] sm:$0xff] }
  0xc2   :  { %8452 = vmatprep.subr.bf16.mxu1 %v8451_v43  ;;  %v647_v61 = vld [vmem:[#allocation5 + $0x178] sm:$0xff]  ;;  %v8331_v0 = vpack.c.bf16 %v645_v59, %v641_v58  ;;  %v644_v2 = vld [vmem:[#allocation5 + $0x160] sm:$0xff]  ;;  %v642_v3 = vld [vmem:[#allocation5 + $0x150] sm:$0xff]  ;;  %v11206_v47 = vshrl.u32 %v13222_v34, 7 }
  0xc3   :  { %v8459_v4 = vpack.c.bf16 %v647_v61, %v643_v60  ;;  %v646_v5 = vld [vmem:[#allocation5 + $0x170] sm:$0xff]  ;;  %v649_v6 = vld [vmem:[#allocation5 + $0x188] sm:$0xff]  ;;  %v651_v8 = vld [vmem:[#allocation5 + $0x198] sm:$0xff]  ;;  %v8333_v10 = vpack.c.bf16 %v644_v2, %v640_v1 }
  0xc4   :  { %8326 = vmatpush1.bf16.msra.mxu0 %v8325_v50  ;;  %v653_v7 = vld [vmem:[#allocation5 + $0x1a8] sm:$0xff]  ;;  %v655_v9 = vld [vmem:[#allocation5 + $0x1b8] sm:$0xff]  ;;  %v8461_v11 = vpack.c.bf16 %v646_v5, %v642_v3  ;;  %v648_v13 = vld [vmem:[#allocation5 + $0x180] sm:$0xff]  ;;  %v11209_v60 = vand.u32 15, %v11206_v47 }
  0xc5   :  { %8454 = vmatpush1.bf16.msra.mxu1 %v8453_v51  ;;  %8328 = vmatprep.subr.bf16.mxu0 %v8327_v52  ;;  %v8335_v12 = vpack.c.bf16 %v653_v7, %v649_v6  ;;  %v652_v14 = vld [vmem:[#allocation5 + $0x1a0] sm:$0xff]  ;;  %v650_v15 = vld [vmem:[#allocation5 + $0x190] sm:$0xff]  ;;  %v8463_v16 = vpack.c.bf16 %v655_v9, %v651_v8  ;;  %v657_v18 = vld [vmem:[#allocation5 + $0x1c8] sm:$0xff] }
  0xc6   :  { %8456 = vmatprep.subr.bf16.mxu1 %v8455_v56  ;;  %v654_v17 = vld [vmem:[#allocation5 + $0x1b0] sm:$0xff]  ;;  %v661_v19 = vld [vmem:[#allocation5 + $0x1e8] sm:$0xff]  ;;  %v659_v20 = vld [vmem:[#allocation5 + $0x1d8] sm:$0xff]  ;;  %v8337_v22 = vpack.c.bf16 %v652_v14, %v648_v13  ;;  %13241 = vst [vmem:[#allocation27_spill] sm:$0xff] %v11209_v60  ;;  %v11212_v9 = vadd.s32 4294967295, %v11209_v60 }
  0xc7   :  { %v663_v21 = vld [vmem:[#allocation5 + $0x1f8] sm:$0xff]  ;;  %v8465_v23 = vpack.c.bf16 %v654_v17, %v650_v15  ;;  %v8339_v24 = vpack.c.bf16 %v661_v19, %v657_v18  ;;  %v656_v25 = vld [vmem:[#allocation5 + $0x1c0] sm:$0xff]  ;;  %v658_v27 = vld [vmem:[#allocation5 + $0x1d0] sm:$0xff] }
  0xc8   :  { %8330 = vmatpush1.bf16.msra.mxu0 %v8329_v62  ;;  %v660_v26 = vld [vmem:[#allocation5 + $0x1e0] sm:$0xff]  ;;  %v8467_v28 = vpack.c.bf16 %v663_v21, %v659_v20  ;;  %v662_v29 = vld [vmem:[#allocation5 + $0x1f0] sm:$0xff]  ;;  %v665_v30 = vld [vmem:[#allocation5 + $0x208] sm:$0xff]  ;;  %13242 = vst [vmem:[#allocation28_spill] sm:$0xff] %v11212_v9  ;;  %vm564_vm1 = vcmp.ge.s32.totalorder %v11212_v9, 0 }
  0xc9   :  { %8458 = vmatpush1.bf16.msra.mxu1 %v8457_v63  ;;  %8332 = vmatprep.subr.bf16.mxu0 %v8331_v0  ;;  %v669_v31 = vld [vmem:[#allocation5 + $0x228] sm:$0xff]  ;;  %v667_v32 = vld [vmem:[#allocation5 + $0x218] sm:$0xff]  ;;  %v8341_v35 = vpack.c.bf16 %v660_v26, %v656_v25  ;;  %v8469_v36 = vpack.c.bf16 %v662_v29, %v658_v27  ;;  %v664_v38 = vld [vmem:[#allocation5 + $0x200] sm:$0xff] }
  0xca   :  { %8460 = vmatprep.subr.bf16.mxu1 %v8459_v4  ;;  %v671_v33 = vld [vmem:[#allocation5 + $0x238] sm:$0xff]  ;;  %v8343_v37 = vpack.c.bf16 %v669_v31, %v665_v30  ;;  %v668_v39 = vld [vmem:[#allocation5 + $0x220] sm:$0xff]  ;;  %v666_v40 = vld [vmem:[#allocation5 + $0x210] sm:$0xff] }
  0xcb   :  { %v8471_v41 = vpack.c.bf16 %v671_v33, %v667_v32  ;;  %v670_v42 = vld [vmem:[#allocation5 + $0x230] sm:$0xff]  ;;  %v673_v43 = vld [vmem:[#allocation5 + $0x248] sm:$0xff]  ;;  %v675_v45 = vld [vmem:[#allocation5 + $0x258] sm:$0xff]  ;;  %v8345_v48 = vpack.c.bf16 %v668_v39, %v664_v38 }
  0xcc   :  { %8334 = vmatpush1.bf16.msra.mxu0 %v8333_v10  ;;  %v677_v44 = vld [vmem:[#allocation5 + $0x268] sm:$0xff]  ;;  %v679_v46 = vld [vmem:[#allocation5 + $0x278] sm:$0xff]  ;;  %v8473_v49 = vpack.c.bf16 %v670_v42, %v666_v40  ;;  %v672_v51 = vld [vmem:[#allocation5 + $0x240] sm:$0xff] }
  0xcd   :  { %8462 = vmatpush1.bf16.msra.mxu1 %v8461_v11  ;;  %8336 = vmatprep.subr.bf16.mxu0 %v8335_v12  ;;  %v8347_v50 = vpack.c.bf16 %v677_v44, %v673_v43  ;;  %v676_v52 = vld [vmem:[#allocation5 + $0x260] sm:$0xff]  ;;  %v674_v53 = vld [vmem:[#allocation5 + $0x250] sm:$0xff]  ;;  %v8475_v54 = vpack.c.bf16 %v679_v46, %v675_v45  ;;  %v681_v56 = vld [vmem:[#allocation5 + $0x288] sm:$0xff] }
  0xce   :  { %8464 = vmatprep.subr.bf16.mxu1 %v8463_v16  ;;  %v678_v55 = vld [vmem:[#allocation5 + $0x270] sm:$0xff]  ;;  %v685_v57 = vld [vmem:[#allocation5 + $0x2a8] sm:$0xff]  ;;  %v683_v58 = vld [vmem:[#allocation5 + $0x298] sm:$0xff]  ;;  %v8349_v61 = vpack.c.bf16 %v676_v52, %v672_v51 }
  0xcf   :  { %v687_v59 = vld [vmem:[#allocation5 + $0x2b8] sm:$0xff]  ;;  %v8477_v62 = vpack.c.bf16 %v678_v55, %v674_v53  ;;  %v8351_v63 = vpack.c.bf16 %v685_v57, %v681_v56  ;;  %v680_v0 = vld [vmem:[#allocation5 + $0x280] sm:$0xff]  ;;  %v682_v2 = vld [vmem:[#allocation5 + $0x290] sm:$0xff] }
  0xd0   :  { %8338 = vmatpush1.bf16.msra.mxu0 %v8337_v22  ;;  %v684_v1 = vld [vmem:[#allocation5 + $0x2a0] sm:$0xff]  ;;  %v8479_v3 = vpack.c.bf16 %v687_v59, %v683_v58  ;;  %v686_v4 = vld [vmem:[#allocation5 + $0x2b0] sm:$0xff]  ;;  %v689_v5 = vld [vmem:[#allocation5 + $0x2c8] sm:$0xff] }
  0xd1   :  { %8466 = vmatpush1.bf16.msra.mxu1 %v8465_v23  ;;  %8340 = vmatprep.subr.bf16.mxu0 %v8339_v24  ;;  %v693_v6 = vld [vmem:[#allocation5 + $0x2e8] sm:$0xff]  ;;  %v691_v7 = vld [vmem:[#allocation5 + $0x2d8] sm:$0xff]  ;;  %v8353_v10 = vpack.c.bf16 %v684_v1, %v680_v0  ;;  %v688_v11 = vld [vmem:[#allocation5 + $0x2c0] sm:$0xff]  ;;  %v8481_v12 = vpack.c.bf16 %v686_v4, %v682_v2 }
  0xd2   :  { %8468 = vmatprep.subr.bf16.mxu1 %v8467_v28  ;;  %v695_v8 = vld [vmem:[#allocation5 + $0x2f8] sm:$0xff]  ;;  %v8355_v13 = vpack.c.bf16 %v693_v6, %v689_v5  ;;  %v692_v14 = vld [vmem:[#allocation5 + $0x2e0] sm:$0xff]  ;;  %v690_v15 = vld [vmem:[#allocation5 + $0x2d0] sm:$0xff] }
  0xd3   :  { %v694_v16 = vld [vmem:[#allocation5 + $0x2f0] sm:$0xff]  ;;  %v8483_v17 = vpack.c.bf16 %v695_v8, %v691_v7  ;;  %v697_v18 = vld [vmem:[#allocation5 + $0x308] sm:$0xff]  ;;  %v699_v21 = vld [vmem:[#allocation5 + $0x318] sm:$0xff]  ;;  %v8357_v24 = vpack.c.bf16 %v692_v14, %v688_v11 }
  0xd4   :  { %8342 = vmatpush1.bf16.msra.mxu0 %v8341_v35  ;;  %v701_v19 = vld [vmem:[#allocation5 + $0x328] sm:$0xff]  ;;  %v703_v22 = vld [vmem:[#allocation5 + $0x338] sm:$0xff]  ;;  %v8485_v25 = vpack.c.bf16 %v694_v16, %v690_v15  ;;  %v696_v27 = vld [vmem:[#allocation5 + $0x300] sm:$0xff] }
  0xd5   :  { %8470 = vmatpush1.bf16.msra.mxu1 %v8469_v36  ;;  %8344 = vmatprep.subr.bf16.mxu0 %v8343_v37  ;;  %v11214_v20 = vld [vmem:[#allocation2 + $0x8] sm:$0xff]  ;;  %v8359_v26 = vpack.c.bf16 %v701_v19, %v697_v18  ;;  %v700_v28 = vld [vmem:[#allocation5 + $0x320] sm:$0xff]  ;;  %v698_v29 = vld [vmem:[#allocation5 + $0x310] sm:$0xff]  ;;  %v8487_v31 = vpack.c.bf16 %v703_v22, %v699_v21 }
  0xd6   :  { %8472 = vmatprep.subr.bf16.mxu1 %v8471_v41  ;;  %v513_v23 = vrot.slane %v11214_v20, 7  ;;  %v702_v32 = vld [vmem:[#allocation5 + $0x330] sm:$0xff]  ;;  %v705_v33 = vld [vmem:[#allocation5 + $0x348] sm:$0xff]  ;;  %v707_v36 = vld [vmem:[#allocation5 + $0x358] sm:$0xff]  ;;  %v8361_v38 = vpack.c.bf16 %v700_v28, %v696_v27 }
  0xd7   :  { %v709_v35 = vld [vmem:[#allocation5 + $0x368] sm:$0xff]  ;;  %v711_v37 = vld [vmem:[#allocation5 + $0x378] sm:$0xff]  ;;  %v8489_v39 = vpack.c.bf16 %v702_v32, %v698_v29  ;;  %v704_v41 = vld [vmem:[#allocation5 + $0x340] sm:$0xff] }
  0xd8   :  { %8346 = vmatpush1.bf16.msra.mxu0 %v8345_v48  ;;  %v557_v30 = vsel %vm511_vm0, 0.0, %v513_v23  ;;  %v8363_v40 = vpack.c.bf16 %v709_v35, %v705_v33  ;;  %v708_v42 = vld [vmem:[#allocation5 + $0x360] sm:$0xff]  ;;  %v706_v43 = vld [vmem:[#allocation5 + $0x350] sm:$0xff]  ;;  %v8491_v44 = vpack.c.bf16 %v711_v37, %v707_v36  ;;  %v713_v46 = vld [vmem:[#allocation5 + $0x388] sm:$0xff] }
  0xd9   :  { %8474 = vmatpush1.bf16.msra.mxu1 %v8473_v49  ;;  %8348 = vmatprep.subr.bf16.mxu0 %v8347_v50  ;;  %v710_v45 = vld [vmem:[#allocation5 + $0x370] sm:$0xff]  ;;  %v717_v48 = vld [vmem:[#allocation5 + $0x3a8] sm:$0xff]  ;;  %v715_v49 = vld [vmem:[#allocation5 + $0x398] sm:$0xff]  ;;  %v8365_v51 = vpack.c.bf16 %v708_v42, %v704_v41 }
  0xda   :  { %8476 = vmatprep.subr.bf16.mxu1 %v8475_v54  ;;  %7977 = vmatprep.mubr.msk.f32.mxu0 %vm564_vm1, %v557_v30  ;;  %v719_v50 = vld [vmem:[#allocation5 + $0x3b8] sm:$0xff]  ;;  %v8493_v52 = vpack.c.bf16 %v710_v45, %v706_v43  ;;  %v8367_v53 = vpack.c.bf16 %v717_v48, %v713_v46  ;;  %v712_v54 = vld [vmem:[#allocation5 + $0x380] sm:$0xff]  ;;  %v714_v56 = vld [vmem:[#allocation5 + $0x390] sm:$0xff] }
  0xdb   :  { %7985 = vmatprep.mubr.msk.f32.mxu1 %vm564_vm1, %v557_v30  ;;  %v716_v55 = vld [vmem:[#allocation5 + $0x3a0] sm:$0xff]  ;;  %v8495_v57 = vpack.c.bf16 %v719_v50, %v715_v49  ;;  %v718_v58 = vld [vmem:[#allocation5 + $0x3b0] sm:$0xff]  ;;  %v721_v59 = vld [vmem:[#allocation5 + $0x3c8] sm:$0xff] }
  0xdc   :  { %8350 = vmatpush1.bf16.msra.mxu0 %v8349_v61  ;;  %v725_v61 = vld [vmem:[#allocation5 + $0x3e8] sm:$0xff]  ;;  %v8369_v0 = vpack.c.bf16 %v716_v55, %v712_v54  ;;  %v720_v1 = vld [vmem:[#allocation5 + $0x3c0] sm:$0xff]  ;;  %v8497_v2 = vpack.c.bf16 %v718_v58, %v714_v56  ;;  %v722_v5 = vld [vmem:[#allocation5 + $0x3d0] sm:$0xff]  ;;  %v172_v56 = vadd.s32 16, %v11206_v47 }
  0xdd   :  { %8478 = vmatpush1.bf16.msra.mxu1 %v8477_v62  ;;  %8352 = vmatprep.subr.bf16.mxu0 %v8351_v63  ;;  %v723_v62 = vld [vmem:[#allocation5 + $0x3d8] sm:$0xff]  ;;  %v724_v4 = vld [vmem:[#allocation5 + $0x3e0] sm:$0xff]  ;;  %v726_v8 = vld [vmem:[#allocation5 + $0x3f0] sm:$0xff] }
  0xde   :  { %8480 = vmatprep.subr.bf16.mxu1 %v8479_v3  ;;  %v727_v63 = vld [vmem:[#allocation5 + $0x3f8] sm:$0xff]  ;;  %v8371_v3 = vpack.c.bf16 %v725_v61, %v721_v59  ;;  %v11225_v6 = vld [vmem:[#allocation2] sm:$0xff]  ;;  %v733_v11 = vld [vmem:[#allocation5 + $0x428] sm:$0xff]  ;;  %v8373_v14 = vpack.c.bf16 %v724_v4, %v720_v1  ;;  %v8501_v16 = vpack.c.bf16 %v726_v8, %v722_v5 }
  0xdf   :  { %v8499_v7 = vpack.c.bf16 %v727_v63, %v723_v62  ;;  %v512_v15 = vrot.slane %v11225_v6, 7  ;;  %v728_v18 = vld [vmem:[#allocation5 + $0x400] sm:$0xff]  ;;  %v730_v21 = vld [vmem:[#allocation5 + $0x410] sm:$0xff]  ;;  %v739_v27 = vld [vmem:[#allocation5 + $0x458] sm:$0xff] }
  0xe0   :  { %8354 = vmatpush1.bf16.msra.mxu0 %v8353_v10  ;;  %v729_v10 = vld [vmem:[#allocation5 + $0x408] sm:$0xff]  ;;  %v732_v19 = vld [vmem:[#allocation5 + $0x420] sm:$0xff]  ;;  %v743_v28 = vld [vmem:[#allocation5 + $0x478] sm:$0xff] }
  0xe1   :  { %8482 = vmatpush1.bf16.msra.mxu1 %v8481_v12  ;;  %8356 = vmatprep.subr.bf16.mxu0 %v8355_v13  ;;  %v731_v12 = vld [vmem:[#allocation5 + $0x418] sm:$0xff]  ;;  %v556_v29 = vsel %vm511_vm0, 0.0, %v512_v15  ;;  %v8377_v30 = vpack.c.bf16 %v732_v19, %v728_v18  ;;  %v736_v33 = vld [vmem:[#allocation5 + $0x440] sm:$0xff]  ;;  %v738_v36 = vld [vmem:[#allocation5 + $0x450] sm:$0xff]  ;;  %v8507_v37 = vpack.c.bf16 %v743_v28, %v739_v27 }
  0xe2   :  { %8484 = vmatprep.subr.bf16.mxu1 %v8483_v17  ;;  %v735_v13 = vld [vmem:[#allocation5 + $0x438] sm:$0xff]  ;;  %v8375_v17 = vpack.c.bf16 %v733_v11, %v729_v10  ;;  %v740_v35 = vld [vmem:[#allocation5 + $0x460] sm:$0xff]  ;;  %v746_v49 = vld [vmem:[#allocation5 + $0x490] sm:$0xff] }
  0xe3   :  { %v8503_v22 = vpack.c.bf16 %v735_v13, %v731_v12  ;;  %v747_v41 = vld [vmem:[#allocation5 + $0x498] sm:$0xff]  ;;  %v8381_v43 = vpack.c.bf16 %v740_v35, %v736_v33  ;;  %v744_v46 = vld [vmem:[#allocation5 + $0x480] sm:$0xff]  ;;  %v754_v63 = vld [vmem:[#allocation5 + $0x4d0] sm:$0xff] }
  0xe4   :  { %8358 = vmatpush1.bf16.msra.mxu0 %v8357_v24  ;;  %v734_v24 = vld [vmem:[#allocation5 + $0x430] sm:$0xff]  ;;  %v751_v42 = vld [vmem:[#allocation5 + $0x4b8] sm:$0xff]  ;;  %v748_v48 = vld [vmem:[#allocation5 + $0x4a0] sm:$0xff] }
  0xe5   :  { %8486 = vmatpush1.bf16.msra.mxu1 %v8485_v25  ;;  %8360 = vmatprep.subr.bf16.mxu0 %v8359_v26  ;;  %v737_v25 = vld [vmem:[#allocation5 + $0x448] sm:$0xff]  ;;  %v8511_v50 = vpack.c.bf16 %v751_v42, %v747_v41  ;;  %v755_v54 = vld [vmem:[#allocation5 + $0x4d8] sm:$0xff]  ;;  %v752_v61 = vld [vmem:[#allocation5 + $0x4c0] sm:$0xff] }
  0xe6   :  { %8488 = vmatprep.subr.bf16.mxu1 %v8487_v31  ;;  %v741_v26 = vld [vmem:[#allocation5 + $0x468] sm:$0xff]  ;;  %v8505_v31 = vpack.c.bf16 %v734_v24, %v730_v21  ;;  %v759_v55 = vld [vmem:[#allocation5 + $0x4f8] sm:$0xff]  ;;  %v756_v62 = vld [vmem:[#allocation5 + $0x4e0] sm:$0xff] }
  0xe7   :  { %v8379_v32 = vpack.c.bf16 %v741_v26, %v737_v25  ;;  %v758_v1 = vld [vmem:[#allocation5 + $0x4f0] sm:$0xff]  ;;  %v763_v4 = vld [vmem:[#allocation5 + $0x518] sm:$0xff]  ;;  %v8389_v8 = vpack.c.bf16 %v756_v62, %v752_v61  ;;  %v760_v10 = vld [vmem:[#allocation5 + $0x500] sm:$0xff] }
  0xe8   :  { %8362 = vmatpush1.bf16.msra.mxu0 %v8361_v38  ;;  %v742_v38 = vld [vmem:[#allocation5 + $0x470] sm:$0xff]  ;;  %v767_v5 = vld [vmem:[#allocation5 + $0x538] sm:$0xff]  ;;  %v8517_v11 = vpack.c.bf16 %v758_v1, %v754_v63  ;;  %v764_v13 = vld [vmem:[#allocation5 + $0x520] sm:$0xff] }
  0xe9   :  { %8490 = vmatpush1.bf16.msra.mxu1 %v8489_v39  ;;  %8364 = vmatprep.subr.bf16.mxu0 %v8363_v40  ;;  %v745_v39 = vld [vmem:[#allocation5 + $0x488] sm:$0xff]  ;;  %v775_v24 = vld [vmem:[#allocation5 + $0x578] sm:$0xff]  ;;  %v226_v26 = vld [vmem:[#allocation2 + $0x20] sm:$0xff]  ;;  %v8393_v28 = vpack.c.bf16 %v764_v13, %v760_v10 }
  0xea   :  { %8492 = vmatprep.subr.bf16.mxu1 %v8491_v44  ;;  %v749_v40 = vld [vmem:[#allocation5 + $0x4a8] sm:$0xff]  ;;  %v8509_v44 = vpack.c.bf16 %v742_v38, %v738_v36  ;;  %v772_v33 = vld [vmem:[#allocation5 + $0x560] sm:$0xff]  ;;  %v770_v35 = vld [vmem:[#allocation5 + $0x550] sm:$0xff] }
  0xeb   :  { %v8383_v45 = vpack.c.bf16 %v749_v40, %v745_v39  ;;  %v769_v18 = vld [vmem:[#allocation5 + $0x548] sm:$0xff]  ;;  %v774_v39 = vld [vmem:[#allocation5 + $0x570] sm:$0xff]  ;;  %v234_v61 = vld [vmem:[#allocation2 + $0x60] sm:$0xff] }
  0xec   :  { %8366 = vmatpush1.bf16.msra.mxu0 %v8365_v51  ;;  %v750_v51 = vld [vmem:[#allocation5 + $0x4b0] sm:$0xff]  ;;  %v773_v19 = vld [vmem:[#allocation5 + $0x568] sm:$0xff]  ;;  %v8525_v6 = vpack.c.bf16 %v774_v39, %v770_v35  ;;  %v787_v62 = vld [vmem:[#allocation5 + $0x5d8] sm:$0xff]  ;;  %v532_v1 = vrot.slane %v234_v61, 7 }
  0xed   :  { %8494 = vmatpush1.bf16.msra.mxu1 %v8493_v52  ;;  %8368 = vmatprep.subr.bf16.mxu0 %v8367_v53  ;;  %v753_v52 = vld [vmem:[#allocation5 + $0x4c8] sm:$0xff]  ;;  %v8513_v58 = vpack.c.bf16 %v750_v51, %v746_v49  ;;  %v791_v63 = vld [vmem:[#allocation5 + $0x5f8] sm:$0xff]  ;;  %v788_v10 = vld [vmem:[#allocation5 + $0x5e0] sm:$0xff] }
  0xee   :  { %8496 = vmatprep.subr.bf16.mxu1 %v8495_v57  ;;  %v757_v53 = vld [vmem:[#allocation5 + $0x4e8] sm:$0xff]  ;;  %v8385_v57 = vpack.c.bf16 %v748_v48, %v744_v46  ;;  %v230_v46 = vld [vmem:[#allocation2 + $0x40] sm:$0xff] }
  0xef   :  { %v8387_v59 = vpack.c.bf16 %v757_v53, %v753_v52  ;;  %v227_v21 = vld [vmem:[#allocation2 + $0x28] sm:$0xff]  ;;  %v776_v48 = vld [vmem:[#allocation5 + $0x580] sm:$0xff]  ;;  %v778_v53 = vld [vmem:[#allocation5 + $0x590] sm:$0xff] }
  0xf0   :  { %8370 = vmatpush1.bf16.msra.mxu0 %v8369_v0  ;;  %v8515_v0 = vpack.c.bf16 %v759_v55, %v755_v54  ;;  %v518_v25 = vrot.slane %v227_v21, 7  ;;  %v777_v40 = vld [vmem:[#allocation5 + $0x588] sm:$0xff]  ;;  %v780_v52 = vld [vmem:[#allocation5 + $0x5a0] sm:$0xff]  ;;  %v782_v54 = vld [vmem:[#allocation5 + $0x5b0] sm:$0xff] }
  0xf1   :  { %8498 = vmatpush1.bf16.msra.mxu1 %v8497_v2  ;;  %8372 = vmatprep.subr.bf16.mxu0 %v8371_v3  ;;  %v761_v2 = vld [vmem:[#allocation5 + $0x508] sm:$0xff]  ;;  %v799_v21 = vld [vmem:[#allocation5 + $0x638] sm:$0xff] }
  0xf2   :  { %8500 = vmatprep.subr.bf16.mxu1 %v8499_v7  ;;  %v765_v3 = vld [vmem:[#allocation5 + $0x528] sm:$0xff]  ;;  %v11236_v7 = vand.u32 15, %v172_v56  ;;  %v519_v36 = vsel %vm511_vm0, %v513_v23, %v518_v25 }
  0xf3   :  { %v8391_v12 = vpack.c.bf16 %v765_v3, %v761_v2  ;;  %v781_v41 = vld [vmem:[#allocation5 + $0x5a8] sm:$0xff]  ;;  %v8401_v2 = vpack.c.bf16 %v780_v52, %v776_v48  ;;  %v11259_v3 = vld [vmem:[#allocation2 + $0x18] sm:$0xff]  ;;  %v812_v52 = vld [vmem:[#allocation5 + $0x6a0] sm:$0xff] }
  0xf4   :  { %8374 = vmatpush1.bf16.msra.mxu0 %v8373_v14  ;;  %13243 = vst [vmem:[#allocation29_spill] sm:$0xff] %v11236_v7  ;;  %v762_v14 = vld [vmem:[#allocation5 + $0x510] sm:$0xff]  ;;  %v11239_v27 = vadd.s32 4294967295, %v11236_v7  ;;  %v235_v51 = vld [vmem:[#allocation2 + $0x68] sm:$0xff]  ;;  %v515_v13 = vrot.slane %v11259_v3, 7  ;;  %v811_v48 = vld [vmem:[#allocation5 + $0x698] sm:$0xff] }
  0xf5   :  { %8502 = vmatpush1.bf16.msra.mxu1 %v8501_v16  ;;  %8376 = vmatprep.subr.bf16.mxu0 %v8375_v17  ;;  %v766_v16 = vld [vmem:[#allocation5 + $0x530] sm:$0xff]  ;;  %v8519_v17 = vpack.c.bf16 %v767_v5, %v763_v4  ;;  %v534_v55 = vrot.slane %v235_v51, 7  ;;  %v8529_v4 = vpack.c.bf16 %v782_v54, %v778_v53  ;;  %v805_v35 = vld [vmem:[#allocation5 + $0x668] sm:$0xff]  ;;  %v259_v3 = vld [vmem:[#allocation5 + $0x8a0] sm:$0xff] }
  0xf6   :  { %8504 = vmatprep.subr.bf16.mxu1 %v8503_v22  ;;  %v771_v22 = vld [vmem:[#allocation5 + $0x558] sm:$0xff]  ;;  %13244 = vst [vmem:[#allocation30_spill] sm:$0xff] %v11239_v27  ;;  %vm566_vm2 = vcmp.ge.s32.totalorder %v11239_v27, 0  ;;  %v810_v53 = vld [vmem:[#allocation5 + $0x690] sm:$0xff] }
  0xf7   :  { %7978 = vmatmul.mubr.msk.f32.vlgmr.msra.gmra.mrb[0].mxu0 %vm564_vm1, %v556_v29  ;;  %v8523_v38 = vpack.c.bf16 %v775_v24, %v771_v22  ;;  %v559_v22 = vsel %vm511_vm0, 0.0, %v515_v13 }
  0xf8   :  { %8378 = vmatpush1.bf16.msra.mxu0 %v8377_v30  ;;  %7986 = vmatmul.mubr.msk.f32.vlgmr.msra.gmra.mrb[0].mxu1 %vm564_vm1, %v556_v29  ;;  %v768_v29 = vld [vmem:[#allocation5 + $0x540] sm:$0xff]  ;;  %v516_v30 = vrot.slane %v226_v26, 7 }
  0xf9   :  { %8506 = vmatpush1.bf16.msra.mxu1 %v8505_v31  ;;  %8380 = vmatprep.subr.bf16.mxu0 %v8379_v32  ;;  %v8521_v31 = vpack.c.bf16 %v766_v16, %v762_v14  ;;  %v8395_v32 = vpack.c.bf16 %v773_v19, %v769_v18  ;;  %v8397_v23 = vpack.c.bf16 %v772_v33, %v768_v29  ;;  %v790_v16 = vld [vmem:[#allocation5 + $0x5f0] sm:$0xff]  ;;  %v797_v18 = vld [vmem:[#allocation5 + $0x628] sm:$0xff]  ;;  %v795_v19 = vld [vmem:[#allocation5 + $0x618] sm:$0xff] }
  0xfa   :  { %8508 = vmatprep.subr.bf16.mxu1 %v8507_v37  ;;  %v231_v37 = vld [vmem:[#allocation2 + $0x48] sm:$0xff]  ;;  %926 = vmatprep.mubr.f32.mxu0 %v519_v36  ;;  %v517_v42 = vsel %vm511_vm0, %v512_v15, %v516_v30  ;;  %v8399_v15 = vpack.c.bf16 %v781_v41, %v777_v40  ;;  %v8531_v14 = vpack.c.bf16 %v791_v63, %v787_v62  ;;  %v796_v29 = vld [vmem:[#allocation5 + $0x620] sm:$0xff] }
  0xfb   :  { %1104 = vmatprep.mubr.f32.mxu1 %v519_v36  ;;  %927 = vmatmul.mubr.f32.gmra.mrb[2].mxu0 %v517_v42  ;;  %v801_v33 = vld [vmem:[#allocation5 + $0x648] sm:$0xff]  ;;  %v803_v36 = vld [vmem:[#allocation5 + $0x658] sm:$0xff]  ;;  %v800_v41 = vld [vmem:[#allocation5 + $0x640] sm:$0xff] }
  0xfc   :  { %8382 = vmatpush1.bf16.msra.mxu0 %v8381_v43  ;;  %v526_v43 = vrot.slane %v231_v37, 7  ;;  %1105 = vmatmul.mubr.f32.gmra.mrb[2].mxu1 %v517_v42  ;;  %v807_v37 = vld [vmem:[#allocation5 + $0x678] sm:$0xff]  ;;  %v8411_v40 = vpack.c.bf16 %v805_v35, %v801_v33  ;;  %v804_v42 = vld [vmem:[#allocation5 + $0x660] sm:$0xff] }
  0xfd   :  { %8510 = vmatpush1.bf16.msra.mxu1 %v8509_v44  ;;  %8384 = vmatprep.subr.bf16.mxu0 %v8383_v45  ;;  %v779_v44 = vld [vmem:[#allocation5 + $0x598] sm:$0xff]  ;;  %v832_v33 = vld [vmem:[#allocation5 + $0x740] sm:$0xff] }
  0xfe   :  { %8512 = vmatprep.subr.bf16.mxu1 %v8511_v50  ;;  %v783_v45 = vld [vmem:[#allocation5 + $0x5b8] sm:$0xff]  ;;  %v527_v49 = vsel %vm511_vm0, %v518_v25, %v526_v43  ;;  %v524_v50 = vrot.slane %v230_v46, 7  ;;  %v809_v46 = vld [vmem:[#allocation5 + $0x688] sm:$0xff]  ;;  %v836_v35 = vld [vmem:[#allocation5 + $0x760] sm:$0xff] }
  0xff   :  { %v8527_v56 = vpack.c.bf16 %v783_v45, %v779_v44  ;;  %7979 = vmatprep.mubr.msk.f32.mxu0 %vm566_vm2, %v527_v49  ;;  %7987 = vmatprep.mubr.msk.f32.mxu1 %vm566_vm2, %v527_v49  ;;  %v8539_v44 = vpack.c.bf16 %v807_v37, %v803_v36  ;;  %v806_v45 = vld [vmem:[#allocation5 + $0x670] sm:$0xff]  ;;  %v815_v49 = vld [vmem:[#allocation5 + $0x6b8] sm:$0xff] }
 0x100   :  { %8386 = vmatpush1.bf16.msra.mxu0 %v8385_v57  ;;  %v785_v57 = vld [vmem:[#allocation5 + $0x5c8] sm:$0xff]  ;;  %v8543_v54 = vpack.c.bf16 %v815_v49, %v811_v48  ;;  %v834_v36 = vld [vmem:[#allocation5 + $0x750] sm:$0xff] }
 0x101   :  { %8514 = vmatpush1.bf16.msra.mxu1 %v8513_v58  ;;  %8388 = vmatprep.subr.bf16.mxu0 %v8387_v59  ;;  %v789_v58 = vld [vmem:[#allocation5 + $0x5e8] sm:$0xff]  ;;  %v525_v59 = vsel %vm511_vm0, %v516_v30, %v524_v50  ;;  %v794_v30 = vld [vmem:[#allocation5 + $0x610] sm:$0xff] }
 0x102   :  { %8516 = vmatprep.subr.bf16.mxu1 %v8515_v0  ;;  %7980 = vmatmul.mubr.msk.f32.gmra.mrb[4].mxu0 %vm566_vm2, %v525_v59  ;;  %v535_v0 = vsel %vm511_vm0, %v526_v43, %v534_v55  ;;  %v8403_v5 = vpack.c.bf16 %v789_v58, %v785_v57  ;;  %v802_v43 = vld [vmem:[#allocation5 + $0x650] sm:$0xff]  ;;  %v821_v57 = vld [vmem:[#allocation5 + $0x6e8] sm:$0xff]  ;;  %v819_v58 = vld [vmem:[#allocation5 + $0x6d8] sm:$0xff] }
 0x103   :  { %7988 = vmatmul.mubr.msk.f32.gmra.mrb[4].mxu1 %vm566_vm2, %v525_v59  ;;  %938 = vmatprep.mubr.f32.mxu0 %v535_v0  ;;  %v8541_v51 = vpack.c.bf16 %v806_v45, %v802_v43  ;;  %v814_v55 = vld [vmem:[#allocation5 + $0x6b0] sm:$0xff]  ;;  %v823_v59 = vld [vmem:[#allocation5 + $0x6f8] sm:$0xff]  ;;  %v8429_v43 = vpack.c.bf16 %v836_v35, %v832_v33 }
 0x104   :  { %8390 = vmatpush1.bf16.msra.mxu0 %v8389_v8  ;;  %v784_v8 = vld [vmem:[#allocation5 + $0x5c0] sm:$0xff]  ;;  %1116 = vmatprep.mubr.f32.mxu1 %v535_v0  ;;  %v8545_v62 = vpack.c.bf16 %v814_v55, %v810_v53  ;;  %v842_v48 = vld [vmem:[#allocation5 + $0x790] sm:$0xff] }
 0x105   :  { %8518 = vmatpush1.bf16.msra.mxu1 %v8517_v11  ;;  %8392 = vmatprep.subr.bf16.mxu0 %v8391_v12  ;;  %v786_v11 = vld [vmem:[#allocation5 + $0x5d0] sm:$0xff]  ;;  %v533_v12 = vsel %vm511_vm0, %v524_v50, %v532_v1  ;;  %v8405_v24 = vpack.c.bf16 %v788_v10, %v784_v8  ;;  %v8413_v50 = vpack.c.bf16 %v804_v42, %v800_v41  ;;  %v816_v0 = vld [vmem:[#allocation5 + $0x6c0] sm:$0xff]  ;;  %v825_v8 = vld [vmem:[#allocation5 + $0x708] sm:$0xff] }
 0x106   :  { %8520 = vmatprep.subr.bf16.mxu1 %v8519_v17  ;;  %v793_v17 = vld [vmem:[#allocation5 + $0x608] sm:$0xff]  ;;  %939 = vmatmul.mubr.f32.gmra.mrb[6].mxu0 %v533_v12  ;;  %v8533_v25 = vpack.c.bf16 %v790_v16, %v786_v11  ;;  %v820_v1 = vld [vmem:[#allocation5 + $0x6e0] sm:$0xff]  ;;  %v827_v11 = vld [vmem:[#allocation5 + $0x718] sm:$0xff] }
 0x107   :  { %1117 = vmatmul.mubr.f32.gmra.mrb[6].mxu1 %v533_v12  ;;  %v8407_v26 = vpack.c.bf16 %v797_v18, %v793_v17  ;;  %7981 = vmatprep.mubr.msk.f32.mxu0 %vm564_vm1, %v559_v22  ;;  %v829_v10 = vld [vmem:[#allocation5 + $0x728] sm:$0xff]  ;;  %v831_v12 = vld [vmem:[#allocation5 + $0x738] sm:$0xff]  ;;  %v824_v18 = vld [vmem:[#allocation5 + $0x700] sm:$0xff] }
 0x108   :  { %8394 = vmatpush1.bf16.msra.mxu0 %v8393_v28  ;;  %v792_v28 = vld [vmem:[#allocation5 + $0x600] sm:$0xff]  ;;  %7989 = vmatprep.mubr.msk.f32.mxu1 %vm564_vm1, %v559_v22  ;;  %v8423_v17 = vpack.c.bf16 %v829_v10, %v825_v8  ;;  %v8551_v22 = vpack.c.bf16 %v831_v12, %v827_v11  ;;  %v843_v41 = vld [vmem:[#allocation5 + $0x798] sm:$0xff] }
 0x109   :  { %8522 = vmatpush1.bf16.msra.mxu1 %v8521_v31  ;;  %8396 = vmatprep.subr.bf16.mxu0 %v8395_v32  ;;  %v8535_v31 = vpack.c.bf16 %v799_v21, %v795_v19  ;;  %v798_v32 = vld [vmem:[#allocation5 + $0x630] sm:$0xff]  ;;  %v828_v19 = vld [vmem:[#allocation5 + $0x720] sm:$0xff]  ;;  %v847_v42 = vld [vmem:[#allocation5 + $0x7b8] sm:$0xff] }
 0x10a   :  { %8524 = vmatprep.subr.bf16.mxu1 %v8523_v38  ;;  %v8409_v38 = vpack.c.bf16 %v796_v29, %v792_v28  ;;  %v8537_v39 = vpack.c.bf16 %v798_v32, %v794_v30  ;;  %v826_v21 = vld [vmem:[#allocation5 + $0x710] sm:$0xff]  ;;  %v835_v28 = vld [vmem:[#allocation5 + $0x758] sm:$0xff]  ;;  %v8425_v30 = vpack.c.bf16 %v828_v19, %v824_v18  ;;  %v8559_v49 = vpack.c.bf16 %v847_v42, %v843_v41  ;;  %v239_v8 = vld [vmem:[#allocation5 + $0x800] sm:$0xff] }
 0x10b   :  { %v839_v29 = vld [vmem:[#allocation5 + $0x778] sm:$0xff]  ;;  %v245_v19 = vld [vmem:[#allocation5 + $0x830] sm:$0xff]  ;;  %v256_v41 = vld [vmem:[#allocation5 + $0x888] sm:$0xff] }
 0x10c   :  { %8398 = vmatpush1.bf16.msra.mxu0 %v8397_v23  ;;  %v813_v23 = vld [vmem:[#allocation5 + $0x6a8] sm:$0xff]  ;;  %v8555_v37 = vpack.c.bf16 %v839_v29, %v835_v28  ;;  %v11270_v10 = vld [vmem:[#allocation2 + $0x38] sm:$0xff] }
 0x10d   :  { %8526 = vmatpush1.bf16.msra.mxu1 %v8525_v6  ;;  %8400 = vmatprep.subr.bf16.mxu0 %v8399_v15  ;;  %v8415_v6 = vpack.c.bf16 %v813_v23, %v809_v46  ;;  %v808_v15 = vld [vmem:[#allocation5 + $0x680] sm:$0xff]  ;;  %v260_v42 = vld [vmem:[#allocation5 + $0x8a8] sm:$0xff] }
 0x10e   :  { %8528 = vmatprep.subr.bf16.mxu1 %v8527_v56  ;;  %v817_v56 = vld [vmem:[#allocation5 + $0x6c8] sm:$0xff]  ;;  %v8417_v61 = vpack.c.bf16 %v812_v52, %v808_v15  ;;  %v840_v46 = vld [vmem:[#allocation5 + $0x780] sm:$0xff]  ;;  %v851_v15 = vld [vmem:[#allocation5 + $0x7d8] sm:$0xff] }
 0x10f   :  { %v8419_v63 = vpack.c.bf16 %v821_v57, %v817_v56  ;;  %v844_v23 = vld [vmem:[#allocation5 + $0x7a0] sm:$0xff]  ;;  %v855_v52 = vld [vmem:[#allocation5 + $0x7f8] sm:$0xff] }
 0x110   :  { %8402 = vmatpush1.bf16.msra.mxu0 %v8401_v2  ;;  %v818_v2 = vld [vmem:[#allocation5 + $0x6d0] sm:$0xff]  ;;  %v8433_v53 = vpack.c.bf16 %v844_v23, %v840_v46  ;;  %v852_v57 = vld [vmem:[#allocation5 + $0x7e0] sm:$0xff] }
 0x111   :  { %8530 = vmatpush1.bf16.msra.mxu1 %v8529_v4  ;;  %8404 = vmatprep.subr.bf16.mxu0 %v8403_v5  ;;  %v8547_v4 = vpack.c.bf16 %v823_v59, %v819_v58  ;;  %v822_v5 = vld [vmem:[#allocation5 + $0x6f0] sm:$0xff] }
 0x112   :  { %8532 = vmatprep.subr.bf16.mxu1 %v8531_v14  ;;  %v8421_v14 = vpack.c.bf16 %v820_v1, %v816_v0  ;;  %v8549_v16 = vpack.c.bf16 %v822_v5, %v818_v2  ;;  %v850_v58 = vld [vmem:[#allocation5 + $0x7d0] sm:$0xff]  ;;  %v244_v0 = vld [vmem:[#allocation5 + $0x828] sm:$0xff]  ;;  %v242_v1 = vld [vmem:[#allocation5 + $0x818] sm:$0xff] }
 0x113   :  { %v224_v59 = vld [vmem:[#allocation2 + $0x10] sm:$0xff]  ;;  %v246_v2 = vld [vmem:[#allocation5 + $0x838] sm:$0xff] }
 0x114   :  { %8406 = vmatpush1.bf16.msra.mxu0 %v8405_v24  ;;  %v830_v24 = vld [vmem:[#allocation5 + $0x730] sm:$0xff]  ;;  %v514_v5 = vrot.slane %v224_v59, 7  ;;  %v8695_v18 = vpack.c.bf16 %v246_v2, %v242_v1 }
 0x115   :  { %8534 = vmatpush1.bf16.msra.mxu1 %v8533_v25  ;;  %8408 = vmatprep.subr.bf16.mxu0 %v8407_v26  ;;  %v833_v25 = vld [vmem:[#allocation5 + $0x748] sm:$0xff] }
 0x116   :  { %8536 = vmatprep.subr.bf16.mxu1 %v8535_v31  ;;  %v837_v26 = vld [vmem:[#allocation5 + $0x768] sm:$0xff]  ;;  %v8553_v31 = vpack.c.bf16 %v830_v24, %v826_v21  ;;  %v250_v24 = vld [vmem:[#allocation5 + $0x858] sm:$0xff]  ;;  %v558_v28 = vsel %vm511_vm0, 0.0, %v514_v5 }
 0x117   :  { %v8427_v32 = vpack.c.bf16 %v837_v26, %v833_v25  ;;  %v248_v21 = vld [vmem:[#allocation5 + $0x848] sm:$0xff]  ;;  %v254_v25 = vld [vmem:[#allocation5 + $0x878] sm:$0xff]  ;;  %v522_v26 = vrot.slane %v11270_v10, 7 }
 0x118   :  { %8410 = vmatpush1.bf16.msra.mxu0 %v8409_v38  ;;  %v838_v38 = vld [vmem:[#allocation5 + $0x770] sm:$0xff] }
 0x119   :  { %8538 = vmatpush1.bf16.msra.mxu1 %v8537_v39  ;;  %8412 = vmatprep.subr.bf16.mxu0 %v8411_v40  ;;  %v841_v39 = vld [vmem:[#allocation5 + $0x788] sm:$0xff] }
 0x11a   :  { %8540 = vmatprep.subr.bf16.mxu1 %v8539_v44  ;;  %v845_v40 = vld [vmem:[#allocation5 + $0x7a8] sm:$0xff]  ;;  %v8557_v44 = vpack.c.bf16 %v838_v38, %v834_v36  ;;  %v251_v36 = vld [vmem:[#allocation5 + $0x860] sm:$0xff]  ;;  %v11279_v38 = vld [vmem:[#allocation2 + $0x50] sm:$0xff] }
 0x11b   :  { %v8431_v45 = vpack.c.bf16 %v845_v40, %v841_v39  ;;  %v8699_v39 = vpack.c.bf16 %v254_v25, %v250_v24  ;;  %v253_v40 = vld [vmem:[#allocation5 + $0x870] sm:$0xff]  ;;  %v271_v25 = vld [vmem:[#allocation5 + $0x900] sm:$0xff] }
 0x11c   :  { %8414 = vmatpush1.bf16.msra.mxu0 %v8413_v50  ;;  %v846_v50 = vld [vmem:[#allocation5 + $0x7b0] sm:$0xff] }
 0x11d   :  { %8542 = vmatpush1.bf16.msra.mxu1 %v8541_v51  ;;  %8416 = vmatprep.subr.bf16.mxu0 %v8415_v6  ;;  %v849_v51 = vld [vmem:[#allocation5 + $0x7c8] sm:$0xff]  ;;  %v8561_v55 = vpack.c.bf16 %v846_v50, %v842_v48  ;;  %v255_v48 = vld [vmem:[#allocation5 + $0x880] sm:$0xff]  ;;  %v528_v50 = vrot.slane %v11279_v38, 7 }
 0x11e   :  { %8544 = vmatprep.subr.bf16.mxu1 %v8543_v54  ;;  %v853_v6 = vld [vmem:[#allocation5 + $0x7e8] sm:$0xff]  ;;  %v848_v54 = vld [vmem:[#allocation5 + $0x7c0] sm:$0xff] }
 0x11f   :  { %v8435_v56 = vpack.c.bf16 %v853_v6, %v849_v51  ;;  %v237_v51 = vld [vmem:[#allocation2 + $0x78] sm:$0xff] }
 0x120   :  { %8418 = vmatpush1.bf16.msra.mxu0 %v8417_v61  ;;  %v8563_v61 = vpack.c.bf16 %v855_v52, %v851_v15  ;;  %v8575_v15 = vpack.c.bf16 %v260_v42, %v256_v41  ;;  %v257_v52 = vld [vmem:[#allocation5 + $0x890] sm:$0xff] }
 0x121   :  { %8546 = vmatpush1.bf16.msra.mxu1 %v8545_v62  ;;  %8420 = vmatprep.subr.bf16.mxu0 %v8419_v63  ;;  %v854_v62 = vld [vmem:[#allocation5 + $0x7f0] sm:$0xff]  ;;  %v240_v63 = vld [vmem:[#allocation5 + $0x808] sm:$0xff] }
 0x122   :  { %8548 = vmatprep.subr.bf16.mxu1 %v8547_v4  ;;  %v8437_v4 = vpack.c.bf16 %v852_v57, %v848_v54  ;;  %v8565_v11 = vpack.c.bf16 %v854_v62, %v850_v58  ;;  %v8567_v12 = vpack.c.bf16 %v244_v0, %v240_v63  ;;  %v261_v54 = vld [vmem:[#allocation5 + $0x8b0] sm:$0xff]  ;;  %v266_v57 = vld [vmem:[#allocation5 + $0x8d8] sm:$0xff]  ;;  %v8577_v62 = vpack.c.bf16 %v259_v3, %v255_v48 }
 0x123   :  { %v270_v58 = vld [vmem:[#allocation5 + $0x8f8] sm:$0xff]  ;;  %v8705_v1 = vpack.c.bf16 %v261_v54, %v257_v52  ;;  %v281_v41 = vld [vmem:[#allocation5 + $0x950] sm:$0xff] }
 0x124   :  { %8422 = vmatpush1.bf16.msra.mxu0 %v8421_v14  ;;  %v243_v14 = vld [vmem:[#allocation5 + $0x820] sm:$0xff]  ;;  %v8707_v10 = vpack.c.bf16 %v270_v58, %v266_v57  ;;  %v293_v52 = vld [vmem:[#allocation5 + $0x9b0] sm:$0xff]  ;;  %v298_v54 = vld [vmem:[#allocation5 + $0x9d8] sm:$0xff] }
 0x125   :  { %8550 = vmatpush1.bf16.msra.mxu1 %v8549_v16  ;;  %8424 = vmatprep.subr.bf16.mxu0 %v8423_v17  ;;  %v241_v16 = vld [vmem:[#allocation5 + $0x810] sm:$0xff]  ;;  %v8569_v29 = vpack.c.bf16 %v243_v14, %v239_v8  ;;  %v276_v14 = vld [vmem:[#allocation5 + $0x928] sm:$0xff]  ;;  %v295_v58 = vld [vmem:[#allocation5 + $0x9c0] sm:$0xff] }
 0x126   :  { %8552 = vmatprep.subr.bf16.mxu1 %v8551_v22  ;;  %v11272_v17 = vld [vmem:[#allocation2 + $0x30] sm:$0xff]  ;;  %v252_v22 = vld [vmem:[#allocation5 + $0x868] sm:$0xff]  ;;  %v8697_v33 = vpack.c.bf16 %v245_v19, %v241_v16  ;;  %v274_v16 = vld [vmem:[#allocation5 + $0x918] sm:$0xff] }
 0x127   :  { %v8571_v35 = vpack.c.bf16 %v252_v22, %v248_v21  ;;  %v265_v8 = vld [vmem:[#allocation5 + $0x8d0] sm:$0xff] }
 0x128   :  { %8426 = vmatpush1.bf16.msra.mxu0 %v8425_v30  ;;  %v247_v30 = vld [vmem:[#allocation5 + $0x840] sm:$0xff] }
 0x129   :  { %8554 = vmatpush1.bf16.msra.mxu1 %v8553_v31  ;;  %8428 = vmatprep.subr.bf16.mxu0 %v8427_v32  ;;  %v520_v31 = vrot.slane %v11272_v17, 7  ;;  %v11277_v32 = vld [vmem:[#allocation2 + $0x58] sm:$0xff]  ;;  %v8573_v23 = vpack.c.bf16 %v251_v36, %v247_v30  ;;  %v277_v30 = vld [vmem:[#allocation5 + $0x930] sm:$0xff] }
 0x12a   :  { %8556 = vmatprep.subr.bf16.mxu1 %v8555_v37  ;;  %v249_v37 = vld [vmem:[#allocation5 + $0x850] sm:$0xff]  ;;  %v530_v46 = vrot.slane %v11277_v32, 7  ;;  %v278_v17 = vld [vmem:[#allocation5 + $0x938] sm:$0xff]  ;;  %v284_v32 = vld [vmem:[#allocation5 + $0x968] sm:$0xff] }
 0x12b   :  { %v8701_v6 = vpack.c.bf16 %v253_v40, %v249_v37  ;;  %v529_v63 = vsel %vm511_vm0, %v520_v31, %v528_v50  ;;  %v283_v40 = vld [vmem:[#allocation5 + $0x960] sm:$0xff] }
 0x12c   :  { %8430 = vmatpush1.bf16.msra.mxu0 %v8429_v43  ;;  %v258_v43 = vld [vmem:[#allocation5 + $0x898] sm:$0xff]  ;;  %v531_v59 = vsel %vm511_vm0, %v522_v26, %v530_v46 }
 0x12d   :  { %8558 = vmatpush1.bf16.msra.mxu1 %v8557_v44  ;;  %8432 = vmatprep.subr.bf16.mxu0 %v8431_v45  ;;  %v262_v44 = vld [vmem:[#allocation5 + $0x8b8] sm:$0xff]  ;;  %v523_v45 = vsel %vm511_vm0, %v515_v13, %v522_v26  ;;  %v236_v13 = vld [vmem:[#allocation2 + $0x70] sm:$0xff]  ;;  %v275_v26 = vld [vmem:[#allocation5 + $0x920] sm:$0xff] }
 0x12e   :  { %8560 = vmatprep.subr.bf16.mxu1 %v8559_v49  ;;  %v521_v49 = vsel %vm511_vm0, %v514_v5, %v520_v31  ;;  %v536_v0 = vrot.slane %v236_v13, 7  ;;  %v267_v5 = vld [vmem:[#allocation5 + $0x8e0] sm:$0xff]  ;;  %v280_v31 = vld [vmem:[#allocation5 + $0x948] sm:$0xff]  ;;  %v8585_v36 = vpack.c.bf16 %v275_v26, %v271_v25 }
 0x12f   :  { %v8587_v38 = vpack.c.bf16 %v284_v32, %v280_v31  ;;  %v296_v13 = vld [vmem:[#allocation5 + $0x9c8] sm:$0xff]  ;;  %v317_v32 = vld [vmem:[#allocation5 + $0xa70] sm:$0xff] }
 0x130   :  { %8434 = vmatpush1.bf16.msra.mxu0 %v8433_v53  ;;  %v8703_v53 = vpack.c.bf16 %v262_v44, %v258_v43  ;;  %v537_v21 = vsel %vm511_vm0, %v528_v50, %v536_v0  ;;  %v285_v43 = vld [vmem:[#allocation5 + $0x970] sm:$0xff]  ;;  %v288_v44 = vld [vmem:[#allocation5 + $0x988] sm:$0xff] }
 0x131   :  { %8562 = vmatpush1.bf16.msra.mxu1 %v8561_v55  ;;  %8436 = vmatprep.subr.bf16.mxu0 %v8435_v56  ;;  %v264_v55 = vld [vmem:[#allocation5 + $0x8c8] sm:$0xff] }
 0x132   :  { %8564 = vmatprep.subr.bf16.mxu1 %v8563_v61  ;;  %v268_v56 = vld [vmem:[#allocation5 + $0x8e8] sm:$0xff]  ;;  %v538_v61 = vrot.slane %v237_v51, 7  ;;  %v287_v51 = vld [vmem:[#allocation5 + $0x980] sm:$0xff] }
 0x133   :  { %v8579_v2 = vpack.c.bf16 %v268_v56, %v264_v55  ;;  %v302_v55 = vld [vmem:[#allocation5 + $0x9f8] sm:$0xff]  ;;  %v304_v0 = vld [vmem:[#allocation5 + $0xa08] sm:$0xff] }
 0x134   :  { %8438 = vmatpush1.bf16.msra.mxu0 %v8437_v4  ;;  %v263_v4 = vld [vmem:[#allocation5 + $0x8c0] sm:$0xff] }
 0x135   :  { %8566 = vmatpush1.bf16.msra.mxu1 %v8565_v11  ;;  %8568 = vmatprep.subr.bf16.mxu0 %v8567_v12  ;;  %v269_v11 = vld [vmem:[#allocation5 + $0x8f0] sm:$0xff]  ;;  %v272_v12 = vld [vmem:[#allocation5 + $0x908] sm:$0xff]  ;;  %v8581_v19 = vpack.c.bf16 %v267_v5, %v263_v4  ;;  %v310_v4 = vld [vmem:[#allocation5 + $0xa38] sm:$0xff] }
 0x136   :  { %8696 = vmatprep.subr.bf16.mxu1 %v8695_v18  ;;  %v539_v18 = vsel %vm511_vm0, %v530_v46, %v538_v61  ;;  %v8709_v22 = vpack.c.bf16 %v269_v11, %v265_v8  ;;  %v8583_v24 = vpack.c.bf16 %v276_v14, %v272_v12  ;;  %v290_v46 = vld [vmem:[#allocation5 + $0x998] sm:$0xff]  ;;  %v297_v61 = vld [vmem:[#allocation5 + $0x9d0] sm:$0xff]  ;;  %v303_v11 = vld [vmem:[#allocation5 + $0xa00] sm:$0xff] }
 0x137   :  { %7982 = vmatmul.mubr.msk.f32.vlgmr.msra.gmra.mrb[0].mxu0 %vm564_vm1, %v558_v28  ;;  %v307_v12 = vld [vmem:[#allocation5 + $0xa20] sm:$0xff]  ;;  %v305_v14 = vld [vmem:[#allocation5 + $0xa10] sm:$0xff] }
 0x138   :  { %7990 = vmatmul.mubr.msk.f32.vlgmr.msra.gmra.mrb[0].mxu1 %vm564_vm1, %v558_v28  ;;  %8570 = vmatpush1.bf16.msra.mxu0 %v8569_v29  ;;  %v273_v28 = vld [vmem:[#allocation5 + $0x910] sm:$0xff]  ;;  %v8711_v29 = vpack.c.bf16 %v278_v17, %v274_v16 }
 0x139   :  { %8698 = vmatpush1.bf16.msra.mxu1 %v8697_v33  ;;  %8572 = vmatprep.subr.bf16.mxu0 %v8571_v35  ;;  %v282_v33 = vld [vmem:[#allocation5 + $0x958] sm:$0xff]  ;;  %v8713_v37 = vpack.c.bf16 %v277_v30, %v273_v28  ;;  %v309_v17 = vld [vmem:[#allocation5 + $0xa30] sm:$0xff]  ;;  %v311_v28 = vld [vmem:[#allocation5 + $0xa40] sm:$0xff] }
 0x13a   :  { %8700 = vmatprep.subr.bf16.mxu1 %v8699_v39  ;;  %1015 = vmatprep.mubr.f32.mxu0 %v523_v45  ;;  %v286_v35 = vld [vmem:[#allocation5 + $0x978] sm:$0xff]  ;;  %v279_v39 = vld [vmem:[#allocation5 + $0x940] sm:$0xff]  ;;  %v8729_v25 = vpack.c.bf16 %v309_v17, %v305_v14  ;;  %v313_v30 = vld [vmem:[#allocation5 + $0xa50] sm:$0xff] }
 0x13b   :  { %1193 = vmatprep.mubr.f32.mxu1 %v523_v45  ;;  %1016 = vmatmul.mubr.f32.gmra.mrb[2].mxu0 %v521_v49  ;;  %v8715_v42 = vpack.c.bf16 %v286_v35, %v282_v33  ;;  %v292_v45 = vld [vmem:[#allocation5 + $0x9a8] sm:$0xff]  ;;  %v8589_v48 = vpack.c.bf16 %v283_v40, %v279_v39  ;;  %v8733_v39 = vpack.c.bf16 %v317_v32, %v313_v30  ;;  %v343_v14 = vld [vmem:[#allocation5 + $0xb40] sm:$0xff]  ;;  %v345_v17 = vld [vmem:[#allocation5 + $0xb50] sm:$0xff] }
 0x13c   :  { %8574 = vmatpush1.bf16.msra.mxu0 %v8573_v23  ;;  %1194 = vmatmul.mubr.f32.gmra.mrb[2].mxu1 %v521_v49  ;;  %v294_v23 = vld [vmem:[#allocation5 + $0x9b8] sm:$0xff]  ;;  %v8717_v49 = vpack.c.bf16 %v285_v43, %v281_v41  ;;  %v8591_v50 = vpack.c.bf16 %v292_v45, %v288_v44  ;;  %v320_v33 = vld [vmem:[#allocation5 + $0xa88] sm:$0xff]  ;;  %v319_v41 = vld [vmem:[#allocation5 + $0xa80] sm:$0xff] }
 0x13d   :  { %8702 = vmatpush1.bf16.msra.mxu1 %v8701_v6  ;;  %8576 = vmatprep.subr.bf16.mxu0 %v8575_v15  ;;  %v291_v6 = vld [vmem:[#allocation5 + $0x9a0] sm:$0xff]  ;;  %v289_v15 = vld [vmem:[#allocation5 + $0x990] sm:$0xff]  ;;  %v8719_v3 = vpack.c.bf16 %v294_v23, %v290_v46  ;;  %v324_v35 = vld [vmem:[#allocation5 + $0xaa8] sm:$0xff] }
 0x13e   :  { %8704 = vmatprep.subr.bf16.mxu1 %v8703_v53  ;;  %7983 = vmatprep.mubr.msk.f32.mxu0 %vm566_vm2, %v531_v59  ;;  %v300_v53 = vld [vmem:[#allocation5 + $0x9e8] sm:$0xff]  ;;  %v8593_v56 = vpack.c.bf16 %v291_v6, %v287_v51  ;;  %v8607_v40 = vpack.c.bf16 %v324_v35, %v320_v33  ;;  %v321_v43 = vld [vmem:[#allocation5 + $0xa90] sm:$0xff]  ;;  %v351_v30 = vld [vmem:[#allocation5 + $0xb80] sm:$0xff] }
 0x13f   :  { %7991 = vmatprep.mubr.msk.f32.mxu1 %vm566_vm2, %v531_v59  ;;  %7984 = vmatmul.mubr.msk.f32.gmra.mrb[4].mxu0 %vm566_vm2, %v529_v63  ;;  %v8595_v57 = vpack.c.bf16 %v300_v53, %v296_v13  ;;  %v299_v59 = vld [vmem:[#allocation5 + $0x9e0] sm:$0xff]  ;;  %v325_v45 = vld [vmem:[#allocation5 + $0xab0] sm:$0xff]  ;;  %v328_v46 = vld [vmem:[#allocation5 + $0xac8] sm:$0xff] }
 0x140   :  { %8578 = vmatpush1.bf16.msra.mxu0 %v8577_v62  ;;  %7992 = vmatmul.mubr.msk.f32.gmra.mrb[4].mxu1 %vm566_vm2, %v529_v63  ;;  %v8723_v62 = vpack.c.bf16 %v302_v55, %v298_v54  ;;  %v301_v63 = vld [vmem:[#allocation5 + $0x9f0] sm:$0xff]  ;;  %v8597_v5 = vpack.c.bf16 %v299_v59, %v295_v58  ;;  %v332_v23 = vld [vmem:[#allocation5 + $0xae8] sm:$0xff]  ;;  %v8737_v51 = vpack.c.bf16 %v325_v45, %v321_v43  ;;  %v359_v43 = vld [vmem:[#allocation5 + $0xbc0] sm:$0xff] }
 0x141   :  { %8706 = vmatpush1.bf16.msra.mxu1 %v8705_v1  ;;  %8580 = vmatprep.subr.bf16.mxu0 %v8579_v2  ;;  %v308_v1 = vld [vmem:[#allocation5 + $0xa28] sm:$0xff]  ;;  %v306_v2 = vld [vmem:[#allocation5 + $0xa18] sm:$0xff]  ;;  %v8725_v8 = vpack.c.bf16 %v301_v63, %v297_v61  ;;  %v8611_v6 = vpack.c.bf16 %v332_v23, %v328_v46  ;;  %v333_v53 = vld [vmem:[#allocation5 + $0xaf0] sm:$0xff] }
 0x142   :  { %8708 = vmatprep.subr.bf16.mxu1 %v8707_v10  ;;  %1027 = vmatprep.mubr.f32.mxu0 %v539_v18  ;;  %v8599_v10 = vpack.c.bf16 %v308_v1, %v304_v0  ;;  %v8727_v16 = vpack.c.bf16 %v310_v4, %v306_v2  ;;  %v336_v54 = vld [vmem:[#allocation5 + $0xb08] sm:$0xff]  ;;  %v335_v61 = vld [vmem:[#allocation5 + $0xb00] sm:$0xff]  ;;  %v337_v63 = vld [vmem:[#allocation5 + $0xb10] sm:$0xff] }
 0x143   :  { %1205 = vmatprep.mubr.f32.mxu1 %v539_v18  ;;  %1028 = vmatmul.mubr.f32.gmra.mrb[6].mxu0 %v537_v21  ;;  %v312_v18 = vld [vmem:[#allocation5 + $0xa48] sm:$0xff]  ;;  %v341_v1 = vld [vmem:[#allocation5 + $0xb30] sm:$0xff] }
 0x144   :  { %8582 = vmatpush1.bf16.msra.mxu0 %v8581_v19  ;;  %1206 = vmatmul.mubr.f32.gmra.mrb[6].mxu1 %v537_v21  ;;  %v316_v19 = vld [vmem:[#allocation5 + $0xa68] sm:$0xff]  ;;  %v314_v21 = vld [vmem:[#allocation5 + $0xa58] sm:$0xff]  ;;  %v353_v32 = vld [vmem:[#allocation5 + $0xb90] sm:$0xff] }
 0x145   :  { %8710 = vmatpush1.bf16.msra.mxu1 %v8709_v22  ;;  %8584 = vmatprep.subr.bf16.mxu0 %v8583_v24  ;;  %v318_v22 = vld [vmem:[#allocation5 + $0xa78] sm:$0xff]  ;;  %v8601_v24 = vpack.c.bf16 %v307_v12, %v303_v11  ;;  %v8603_v26 = vpack.c.bf16 %v316_v19, %v312_v18  ;;  %v340_v55 = vld [vmem:[#allocation5 + $0xb28] sm:$0xff]  ;;  %v8745_v11 = vpack.c.bf16 %v341_v1, %v337_v63  ;;  %v349_v19 = vld [vmem:[#allocation5 + $0xb70] sm:$0xff] }
 0x146   :  { %8712 = vmatprep.subr.bf16.mxu1 %v8711_v29  ;;  %1276 = vmatprep.mubr.f32.mxu0 %v11214_v20  ;;  %v315_v29 = vld [vmem:[#allocation5 + $0xa60] sm:$0xff]  ;;  %v8731_v31 = vpack.c.bf16 %v318_v22, %v314_v21  ;;  %v8615_v59 = vpack.c.bf16 %v340_v55, %v336_v54  ;;  %v344_v2 = vld [vmem:[#allocation5 + $0xb48] sm:$0xff]  ;;  %v357_v35 = vld [vmem:[#allocation5 + $0xbb0] sm:$0xff] }
 0x147   :  { %1454 = vmatprep.mubr.f32.mxu1 %v11214_v20  ;;  %v8721_v20 = vpack.c.bf16 %v293_v52, %v289_v15  ;;  %v327_v15 = vld [vmem:[#allocation5 + $0xac0] sm:$0xff]  ;;  %v329_v52 = vld [vmem:[#allocation5 + $0xad0] sm:$0xff]  ;;  %v348_v4 = vld [vmem:[#allocation5 + $0xb68] sm:$0xff] }
 0x148   :  { %8586 = vmatpush1.bf16.msra.mxu0 %v8585_v36  ;;  %v322_v36 = vld [vmem:[#allocation5 + $0xa98] sm:$0xff]  ;;  %v8741_v58 = vpack.c.bf16 %v333_v53, %v329_v52  ;;  %v8619_v12 = vpack.c.bf16 %v348_v4, %v344_v2  ;;  %v352_v21 = vld [vmem:[#allocation5 + $0xb88] sm:$0xff]  ;;  %v361_v45 = vld [vmem:[#allocation5 + $0xbd0] sm:$0xff] }
 0x149   :  { %8714 = vmatpush1.bf16.msra.mxu1 %v8713_v37  ;;  %8588 = vmatprep.subr.bf16.mxu0 %v8587_v38  ;;  %v326_v37 = vld [vmem:[#allocation5 + $0xab8] sm:$0xff]  ;;  %v8605_v38 = vpack.c.bf16 %v315_v29, %v311_v28  ;;  %v356_v22 = vld [vmem:[#allocation5 + $0xba8] sm:$0xff]  ;;  %v8749_v28 = vpack.c.bf16 %v349_v19, %v345_v17  ;;  %v365_v23 = vld [vmem:[#allocation5 + $0xbf0] sm:$0xff] }
 0x14a   :  { %8716 = vmatprep.subr.bf16.mxu1 %v8715_v42  ;;  %v323_v42 = vld [vmem:[#allocation5 + $0xaa0] sm:$0xff]  ;;  %v8735_v44 = vpack.c.bf16 %v326_v37, %v322_v36  ;;  %v8623_v29 = vpack.c.bf16 %v356_v22, %v352_v21  ;;  %v360_v36 = vld [vmem:[#allocation5 + $0xbc8] sm:$0xff]  ;;  %v369_v53 = vld [vmem:[#allocation5 + $0xc10] sm:$0xff] }
 0x14b   :  { %v364_v37 = vld [vmem:[#allocation5 + $0xbe8] sm:$0xff]  ;;  %v367_v52 = vld [vmem:[#allocation5 + $0xc00] sm:$0xff]  ;;  %v373_v55 = vld [vmem:[#allocation5 + $0xc30] sm:$0xff] }
 0x14c   :  { %8590 = vmatpush1.bf16.msra.mxu0 %v8589_v48  ;;  %v330_v48 = vld [vmem:[#allocation5 + $0xad8] sm:$0xff]  ;;  %v375_v63 = vld [vmem:[#allocation5 + $0xc40] sm:$0xff]  ;;  %v377_v1 = vld [vmem:[#allocation5 + $0xc50] sm:$0xff] }
 0x14d   :  { %8718 = vmatpush1.bf16.msra.mxu1 %v8717_v49  ;;  %8592 = vmatprep.subr.bf16.mxu0 %v8591_v50  ;;  %v334_v49 = vld [vmem:[#allocation5 + $0xaf8] sm:$0xff]  ;;  %v8609_v50 = vpack.c.bf16 %v323_v42, %v319_v41  ;;  %v8753_v41 = vpack.c.bf16 %v357_v35, %v353_v32  ;;  %v8627_v42 = vpack.c.bf16 %v364_v37, %v360_v36  ;;  %v381_v4 = vld [vmem:[#allocation5 + $0xc70] sm:$0xff]  ;;  %v387_v19 = vld [vmem:[#allocation5 + $0xca0] sm:$0xff] }
 0x14e   :  { %8720 = vmatprep.subr.bf16.mxu1 %v8719_v3  ;;  %v331_v3 = vld [vmem:[#allocation5 + $0xae0] sm:$0xff]  ;;  %v8739_v13 = vpack.c.bf16 %v334_v49, %v330_v48  ;;  %v368_v48 = vld [vmem:[#allocation5 + $0xc08] sm:$0xff]  ;;  %v385_v21 = vld [vmem:[#allocation5 + $0xc90] sm:$0xff] }
 0x14f   :  { %v372_v49 = vld [vmem:[#allocation5 + $0xc28] sm:$0xff]  ;;  %v391_v36 = vld [vmem:[#allocation5 + $0xcc0] sm:$0xff] }
 0x150   :  { %8594 = vmatpush1.bf16.msra.mxu0 %v8593_v56  ;;  %v338_v56 = vld [vmem:[#allocation5 + $0xb18] sm:$0xff]  ;;  %v395_v37 = vld [vmem:[#allocation5 + $0xce0] sm:$0xff] }
 0x151   :  { %8722 = vmatpush1.bf16.msra.mxu1 %v8721_v20  ;;  %8596 = vmatprep.subr.bf16.mxu0 %v8595_v57  ;;  %v342_v20 = vld [vmem:[#allocation5 + $0xb38] sm:$0xff]  ;;  %v8613_v57 = vpack.c.bf16 %v331_v3, %v327_v15  ;;  %v8757_v15 = vpack.c.bf16 %v365_v23, %v361_v45  ;;  %v8631_v3 = vpack.c.bf16 %v372_v49, %v368_v48 }
 0x152   :  { %8724 = vmatprep.subr.bf16.mxu1 %v8723_v62  ;;  %v339_v62 = vld [vmem:[#allocation5 + $0xb20] sm:$0xff]  ;;  %v8743_v0 = vpack.c.bf16 %v342_v20, %v338_v56  ;;  %v376_v56 = vld [vmem:[#allocation5 + $0xc48] sm:$0xff]  ;;  %v406_v45 = vld [vmem:[#allocation5 + $0xd38] sm:$0xff]  ;;  %v8645_v23 = vpack.c.bf16 %v395_v37, %v391_v36 }
 0x153   :  { %v380_v20 = vld [vmem:[#allocation5 + $0xc68] sm:$0xff]  ;;  %v429_v37 = vld [vmem:[#allocation5 + $0xdf0] sm:$0xff] }
 0x154   :  { %8598 = vmatpush1.bf16.msra.mxu0 %v8597_v5  ;;  %v346_v5 = vld [vmem:[#allocation5 + $0xb58] sm:$0xff] }
 0x155   :  { %8726 = vmatpush1.bf16.msra.mxu1 %v8725_v8  ;;  %8600 = vmatprep.subr.bf16.mxu0 %v8599_v10  ;;  %v350_v8 = vld [vmem:[#allocation5 + $0xb78] sm:$0xff]  ;;  %v8617_v10 = vpack.c.bf16 %v339_v62, %v335_v61  ;;  %v8761_v61 = vpack.c.bf16 %v373_v55, %v369_v53  ;;  %v8635_v62 = vpack.c.bf16 %v380_v20, %v376_v56  ;;  %v11321_v53 = vld [vmem:[#allocation2 + $0x68] sm:$0xff]  ;;  %v11325_v56 = vld [vmem:[#allocation2 + $0x60] sm:$0xff] }
 0x156   :  { %8728 = vmatprep.subr.bf16.mxu1 %v8727_v16  ;;  %v347_v16 = vld [vmem:[#allocation5 + $0xb60] sm:$0xff]  ;;  %v8747_v18 = vpack.c.bf16 %v350_v8, %v346_v5  ;;  %v384_v5 = vld [vmem:[#allocation5 + $0xc88] sm:$0xff]  ;;  %v414_v55 = vld [vmem:[#allocation5 + $0xd78] sm:$0xff] }
 0x157   :  { %v388_v8 = vld [vmem:[#allocation5 + $0xca8] sm:$0xff] }
 0x158   :  { %8602 = vmatpush1.bf16.msra.mxu0 %v8601_v24  ;;  %v354_v24 = vld [vmem:[#allocation5 + $0xb98] sm:$0xff]  ;;  %v8639_v17 = vpack.c.bf16 %v388_v8, %v384_v5 }
 0x159   :  { %8730 = vmatpush1.bf16.msra.mxu1 %v8729_v25  ;;  %8604 = vmatprep.subr.bf16.mxu0 %v8603_v26  ;;  %v358_v25 = vld [vmem:[#allocation5 + $0xbb8] sm:$0xff]  ;;  %v8621_v26 = vpack.c.bf16 %v347_v16, %v343_v14  ;;  %v8765_v16 = vpack.c.bf16 %v381_v4, %v377_v1  ;;  %v416_v1 = vld [vmem:[#allocation5 + $0xd88] sm:$0xff] }
 0x15a   :  { %8732 = vmatprep.subr.bf16.mxu1 %v8731_v31  ;;  %v355_v31 = vld [vmem:[#allocation5 + $0xba0] sm:$0xff]  ;;  %v8751_v33 = vpack.c.bf16 %v358_v25, %v354_v24  ;;  %v389_v24 = vld [vmem:[#allocation5 + $0xcb0] sm:$0xff]  ;;  %v392_v25 = vld [vmem:[#allocation5 + $0xcc8] sm:$0xff] }
 0x15b   :  { %v10684_v4 = vld [vmem:[#allocation2 + $0x18] sm:$0xff] }
 0x15c   :  { %8606 = vmatpush1.bf16.msra.mxu0 %v8605_v38  ;;  %v362_v38 = vld [vmem:[#allocation5 + $0xbd8] sm:$0xff] }
 0x15d   :  { %8734 = vmatpush1.bf16.msra.mxu1 %v8733_v39  ;;  %8608 = vmatprep.subr.bf16.mxu0 %v8607_v40  ;;  %v366_v39 = vld [vmem:[#allocation5 + $0xbf8] sm:$0xff]  ;;  %v8625_v40 = vpack.c.bf16 %v355_v31, %v351_v30  ;;  %v11309_v31 = vld [vmem:[#allocation2 + $0x20] sm:$0xff] }
 0x15e   :  { %8736 = vmatprep.subr.bf16.mxu1 %v8735_v44  ;;  %v363_v44 = vld [vmem:[#allocation5 + $0xbe0] sm:$0xff]  ;;  %v8755_v46 = vpack.c.bf16 %v366_v39, %v362_v38  ;;  %v398_v30 = vld [vmem:[#allocation5 + $0xcf8] sm:$0xff]  ;;  %v393_v38 = vld [vmem:[#allocation5 + $0xcd0] sm:$0xff] }
 0x15f   :  { %v418_v5 = vld [vmem:[#allocation5 + $0xd98] sm:$0xff] }
 0x160   :  { %8610 = vmatpush1.bf16.msra.mxu0 %v8609_v50  ;;  %v370_v50 = vld [vmem:[#allocation5 + $0xc18] sm:$0xff] }
 0x161   :  { %8738 = vmatpush1.bf16.msra.mxu1 %v8737_v51  ;;  %8612 = vmatprep.subr.bf16.mxu0 %v8611_v6  ;;  %v374_v51 = vld [vmem:[#allocation5 + $0xc38] sm:$0xff]  ;;  %v8629_v6 = vpack.c.bf16 %v363_v44, %v359_v43  ;;  %v11313_v43 = vld [vmem:[#allocation2 + $0x48] sm:$0xff] }
 0x162   :  { %8740 = vmatprep.subr.bf16.mxu1 %v8739_v13  ;;  %v371_v13 = vld [vmem:[#allocation5 + $0xc20] sm:$0xff]  ;;  %v8759_v54 = vpack.c.bf16 %v374_v51, %v370_v50  ;;  %v402_v44 = vld [vmem:[#allocation5 + $0xd18] sm:$0xff] }
 0x163   :  { %v399_v50 = vld [vmem:[#allocation5 + $0xd00] sm:$0xff]  ;;  %v422_v8 = vld [vmem:[#allocation5 + $0xdb8] sm:$0xff] }
 0x164   :  { %8614 = vmatpush1.bf16.msra.mxu0 %v8613_v57  ;;  %v378_v57 = vld [vmem:[#allocation5 + $0xc58] sm:$0xff]  ;;  %v403_v51 = vld [vmem:[#allocation5 + $0xd20] sm:$0xff] }
 0x165   :  { %8742 = vmatpush1.bf16.msra.mxu1 %v8741_v58  ;;  %8616 = vmatprep.subr.bf16.mxu0 %v8615_v59  ;;  %v382_v58 = vld [vmem:[#allocation5 + $0xc78] sm:$0xff]  ;;  %v8633_v59 = vpack.c.bf16 %v371_v13, %v367_v52  ;;  %v408_v52 = vld [vmem:[#allocation5 + $0xd48] sm:$0xff]  ;;  %v8649_v20 = vpack.c.bf16 %v403_v51, %v399_v50  ;;  %v437_v51 = vld [vmem:[#allocation5 + $0xe30] sm:$0xff] }
 0x166   :  { %8744 = vmatprep.subr.bf16.mxu1 %v8743_v0  ;;  %v379_v0 = vld [vmem:[#allocation5 + $0xc60] sm:$0xff]  ;;  %v8763_v2 = vpack.c.bf16 %v382_v58, %v378_v57  ;;  %v412_v13 = vld [vmem:[#allocation5 + $0xd68] sm:$0xff] }
 0x167   :  { %v8637_v14 = vpack.c.bf16 %v379_v0, %v375_v63  ;;  %v8651_v58 = vpack.c.bf16 %v412_v13, %v408_v52  ;;  %v413_v0 = vld [vmem:[#allocation5 + $0xd70] sm:$0xff]  ;;  %v446_v52 = vld [vmem:[#allocation5 + $0xe78] sm:$0xff] }
 0x168   :  { %8618 = vmatpush1.bf16.msra.mxu0 %v8617_v10  ;;  %v10677_v10 = vld [vmem:[#allocation2] sm:$0xff] }
 0x169   :  { %8746 = vmatpush1.bf16.msra.mxu1 %v8745_v11  ;;  %8620 = vmatprep.subr.bf16.mxu0 %v8619_v12  ;;  %v386_v11 = vld [vmem:[#allocation5 + $0xc98] sm:$0xff] }
 0x16a   :  { %8748 = vmatprep.subr.bf16.mxu1 %v8747_v18  ;;  %v390_v12 = vld [vmem:[#allocation5 + $0xcb8] sm:$0xff]  ;;  %v383_v18 = vld [vmem:[#allocation5 + $0xc80] sm:$0xff] }
 0x16b   :  { %v8767_v22 = vpack.c.bf16 %v390_v12, %v386_v11  ;;  %v8641_v32 = vpack.c.bf16 %v387_v19, %v383_v18  ;;  %v8783_v18 = vpack.c.bf16 %v422_v8, %v418_v5  ;;  %v421_v19 = vld [vmem:[#allocation5 + $0xdb0] sm:$0xff]  ;;  %v447_v8 = vld [vmem:[#allocation5 + $0xe80] sm:$0xff] }
 0x16c   :  { %8622 = vmatpush1.bf16.msra.mxu0 %v8621_v26  ;;  %v396_v26 = vld [vmem:[#allocation5 + $0xce8] sm:$0xff] }
 0x16d   :  { %8750 = vmatpush1.bf16.msra.mxu1 %v8749_v28  ;;  %8624 = vmatprep.subr.bf16.mxu0 %v8623_v29  ;;  %v11305_v28 = vld [vmem:[#allocation2 + $0x28] sm:$0xff]  ;;  %v394_v29 = vld [vmem:[#allocation5 + $0xcd8] sm:$0xff]  ;;  %v8643_v35 = vpack.c.bf16 %v396_v26, %v392_v25 }
 0x16e   :  { %8752 = vmatprep.subr.bf16.mxu1 %v8751_v33  ;;  %v8769_v33 = vpack.c.bf16 %v389_v24, %v385_v21  ;;  %v8771_v39 = vpack.c.bf16 %v398_v30, %v394_v29  ;;  %v424_v21 = vld [vmem:[#allocation5 + $0xdc8] sm:$0xff]  ;;  %v426_v24 = vld [vmem:[#allocation5 + $0xdd8] sm:$0xff] }
 0x16f   :  { %v430_v25 = vld [vmem:[#allocation5 + $0xdf8] sm:$0xff] }
 0x170   :  { %8626 = vmatpush1.bf16.msra.mxu0 %v8625_v40  ;;  %v397_v40 = vld [vmem:[#allocation5 + $0xcf0] sm:$0xff]  ;;  %v8787_v36 = vpack.c.bf16 %v430_v25, %v426_v24  ;;  %v455_v25 = vld [vmem:[#allocation5 + $0xec0] sm:$0xff] }
 0x171   :  { %8754 = vmatpush1.bf16.msra.mxu1 %v8753_v41  ;;  %8628 = vmatprep.subr.bf16.mxu0 %v8627_v42  ;;  %v400_v41 = vld [vmem:[#allocation5 + $0xd08] sm:$0xff]  ;;  %v8773_v48 = vpack.c.bf16 %v397_v40, %v393_v38  ;;  %v434_v40 = vld [vmem:[#allocation5 + $0xe18] sm:$0xff] }
 0x172   :  { %8756 = vmatprep.subr.bf16.mxu1 %v8755_v46  ;;  %v404_v42 = vld [vmem:[#allocation5 + $0xd28] sm:$0xff]  ;;  %v11317_v46 = vld [vmem:[#allocation2 + $0x40] sm:$0xff] }
 0x173   :  { %v8647_v49 = vpack.c.bf16 %v404_v42, %v400_v41  ;;  %v432_v38 = vld [vmem:[#allocation5 + $0xe08] sm:$0xff]  ;;  %v438_v41 = vld [vmem:[#allocation5 + $0xe38] sm:$0xff] }
 0x174   :  { %8630 = vmatpush1.bf16.msra.mxu0 %v8629_v6  ;;  %v401_v6 = vld [vmem:[#allocation5 + $0xd10] sm:$0xff]  ;;  %v8791_v50 = vpack.c.bf16 %v438_v41, %v434_v40  ;;  %v463_v41 = vld [vmem:[#allocation5 + $0xf00] sm:$0xff] }
 0x175   :  { %8758 = vmatpush1.bf16.msra.mxu1 %v8757_v15  ;;  %8632 = vmatprep.subr.bf16.mxu0 %v8631_v3  ;;  %v8775_v15 = vpack.c.bf16 %v406_v45, %v402_v44  ;;  %v405_v3 = vld [vmem:[#allocation5 + $0xd30] sm:$0xff] }
 0x176   :  { %8760 = vmatprep.subr.bf16.mxu1 %v8759_v54  ;;  %v410_v54 = vld [vmem:[#allocation5 + $0xd58] sm:$0xff]  ;;  %v8777_v57 = vpack.c.bf16 %v405_v3, %v401_v6  ;;  %v440_v6 = vld [vmem:[#allocation5 + $0xe48] sm:$0xff] }
 0x177   :  { %1277 = vmatmul.mubr.f32.vlgmr.msra.gmra.mrb[0].mxu0 %v10677_v10  ;;  %v8779_v63 = vpack.c.bf16 %v414_v55, %v410_v54  ;;  %v442_v3 = vld [vmem:[#allocation5 + $0xe58] sm:$0xff] }
 0x178   :  { %8634 = vmatpush1.bf16.msra.mxu0 %v8633_v59  ;;  %1455 = vmatmul.mubr.f32.vlgmr.msra.gmra.mrb[0].mxu1 %v10677_v10  ;;  %v407_v59 = vld [vmem:[#allocation5 + $0xd40] sm:$0xff] }
 0x179   :  { %8762 = vmatpush1.bf16.msra.mxu1 %v8761_v61  ;;  %8636 = vmatprep.subr.bf16.mxu0 %v8635_v62  ;;  %v411_v61 = vld [vmem:[#allocation5 + $0xd60] sm:$0xff]  ;;  %v409_v62 = vld [vmem:[#allocation5 + $0xd50] sm:$0xff] }
 0x17a   :  { %8764 = vmatprep.subr.bf16.mxu1 %v8763_v2  ;;  %1282 = vmatprep.mubr.f32.mxu0 %v11305_v28  ;;  %v420_v2 = vld [vmem:[#allocation5 + $0xda8] sm:$0xff]  ;;  %v8653_v10 = vpack.c.bf16 %v411_v61, %v407_v59  ;;  %v8781_v11 = vpack.c.bf16 %v413_v0, %v409_v62  ;;  %v8795_v59 = vpack.c.bf16 %v446_v52, %v442_v3  ;;  %v445_v61 = vld [vmem:[#allocation5 + $0xe70] sm:$0xff]  ;;  %v450_v0 = vld [vmem:[#allocation5 + $0xe98] sm:$0xff] }
 0x17b   :  { %1460 = vmatprep.mubr.f32.mxu1 %v11305_v28  ;;  %1283 = vmatmul.mubr.f32.gmra.mrb[2].mxu0 %v11309_v31  ;;  %v8655_v12 = vpack.c.bf16 %v420_v2, %v416_v1  ;;  %v448_v62 = vld [vmem:[#allocation5 + $0xe88] sm:$0xff]  ;;  %v454_v1 = vld [vmem:[#allocation5 + $0xeb8] sm:$0xff]  ;;  %v471_v52 = vld [vmem:[#allocation5 + $0xf40] sm:$0xff] }
 0x17c   :  { %8638 = vmatpush1.bf16.msra.mxu0 %v8637_v14  ;;  %1461 = vmatmul.mubr.f32.gmra.mrb[2].mxu1 %v11309_v31  ;;  %v415_v14 = vld [vmem:[#allocation5 + $0xd80] sm:$0xff] }
 0x17d   :  { %8766 = vmatpush1.bf16.msra.mxu1 %v8765_v16  ;;  %8640 = vmatprep.subr.bf16.mxu0 %v8639_v17  ;;  %v419_v16 = vld [vmem:[#allocation5 + $0xda0] sm:$0xff]  ;;  %v417_v17 = vld [vmem:[#allocation5 + $0xd90] sm:$0xff] }
 0x17e   :  { %8768 = vmatprep.subr.bf16.mxu1 %v8767_v22  ;;  %1288 = vmatprep.mubr.f32.mxu0 %v11313_v43  ;;  %v428_v22 = vld [vmem:[#allocation5 + $0xde8] sm:$0xff]  ;;  %v8657_v26 = vpack.c.bf16 %v419_v16, %v415_v14  ;;  %v8785_v29 = vpack.c.bf16 %v421_v19, %v417_v17  ;;  %v453_v14 = vld [vmem:[#allocation5 + $0xeb0] sm:$0xff]  ;;  %v462_v19 = vld [vmem:[#allocation5 + $0xef8] sm:$0xff] }
 0x17f   :  { %1466 = vmatprep.mubr.f32.mxu1 %v11313_v43  ;;  %1289 = vmatmul.mubr.f32.gmra.mrb[4].mxu0 %v11317_v46  ;;  %v8659_v30 = vpack.c.bf16 %v428_v22, %v424_v21  ;;  %v456_v16 = vld [vmem:[#allocation5 + $0xec8] sm:$0xff] }
 0x180   :  { %8642 = vmatpush1.bf16.msra.mxu0 %v8641_v32  ;;  %1467 = vmatmul.mubr.f32.gmra.mrb[4].mxu1 %v11317_v46  ;;  %v423_v32 = vld [vmem:[#allocation5 + $0xdc0] sm:$0xff]  ;;  %v460_v17 = vld [vmem:[#allocation5 + $0xee8] sm:$0xff] }
 0x181   :  { %8770 = vmatpush1.bf16.msra.mxu1 %v8769_v33  ;;  %8644 = vmatprep.subr.bf16.mxu0 %v8643_v35  ;;  %v427_v33 = vld [vmem:[#allocation5 + $0xde0] sm:$0xff]  ;;  %v425_v35 = vld [vmem:[#allocation5 + $0xdd0] sm:$0xff]  ;;  %v8675_v24 = vpack.c.bf16 %v460_v17, %v456_v16 }
 0x182   :  { %8772 = vmatprep.subr.bf16.mxu1 %v8771_v39  ;;  %1294 = vmatprep.mubr.f32.mxu0 %v11321_v53  ;;  %v436_v39 = vld [vmem:[#allocation5 + $0xe28] sm:$0xff]  ;;  %v8661_v42 = vpack.c.bf16 %v427_v33, %v423_v32  ;;  %v8789_v44 = vpack.c.bf16 %v429_v37, %v425_v35  ;;  %v461_v32 = vld [vmem:[#allocation5 + $0xef0] sm:$0xff]  ;;  %v470_v37 = vld [vmem:[#allocation5 + $0xf38] sm:$0xff] }
 0x183   :  { %1472 = vmatprep.mubr.f32.mxu1 %v11321_v53  ;;  %1295 = vmatmul.mubr.f32.gmra.mrb[6].mxu0 %v11325_v56  ;;  %v8663_v45 = vpack.c.bf16 %v436_v39, %v432_v38  ;;  %v464_v33 = vld [vmem:[#allocation5 + $0xf08] sm:$0xff] }
 0x184   :  { %8646 = vmatpush1.bf16.msra.mxu0 %v8645_v23  ;;  %1473 = vmatmul.mubr.f32.gmra.mrb[6].mxu1 %v11325_v56  ;;  %v431_v23 = vld [vmem:[#allocation5 + $0xe00] sm:$0xff]  ;;  %v468_v35 = vld [vmem:[#allocation5 + $0xf28] sm:$0xff] }
 0x185   :  { %8774 = vmatpush1.bf16.msra.mxu1 %v8773_v48  ;;  %8648 = vmatprep.subr.bf16.mxu0 %v8647_v49  ;;  %v435_v48 = vld [vmem:[#allocation5 + $0xe20] sm:$0xff]  ;;  %v433_v49 = vld [vmem:[#allocation5 + $0xe10] sm:$0xff]  ;;  %v8679_v40 = vpack.c.bf16 %v468_v35, %v464_v33 }
 0x186   :  { %8776 = vmatprep.subr.bf16.mxu1 %v8775_v15  ;;  %1365 = vmatprep.mubr.f32.mxu0 %v10684_v4  ;;  %v444_v15 = vld [vmem:[#allocation5 + $0xe68] sm:$0xff]  ;;  %v8665_v13 = vpack.c.bf16 %v435_v48, %v431_v23  ;;  %v8793_v54 = vpack.c.bf16 %v437_v51, %v433_v49  ;;  %v469_v23 = vld [vmem:[#allocation5 + $0xf30] sm:$0xff]  ;;  %v478_v51 = vld [vmem:[#allocation5 + $0xf78] sm:$0xff] }
 0x187   :  { %1543 = vmatprep.mubr.f32.mxu1 %v10684_v4  ;;  %v8667_v55 = vpack.c.bf16 %v444_v15, %v440_v6  ;;  %v472_v48 = vld [vmem:[#allocation5 + $0xf48] sm:$0xff] }
 0x188   :  { %8650 = vmatpush1.bf16.msra.mxu0 %v8649_v20  ;;  %v439_v20 = vld [vmem:[#allocation5 + $0xe40] sm:$0xff]  ;;  %v476_v49 = vld [vmem:[#allocation5 + $0xf68] sm:$0xff] }
 0x189   :  { %8778 = vmatpush1.bf16.msra.mxu1 %v8777_v57  ;;  %8652 = vmatprep.subr.bf16.mxu0 %v8651_v58  ;;  %v443_v57 = vld [vmem:[#allocation5 + $0xe60] sm:$0xff]  ;;  %v441_v58 = vld [vmem:[#allocation5 + $0xe50] sm:$0xff]  ;;  %v8683_v3 = vpack.c.bf16 %v476_v49, %v472_v48 }
 0x18a   :  { %8780 = vmatprep.subr.bf16.mxu1 %v8779_v63  ;;  %v452_v63 = vld [vmem:[#allocation5 + $0xea8] sm:$0xff]  ;;  %v8669_v2 = vpack.c.bf16 %v443_v57, %v439_v20  ;;  %v8797_v4 = vpack.c.bf16 %v445_v61, %v441_v58  ;;  %v477_v20 = vld [vmem:[#allocation5 + $0xf70] sm:$0xff]  ;;  %v486_v61 = vld [vmem:[#allocation5 + $0xfb8] sm:$0xff] }
 0x18b   :  { %v8671_v5 = vpack.c.bf16 %v452_v63, %v448_v62  ;;  %v480_v57 = vld [vmem:[#allocation5 + $0xf88] sm:$0xff] }
 0x18c   :  { %8654 = vmatpush1.bf16.msra.mxu0 %v8653_v10  ;;  %v451_v10 = vld [vmem:[#allocation5 + $0xea0] sm:$0xff]  ;;  %v484_v58 = vld [vmem:[#allocation5 + $0xfa8] sm:$0xff] }
 0x18d   :  { %8782 = vmatpush1.bf16.msra.mxu1 %v8781_v11  ;;  %8656 = vmatprep.subr.bf16.mxu0 %v8655_v12  ;;  %v449_v11 = vld [vmem:[#allocation5 + $0xe90] sm:$0xff]  ;;  %v8799_v12 = vpack.c.bf16 %v454_v1, %v450_v0  ;;  %v8673_v21 = vpack.c.bf16 %v451_v10, %v447_v8  ;;  %v8687_v0 = vpack.c.bf16 %v484_v58, %v480_v57  ;;  %v479_v1 = vld [vmem:[#allocation5 + $0xf80] sm:$0xff]  ;;  %v488_v10 = vld [vmem:[#allocation5 + $0xfc8] sm:$0xff] }
 0x18e   :  { %8784 = vmatprep.subr.bf16.mxu1 %v8783_v18  ;;  %v458_v18 = vld [vmem:[#allocation5 + $0xed8] sm:$0xff]  ;;  %v8801_v22 = vpack.c.bf16 %v453_v14, %v449_v11  ;;  %v485_v8 = vld [vmem:[#allocation5 + $0xfb0] sm:$0xff]  ;;  %v492_v11 = vld [vmem:[#allocation5 + $0xfe8] sm:$0xff] }
 0x18f   :  { %v494_v14 = vld [vmem:[#allocation5 + $0xff8] sm:$0xff] }
 0x190   :  { %8658 = vmatpush1.bf16.msra.mxu0 %v8657_v26  ;;  %v459_v26 = vld [vmem:[#allocation5 + $0xee0] sm:$0xff]  ;;  %v1680_v57 = vld [vmem:[#allocation5 + $0x10b8] sm:$0xff] }
 0x191   :  { %8786 = vmatpush1.bf16.msra.mxu1 %v8785_v29  ;;  %8660 = vmatprep.subr.bf16.mxu0 %v8659_v30  ;;  %v457_v29 = vld [vmem:[#allocation5 + $0xed0] sm:$0xff]  ;;  %v8803_v30 = vpack.c.bf16 %v462_v19, %v458_v18  ;;  %v8677_v38 = vpack.c.bf16 %v459_v26, %v455_v25  ;;  %v8691_v18 = vpack.c.bf16 %v492_v11, %v488_v10  ;;  %v487_v19 = vld [vmem:[#allocation5 + $0xfc0] sm:$0xff]  ;;  %v1658_v26 = vld [vmem:[#allocation5 + $0x1008] sm:$0xff] }
 0x192   :  { %8788 = vmatprep.subr.bf16.mxu1 %v8787_v36  ;;  %v466_v36 = vld [vmem:[#allocation5 + $0xf18] sm:$0xff]  ;;  %v8805_v39 = vpack.c.bf16 %v461_v32, %v457_v29  ;;  %v493_v25 = vld [vmem:[#allocation5 + $0xff0] sm:$0xff]  ;;  %v1662_v29 = vld [vmem:[#allocation5 + $0x1028] sm:$0xff] }
 0x193   :  { %v1664_v32 = vld [vmem:[#allocation5 + $0x1038] sm:$0xff] }
 0x194   :  { %8662 = vmatpush1.bf16.msra.mxu0 %v8661_v42  ;;  %v467_v42 = vld [vmem:[#allocation5 + $0xf20] sm:$0xff]  ;;  %v1684_v10 = vld [vmem:[#allocation5 + $0x10d8] sm:$0xff] }
 0x195   :  { %8790 = vmatpush1.bf16.msra.mxu1 %v8789_v44  ;;  %8664 = vmatprep.subr.bf16.mxu0 %v8663_v45  ;;  %v465_v44 = vld [vmem:[#allocation5 + $0xf10] sm:$0xff]  ;;  %v8807_v45 = vpack.c.bf16 %v470_v37, %v466_v36  ;;  %v8681_v6 = vpack.c.bf16 %v467_v42, %v463_v41  ;;  %v8823_v36 = vpack.c.bf16 %v1662_v29, %v1658_v26  ;;  %v1657_v37 = vld [vmem:[#allocation5 + $0x1000] sm:$0xff]  ;;  %v1666_v42 = vld [vmem:[#allocation5 + $0x1048] sm:$0xff] }
 0x196   :  { %8792 = vmatprep.subr.bf16.mxu1 %v8791_v50  ;;  %v474_v50 = vld [vmem:[#allocation5 + $0xf58] sm:$0xff]  ;;  %v8809_v15 = vpack.c.bf16 %v469_v23, %v465_v44  ;;  %v1663_v41 = vld [vmem:[#allocation5 + $0x1030] sm:$0xff]  ;;  %v1670_v44 = vld [vmem:[#allocation5 + $0x1068] sm:$0xff] }
 0x197   :  { %v1672_v23 = vld [vmem:[#allocation5 + $0x1078] sm:$0xff]  ;;  %v1694_v26 = vld [vmem:[#allocation5 + $0x1128] sm:$0xff] }
 0x198   :  { %8666 = vmatpush1.bf16.msra.mxu0 %v8665_v13  ;;  %v475_v13 = vld [vmem:[#allocation5 + $0xf60] sm:$0xff]  ;;  %v1688_v11 = vld [vmem:[#allocation5 + $0x10f8] sm:$0xff] }
 0x199   :  { %8794 = vmatpush1.bf16.msra.mxu1 %v8793_v54  ;;  %8668 = vmatprep.subr.bf16.mxu0 %v8667_v55  ;;  %v473_v54 = vld [vmem:[#allocation5 + $0xf50] sm:$0xff]  ;;  %v8811_v55 = vpack.c.bf16 %v478_v51, %v474_v50  ;;  %v8685_v62 = vpack.c.bf16 %v475_v13, %v471_v52  ;;  %v8827_v50 = vpack.c.bf16 %v1670_v44, %v1666_v42  ;;  %v1665_v51 = vld [vmem:[#allocation5 + $0x1040] sm:$0xff]  ;;  %v1674_v13 = vld [vmem:[#allocation5 + $0x1088] sm:$0xff] }
 0x19a   :  { %8796 = vmatprep.subr.bf16.mxu1 %v8795_v59  ;;  %v482_v59 = vld [vmem:[#allocation5 + $0xf98] sm:$0xff]  ;;  %v8813_v63 = vpack.c.bf16 %v477_v20, %v473_v54  ;;  %v1671_v52 = vld [vmem:[#allocation5 + $0x1070] sm:$0xff]  ;;  %v1678_v54 = vld [vmem:[#allocation5 + $0x10a8] sm:$0xff] }
 0x19b   :  { %v1676_v20 = vld [vmem:[#allocation5 + $0x1098] sm:$0xff]  ;;  %v1693_v42 = vld [vmem:[#allocation5 + $0x1120] sm:$0xff]  ;;  %v1691_v44 = vld [vmem:[#allocation5 + $0x1110] sm:$0xff] }
 0x19c   :  { %8670 = vmatpush1.bf16.msra.mxu0 %v8669_v2  ;;  %v483_v2 = vld [vmem:[#allocation5 + $0xfa0] sm:$0xff]  ;;  %v11333_v29 = vld [vmem:[#allocation2 + $0x58] sm:$0xff] }
 0x19d   :  { %8798 = vmatpush1.bf16.msra.mxu1 %v8797_v4  ;;  %8672 = vmatprep.subr.bf16.mxu0 %v8671_v5  ;;  %v481_v4 = vld [vmem:[#allocation5 + $0xf90] sm:$0xff]  ;;  %v8815_v5 = vpack.c.bf16 %v486_v61, %v482_v59  ;;  %v8689_v16 = vpack.c.bf16 %v483_v2, %v479_v1  ;;  %v8831_v61 = vpack.c.bf16 %v1678_v54, %v1674_v13 }
 0x19e   :  { %8800 = vmatprep.subr.bf16.mxu1 %v8799_v12  ;;  %v490_v12 = vld [vmem:[#allocation5 + $0xfd8] sm:$0xff]  ;;  %v8817_v17 = vpack.c.bf16 %v485_v8, %v481_v4  ;;  %v8959_v1 = vpack.c.bf16 %v1680_v57, %v1676_v20  ;;  %v1679_v2 = vld [vmem:[#allocation5 + $0x10b0] sm:$0xff]  ;;  %v1682_v4 = vld [vmem:[#allocation5 + $0x10c8] sm:$0xff] }
 0x19f   :  { %v11329_v8 = vld [vmem:[#allocation2 + $0x38] sm:$0xff]  ;;  %v1701_v20 = vld [vmem:[#allocation5 + $0x1160] sm:$0xff]  ;;  %v1699_v57 = vld [vmem:[#allocation5 + $0x1150] sm:$0xff] }
 0x1a0   :  { %8674 = vmatpush1.bf16.msra.mxu0 %v8673_v21  ;;  %v491_v21 = vld [vmem:[#allocation5 + $0xfe0] sm:$0xff] }
 0x1a1   :  { %8802 = vmatpush1.bf16.msra.mxu1 %v8801_v22  ;;  %8676 = vmatprep.subr.bf16.mxu0 %v8675_v24  ;;  %v489_v22 = vld [vmem:[#allocation5 + $0xfd0] sm:$0xff]  ;;  %v8819_v24 = vpack.c.bf16 %v494_v14, %v490_v12  ;;  %v8693_v33 = vpack.c.bf16 %v491_v21, %v487_v19  ;;  %v1685_v19 = vld [vmem:[#allocation5 + $0x10e0] sm:$0xff] }
 0x1a2   :  { %8804 = vmatprep.subr.bf16.mxu1 %v8803_v30  ;;  %v1660_v30 = vld [vmem:[#allocation5 + $0x1018] sm:$0xff]  ;;  %v8821_v35 = vpack.c.bf16 %v493_v25, %v489_v22  ;;  %v10687_v12 = vld [vmem:[#allocation2 + $0x30] sm:$0xff]  ;;  %v8963_v22 = vpack.c.bf16 %v1688_v11, %v1684_v10  ;;  %v1690_v25 = vld [vmem:[#allocation5 + $0x1108] sm:$0xff] }
 0x1a3   :  { %v1683_v21 = vld [vmem:[#allocation5 + $0x10d0] sm:$0xff]  ;;  %v1709_v10 = vld [vmem:[#allocation5 + $0x11a0] sm:$0xff] }
 0x1a4   :  { %8678 = vmatpush1.bf16.msra.mxu0 %v8677_v38  ;;  %v1661_v38 = vld [vmem:[#allocation5 + $0x1020] sm:$0xff]  ;;  %v1707_v11 = vld [vmem:[#allocation5 + $0x1190] sm:$0xff] }
 0x1a5   :  { %8806 = vmatpush1.bf16.msra.mxu1 %v8805_v39  ;;  %8680 = vmatprep.subr.bf16.mxu0 %v8679_v40  ;;  %v1659_v39 = vld [vmem:[#allocation5 + $0x1010] sm:$0xff]  ;;  %v8951_v40 = vpack.c.bf16 %v1664_v32, %v1660_v30  ;;  %v8825_v48 = vpack.c.bf16 %v1661_v38, %v1657_v37  ;;  %v1692_v30 = vld [vmem:[#allocation5 + $0x1118] sm:$0xff]  ;;  %v1573_v37 = vrot.slane %v11305_v28, 1  ;;  %v1801_v28 = vld [vmem:[#allocation5 + $0x1480] sm:$0xff] }
 0x1a6   :  { %8808 = vmatprep.subr.bf16.mxu1 %v8807_v45  ;;  %v1668_v45 = vld [vmem:[#allocation5 + $0x1058] sm:$0xff]  ;;  %v8953_v49 = vpack.c.bf16 %v1663_v41, %v1659_v39  ;;  %v1689_v41 = vld [vmem:[#allocation5 + $0x1100] sm:$0xff] }
 0x1a7   :  { %v1696_v32 = vld [vmem:[#allocation5 + $0x1138] sm:$0xff] }
 0x1a8   :  { %8682 = vmatpush1.bf16.msra.mxu0 %v8681_v6  ;;  %v1669_v6 = vld [vmem:[#allocation5 + $0x1060] sm:$0xff] }
 0x1a9   :  { %8810 = vmatpush1.bf16.msra.mxu1 %v8809_v15  ;;  %8684 = vmatprep.subr.bf16.mxu0 %v8683_v3  ;;  %v1667_v15 = vld [vmem:[#allocation5 + $0x1050] sm:$0xff]  ;;  %v8955_v3 = vpack.c.bf16 %v1672_v23, %v1668_v45  ;;  %v8829_v58 = vpack.c.bf16 %v1669_v6, %v1665_v51  ;;  %v8967_v45 = vpack.c.bf16 %v1696_v32, %v1692_v30  ;;  %v1700_v51 = vld [vmem:[#allocation5 + $0x1158] sm:$0xff] }
 0x1aa   :  { %8812 = vmatprep.subr.bf16.mxu1 %v8811_v55  ;;  %v10685_v55 = vld [vmem:[#allocation2 + $0x10] sm:$0xff]  ;;  %v8957_v59 = vpack.c.bf16 %v1671_v52, %v1667_v15  ;;  %v1704_v6 = vld [vmem:[#allocation5 + $0x1178] sm:$0xff]  ;;  %v8841_v52 = vpack.c.bf16 %v1693_v42, %v1689_v41 }
 0x1ab   :  { %v1695_v23 = vld [vmem:[#allocation5 + $0x1130] sm:$0xff] }
 0x1ac   :  { %8686 = vmatpush1.bf16.msra.mxu0 %v8685_v62  ;;  %v1673_v62 = vld [vmem:[#allocation5 + $0x1080] sm:$0xff]  ;;  %v10692_v15 = vld [vmem:[#allocation2 + $0x70] sm:$0xff]  ;;  %v8969_v13 = vpack.c.bf16 %v1695_v23, %v1691_v44 }
 0x1ad   :  { %8814 = vmatpush1.bf16.msra.mxu1 %v8813_v63  ;;  %8688 = vmatprep.subr.bf16.mxu0 %v8687_v0  ;;  %v1677_v63 = vld [vmem:[#allocation5 + $0x10a0] sm:$0xff]  ;;  %v1675_v0 = vld [vmem:[#allocation5 + $0x1090] sm:$0xff] }
 0x1ae   :  { %8816 = vmatprep.subr.bf16.mxu1 %v8815_v5  ;;  %v1686_v5 = vld [vmem:[#allocation5 + $0x10e8] sm:$0xff]  ;;  %v8833_v14 = vpack.c.bf16 %v1677_v63, %v1673_v62  ;;  %v1708_v63 = vld [vmem:[#allocation5 + $0x1198] sm:$0xff]  ;;  %v1715_v30 = vld [vmem:[#allocation5 + $0x11d0] sm:$0xff] }
 0x1af   :  { %v1710_v62 = vld [vmem:[#allocation5 + $0x11a8] sm:$0xff]  ;;  %v1721_v44 = vld [vmem:[#allocation5 + $0x1200] sm:$0xff]  ;;  %v1723_v23 = vld [vmem:[#allocation5 + $0x1210] sm:$0xff] }
 0x1b0   :  { %8690 = vmatpush1.bf16.msra.mxu0 %v8689_v16  ;;  %v8961_v16 = vpack.c.bf16 %v1679_v2, %v1675_v0  ;;  %v1712_v0 = vld [vmem:[#allocation5 + $0x11b8] sm:$0xff] }
 0x1b1   :  { %8818 = vmatpush1.bf16.msra.mxu1 %v8817_v17  ;;  %8692 = vmatprep.subr.bf16.mxu0 %v8691_v18  ;;  %v8835_v17 = vpack.c.bf16 %v1686_v5, %v1682_v4  ;;  %v1681_v18 = vld [vmem:[#allocation5 + $0x10c0] sm:$0xff] }
 0x1b2   :  { %8820 = vmatprep.subr.bf16.mxu1 %v8819_v24  ;;  %v1687_v24 = vld [vmem:[#allocation5 + $0x10f0] sm:$0xff]  ;;  %v8837_v38 = vpack.c.bf16 %v1685_v19, %v1681_v18  ;;  %v1705_v5 = vld [vmem:[#allocation5 + $0x1180] sm:$0xff]  ;;  %v1716_v18 = vld [vmem:[#allocation5 + $0x11d8] sm:$0xff] }
 0x1b3   :  { %v8965_v39 = vpack.c.bf16 %v1687_v24, %v1683_v21  ;;  %v1720_v19 = vld [vmem:[#allocation5 + $0x11f8] sm:$0xff]  ;;  %v8849_v21 = vpack.c.bf16 %v1709_v10, %v1705_v5  ;;  %v1737_v5 = vld [vmem:[#allocation5 + $0x1280] sm:$0xff] }
 0x1b4   :  { %8694 = vmatpush1.bf16.msra.mxu0 %v8693_v33  ;;  %v10689_v33 = vld [vmem:[#allocation2 + $0x50] sm:$0xff]  ;;  %v8979_v32 = vpack.c.bf16 %v1720_v19, %v1716_v18  ;;  %v1741_v10 = vld [vmem:[#allocation5 + $0x12a0] sm:$0xff]  ;;  %v1748_v18 = vld [vmem:[#allocation5 + $0x12d8] sm:$0xff] }
 0x1b5   :  { %8822 = vmatpush1.bf16.msra.mxu1 %v8821_v35  ;;  %8824 = vmatprep.subr.bf16.mxu0 %v8823_v36  ;;  %v10690_v35 = vld [vmem:[#allocation2 + $0x8] sm:$0xff]  ;;  %v1752_v19 = vld [vmem:[#allocation5 + $0x12f8] sm:$0xff] }
 0x1b6   :  { %8952 = vmatprep.subr.bf16.mxu1 %v8951_v40  ;;  %v1572_v36 = vrot.slane %v10690_v35, 1  ;;  %v8839_v40 = vpack.c.bf16 %v1694_v26, %v1690_v25  ;;  %v1713_v25 = vld [vmem:[#allocation5 + $0x11c0] sm:$0xff]  ;;  %v1722_v35 = vld [vmem:[#allocation5 + $0x1208] sm:$0xff] }
 0x1b7   :  { %1366 = vmatmul.mubr.f32.vlgmr.msra.gmra.mrb[0].mxu0 %v10685_v55  ;;  %v1717_v26 = vld [vmem:[#allocation5 + $0x11e0] sm:$0xff] }
 0x1b8   :  { %1544 = vmatmul.mubr.f32.vlgmr.msra.gmra.mrb[0].mxu1 %v10685_v55  ;;  %8826 = vmatpush1.bf16.msra.mxu0 %v8825_v48  ;;  %v1698_v48 = vld [vmem:[#allocation5 + $0x1148] sm:$0xff]  ;;  %v1697_v55 = vld [vmem:[#allocation5 + $0x1140] sm:$0xff] }
 0x1b9   :  { %8954 = vmatpush1.bf16.msra.mxu1 %v8953_v49  ;;  %8828 = vmatprep.subr.bf16.mxu0 %v8827_v50  ;;  %v1702_v49 = vld [vmem:[#allocation5 + $0x1168] sm:$0xff]  ;;  %v11338_v50 = vld [vmem:[#allocation2 + $0x78] sm:$0xff] }
 0x1ba   :  { %8956 = vmatprep.subr.bf16.mxu1 %v8955_v3  ;;  %1371 = vmatprep.mubr.f32.mxu0 %v11329_v8  ;;  %v1574_v3 = vsel %vm1568_vm3, %v1572_v36, %v1573_v37  ;;  %v8843_v54 = vpack.c.bf16 %v1702_v49, %v1698_v48  ;;  %v1726_v36 = vld [vmem:[#allocation5 + $0x1228] sm:$0xff]  ;;  %v1727_v49 = vld [vmem:[#allocation5 + $0x1230] sm:$0xff] }
 0x1bb   :  { %1549 = vmatprep.mubr.f32.mxu1 %v11329_v8  ;;  %1372 = vmatmul.mubr.f32.gmra.mrb[2].mxu0 %v10687_v12  ;;  %v8855_v42 = vpack.c.bf16 %v1726_v36, %v1722_v35  ;;  %v1754_v35 = vld [vmem:[#allocation5 + $0x1308] sm:$0xff] }
 0x1bc   :  { %8830 = vmatpush1.bf16.msra.mxu0 %v8829_v58  ;;  %1550 = vmatmul.mubr.f32.gmra.mrb[2].mxu1 %v10687_v12  ;;  %v8971_v58 = vpack.c.bf16 %v1704_v6, %v1700_v51  ;;  %v8975_v12 = vpack.c.bf16 %v1712_v0, %v1708_v63  ;;  %v1730_v51 = vld [vmem:[#allocation5 + $0x1248] sm:$0xff]  ;;  %v1740_v63 = vld [vmem:[#allocation5 + $0x1298] sm:$0xff] }
 0x1bd   :  { %8958 = vmatpush1.bf16.msra.mxu1 %v8957_v59  ;;  %8832 = vmatprep.subr.bf16.mxu0 %v8831_v61  ;;  %v1703_v59 = vld [vmem:[#allocation5 + $0x1170] sm:$0xff]  ;;  %v1706_v61 = vld [vmem:[#allocation5 + $0x1188] sm:$0xff]  ;;  %v1744_v0 = vld [vmem:[#allocation5 + $0x12b8] sm:$0xff] }
 0x1be   :  { %8960 = vmatprep.subr.bf16.mxu1 %v8959_v1  ;;  %1377 = vmatprep.mubr.f32.mxu0 %v11333_v29  ;;  %v8845_v1 = vpack.c.bf16 %v1701_v20, %v1697_v55  ;;  %v8973_v2 = vpack.c.bf16 %v1703_v59, %v1699_v57  ;;  %v8847_v4 = vpack.c.bf16 %v1710_v62, %v1706_v61  ;;  %v1734_v6 = vld [vmem:[#allocation5 + $0x1268] sm:$0xff]  ;;  %v1729_v55 = vld [vmem:[#allocation5 + $0x1240] sm:$0xff]  ;;  %v1731_v57 = vld [vmem:[#allocation5 + $0x1250] sm:$0xff] }
 0x1bf   :  { %1555 = vmatprep.mubr.f32.mxu1 %v11333_v29  ;;  %1378 = vmatmul.mubr.f32.gmra.mrb[4].mxu0 %v10689_v33  ;;  %v1733_v20 = vld [vmem:[#allocation5 + $0x1260] sm:$0xff]  ;;  %v1735_v59 = vld [vmem:[#allocation5 + $0x1270] sm:$0xff]  ;;  %v1738_v61 = vld [vmem:[#allocation5 + $0x1288] sm:$0xff] }
 0x1c0   :  { %8834 = vmatpush1.bf16.msra.mxu0 %v8833_v14  ;;  %1556 = vmatmul.mubr.f32.gmra.mrb[4].mxu1 %v10689_v33  ;;  %v1711_v14 = vld [vmem:[#allocation5 + $0x11b0] sm:$0xff]  ;;  %v1742_v62 = vld [vmem:[#allocation5 + $0x12a8] sm:$0xff] }
 0x1c1   :  { %8962 = vmatpush1.bf16.msra.mxu1 %v8961_v16  ;;  %8836 = vmatprep.subr.bf16.mxu0 %v8835_v17  ;;  %v1714_v16 = vld [vmem:[#allocation5 + $0x11c8] sm:$0xff]  ;;  %v1719_v33 = vld [vmem:[#allocation5 + $0x11f0] sm:$0xff] }
 0x1c2   :  { %8964 = vmatprep.subr.bf16.mxu1 %v8963_v22  ;;  %1383 = vmatprep.mubr.f32.mxu0 %v11338_v50  ;;  %v1718_v17 = vld [vmem:[#allocation5 + $0x11e8] sm:$0xff]  ;;  %v8977_v22 = vpack.c.bf16 %v1711_v14, %v1707_v11  ;;  %v8981_v41 = vpack.c.bf16 %v1719_v33, %v1715_v30  ;;  %v1739_v11 = vld [vmem:[#allocation5 + $0x1290] sm:$0xff] }
 0x1c3   :  { %1561 = vmatprep.mubr.f32.mxu1 %v11338_v50  ;;  %1384 = vmatmul.mubr.f32.gmra.mrb[6].mxu0 %v10692_v15  ;;  %v8851_v24 = vpack.c.bf16 %v1718_v17, %v1714_v16  ;;  %v1743_v14 = vld [vmem:[#allocation5 + $0x12b0] sm:$0xff]  ;;  %v1746_v16 = vld [vmem:[#allocation5 + $0x12c8] sm:$0xff] }
 0x1c4   :  { %8838 = vmatpush1.bf16.msra.mxu0 %v8837_v38  ;;  %1562 = vmatmul.mubr.f32.gmra.mrb[6].mxu1 %v10692_v15  ;;  %v1724_v38 = vld [vmem:[#allocation5 + $0x1218] sm:$0xff]  ;;  %v1750_v17 = vld [vmem:[#allocation5 + $0x12e8] sm:$0xff]  ;;  %v1747_v30 = vld [vmem:[#allocation5 + $0x12d0] sm:$0xff] }
 0x1c5   :  { %8966 = vmatpush1.bf16.msra.mxu1 %v8965_v39  ;;  %8840 = vmatprep.subr.bf16.mxu0 %v8839_v40  ;;  %v1728_v39 = vld [vmem:[#allocation5 + $0x1238] sm:$0xff]  ;;  %v8853_v40 = vpack.c.bf16 %v1717_v26, %v1713_v25  ;;  %v1745_v25 = vld [vmem:[#allocation5 + $0x12c0] sm:$0xff]  ;;  %v1751_v33 = vld [vmem:[#allocation5 + $0x12f0] sm:$0xff] }
 0x1c6   :  { %8968 = vmatprep.subr.bf16.mxu1 %v8967_v45  ;;  %1977 = vmatprep.mubr.f32.mxu0 %v1574_v3  ;;  %v1725_v45 = vld [vmem:[#allocation5 + $0x1220] sm:$0xff]  ;;  %v8983_v48 = vpack.c.bf16 %v1728_v39, %v1724_v38  ;;  %v1732_v15 = vld [vmem:[#allocation5 + $0x1258] sm:$0xff]  ;;  %v1758_v36 = vld [vmem:[#allocation5 + $0x1328] sm:$0xff] }
 0x1c7   :  { %2155 = vmatprep.mubr.f32.mxu1 %v1574_v3  ;;  %v1736_v3 = vld [vmem:[#allocation5 + $0x1278] sm:$0xff]  ;;  %v1749_v26 = vld [vmem:[#allocation5 + $0x12e0] sm:$0xff] }
 0x1c8   :  { %8842 = vmatpush1.bf16.msra.mxu0 %v8841_v52  ;;  %v8857_v52 = vpack.c.bf16 %v1725_v45, %v1721_v44  ;;  %v1756_v38 = vld [vmem:[#allocation5 + $0x1318] sm:$0xff]  ;;  %v1753_v44 = vld [vmem:[#allocation5 + $0x1300] sm:$0xff] }
 0x1c9   :  { %8970 = vmatpush1.bf16.msra.mxu1 %v8969_v13  ;;  %8844 = vmatprep.subr.bf16.mxu0 %v8843_v54  ;;  %v8985_v13 = vpack.c.bf16 %v1727_v49, %v1723_v23  ;;  %v8859_v54 = vpack.c.bf16 %v1734_v6, %v1730_v51  ;;  %v1760_v39 = vld [vmem:[#allocation5 + $0x1338] sm:$0xff]  ;;  %v1757_v45 = vld [vmem:[#allocation5 + $0x1320] sm:$0xff]  ;;  %v1755_v23 = vld [vmem:[#allocation5 + $0x1310] sm:$0xff] }
 0x1ca   :  { %8972 = vmatprep.subr.bf16.mxu1 %v8971_v58  ;;  %v8987_v58 = vpack.c.bf16 %v1736_v3, %v1732_v15  ;;  %v1759_v49 = vld [vmem:[#allocation5 + $0x1330] sm:$0xff]  ;;  %v1762_v51 = vld [vmem:[#allocation5 + $0x1348] sm:$0xff]  ;;  %v1764_v15 = vld [vmem:[#allocation5 + $0x1358] sm:$0xff] }
 0x1cb   :  { %v1766_v6 = vld [vmem:[#allocation5 + $0x1368] sm:$0xff]  ;;  %v1768_v3 = vld [vmem:[#allocation5 + $0x1378] sm:$0xff] }
 0x1cc   :  { %8846 = vmatpush1.bf16.msra.mxu0 %v8845_v1  ;;  %v8861_v1 = vpack.c.bf16 %v1733_v20, %v1729_v55  ;;  %v1761_v55 = vld [vmem:[#allocation5 + $0x1340] sm:$0xff] }
 0x1cd   :  { %8974 = vmatpush1.bf16.msra.mxu1 %v8973_v2  ;;  %8848 = vmatprep.subr.bf16.mxu0 %v8847_v4  ;;  %v8989_v2 = vpack.c.bf16 %v1735_v59, %v1731_v57  ;;  %v8863_v4 = vpack.c.bf16 %v1742_v62, %v1738_v61  ;;  %v1765_v20 = vld [vmem:[#allocation5 + $0x1360] sm:$0xff]  ;;  %v1763_v57 = vld [vmem:[#allocation5 + $0x1350] sm:$0xff]  ;;  %v1770_v61 = vld [vmem:[#allocation5 + $0x1388] sm:$0xff] }
 0x1ce   :  { %8976 = vmatprep.subr.bf16.mxu1 %v8975_v12  ;;  %v8991_v12 = vpack.c.bf16 %v1744_v0, %v1740_v63  ;;  %v1767_v59 = vld [vmem:[#allocation5 + $0x1370] sm:$0xff]  ;;  %v1774_v62 = vld [vmem:[#allocation5 + $0x13a8] sm:$0xff]  ;;  %v1772_v63 = vld [vmem:[#allocation5 + $0x1398] sm:$0xff] }
 0x1cf   :  { %v1776_v0 = vld [vmem:[#allocation5 + $0x13b8] sm:$0xff] }
 0x1d0   :  { %8850 = vmatpush1.bf16.msra.mxu0 %v8849_v21  ;;  %v8865_v21 = vpack.c.bf16 %v1741_v10, %v1737_v5  ;;  %v1769_v5 = vld [vmem:[#allocation5 + $0x1380] sm:$0xff] }
 0x1d1   :  { %8978 = vmatpush1.bf16.msra.mxu1 %v8977_v22  ;;  %8852 = vmatprep.subr.bf16.mxu0 %v8851_v24  ;;  %v8993_v22 = vpack.c.bf16 %v1743_v14, %v1739_v11  ;;  %v8867_v24 = vpack.c.bf16 %v1750_v17, %v1746_v16  ;;  %v1773_v10 = vld [vmem:[#allocation5 + $0x13a0] sm:$0xff]  ;;  %v1771_v11 = vld [vmem:[#allocation5 + $0x1390] sm:$0xff]  ;;  %v1778_v16 = vld [vmem:[#allocation5 + $0x13c8] sm:$0xff] }
 0x1d2   :  { %8980 = vmatprep.subr.bf16.mxu1 %v8979_v32  ;;  %v8995_v32 = vpack.c.bf16 %v1752_v19, %v1748_v18  ;;  %v1775_v14 = vld [vmem:[#allocation5 + $0x13b0] sm:$0xff]  ;;  %v1782_v17 = vld [vmem:[#allocation5 + $0x13e8] sm:$0xff]  ;;  %v1780_v18 = vld [vmem:[#allocation5 + $0x13d8] sm:$0xff] }
 0x1d3   :  { %v1784_v19 = vld [vmem:[#allocation5 + $0x13f8] sm:$0xff] }
 0x1d4   :  { %8854 = vmatpush1.bf16.msra.mxu0 %v8853_v40  ;;  %v8869_v40 = vpack.c.bf16 %v1749_v26, %v1745_v25  ;;  %v8883_v25 = vpack.c.bf16 %v1782_v17, %v1778_v16  ;;  %v1777_v26 = vld [vmem:[#allocation5 + $0x13c0] sm:$0xff] }
 0x1d5   :  { %8982 = vmatpush1.bf16.msra.mxu1 %v8981_v41  ;;  %8856 = vmatprep.subr.bf16.mxu0 %v8855_v42  ;;  %v8997_v41 = vpack.c.bf16 %v1751_v33, %v1747_v30  ;;  %v8871_v42 = vpack.c.bf16 %v1758_v36, %v1754_v35  ;;  %v1781_v30 = vld [vmem:[#allocation5 + $0x13e0] sm:$0xff]  ;;  %v9011_v33 = vpack.c.bf16 %v1784_v19, %v1780_v18  ;;  %v1783_v35 = vld [vmem:[#allocation5 + $0x13f0] sm:$0xff]  ;;  %v1786_v36 = vld [vmem:[#allocation5 + $0x1408] sm:$0xff] }
 0x1d6   :  { %8984 = vmatprep.subr.bf16.mxu1 %v8983_v48  ;;  %v8999_v48 = vpack.c.bf16 %v1760_v39, %v1756_v38  ;;  %v1790_v38 = vld [vmem:[#allocation5 + $0x1428] sm:$0xff]  ;;  %v1788_v39 = vld [vmem:[#allocation5 + $0x1418] sm:$0xff] }
 0x1d8   :  { %8858 = vmatpush1.bf16.msra.mxu0 %v8857_v52  ;;  %v8873_v52 = vpack.c.bf16 %v1757_v45, %v1753_v44  ;;  %v10693_v44 = vld [vmem:[#allocation2] sm:$0xff] }
 0x1d9   :  { %8986 = vmatpush1.bf16.msra.mxu1 %v8985_v13  ;;  %8860 = vmatprep.subr.bf16.mxu0 %v8859_v54  ;;  %v9001_v13 = vpack.c.bf16 %v1759_v49, %v1755_v23  ;;  %v8875_v54 = vpack.c.bf16 %v1766_v6, %v1762_v51  ;;  %v1569_v45 = vrot.slane %v10693_v44, 1  ;;  %v1570_v23 = vrot.slane %v11309_v31, 1  ;;  %v1785_v51 = vld [vmem:[#allocation5 + $0x1400] sm:$0xff] }
 0x1da   :  { %8988 = vmatprep.subr.bf16.mxu1 %v8987_v58  ;;  %v9003_v58 = vpack.c.bf16 %v1768_v3, %v1764_v15  ;;  %v8887_v49 = vpack.c.bf16 %v1790_v38, %v1786_v36  ;;  %v1789_v6 = vld [vmem:[#allocation5 + $0x1420] sm:$0xff]  ;;  %v1787_v15 = vld [vmem:[#allocation5 + $0x1410] sm:$0xff]  ;;  %v173_v31 = vadd.s32 24, %v11206_v47 }
 0x1db   :  { %v1809_v44 = vld [vmem:[#allocation5 + $0x14c0] sm:$0xff] }
 0x1dc   :  { %8862 = vmatpush1.bf16.msra.mxu0 %v8861_v1  ;;  %v8877_v1 = vpack.c.bf16 %v1765_v20, %v1761_v55  ;;  %v1796_v55 = vld [vmem:[#allocation5 + $0x1458] sm:$0xff]  ;;  %v11361_v17 = vand.u32 15, %v173_v31 }
 0x1dd   :  { %8990 = vmatpush1.bf16.msra.mxu1 %v8989_v2  ;;  %8864 = vmatprep.subr.bf16.mxu0 %v8863_v4  ;;  %v9005_v2 = vpack.c.bf16 %v1767_v59, %v1763_v57  ;;  %v8879_v4 = vpack.c.bf16 %v1774_v62, %v1770_v61  ;;  %v1800_v20 = vld [vmem:[#allocation5 + $0x1478] sm:$0xff]  ;;  %v1583_v57 = vrot.slane %v11313_v43, 1  ;;  %v1571_v59 = vsel %vm1568_vm3, %v1569_v45, %v1570_v23  ;;  %v1813_v45 = vld [vmem:[#allocation5 + $0x14e0] sm:$0xff] }
 0x1de   :  { %8992 = vmatprep.subr.bf16.mxu1 %v8991_v12  ;;  %v9007_v12 = vpack.c.bf16 %v1776_v0, %v1772_v63  ;;  %v8889_v61 = vpack.c.bf16 %v1789_v6, %v1785_v51  ;;  %v1581_v62 = vrot.slane %v11317_v46, 1  ;;  %v9019_v43 = vpack.c.bf16 %v1800_v20, %v1796_v55  ;;  %13247 = vst [vmem:[#allocation33_spill] sm:$0xff] %v11361_v17  ;;  %v1818_v51 = vld [vmem:[#allocation5 + $0x1508] sm:$0xff] }
 0x1df   :  { %v1584_v16 = vsel %vm1568_vm3, %v1573_v37, %v1583_v57  ;;  %v1591_v46 = vrot.slane %v11321_v53, 1  ;;  %v1803_v37 = vld [vmem:[#allocation5 + $0x1490] sm:$0xff]  ;;  %v1810_v53 = vld [vmem:[#allocation5 + $0x14c8] sm:$0xff]  ;;  %v11373_v36 = vadd.s32 1, %v11361_v17  ;;  %v1579_v55 = vrot.slane %v11329_v8, 1 }
 0x1e0   :  { %8866 = vmatpush1.bf16.msra.mxu0 %v8865_v21  ;;  %v171_v21 = vadd.s32 8, %v11206_v47  ;;  %v1582_v19 = vsel %vm1568_vm3, %v1570_v23, %v1581_v62  ;;  %v1811_v23 = vld [vmem:[#allocation5 + $0x14d0] sm:$0xff]  ;;  %v1822_v6 = vld [vmem:[#allocation5 + $0x1528] sm:$0xff]  ;;  %v8901_v20 = vpack.c.bf16 %v1813_v45, %v1809_v44 }
 0x1e1   :  { %8994 = vmatpush1.bf16.msra.mxu1 %v8993_v22  ;;  %8868 = vmatprep.subr.bf16.mxu0 %v8867_v24  ;;  %v8881_v22 = vpack.c.bf16 %v1773_v10, %v1769_v5  ;;  %v9009_v24 = vpack.c.bf16 %v1775_v14, %v1771_v11  ;;  %v1799_v5 = vld [vmem:[#allocation5 + $0x1470] sm:$0xff]  ;;  %v1802_v10 = vld [vmem:[#allocation5 + $0x1488] sm:$0xff]  ;;  %v1808_v14 = vld [vmem:[#allocation5 + $0x14b8] sm:$0xff]  ;;  %13248 = vst [vmem:[#allocation34_spill] sm:$0xff] %v11373_v36  ;;  %vm1628_vm5 = vcmp.le.s32.totalorder %v11373_v36, 15 }
 0x1e2   :  { %8996 = vmatprep.subr.bf16.mxu1 %v8995_v32  ;;  %v1779_v32 = vld [vmem:[#allocation5 + $0x13d0] sm:$0xff]  ;;  %v1806_v11 = vld [vmem:[#allocation5 + $0x14a8] sm:$0xff] }
 0x1e4   :  { %8870 = vmatpush1.bf16.msra.mxu0 %v8869_v40  ;;  %v1792_v40 = vld [vmem:[#allocation5 + $0x1438] sm:$0xff] }
 0x1e5   :  { %8998 = vmatpush1.bf16.msra.mxu1 %v8997_v41  ;;  %8872 = vmatprep.subr.bf16.mxu0 %v8871_v42  ;;  %v11346_v41 = vand.u32 15, %v171_v21  ;;  %v8885_v42 = vpack.c.bf16 %v1781_v30, %v1777_v26  ;;  %v9015_v3 = vpack.c.bf16 %v1792_v40, %v1788_v39  ;;  %v1589_v21 = vrot.slane %v11325_v56, 1  ;;  %v1807_v30 = vld [vmem:[#allocation5 + $0x14b0] sm:$0xff] }
 0x1e6   :  { %9000 = vmatprep.subr.bf16.mxu1 %v8999_v48  ;;  %v9013_v48 = vpack.c.bf16 %v1783_v35, %v1779_v32  ;;  %v1814_v32 = vld [vmem:[#allocation5 + $0x14e8] sm:$0xff]  ;;  %v1816_v35 = vld [vmem:[#allocation5 + $0x14f8] sm:$0xff]  ;;  %v1592_v56 = vsel %vm1568_vm3, %v1583_v57, %v1591_v46  ;;  %v9025_v40 = vpack.c.bf16 %v1807_v30, %v1803_v37 }
 0x1e7   :  { %13245 = vst [vmem:[#allocation31_spill] sm:$0xff] %v11346_v41  ;;  %v1590_v39 = vsel %vm1568_vm3, %v1581_v62, %v1589_v21  ;;  %v1613_v57 = vsel %vm1568_vm3, %v1589_v21, 0.0  ;;  %v1821_v62 = vld [vmem:[#allocation5 + $0x1520] sm:$0xff]  ;;  %v1831_v21 = vld [vmem:[#allocation5 + $0x1570] sm:$0xff] }
 0x1e8   :  { %8874 = vmatpush1.bf16.msra.mxu0 %v8873_v52  ;;  %v1791_v52 = vld [vmem:[#allocation5 + $0x1430] sm:$0xff] }
 0x1e9   :  { %9002 = vmatpush1.bf16.msra.mxu1 %v9001_v13  ;;  %8876 = vmatprep.subr.bf16.mxu0 %v8875_v54  ;;  %v1794_v13 = vld [vmem:[#allocation5 + $0x1448] sm:$0xff]  ;;  %v9017_v63 = vpack.c.bf16 %v1791_v52, %v1787_v15  ;;  %v1820_v15 = vld [vmem:[#allocation5 + $0x1518] sm:$0xff]  ;;  %v1614_v52 = vsel %vm1568_vm3, %v1591_v46, 0.0  ;;  %v1829_v46 = vld [vmem:[#allocation5 + $0x1560] sm:$0xff] }
 0x1ea   :  { %9004 = vmatprep.subr.bf16.mxu1 %v9003_v58  ;;  %v1798_v54 = vld [vmem:[#allocation5 + $0x1468] sm:$0xff]  ;;  %v11351_v58 = vadd.s32 1, %v11346_v41 }
 0x1eb   :  { %v8891_v0 = vpack.c.bf16 %v1798_v54, %v1794_v13  ;;  %v10694_v13 = vld [vmem:[#allocation2 + $0x18] sm:$0xff] }
 0x1ec   :  { %8878 = vmatpush1.bf16.msra.mxu0 %v8877_v1  ;;  %13246 = vst [vmem:[#allocation32_spill] sm:$0xff] %v11351_v58  ;;  %v1793_v1 = vld [vmem:[#allocation5 + $0x1440] sm:$0xff]  ;;  %vm1626_vm4 = vcmp.le.s32.totalorder %v11351_v58, 15  ;;  %v1578_v54 = vrot.slane %v10694_v13, 1  ;;  %v1852_v13 = vld [vmem:[#allocation5 + $0x1618] sm:$0xff] }
 0x1ed   :  { %9006 = vmatpush1.bf16.msra.mxu1 %v9005_v2  ;;  %8880 = vmatprep.subr.bf16.mxu0 %v8879_v4  ;;  %v1797_v2 = vld [vmem:[#allocation5 + $0x1460] sm:$0xff]  ;;  %v1795_v4 = vld [vmem:[#allocation5 + $0x1450] sm:$0xff] }
 0x1ee   :  { %9008 = vmatprep.subr.bf16.mxu1 %v9007_v12  ;;  %v1804_v12 = vld [vmem:[#allocation5 + $0x1498] sm:$0xff]  ;;  %v8893_v18 = vpack.c.bf16 %v1797_v2, %v1793_v1  ;;  %v1823_v1 = vld [vmem:[#allocation5 + $0x1530] sm:$0xff]  ;;  %v1826_v2 = vld [vmem:[#allocation5 + $0x1548] sm:$0xff] }
 0x1ef   :  { %v9023_v26 = vpack.c.bf16 %v1808_v14, %v1804_v12 }
 0x1f0   :  { %8882 = vmatpush1.bf16.msra.mxu0 %v8881_v22  ;;  %v9021_v22 = vpack.c.bf16 %v1799_v5, %v1795_v4  ;;  %v1830_v4 = vld [vmem:[#allocation5 + $0x1568] sm:$0xff]  ;;  %v1832_v5 = vld [vmem:[#allocation5 + $0x1578] sm:$0xff] }
 0x1f1   :  { %9010 = vmatpush1.bf16.msra.mxu1 %v9009_v24  ;;  %8884 = vmatprep.subr.bf16.mxu0 %v8883_v25  ;;  %v8895_v24 = vpack.c.bf16 %v1806_v11, %v1802_v10  ;;  %v1805_v25 = vld [vmem:[#allocation5 + $0x14a0] sm:$0xff]  ;;  %v1580_v10 = vsel %vm1568_vm3, %v1578_v54, %v1579_v55  ;;  %v8907_v14 = vpack.c.bf16 %v1830_v4, %v1826_v2  ;;  %v1856_v54 = vld [vmem:[#allocation5 + $0x1638] sm:$0xff]  ;;  %v1862_v2 = vld [vmem:[#allocation5 + $0x1668] sm:$0xff] }
 0x1f2   :  { %9012 = vmatprep.subr.bf16.mxu1 %v9011_v33  ;;  %v1812_v33 = vld [vmem:[#allocation5 + $0x14d8] sm:$0xff]  ;;  %v8897_v38 = vpack.c.bf16 %v1805_v25, %v1801_v28 }
 0x1f3   :  { %v1836_v28 = vld [vmem:[#allocation5 + $0x1598] sm:$0xff] }
 0x1f4   :  { %8886 = vmatpush1.bf16.msra.mxu0 %v8885_v42  ;;  %v8899_v42 = vpack.c.bf16 %v1814_v32, %v1810_v53  ;;  %v1840_v25 = vld [vmem:[#allocation5 + $0x15b8] sm:$0xff]  ;;  %v1833_v53 = vld [vmem:[#allocation5 + $0x1580] sm:$0xff] }
 0x1f5   :  { %9014 = vmatpush1.bf16.msra.mxu1 %v9013_v48  ;;  %8888 = vmatprep.subr.bf16.mxu0 %v8887_v49  ;;  %v9027_v48 = vpack.c.bf16 %v1816_v35, %v1812_v33  ;;  %v1815_v49 = vld [vmem:[#allocation5 + $0x14f0] sm:$0xff]  ;;  %v1837_v32 = vld [vmem:[#allocation5 + $0x15a0] sm:$0xff]  ;;  %v9039_v35 = vpack.c.bf16 %v1840_v25, %v1836_v28  ;;  %v1860_v4 = vld [vmem:[#allocation5 + $0x1658] sm:$0xff] }
 0x1f6   :  { %9016 = vmatprep.subr.bf16.mxu1 %v9015_v3  ;;  %v1824_v3 = vld [vmem:[#allocation5 + $0x1538] sm:$0xff]  ;;  %v9029_v31 = vpack.c.bf16 %v1815_v49, %v1811_v23  ;;  %v1835_v33 = vld [vmem:[#allocation5 + $0x1590] sm:$0xff]  ;;  %v8913_v44 = vpack.c.bf16 %v1837_v32, %v1833_v53  ;;  %v1845_v49 = vld [vmem:[#allocation5 + $0x15e0] sm:$0xff] }
 0x1f7   :  { %1978 = vmatmul.mubr.f32.vlgmr.msra.gmra.mrb[0].mxu0 %v1571_v59  ;;  %v1867_v53 = vld [vmem:[#allocation5 + $0x1690] sm:$0xff] }
 0x1f8   :  { %8890 = vmatpush1.bf16.msra.mxu0 %v8889_v61  ;;  %2156 = vmatmul.mubr.f32.vlgmr.msra.gmra.mrb[0].mxu1 %v1571_v59  ;;  %v8903_v59 = vpack.c.bf16 %v1822_v6, %v1818_v51  ;;  %v1817_v61 = vld [vmem:[#allocation5 + $0x1500] sm:$0xff]  ;;  %v1843_v51 = vld [vmem:[#allocation5 + $0x15d0] sm:$0xff] }
 0x1f9   :  { %9018 = vmatpush1.bf16.msra.mxu1 %v9017_v63  ;;  %8892 = vmatprep.subr.bf16.mxu0 %v8891_v0  ;;  %v1819_v63 = vld [vmem:[#allocation5 + $0x1510] sm:$0xff]  ;;  %v9031_v0 = vpack.c.bf16 %v1824_v3, %v1820_v15  ;;  %v8905_v11 = vpack.c.bf16 %v1821_v62, %v1817_v61  ;;  %v1850_v3 = vld [vmem:[#allocation5 + $0x1608] sm:$0xff]  ;;  %v1853_v61 = vld [vmem:[#allocation5 + $0x1620] sm:$0xff] }
 0x1fa   :  { %9020 = vmatprep.subr.bf16.mxu1 %v9019_v43  ;;  %7993 = vmatprep.mubr.msk.f32.mxu0 %vm1626_vm4, %v1584_v16  ;;  %v1828_v43 = vld [vmem:[#allocation5 + $0x1558] sm:$0xff]  ;;  %v9033_v12 = vpack.c.bf16 %v1823_v1, %v1819_v63  ;;  %v1847_v15 = vld [vmem:[#allocation5 + $0x15f0] sm:$0xff]  ;;  %v9047_v63 = vpack.c.bf16 %v1856_v54, %v1852_v13  ;;  %v1858_v1 = vld [vmem:[#allocation5 + $0x1648] sm:$0xff] }
 0x1fb   :  { %8001 = vmatprep.mubr.msk.f32.mxu1 %vm1626_vm4, %v1584_v16  ;;  %7994 = vmatmul.mubr.msk.f32.gmra.mrb[2].mxu0 %vm1626_vm4, %v1582_v19  ;;  %v1825_v16 = vld [vmem:[#allocation5 + $0x1540] sm:$0xff]  ;;  %v1851_v62 = vld [vmem:[#allocation5 + $0x1610] sm:$0xff] }
 0x1fc   :  { %8894 = vmatpush1.bf16.msra.mxu0 %v8893_v18  ;;  %8002 = vmatmul.mubr.msk.f32.gmra.mrb[2].mxu1 %vm1626_vm4, %v1582_v19  ;;  %v1827_v18 = vld [vmem:[#allocation5 + $0x1550] sm:$0xff]  ;;  %v9035_v19 = vpack.c.bf16 %v1832_v5, %v1828_v43  ;;  %v8909_v37 = vpack.c.bf16 %v1829_v46, %v1825_v16  ;;  %v1864_v43 = vld [vmem:[#allocation5 + $0x1678] sm:$0xff] }
 0x1fd   :  { %9022 = vmatpush1.bf16.msra.mxu1 %v9021_v22  ;;  %8896 = vmatprep.subr.bf16.mxu0 %v8895_v24  ;;  %v1834_v22 = vld [vmem:[#allocation5 + $0x1588] sm:$0xff]  ;;  %v1859_v16 = vld [vmem:[#allocation5 + $0x1650] sm:$0xff]  ;;  %v9051_v46 = vpack.c.bf16 %v1864_v43, %v1860_v4 }
 0x1fe   :  { %9024 = vmatprep.subr.bf16.mxu1 %v9023_v26  ;;  %1989 = vmatprep.mubr.f32.mxu0 %v1592_v56  ;;  %v1838_v24 = vld [vmem:[#allocation5 + $0x15a8] sm:$0xff]  ;;  %v9037_v26 = vpack.c.bf16 %v1831_v21, %v1827_v18  ;;  %v1863_v18 = vld [vmem:[#allocation5 + $0x1670] sm:$0xff] }
 0x1ff   :  { %2167 = vmatprep.mubr.f32.mxu1 %v1592_v56  ;;  %1990 = vmatmul.mubr.f32.gmra.mrb[4].mxu0 %v1590_v39  ;;  %v8911_v30 = vpack.c.bf16 %v1838_v24, %v1834_v22  ;;  %v1839_v56 = vld [vmem:[#allocation5 + $0x15b0] sm:$0xff]  ;;  %v1870_v21 = vld [vmem:[#allocation5 + $0x16a8] sm:$0xff]  ;;  %v1868_v22 = vld [vmem:[#allocation5 + $0x1698] sm:$0xff]  ;;  %v9053_v25 = vpack.c.bf16 %v1863_v18, %v1859_v16 }
 0x200   :  { %8898 = vmatpush1.bf16.msra.mxu0 %v8897_v38  ;;  %2168 = vmatmul.mubr.f32.gmra.mrb[4].mxu1 %v1590_v39  ;;  %v1842_v38 = vld [vmem:[#allocation5 + $0x15c8] sm:$0xff]  ;;  %v9041_v45 = vpack.c.bf16 %v1839_v56, %v1835_v33  ;;  %v1872_v24 = vld [vmem:[#allocation5 + $0x16b8] sm:$0xff]  ;;  %v1871_v33 = vld [vmem:[#allocation5 + $0x16b0] sm:$0xff] }
 0x201   :  { %9026 = vmatpush1.bf16.msra.mxu1 %v9025_v40  ;;  %8900 = vmatprep.subr.bf16.mxu0 %v8899_v42  ;;  %v1846_v39 = vld [vmem:[#allocation5 + $0x15e8] sm:$0xff]  ;;  %v1844_v40 = vld [vmem:[#allocation5 + $0x15d8] sm:$0xff]  ;;  %v9055_v32 = vpack.c.bf16 %v1872_v24, %v1868_v22  ;;  %v1895_v16 = vld [vmem:[#allocation5 + $0x1770] sm:$0xff] }
 0x202   :  { %9028 = vmatprep.subr.bf16.mxu1 %v9027_v48  ;;  %7995 = vmatprep.mubr.msk.f32.mxu0 %vm1628_vm5, %v1614_v52  ;;  %v1848_v42 = vld [vmem:[#allocation5 + $0x15f8] sm:$0xff]  ;;  %v8915_v23 = vpack.c.bf16 %v1846_v39, %v1842_v38  ;;  %v1841_v48 = vld [vmem:[#allocation5 + $0x15c0] sm:$0xff]  ;;  %v1878_v56 = vld [vmem:[#allocation5 + $0x16e8] sm:$0xff] }
 0x203   :  { %8003 = vmatprep.mubr.msk.f32.mxu1 %vm1628_vm5, %v1614_v52  ;;  %7996 = vmatmul.mubr.msk.f32.gmra.mrb[6].mxu0 %vm1628_vm5, %v1613_v57  ;;  %v9043_v6 = vpack.c.bf16 %v1848_v42, %v1844_v40  ;;  %v1854_v52 = vld [vmem:[#allocation5 + $0x1628] sm:$0xff]  ;;  %v1876_v38 = vld [vmem:[#allocation5 + $0x16d8] sm:$0xff]  ;;  %v9057_v42 = vpack.c.bf16 %v1871_v33, %v1867_v53  ;;  %v1903_v53 = vld [vmem:[#allocation5 + $0x17b0] sm:$0xff] }
 0x204   :  { %8902 = vmatpush1.bf16.msra.mxu0 %v8901_v20  ;;  %8004 = vmatmul.mubr.msk.f32.gmra.mrb[6].mxu1 %vm1628_vm5, %v1613_v57  ;;  %v8917_v20 = vpack.c.bf16 %v1845_v49, %v1841_v48  ;;  %v9045_v57 = vpack.c.bf16 %v1847_v15, %v1843_v51  ;;  %v1880_v39 = vld [vmem:[#allocation5 + $0x16f8] sm:$0xff]  ;;  %v1875_v48 = vld [vmem:[#allocation5 + $0x16d0] sm:$0xff]  ;;  %v1886_v15 = vld [vmem:[#allocation5 + $0x1728] sm:$0xff] }
 0x205   :  { %9030 = vmatpush1.bf16.msra.mxu1 %v9029_v31  ;;  %8904 = vmatprep.subr.bf16.mxu0 %v8903_v59  ;;  %v8919_v31 = vpack.c.bf16 %v1854_v52, %v1850_v3  ;;  %v1849_v59 = vld [vmem:[#allocation5 + $0x1600] sm:$0xff]  ;;  %v9059_v49 = vpack.c.bf16 %v1880_v39, %v1876_v38  ;;  %v1879_v51 = vld [vmem:[#allocation5 + $0x16f0] sm:$0xff]  ;;  %v1884_v3 = vld [vmem:[#allocation5 + $0x1718] sm:$0xff] }
 0x206   :  { %9032 = vmatprep.subr.bf16.mxu1 %v9031_v0  ;;  %2066 = vmatprep.mubr.f32.mxu0 %v1580_v10  ;;  %v1855_v0 = vld [vmem:[#allocation5 + $0x1630] sm:$0xff]  ;;  %v8921_v5 = vpack.c.bf16 %v1853_v61, %v1849_v59  ;;  %v1888_v52 = vld [vmem:[#allocation5 + $0x1738] sm:$0xff]  ;;  %v9061_v54 = vpack.c.bf16 %v1879_v51, %v1875_v48  ;;  %v1902_v18 = vld [vmem:[#allocation5 + $0x17a8] sm:$0xff] }
 0x207   :  { %2244 = vmatprep.mubr.f32.mxu1 %v1580_v10  ;;  %v9049_v10 = vpack.c.bf16 %v1855_v0, %v1851_v62  ;;  %v1883_v59 = vld [vmem:[#allocation5 + $0x1710] sm:$0xff]  ;;  %v9063_v61 = vpack.c.bf16 %v1888_v52, %v1884_v3  ;;  %v1894_v0 = vld [vmem:[#allocation5 + $0x1768] sm:$0xff] }
 0x208   :  { %8906 = vmatpush1.bf16.msra.mxu0 %v8905_v11  ;;  %v8923_v11 = vpack.c.bf16 %v1862_v2, %v1858_v1  ;;  %v1887_v62 = vld [vmem:[#allocation5 + $0x1730] sm:$0xff]  ;;  %v1892_v1 = vld [vmem:[#allocation5 + $0x1758] sm:$0xff]  ;;  %v1910_v33 = vld [vmem:[#allocation5 + $0x17e8] sm:$0xff] }
 0x209   :  { %9034 = vmatpush1.bf16.msra.mxu1 %v9033_v12  ;;  %8908 = vmatprep.subr.bf16.mxu0 %v8907_v14  ;;  %v1857_v12 = vld [vmem:[#allocation5 + $0x1640] sm:$0xff]  ;;  %v1896_v2 = vld [vmem:[#allocation5 + $0x1778] sm:$0xff]  ;;  %v9065_v43 = vpack.c.bf16 %v1887_v62, %v1883_v59  ;;  %v1911_v48 = vld [vmem:[#allocation5 + $0x17f0] sm:$0xff] }
 0x20a   :  { %9036 = vmatprep.subr.bf16.mxu1 %v9035_v19  ;;  %v1861_v14 = vld [vmem:[#allocation5 + $0x1660] sm:$0xff]  ;;  %v1866_v19 = vld [vmem:[#allocation5 + $0x1688] sm:$0xff]  ;;  %v10695_v52 = vld [vmem:[#allocation2 + $0x10] sm:$0xff] }
 0x20b   :  { %v8925_v28 = vpack.c.bf16 %v1861_v14, %v1857_v12  ;;  %v1891_v12 = vld [vmem:[#allocation5 + $0x1750] sm:$0xff]  ;;  %v9067_v14 = vpack.c.bf16 %v1896_v2, %v1892_v1  ;;  %v2659_v62 = vld [vmem:[#allocation8] sm:$0xff] }
 0x20c   :  { %8910 = vmatpush1.bf16.msra.mxu0 %v8909_v37  ;;  %v8927_v37 = vpack.c.bf16 %v1870_v21, %v1866_v19  ;;  %v1900_v19 = vld [vmem:[#allocation5 + $0x1798] sm:$0xff]  ;;  %v9069_v24 = vpack.c.bf16 %v1895_v16, %v1891_v12  ;;  %v2664_v51 = vld [vmem:[#allocation8 + $0x28] sm:$0xff] }
 0x20d   :  { %9038 = vmatpush1.bf16.msra.mxu1 %v9037_v26  ;;  %8912 = vmatprep.subr.bf16.mxu0 %v8911_v30  ;;  %v1865_v26 = vld [vmem:[#allocation5 + $0x1680] sm:$0xff]  ;;  %v1904_v21 = vld [vmem:[#allocation5 + $0x17b8] sm:$0xff]  ;;  %v2668_v2 = vld [vmem:[#allocation8 + $0x48] sm:$0xff] }
 0x20e   :  { %9040 = vmatprep.subr.bf16.mxu1 %v9039_v35  ;;  %v1869_v30 = vld [vmem:[#allocation5 + $0x16a0] sm:$0xff]  ;;  %v1874_v35 = vld [vmem:[#allocation5 + $0x16c8] sm:$0xff]  ;;  %v2665_v1 = vld [vmem:[#allocation8 + $0x30] sm:$0xff] }
 0x20f   :  { %v8929_v40 = vpack.c.bf16 %v1869_v30, %v1865_v26  ;;  %v1899_v26 = vld [vmem:[#allocation5 + $0x1790] sm:$0xff]  ;;  %v9071_v30 = vpack.c.bf16 %v1904_v21, %v1900_v19  ;;  %v2674_v12 = vld [vmem:[#allocation8 + $0x78] sm:$0xff]  ;;  %v2667_v19 = vld [vmem:[#allocation8 + $0x40] sm:$0xff] }
 0x210   :  { %8914 = vmatpush1.bf16.msra.mxu0 %v8913_v44  ;;  %v8931_v44 = vpack.c.bf16 %v1878_v56, %v1874_v35  ;;  %v1908_v35 = vld [vmem:[#allocation5 + $0x17d8] sm:$0xff]  ;;  %v9073_v39 = vpack.c.bf16 %v1903_v53, %v1899_v26  ;;  %v2671_v21 = vld [vmem:[#allocation8 + $0x60] sm:$0xff] }
 0x211   :  { %9042 = vmatpush1.bf16.msra.mxu1 %v9041_v45  ;;  %8916 = vmatprep.subr.bf16.mxu0 %v8915_v23  ;;  %v1873_v45 = vld [vmem:[#allocation5 + $0x16c0] sm:$0xff]  ;;  %v1912_v56 = vld [vmem:[#allocation5 + $0x17f8] sm:$0xff] }
 0x212   :  { %9044 = vmatprep.subr.bf16.mxu1 %v9043_v6  ;;  %v1877_v23 = vld [vmem:[#allocation5 + $0x16e0] sm:$0xff]  ;;  %v1882_v6 = vld [vmem:[#allocation5 + $0x1708] sm:$0xff] }
 0x213   :  { %v8933_v13 = vpack.c.bf16 %v1877_v23, %v1873_v45  ;;  %v1907_v45 = vld [vmem:[#allocation5 + $0x17d0] sm:$0xff]  ;;  %v9075_v23 = vpack.c.bf16 %v1912_v56, %v1908_v35  ;;  %v2678_v26 = vld [vmem:[#allocation8 + $0x98] sm:$0xff]  ;;  %v2675_v56 = vld [vmem:[#allocation8 + $0x80] sm:$0xff] }
 0x214   :  { %8918 = vmatpush1.bf16.msra.mxu0 %v8917_v20  ;;  %v8935_v20 = vpack.c.bf16 %v1886_v15, %v1882_v6  ;;  %v2662_v6 = vld [vmem:[#allocation8 + $0x18] sm:$0xff] }
 0x215   :  { %9046 = vmatpush1.bf16.msra.mxu1 %v9045_v57  ;;  %8920 = vmatprep.subr.bf16.mxu0 %v8919_v31  ;;  %v1881_v57 = vld [vmem:[#allocation5 + $0x1700] sm:$0xff] }
 0x216   :  { %9048 = vmatprep.subr.bf16.mxu1 %v9047_v63  ;;  %v1885_v31 = vld [vmem:[#allocation5 + $0x1720] sm:$0xff]  ;;  %v1890_v63 = vld [vmem:[#allocation5 + $0x1748] sm:$0xff] }
 0x217   :  { %v8937_v4 = vpack.c.bf16 %v1885_v31, %v1881_v57  ;;  %v2666_v15 = vld [vmem:[#allocation8 + $0x38] sm:$0xff]  ;;  %v9077_v57 = vpack.c.bf16 %v1911_v48, %v1907_v45  ;;  %v1587_v31 = vrot.slane %v11333_v29, 1  ;;  %v2688_v45 = vld [vmem:[#allocation8 + $0xe8] sm:$0xff] }
 0x218   :  { %8922 = vmatpush1.bf16.msra.mxu0 %v8921_v5  ;;  %v8939_v5 = vpack.c.bf16 %v1894_v0, %v1890_v63  ;;  %v2663_v63 = vld [vmem:[#allocation8 + $0x20] sm:$0xff]  ;;  %v2661_v0 = vld [vmem:[#allocation8 + $0x10] sm:$0xff]  ;;  %v2686_v48 = vld [vmem:[#allocation8 + $0xd8] sm:$0xff] }
 0x219   :  { %9050 = vmatpush1.bf16.msra.mxu1 %v9049_v10  ;;  %8924 = vmatprep.subr.bf16.mxu0 %v8923_v11  ;;  %v1889_v10 = vld [vmem:[#allocation5 + $0x1740] sm:$0xff]  ;;  %v1588_v29 = vsel %vm1568_vm3, %v1579_v55, %v1587_v31  ;;  %v9081_v16 = vpack.c.bf16 %v2663_v63, %v2659_v62 }
 0x21a   :  { %9052 = vmatprep.subr.bf16.mxu1 %v9051_v46  ;;  %v1893_v11 = vld [vmem:[#allocation5 + $0x1760] sm:$0xff]  ;;  %v1898_v46 = vld [vmem:[#allocation5 + $0x1788] sm:$0xff] }
 0x21b   :  { %v8941_v22 = vpack.c.bf16 %v1893_v11, %v1889_v10  ;;  %v2670_v11 = vld [vmem:[#allocation8 + $0x58] sm:$0xff] }
 0x21c   :  { %8926 = vmatpush1.bf16.msra.mxu0 %v8925_v28  ;;  %v8943_v28 = vpack.c.bf16 %v1902_v18, %v1898_v46  ;;  %v9209_v46 = vpack.c.bf16 %v2665_v1, %v2661_v0  ;;  %v2694_v62 = vld [vmem:[#allocation8 + $0x118] sm:$0xff] }
 0x21d   :  { %9054 = vmatpush1.bf16.msra.mxu1 %v9053_v25  ;;  %8928 = vmatprep.subr.bf16.mxu0 %v8927_v37  ;;  %v1897_v25 = vld [vmem:[#allocation5 + $0x1780] sm:$0xff] }
 0x21e   :  { %9056 = vmatprep.subr.bf16.mxu1 %v9055_v32  ;;  %v1901_v37 = vld [vmem:[#allocation5 + $0x17a0] sm:$0xff]  ;;  %v1906_v32 = vld [vmem:[#allocation5 + $0x17c8] sm:$0xff] }
 0x21f   :  { %v8945_v38 = vpack.c.bf16 %v1901_v37, %v1897_v25  ;;  %v2676_v25 = vld [vmem:[#allocation8 + $0x88] sm:$0xff]  ;;  %v2698_v63 = vld [vmem:[#allocation8 + $0x138] sm:$0xff] }
 0x220   :  { %8930 = vmatpush1.bf16.msra.mxu0 %v8929_v40  ;;  %v8947_v40 = vpack.c.bf16 %v1910_v33, %v1906_v32  ;;  %v2680_v37 = vld [vmem:[#allocation8 + $0xa8] sm:$0xff]  ;;  %v9085_v32 = vpack.c.bf16 %v2671_v21, %v2667_v19  ;;  %v2699_v21 = vld [vmem:[#allocation8 + $0x140] sm:$0xff] }
 0x221   :  { %9058 = vmatpush1.bf16.msra.mxu1 %v9057_v42  ;;  %8932 = vmatprep.subr.bf16.mxu0 %v8931_v44  ;;  %v1905_v42 = vld [vmem:[#allocation5 + $0x17c0] sm:$0xff]  ;;  %v9087_v35 = vpack.c.bf16 %v2680_v37, %v2676_v25  ;;  %v2705_v25 = vld [vmem:[#allocation8 + $0x170] sm:$0xff]  ;;  %v2708_v37 = vld [vmem:[#allocation8 + $0x188] sm:$0xff] }
 0x222   :  { %9060 = vmatprep.subr.bf16.mxu1 %v9059_v49  ;;  %v1909_v44 = vld [vmem:[#allocation5 + $0x17e0] sm:$0xff]  ;;  %v2660_v49 = vld [vmem:[#allocation8 + $0x8] sm:$0xff] }
 0x223   :  { %v8949_v3 = vpack.c.bf16 %v1909_v44, %v1905_v42  ;;  %v9079_v59 = vpack.c.bf16 %v2664_v51, %v2660_v49  ;;  %v2681_v42 = vld [vmem:[#allocation8 + $0xb0] sm:$0xff]  ;;  %v2684_v44 = vld [vmem:[#allocation8 + $0xc8] sm:$0xff]  ;;  %v2690_v49 = vld [vmem:[#allocation8 + $0xf8] sm:$0xff] }
 0x224   :  { %8934 = vmatpush1.bf16.msra.mxu0 %v8933_v13  ;;  %v1575_v13 = vrot.slane %v10695_v52, 1  ;;  %v2683_v52 = vld [vmem:[#allocation8 + $0xc0] sm:$0xff] }
 0x225   :  { %9062 = vmatpush1.bf16.msra.mxu1 %v9061_v54  ;;  %8936 = vmatprep.subr.bf16.mxu0 %v8935_v20  ;;  %v10696_v54 = vld [vmem:[#allocation2 + $0x30] sm:$0xff] }
 0x226   :  { %9064 = vmatprep.subr.bf16.mxu1 %v9063_v61  ;;  %v1576_v20 = vrot.slane %v10696_v54, 1  ;;  %v9207_v61 = vpack.c.bf16 %v2666_v15, %v2662_v6  ;;  %v2685_v54 = vld [vmem:[#allocation8 + $0xd0] sm:$0xff] }
 0x228   :  { %8938 = vmatpush1.bf16.msra.mxu0 %v8937_v4  ;;  %v2672_v4 = vld [vmem:[#allocation8 + $0x68] sm:$0xff] }
 0x229   :  { %9066 = vmatpush1.bf16.msra.mxu1 %v9065_v43  ;;  %8940 = vmatprep.subr.bf16.mxu0 %v8939_v5  ;;  %v1577_v43 = vsel %vm1568_vm3, %v1575_v13, %v1576_v20  ;;  %v10697_v5 = vld [vmem:[#allocation2 + $0x50] sm:$0xff]  ;;  %v9083_v18 = vpack.c.bf16 %v2672_v4, %v2668_v2  ;;  %v2687_v13 = vld [vmem:[#allocation8 + $0xe0] sm:$0xff] }
 0x22a   :  { %9068 = vmatprep.subr.bf16.mxu1 %v9067_v14  ;;  %v1585_v10 = vrot.slane %v10697_v5, 1  ;;  %v1595_v14 = vrot.slane %v11338_v50, 1  ;;  %v10698_v50 = vld [vmem:[#allocation2 + $0x70] sm:$0xff]  ;;  %v9093_v0 = vpack.c.bf16 %v2687_v13, %v2683_v52  ;;  %v2691_v4 = vld [vmem:[#allocation8 + $0x100] sm:$0xff] }
 0x22b   :  { %v1593_v55 = vrot.slane %v10698_v50, 1  ;;  %v2693_v5 = vld [vmem:[#allocation8 + $0x110] sm:$0xff]  ;;  %v2710_v50 = vld [vmem:[#allocation8 + $0x198] sm:$0xff]  ;;  %v2724_v52 = vld [vmem:[#allocation8 + $0x208] sm:$0xff] }
 0x22c   :  { %8942 = vmatpush1.bf16.msra.mxu0 %v8941_v22  ;;  %v2669_v22 = vld [vmem:[#allocation8 + $0x50] sm:$0xff]  ;;  %v1586_v8 = vsel %vm1568_vm3, %v1576_v20, %v1585_v10  ;;  %v1596_v53 = vsel %vm1568_vm3, %v1587_v31, %v1595_v14  ;;  %v1616_v51 = vsel %vm1568_vm3, %v1595_v14, 0.0  ;;  %v9219_v20 = vpack.c.bf16 %v2690_v49, %v2686_v48  ;;  %v2692_v31 = vld [vmem:[#allocation8 + $0x108] sm:$0xff]  ;;  %v2702_v14 = vld [vmem:[#allocation8 + $0x158] sm:$0xff] }
 0x22d   :  { %9070 = vmatpush1.bf16.msra.mxu1 %v9069_v24  ;;  %8944 = vmatprep.subr.bf16.mxu0 %v8943_v28  ;;  %v9211_v24 = vpack.c.bf16 %v2674_v12, %v2670_v11  ;;  %v2673_v28 = vld [vmem:[#allocation8 + $0x70] sm:$0xff]  ;;  %v2700_v12 = vld [vmem:[#allocation8 + $0x148] sm:$0xff]  ;;  %v2715_v49 = vld [vmem:[#allocation8 + $0x1c0] sm:$0xff] }
 0x22e   :  { %9072 = vmatprep.subr.bf16.mxu1 %v9071_v30  ;;  %v2682_v30 = vld [vmem:[#allocation8 + $0xb8] sm:$0xff]  ;;  %v9213_v33 = vpack.c.bf16 %v2673_v28, %v2669_v22  ;;  %v2697_v11 = vld [vmem:[#allocation8 + $0x130] sm:$0xff]  ;;  %v2703_v22 = vld [vmem:[#allocation8 + $0x160] sm:$0xff] }
 0x22f   :  { %v2728_v13 = vld [vmem:[#allocation8 + $0x228] sm:$0xff] }
 0x230   :  { %8946 = vmatpush1.bf16.msra.mxu0 %v8945_v38  ;;  %v2679_v38 = vld [vmem:[#allocation8 + $0xa0] sm:$0xff] }
 0x231   :  { %9074 = vmatpush1.bf16.msra.mxu1 %v9073_v39  ;;  %8948 = vmatprep.subr.bf16.mxu0 %v8947_v40  ;;  %v2677_v39 = vld [vmem:[#allocation8 + $0x90] sm:$0xff]  ;;  %v9215_v40 = vpack.c.bf16 %v2682_v30, %v2678_v26  ;;  %v9089_v6 = vpack.c.bf16 %v2679_v38, %v2675_v56  ;;  %v9101_v26 = vpack.c.bf16 %v2703_v22, %v2699_v21  ;;  %v2744_v21 = vld [vmem:[#allocation8 + $0x2a8] sm:$0xff]  ;;  %v2742_v22 = vld [vmem:[#allocation8 + $0x298] sm:$0xff] }
 0x232   :  { %9076 = vmatprep.subr.bf16.mxu1 %v9075_v23  ;;  %v1594_v23 = vsel %vm1568_vm3, %v1585_v10, %v1593_v55  ;;  %v9217_v15 = vpack.c.bf16 %v2681_v42, %v2677_v39  ;;  %v9223_v10 = vpack.c.bf16 %v2698_v63, %v2694_v62  ;;  %v2713_v38 = vld [vmem:[#allocation8 + $0x1b0] sm:$0xff]  ;;  %v2716_v39 = vld [vmem:[#allocation8 + $0x1c8] sm:$0xff]  ;;  %v2718_v42 = vld [vmem:[#allocation8 + $0x1d8] sm:$0xff] }
 0x233   :  { %v2727_v62 = vld [vmem:[#allocation8 + $0x220] sm:$0xff]  ;;  %v2725_v63 = vld [vmem:[#allocation8 + $0x210] sm:$0xff] }
 0x234   :  { %8950 = vmatpush1.bf16.msra.mxu0 %v8949_v3  ;;  %v9091_v3 = vpack.c.bf16 %v2688_v45, %v2684_v44  ;;  %v2722_v44 = vld [vmem:[#allocation8 + $0x1f8] sm:$0xff] }
 0x235   :  { %9078 = vmatpush1.bf16.msra.mxu1 %v9077_v57  ;;  %9080 = vmatprep.subr.bf16.mxu0 %v9079_v59  ;;  %v2689_v57 = vld [vmem:[#allocation8 + $0xf0] sm:$0xff]  ;;  %v2696_v59 = vld [vmem:[#allocation8 + $0x128] sm:$0xff] }
 0x236   :  { %9208 = vmatprep.subr.bf16.mxu1 %v9207_v61  ;;  %v1615_v61 = vsel %vm1568_vm3, %v1593_v55, 0.0  ;;  %v9221_v1 = vpack.c.bf16 %v2689_v57, %v2685_v54  ;;  %v9095_v2 = vpack.c.bf16 %v2696_v59, %v2692_v31  ;;  %v2714_v55 = vld [vmem:[#allocation8 + $0x1b8] sm:$0xff]  ;;  %v9111_v59 = vpack.c.bf16 %v2728_v13, %v2724_v52  ;;  %v2755_v13 = vld [vmem:[#allocation8 + $0x300] sm:$0xff] }
 0x237   :  { %2067 = vmatmul.mubr.f32.vlgmr.msra.gmra.mrb[0].mxu0 %v1577_v43  ;;  %v9231_v56 = vpack.c.bf16 %v2714_v55, %v2710_v50  ;;  %v2726_v54 = vld [vmem:[#allocation8 + $0x218] sm:$0xff]  ;;  %v2743_v50 = vld [vmem:[#allocation8 + $0x2a0] sm:$0xff]  ;;  %v2741_v55 = vld [vmem:[#allocation8 + $0x290] sm:$0xff] }
 0x238   :  { %2245 = vmatmul.mubr.f32.vlgmr.msra.gmra.mrb[0].mxu1 %v1577_v43  ;;  %7997 = vmatprep.mubr.msk.f32.mxu0 %vm1626_vm4, %v1588_v29  ;;  %v2695_v43 = vld [vmem:[#allocation8 + $0x120] sm:$0xff] }
 0x239   :  { %8005 = vmatprep.mubr.msk.f32.mxu1 %vm1626_vm4, %v1588_v29  ;;  %9082 = vmatpush1.bf16.msra.mxu0 %v9081_v16  ;;  %v2704_v29 = vld [vmem:[#allocation8 + $0x168] sm:$0xff]  ;;  %v2706_v16 = vld [vmem:[#allocation8 + $0x178] sm:$0xff] }
 0x23a   :  { %9210 = vmatpush1.bf16.msra.mxu1 %v9209_v46  ;;  %9084 = vmatprep.subr.bf16.mxu0 %v9083_v18  ;;  %v9097_v46 = vpack.c.bf16 %v2695_v43, %v2691_v4  ;;  %v9225_v18 = vpack.c.bf16 %v2697_v11, %v2693_v5  ;;  %v9099_v19 = vpack.c.bf16 %v2704_v29, %v2700_v12  ;;  %v2736_v4 = vld [vmem:[#allocation8 + $0x268] sm:$0xff]  ;;  %v2734_v43 = vld [vmem:[#allocation8 + $0x258] sm:$0xff]  ;;  %v2731_v29 = vld [vmem:[#allocation8 + $0x240] sm:$0xff] }
 0x23b   :  { %7998 = vmatmul.mubr.msk.f32.gmra.mrb[2].mxu0 %vm1626_vm4, %v1586_v8  ;;  %9212 = vmatprep.subr.bf16.mxu1 %v9211_v24  ;;  %v2701_v24 = vld [vmem:[#allocation8 + $0x150] sm:$0xff]  ;;  %v9227_v28 = vpack.c.bf16 %v2706_v16, %v2702_v14  ;;  %v2738_v5 = vld [vmem:[#allocation8 + $0x278] sm:$0xff]  ;;  %v2735_v14 = vld [vmem:[#allocation8 + $0x260] sm:$0xff] }
 0x23c   :  { %8006 = vmatmul.mubr.msk.f32.gmra.mrb[2].mxu1 %vm1626_vm4, %v1586_v8  ;;  %2078 = vmatprep.mubr.f32.mxu0 %v1596_v53  ;;  %v2712_v8 = vld [vmem:[#allocation8 + $0x1a8] sm:$0xff]  ;;  %v9229_v30 = vpack.c.bf16 %v2705_v25, %v2701_v24  ;;  %v2733_v16 = vld [vmem:[#allocation8 + $0x250] sm:$0xff]  ;;  %v2746_v24 = vld [vmem:[#allocation8 + $0x2b8] sm:$0xff] }
 0x23d   :  { %2256 = vmatprep.mubr.f32.mxu1 %v1596_v53  ;;  %9086 = vmatpush1.bf16.msra.mxu0 %v9085_v32  ;;  %v9103_v53 = vpack.c.bf16 %v2712_v8, %v2708_v37  ;;  %v2707_v32 = vld [vmem:[#allocation8 + $0x180] sm:$0xff] }
 0x23e   :  { %9214 = vmatpush1.bf16.msra.mxu1 %v9213_v33  ;;  %9088 = vmatprep.subr.bf16.mxu0 %v9087_v35  ;;  %v2711_v33 = vld [vmem:[#allocation8 + $0x1a0] sm:$0xff]  ;;  %v2709_v35 = vld [vmem:[#allocation8 + $0x190] sm:$0xff] }
 0x23f   :  { %2079 = vmatmul.mubr.f32.gmra.mrb[4].mxu0 %v1594_v23  ;;  %9216 = vmatprep.subr.bf16.mxu1 %v9215_v40  ;;  %v2720_v40 = vld [vmem:[#allocation8 + $0x1e8] sm:$0xff]  ;;  %v9105_v45 = vpack.c.bf16 %v2711_v33, %v2707_v32  ;;  %v2739_v8 = vld [vmem:[#allocation8 + $0x280] sm:$0xff]  ;;  %v2750_v33 = vld [vmem:[#allocation8 + $0x2d8] sm:$0xff] }
 0x240   :  { %2257 = vmatmul.mubr.f32.gmra.mrb[4].mxu1 %v1594_v23  ;;  %7999 = vmatprep.mubr.msk.f32.mxu0 %vm1628_vm5, %v1616_v51  ;;  %v9233_v23 = vpack.c.bf16 %v2713_v38, %v2709_v35  ;;  %v9107_v48 = vpack.c.bf16 %v2720_v40, %v2716_v39  ;;  %v2752_v32 = vld [vmem:[#allocation8 + $0x2e8] sm:$0xff]  ;;  %v2754_v35 = vld [vmem:[#allocation8 + $0x2f8] sm:$0xff]  ;;  %v2747_v40 = vld [vmem:[#allocation8 + $0x2c0] sm:$0xff] }
 0x241   :  { %8007 = vmatprep.mubr.msk.f32.mxu1 %vm1628_vm5, %v1616_v51  ;;  %9090 = vmatpush1.bf16.msra.mxu0 %v9089_v6  ;;  %v2719_v51 = vld [vmem:[#allocation8 + $0x1e0] sm:$0xff]  ;;  %v2717_v6 = vld [vmem:[#allocation8 + $0x1d0] sm:$0xff] }
 0x242   :  { %9218 = vmatpush1.bf16.msra.mxu1 %v9217_v15  ;;  %9092 = vmatprep.subr.bf16.mxu0 %v9091_v3  ;;  %v9235_v15 = vpack.c.bf16 %v2722_v44, %v2718_v42  ;;  %v2721_v3 = vld [vmem:[#allocation8 + $0x1f0] sm:$0xff]  ;;  %v9109_v57 = vpack.c.bf16 %v2719_v51, %v2715_v49  ;;  %v2751_v42 = vld [vmem:[#allocation8 + $0x2e0] sm:$0xff]  ;;  %v2760_v49 = vld [vmem:[#allocation8 + $0x328] sm:$0xff] }
 0x243   :  { %8000 = vmatmul.mubr.msk.f32.gmra.mrb[6].mxu0 %vm1628_vm5, %v1615_v61  ;;  %9220 = vmatprep.subr.bf16.mxu1 %v9219_v20  ;;  %v2730_v20 = vld [vmem:[#allocation8 + $0x238] sm:$0xff]  ;;  %v9237_v31 = vpack.c.bf16 %v2721_v3, %v2717_v6  ;;  %v2749_v44 = vld [vmem:[#allocation8 + $0x2d0] sm:$0xff] }
 0x244   :  { %8008 = vmatmul.mubr.msk.f32.gmra.mrb[6].mxu1 %vm1628_vm5, %v1615_v61  ;;  %v2723_v61 = vld [vmem:[#allocation8 + $0x200] sm:$0xff]  ;;  %v2758_v51 = vld [vmem:[#allocation8 + $0x318] sm:$0xff] }
 0x245   :  { %9094 = vmatpush1.bf16.msra.mxu0 %v9093_v0  ;;  %v9239_v0 = vpack.c.bf16 %v2730_v20, %v2726_v54  ;;  %v2762_v6 = vld [vmem:[#allocation8 + $0x338] sm:$0xff]  ;;  %v2759_v54 = vld [vmem:[#allocation8 + $0x320] sm:$0xff]  ;;  %v2757_v20 = vld [vmem:[#allocation8 + $0x310] sm:$0xff] }
 0x246   :  { %9222 = vmatpush1.bf16.msra.mxu1 %v9221_v1  ;;  %9096 = vmatprep.subr.bf16.mxu0 %v9095_v2  ;;  %v2729_v1 = vld [vmem:[#allocation8 + $0x230] sm:$0xff]  ;;  %v2732_v2 = vld [vmem:[#allocation8 + $0x248] sm:$0xff] }
 0x247   :  { %9224 = vmatprep.subr.bf16.mxu1 %v9223_v10  ;;  %v9113_v10 = vpack.c.bf16 %v2727_v62, %v2723_v61  ;;  %v9241_v11 = vpack.c.bf16 %v2729_v1, %v2725_v63  ;;  %v9115_v12 = vpack.c.bf16 %v2736_v4, %v2732_v2  ;;  %v2768_v61 = vld [vmem:[#allocation8 + $0x368] sm:$0xff]  ;;  %v2766_v62 = vld [vmem:[#allocation8 + $0x358] sm:$0xff]  ;;  %v2763_v4 = vld [vmem:[#allocation8 + $0x340] sm:$0xff] }
 0x248   :  { %v2770_v63 = vld [vmem:[#allocation8 + $0x378] sm:$0xff] }
 0x249   :  { %9098 = vmatpush1.bf16.msra.mxu0 %v9097_v46  ;;  %v9243_v46 = vpack.c.bf16 %v2738_v5, %v2734_v43  ;;  %v2767_v43 = vld [vmem:[#allocation8 + $0x360] sm:$0xff]  ;;  %v2765_v5 = vld [vmem:[#allocation8 + $0x350] sm:$0xff] }
 0x24a   :  { %9226 = vmatpush1.bf16.msra.mxu1 %v9225_v18  ;;  %9100 = vmatprep.subr.bf16.mxu0 %v9099_v19  ;;  %v2737_v18 = vld [vmem:[#allocation8 + $0x270] sm:$0xff]  ;;  %v2740_v19 = vld [vmem:[#allocation8 + $0x288] sm:$0xff] }
 0x24b   :  { %9228 = vmatprep.subr.bf16.mxu1 %v9227_v28  ;;  %v9117_v28 = vpack.c.bf16 %v2735_v14, %v2731_v29  ;;  %v9245_v25 = vpack.c.bf16 %v2737_v18, %v2733_v16  ;;  %v9119_v37 = vpack.c.bf16 %v2744_v21, %v2740_v19  ;;  %v2776_v29 = vld [vmem:[#allocation8 + $0x3a8] sm:$0xff]  ;;  %v2774_v14 = vld [vmem:[#allocation8 + $0x398] sm:$0xff] }
 0x24c   :  { %v2778_v16 = vld [vmem:[#allocation8 + $0x3b8] sm:$0xff] }
 0x24d   :  { %9102 = vmatpush1.bf16.msra.mxu0 %v9101_v26  ;;  %v9247_v26 = vpack.c.bf16 %v2746_v24, %v2742_v22  ;;  %v9263_v21 = vpack.c.bf16 %v2778_v16, %v2774_v14  ;;  %v2771_v22 = vld [vmem:[#allocation8 + $0x380] sm:$0xff] }
 0x24e   :  { %9230 = vmatpush1.bf16.msra.mxu1 %v9229_v30  ;;  %9104 = vmatprep.subr.bf16.mxu0 %v9103_v53  ;;  %v2745_v30 = vld [vmem:[#allocation8 + $0x2b0] sm:$0xff]  ;;  %v2748_v53 = vld [vmem:[#allocation8 + $0x2c8] sm:$0xff]  ;;  %v2775_v24 = vld [vmem:[#allocation8 + $0x3a0] sm:$0xff] }
 0x24f   :  { %9232 = vmatprep.subr.bf16.mxu1 %v9231_v56  ;;  %v9121_v56 = vpack.c.bf16 %v2743_v50, %v2739_v8  ;;  %v9249_v38 = vpack.c.bf16 %v2745_v30, %v2741_v55  ;;  %v9123_v39 = vpack.c.bf16 %v2752_v32, %v2748_v53  ;;  %v2780_v50 = vld [vmem:[#allocation8 + $0x3c8] sm:$0xff]  ;;  %v2786_v53 = vld [vmem:[#allocation8 + $0x3f8] sm:$0xff]  ;;  %v2779_v32 = vld [vmem:[#allocation8 + $0x3c0] sm:$0xff] }
 0x250   :  { %v2784_v55 = vld [vmem:[#allocation8 + $0x3e8] sm:$0xff] }
 0x251   :  { %9106 = vmatpush1.bf16.msra.mxu0 %v9105_v45  ;;  %v9251_v45 = vpack.c.bf16 %v2754_v35, %v2750_v33  ;;  %v9139_v30 = vpack.c.bf16 %v2784_v55, %v2780_v50  ;;  %v2783_v33 = vld [vmem:[#allocation8 + $0x3e0] sm:$0xff]  ;;  %v11461_v50 = vld [vmem:[#allocation8 + $0x488] sm:$0xff] }
 0x252   :  { %9234 = vmatpush1.bf16.msra.mxu1 %v9233_v23  ;;  %9108 = vmatprep.subr.bf16.mxu0 %v9107_v48  ;;  %v2753_v23 = vld [vmem:[#allocation8 + $0x2f0] sm:$0xff]  ;;  %v2756_v48 = vld [vmem:[#allocation8 + $0x308] sm:$0xff] }
 0x253   :  { %9236 = vmatprep.subr.bf16.mxu1 %v9235_v15  ;;  %v9125_v15 = vpack.c.bf16 %v2751_v42, %v2747_v40  ;;  %v9253_v3 = vpack.c.bf16 %v2753_v23, %v2749_v44  ;;  %v9127_v52 = vpack.c.bf16 %v2760_v49, %v2756_v48  ;;  %v2788_v42 = vld [vmem:[#allocation8 + $0x408] sm:$0xff]  ;;  %v2794_v48 = vld [vmem:[#allocation8 + $0x438] sm:$0xff] }
 0x254   :  { %v2792_v44 = vld [vmem:[#allocation8 + $0x428] sm:$0xff] }
 0x255   :  { %9110 = vmatpush1.bf16.msra.mxu0 %v9109_v57  ;;  %v9255_v57 = vpack.c.bf16 %v2762_v6, %v2758_v51  ;;  %v9143_v23 = vpack.c.bf16 %v2792_v44, %v2788_v42  ;;  %v11421_v51 = vsub.s32 0, %v11206_v47  ;;  %v238_v6 = vld [vmem:[#allocation7] sm:$0xf] }
 0x256   :  { %9238 = vmatpush1.bf16.msra.mxu1 %v9237_v31  ;;  %9112 = vmatprep.subr.bf16.mxu0 %v9111_v59  ;;  %v2761_v31 = vld [vmem:[#allocation8 + $0x330] sm:$0xff]  ;;  %v2764_v59 = vld [vmem:[#allocation8 + $0x348] sm:$0xff] }
 0x257   :  { %9240 = vmatprep.subr.bf16.mxu1 %v9239_v0  ;;  %v9129_v0 = vpack.c.bf16 %v2759_v54, %v2755_v13  ;;  %v9257_v1 = vpack.c.bf16 %v2761_v31, %v2757_v20  ;;  %v9131_v2 = vpack.c.bf16 %v2768_v61, %v2764_v59  ;;  %v2787_v61 = vld [vmem:[#allocation8 + $0x400] sm:$0xff] }
 0x259   :  { %9114 = vmatpush1.bf16.msra.mxu0 %v9113_v10  ;;  %v9259_v10 = vpack.c.bf16 %v2770_v63, %v2766_v62  ;;  %v2791_v62 = vld [vmem:[#allocation8 + $0x420] sm:$0xff]  ;;  %v2789_v63 = vld [vmem:[#allocation8 + $0x410] sm:$0xff] }
 0x25a   :  { %9242 = vmatpush1.bf16.msra.mxu1 %v9241_v11  ;;  %9116 = vmatprep.subr.bf16.mxu0 %v9115_v12  ;;  %v2769_v11 = vld [vmem:[#allocation8 + $0x370] sm:$0xff]  ;;  %v2772_v12 = vld [vmem:[#allocation8 + $0x388] sm:$0xff] }
 0x25b   :  { %9244 = vmatprep.subr.bf16.mxu1 %v9243_v46  ;;  %v9133_v46 = vpack.c.bf16 %v2767_v43, %v2763_v4  ;;  %v9261_v18 = vpack.c.bf16 %v2769_v11, %v2765_v5  ;;  %v9135_v19 = vpack.c.bf16 %v2776_v29, %v2772_v12  ;;  %v2793_v4 = vld [vmem:[#allocation8 + $0x430] sm:$0xff]  ;;  %v2796_v43 = vld [vmem:[#allocation8 + $0x448] sm:$0xff]  ;;  %v2798_v11 = vld [vmem:[#allocation8 + $0x458] sm:$0xff]  ;;  %v11451_v29 = vsub.s32 3, %v11206_v47 }
 0x25c   :  { %v2800_v5 = vld [vmem:[#allocation8 + $0x468] sm:$0xff]  ;;  %v2802_v12 = vld [vmem:[#allocation8 + $0x478] sm:$0xff] }
 0x25d   :  { %9118 = vmatpush1.bf16.msra.mxu0 %v9117_v28  ;;  %v2773_v28 = vld [vmem:[#allocation8 + $0x390] sm:$0xff] }
 0x25e   :  { %9246 = vmatpush1.bf16.msra.mxu1 %v9245_v25  ;;  %9120 = vmatprep.subr.bf16.mxu0 %v9119_v37  ;;  %v9137_v25 = vpack.c.bf16 %v2775_v24, %v2771_v22  ;;  %v2777_v37 = vld [vmem:[#allocation8 + $0x3b0] sm:$0xff]  ;;  %v9145_v24 = vpack.c.bf16 %v2791_v62, %v2787_v61 }
 0x25f   :  { %9248 = vmatprep.subr.bf16.mxu1 %v9247_v26  ;;  %v9265_v8 = vpack.c.bf16 %v2777_v37, %v2773_v28  ;;  %v2782_v26 = vld [vmem:[#allocation8 + $0x3d8] sm:$0xff]  ;;  %v9273_v28 = vpack.c.bf16 %v2793_v4, %v2789_v63  ;;  %v2797_v37 = vld [vmem:[#allocation8 + $0x450] sm:$0xff]  ;;  %v2812_v4 = vld [vmem:[#allocation8 + $0x4c8] sm:$0xff] }
 0x260   :  { %v9267_v35 = vpack.c.bf16 %v2786_v53, %v2782_v26  ;;  %v2809_v63 = vld [vmem:[#allocation8 + $0x4b0] sm:$0xff] }
 0x261   :  { %9122 = vmatpush1.bf16.msra.mxu0 %v9121_v56  ;;  %v9141_v56 = vpack.c.bf16 %v2783_v33, %v2779_v32  ;;  %v9275_v32 = vpack.c.bf16 %v2802_v12, %v2798_v11  ;;  %v2808_v33 = vld [vmem:[#allocation8 + $0x4a8] sm:$0xff] }
 0x262   :  { %9250 = vmatpush1.bf16.msra.mxu1 %v9249_v38  ;;  %9124 = vmatprep.subr.bf16.mxu0 %v9123_v39  ;;  %v2781_v38 = vld [vmem:[#allocation8 + $0x3d0] sm:$0xff]  ;;  %v9151_v61 = vpack.c.bf16 %v2808_v33, %v11461_v50  ;;  %v2811_v33 = vld [vmem:[#allocation8 + $0x4c0] sm:$0xff] }
 0x263   :  { %9252 = vmatprep.subr.bf16.mxu1 %v9251_v45  ;;  %v2785_v39 = vld [vmem:[#allocation8 + $0x3f0] sm:$0xff]  ;;  %v2790_v45 = vld [vmem:[#allocation8 + $0x418] sm:$0xff] }
 0x264   :  { %v9269_v40 = vpack.c.bf16 %v2785_v39, %v2781_v38  ;;  %v9271_v49 = vpack.c.bf16 %v2794_v48, %v2790_v45  ;;  %v2803_v48 = vld [vmem:[#allocation8 + $0x480] sm:$0xff] }
 0x265   :  { %9126 = vmatpush1.bf16.msra.mxu0 %v9125_v15  ;;  %v11424_v15 = vsub.s32 2, %v11206_v47 }
 0x266   :  { %9254 = vmatpush1.bf16.msra.mxu1 %v9253_v3  ;;  %9128 = vmatprep.subr.bf16.mxu0 %v9127_v52  ;;  %v11427_v3 = vsub.s32 1, %v11206_v47  ;;  %v11430_v52 = vrot.slane %v238_v6, %v11421_v51 }
 0x267   :  { %9256 = vmatprep.subr.bf16.mxu1 %v9255_v57  ;;  %v11433_v13 = vrot.slane %v238_v6, %v11424_v15 }
 0x268   :  { %v11436_v54 = vrot.slane %v238_v6, %v11427_v3 }
 0x269   :  { %9130 = vmatpush1.bf16.msra.mxu0 %v9129_v0 }
 0x26a   :  { %9258 = vmatpush1.bf16.msra.mxu1 %v9257_v1  ;;  %9132 = vmatprep.subr.bf16.mxu0 %v9131_v2 }
 0x26b   :  { %9260 = vmatprep.subr.bf16.mxu1 %v9259_v10 }
 0x26d   :  { %9134 = vmatpush1.bf16.msra.mxu0 %v9133_v46  ;;  %v11454_v46 = vld [vmem:[#allocation8 + $0x440] sm:$0xff] }
 0x26e   :  { %9262 = vmatpush1.bf16.msra.mxu1 %v9261_v18  ;;  %9136 = vmatprep.subr.bf16.mxu0 %v9135_v19  ;;  %v11456_v18 = vld [vmem:[#allocation8 + $0x460] sm:$0xff] }
 0x26f   :  { %9264 = vmatprep.subr.bf16.mxu1 %v9263_v21  ;;  %v9149_v45 = vpack.c.bf16 %v11456_v18, %v11454_v46  ;;  %v2814_v46 = vld [vmem:[#allocation8 + $0x4d8] sm:$0xff] }
 0x270   :  { %v2818_v18 = vld [vmem:[#allocation8 + $0x4f8] sm:$0xff] }
 0x271   :  { %9138 = vmatpush1.bf16.msra.mxu0 %v9137_v25  ;;  %v9147_v25 = vpack.c.bf16 %v2800_v5, %v2796_v43  ;;  %v2816_v43 = vld [vmem:[#allocation8 + $0x4e8] sm:$0xff] }
 0x272   :  { %9266 = vmatpush1.bf16.msra.mxu1 %v9265_v8  ;;  %9140 = vmatprep.subr.bf16.mxu0 %v9139_v30  ;;  %v2801_v8 = vld [vmem:[#allocation8 + $0x470] sm:$0xff]  ;;  %v9155_v50 = vpack.c.bf16 %v2816_v43, %v2812_v4 }
 0x273   :  { %9268 = vmatprep.subr.bf16.mxu1 %v9267_v35  ;;  %v2806_v35 = vld [vmem:[#allocation8 + $0x498] sm:$0xff]  ;;  %v2821_v4 = vld [vmem:[#allocation8 + $0x510] sm:$0xff] }
 0x274   :  { %v2825_v43 = vld [vmem:[#allocation8 + $0x530] sm:$0xff] }
 0x275   :  { %9142 = vmatpush1.bf16.msra.mxu0 %v9141_v56  ;;  %v2810_v56 = vld [vmem:[#allocation8 + $0x4b8] sm:$0xff] }
 0x276   :  { %9270 = vmatpush1.bf16.msra.mxu1 %v9269_v40  ;;  %9144 = vmatprep.subr.bf16.mxu0 %v9143_v23  ;;  %v11479_v40 = vrot.slane %v238_v6, %v11451_v29  ;;  %v9277_v23 = vpack.c.bf16 %v2801_v8, %v2797_v37  ;;  %v9279_v62 = vpack.c.bf16 %v2810_v56, %v2806_v35 }
 0x277   :  { %9272 = vmatprep.subr.bf16.mxu1 %v9271_v49  ;;  %v2807_v49 = vld [vmem:[#allocation8 + $0x4a0] sm:$0xff] }
 0x278   :  { %v9153_v37 = vpack.c.bf16 %v2807_v49, %v2803_v48  ;;  %v2817_v48 = vld [vmem:[#allocation8 + $0x4f0] sm:$0xff]  ;;  %v2822_v49 = vld [vmem:[#allocation8 + $0x518] sm:$0xff] }
 0x30a   :  { %v2068_v20 = vpop.f32.mrb[0].mxu0 }
 0x30b   :  { %v11439_v57 = vadd.f32 %v11430_v52, %v2068_v20  ;;  %v2246_v31 = vpop.f32.mrb[0].mxu1  ;;  %v2070_v59 = vpop.f32.mrb[1].mxu0  ;;  %v2805_v20 = vld [vmem:[#allocation8 + $0x490] sm:$0xff] }
 0x30c   :  { %v11442_v0 = vadd.f32 %v11433_v13, %v2246_v31  ;;  %v11445_v1 = vadd.f32 %v11436_v54, %v2070_v59  ;;  %v11447_v2 = vpop.f32.mrb[1].mxu1  ;;  %v9281_v8 = vpack.c.bf16 %v2809_v63, %v2805_v20  ;;  %v2826_v20 = vld [vmem:[#allocation8 + $0x538] sm:$0xff] }
 0x30d   :  { %v2595_v10 = vrot.slane %v11439_v57, 7 }
 0x30e   :  { %v2074_v14 = vpop.f32.mrb[2].mxu0  ;;  %v2596_v16 = vrot.slane %v11445_v1, 7 }
 0x30f   :  { %v11459_v19 = vadd.f32 %v11430_v52, %v2074_v14  ;;  %v2252_v21 = vpop.f32.mrb[2].mxu1  ;;  %v2076_v22 = vpop.f32.mrb[3].mxu0  ;;  %v2639_v38 = vsel %vm511_vm0, 0.0, %v2595_v10 }
 0x310   :  { %v11464_v55 = vadd.f32 %v11433_v13, %v2252_v21  ;;  %v11467_v26 = vadd.f32 %v11436_v54, %v2076_v22  ;;  %v11469_v30 = vpop.f32.mrb[3].mxu1  ;;  %v2640_v53 = vsel %vm511_vm0, 0.0, %v2596_v16 }
 0x311   :  { %8009 = vmatprep.mubr.msk.f32.mxu0 %vm564_vm1, %v2640_v53  ;;  %8017 = vmatprep.mubr.msk.f32.mxu1 %vm564_vm1, %v2640_v53  ;;  %v2599_v39 = vrot.slane %v11459_v19, 7 }
 0x312   :  { %v2080_v42 = vpop.f32.mrb[4].mxu0  ;;  %8010 = vmatmul.mubr.msk.f32.vlgmr.msra.gmra.mrb[8].mxu0 %vm564_vm1, %v2639_v38  ;;  %8018 = vmatmul.mubr.msk.f32.vlgmr.msra.gmra.mrb[8].mxu1 %vm564_vm1, %v2639_v38  ;;  %v2601_v44 = vrot.slane %v11467_v26, 7 }
 0x313   :  { %v11489_v31 = vadd.f32 %v11430_v52, %v2080_v42  ;;  %v2258_v6 = vpop.f32.mrb[4].mxu1  ;;  %9146 = vmatpush1.bf16.msra.mxu0 %v9145_v24  ;;  %9274 = vmatpush1.bf16.msra.mxu1 %v9273_v28  ;;  %v2082_v59 = vpop.f32.mrb[5].mxu0  ;;  %v2600_v21 = vsel %vm511_vm0, %v2595_v10, %v2599_v39  ;;  %v2813_v42 = vld [vmem:[#allocation8 + $0x4d0] sm:$0xff] }
 0x314   :  { %v11493_v5 = vadd.f32 %v11433_v13, %v2258_v6  ;;  %v11496_v11 = vadd.f32 %v11436_v54, %v2082_v59  ;;  %v11498_v12 = vpop.f32.mrb[5].mxu1  ;;  %v2602_v14 = vsel %vm511_vm0, %v2596_v16, %v2601_v44  ;;  %9148 = vmatprep.subr.bf16.mxu0 %v9147_v25  ;;  %9276 = vmatprep.subr.bf16.mxu1 %v9275_v32 }
 0x315   :  { %2985 = vmatprep.mubr.f32.mxu0 %v2602_v14  ;;  %3163 = vmatprep.mubr.f32.mxu1 %v2602_v14  ;;  %v2607_v22 = vrot.slane %v11489_v31, 7  ;;  %v11506_v16 = vadd.f32 %v11479_v40, %v11447_v2  ;;  %v9283_v32 = vpack.c.bf16 %v2818_v18, %v2814_v46  ;;  %v9285_v59 = vpack.c.bf16 %v2817_v48, %v2813_v42  ;;  %v2828_v14 = vld [vmem:[#allocation8 + $0x548] sm:$0xff] }
 0x316   :  { %v2086_v24 = vpop.f32.mrb[6].mxu0  ;;  %2986 = vmatmul.mubr.f32.gmra.mrb[10].mxu0 %v2600_v21  ;;  %3164 = vmatmul.mubr.f32.gmra.mrb[10].mxu1 %v2600_v21  ;;  %v2609_v28 = vrot.slane %v11496_v11, 7  ;;  %v9287_v21 = vpack.c.bf16 %v2826_v20, %v2822_v49  ;;  %v2836_v42 = vld [vmem:[#allocation8 + $0x588] sm:$0xff]  ;;  %v2839_v49 = vld [vmem:[#allocation8 + $0x5a0] sm:$0xff] }
 0x317   :  { %v11509_v25 = vadd.f32 %v11430_v52, %v2086_v24  ;;  %v2264_v53 = vpop.f32.mrb[6].mxu1  ;;  %9150 = vmatpush1.bf16.msra.mxu0 %v9149_v45  ;;  %9278 = vmatpush1.bf16.msra.mxu1 %v9277_v23  ;;  %v2088_v10 = vpop.f32.mrb[7].mxu0  ;;  %v2815_v52 = vld [vmem:[#allocation8 + $0x4e0] sm:$0xff]  ;;  %v2820_v45 = vld [vmem:[#allocation8 + $0x508] sm:$0xff] }
 0x318   :  { %v11512_v35 = vadd.f32 %v11433_v13, %v2264_v53  ;;  %v11515_v56 = vadd.f32 %v11436_v54, %v2088_v10  ;;  %v11517_v38 = vpop.f32.mrb[7].mxu1  ;;  %v2610_v2 = vsel %vm511_vm0, %v2601_v44, %v2609_v28  ;;  %9152 = vmatprep.subr.bf16.mxu0 %v9151_v61  ;;  %9280 = vmatprep.subr.bf16.mxu1 %v9279_v62  ;;  %v2824_v23 = vld [vmem:[#allocation8 + $0x528] sm:$0xff]  ;;  %v2819_v61 = vld [vmem:[#allocation8 + $0x500] sm:$0xff] }
 0x319   :  { %8011 = vmatprep.mubr.msk.f32.mxu0 %vm566_vm2, %v2610_v2  ;;  %8019 = vmatprep.mubr.msk.f32.mxu1 %vm566_vm2, %v2610_v2  ;;  %v2608_v13 = vsel %vm511_vm0, %v2599_v39, %v2607_v22  ;;  %v2615_v54 = vrot.slane %v11509_v25, 7  ;;  %v9157_v6 = vpack.c.bf16 %v2815_v52, %v2811_v33  ;;  %v2598_v39 = vrot.slane %v11506_v16, 7  ;;  %v2823_v62 = vld [vmem:[#allocation8 + $0x520] sm:$0xff]  ;;  %v2832_v24 = vld [vmem:[#allocation8 + $0x568] sm:$0xff]  ;;  %v2829_v2 = vld [vmem:[#allocation8 + $0x550] sm:$0xff] }
 0x31a   :  { %8012 = vmatmul.mubr.msk.f32.gmra.mrb[12].mxu0 %vm566_vm2, %v2608_v13  ;;  %8020 = vmatmul.mubr.msk.f32.gmra.mrb[12].mxu1 %vm566_vm2, %v2608_v13  ;;  %v2617_v44 = vrot.slane %v11515_v56, 7  ;;  %v9159_v18 = vpack.c.bf16 %v2824_v23, %v2820_v45  ;;  %v9289_v53 = vpack.c.bf16 %v2825_v43, %v2821_v4  ;;  %v2827_v10 = vld [vmem:[#allocation8 + $0x540] sm:$0xff]  ;;  %v2833_v52 = vld [vmem:[#allocation8 + $0x570] sm:$0xff]  ;;  %v2840_v48 = vld [vmem:[#allocation8 + $0x5a8] sm:$0xff] }
 0x31b   :  { %9154 = vmatpush1.bf16.msra.mxu0 %v9153_v37  ;;  %9282 = vmatpush1.bf16.msra.mxu1 %v9281_v8  ;;  %v2616_v46 = vsel %vm511_vm0, %v2607_v22, %v2615_v54  ;;  %v2830_v37 = vld [vmem:[#allocation8 + $0x558] sm:$0xff]  ;;  %v9163_v22 = vpack.c.bf16 %v2832_v24, %v2828_v14  ;;  %v2835_v23 = vld [vmem:[#allocation8 + $0x580] sm:$0xff]  ;;  %v9167_v20 = vpack.c.bf16 %v2840_v48, %v2836_v42 }
 0x31c   :  { %v2618_v63 = vsel %vm511_vm0, %v2609_v28, %v2617_v44  ;;  %9156 = vmatprep.subr.bf16.mxu0 %v9155_v50  ;;  %9284 = vmatprep.subr.bf16.mxu1 %v9283_v32  ;;  %v2834_v8 = vld [vmem:[#allocation8 + $0x578] sm:$0xff]  ;;  %v2642_v28 = vsel %vm511_vm0, 0.0, %v2598_v39  ;;  %v9161_v50 = vpack.c.bf16 %v2823_v62, %v2819_v61  ;;  %v2831_v32 = vld [vmem:[#allocation8 + $0x560] sm:$0xff]  ;;  %v9293_v44 = vpack.c.bf16 %v2833_v52, %v2829_v2  ;;  %v2841_v61 = vld [vmem:[#allocation8 + $0x5b0] sm:$0xff] }
 0x31d   :  { %2997 = vmatprep.mubr.f32.mxu0 %v2618_v63  ;;  %3175 = vmatprep.mubr.f32.mxu1 %v2618_v63  ;;  %v9291_v33 = vpack.c.bf16 %v2834_v8, %v2830_v37  ;;  %v2838_v13 = vld [vmem:[#allocation8 + $0x598] sm:$0xff]  ;;  %v9165_v45 = vpack.c.bf16 %v2831_v32, %v2827_v10  ;;  %v2844_v62 = vld [vmem:[#allocation8 + $0x5c8] sm:$0xff]  ;;  %v9169_v14 = vpack.c.bf16 %v2839_v49, %v2835_v23  ;;  %v2845_v8 = vld [vmem:[#allocation8 + $0x5d0] sm:$0xff] }
 0x31e   :  { %2998 = vmatmul.mubr.f32.gmra.mrb[14].mxu0 %v2616_v46  ;;  %3176 = vmatmul.mubr.f32.gmra.mrb[14].mxu1 %v2616_v46  ;;  %v2842_v54 = vld [vmem:[#allocation8 + $0x5b8] sm:$0xff]  ;;  %v2848_v63 = vld [vmem:[#allocation8 + $0x5e8] sm:$0xff]  ;;  %v2851_v2 = vld [vmem:[#allocation8 + $0x600] sm:$0xff] }
 0x31f   :  { %9158 = vmatpush1.bf16.msra.mxu0 %v9157_v6  ;;  %9286 = vmatpush1.bf16.msra.mxu1 %v9285_v59  ;;  %v9295_v6 = vpack.c.bf16 %v2842_v54, %v2838_v13  ;;  %v2837_v59 = vld [vmem:[#allocation8 + $0x590] sm:$0xff]  ;;  %v2846_v4 = vld [vmem:[#allocation8 + $0x5d8] sm:$0xff]  ;;  %v9171_v24 = vpack.c.bf16 %v2848_v63, %v2844_v62  ;;  %v2855_v52 = vld [vmem:[#allocation8 + $0x620] sm:$0xff] }
 0x320   :  { %8013 = vmatprep.mubr.msk.f32.mxu0 %vm564_vm1, %v2642_v28  ;;  %8021 = vmatprep.mubr.msk.f32.mxu1 %vm564_vm1, %v2642_v28  ;;  %v2850_v43 = vld [vmem:[#allocation8 + $0x5f8] sm:$0xff]  ;;  %v9297_v46 = vpack.c.bf16 %v2841_v61, %v2837_v59  ;;  %v2849_v28 = vld [vmem:[#allocation8 + $0x5f0] sm:$0xff]  ;;  %v2859_v59 = vld [vmem:[#allocation8 + $0x640] sm:$0xff] }
 0x321   :  { %9160 = vmatprep.subr.bf16.mxu0 %v9159_v18  ;;  %9288 = vmatprep.subr.bf16.mxu1 %v9287_v21  ;;  %v2843_v18 = vld [vmem:[#allocation8 + $0x5c0] sm:$0xff]  ;;  %v9299_v37 = vpack.c.bf16 %v2850_v43, %v2846_v4  ;;  %v2854_v10 = vld [vmem:[#allocation8 + $0x618] sm:$0xff]  ;;  %v2853_v13 = vld [vmem:[#allocation8 + $0x610] sm:$0xff] }
 0x322   :  { %v2847_v21 = vld [vmem:[#allocation8 + $0x5e0] sm:$0xff]  ;;  %v2858_v32 = vld [vmem:[#allocation8 + $0x638] sm:$0xff]  ;;  %v2857_v54 = vld [vmem:[#allocation8 + $0x630] sm:$0xff] }
 0x323   :  { %9162 = vmatpush1.bf16.msra.mxu0 %v9161_v50  ;;  %9290 = vmatpush1.bf16.msra.mxu1 %v9289_v53  ;;  %v2852_v50 = vld [vmem:[#allocation8 + $0x608] sm:$0xff]  ;;  %v9303_v48 = vpack.c.bf16 %v2858_v32, %v2854_v10  ;;  %v2862_v23 = vld [vmem:[#allocation8 + $0x658] sm:$0xff]  ;;  %v2863_v61 = vld [vmem:[#allocation8 + $0x660] sm:$0xff] }
 0x324   :  { %9164 = vmatprep.subr.bf16.mxu0 %v9163_v22  ;;  %9292 = vmatprep.subr.bf16.mxu1 %v9291_v33  ;;  %v2856_v53 = vld [vmem:[#allocation8 + $0x628] sm:$0xff]  ;;  %v9173_v22 = vpack.c.bf16 %v2847_v21, %v2843_v18  ;;  %v9301_v33 = vpack.c.bf16 %v2849_v28, %v2845_v8  ;;  %v2866_v49 = vld [vmem:[#allocation8 + $0x678] sm:$0xff]  ;;  %v2861_v4 = vld [vmem:[#allocation8 + $0x650] sm:$0xff] }
 0x325   :  { %v9175_v42 = vpack.c.bf16 %v2856_v53, %v2852_v50  ;;  %v9307_v63 = vpack.c.bf16 %v2866_v49, %v2862_v23  ;;  %v2865_v43 = vld [vmem:[#allocation8 + $0x670] sm:$0xff]  ;;  %v2870_v18 = vld [vmem:[#allocation8 + $0x698] sm:$0xff]  ;;  %v2867_v8 = vld [vmem:[#allocation8 + $0x680] sm:$0xff] }
 0x326   :  { %v2874_v21 = vld [vmem:[#allocation8 + $0x6b8] sm:$0xff]  ;;  %v2871_v28 = vld [vmem:[#allocation8 + $0x6a0] sm:$0xff]  ;;  %v2869_v10 = vld [vmem:[#allocation8 + $0x690] sm:$0xff] }
 0x327   :  { %9166 = vmatpush1.bf16.msra.mxu0 %v9165_v45  ;;  %9294 = vmatpush1.bf16.msra.mxu1 %v9293_v44  ;;  %v2860_v45 = vld [vmem:[#allocation8 + $0x648] sm:$0xff]  ;;  %v9311_v53 = vpack.c.bf16 %v2874_v21, %v2870_v18  ;;  %v2873_v32 = vld [vmem:[#allocation8 + $0x6b0] sm:$0xff] }
 0x328   :  { %9168 = vmatprep.subr.bf16.mxu0 %v9167_v20  ;;  %9296 = vmatprep.subr.bf16.mxu1 %v9295_v6  ;;  %v2864_v44 = vld [vmem:[#allocation8 + $0x668] sm:$0xff]  ;;  %v9177_v20 = vpack.c.bf16 %v2855_v52, %v2851_v2  ;;  %v9305_v6 = vpack.c.bf16 %v2857_v54, %v2853_v13  ;;  %v2878_v2 = vld [vmem:[#allocation8 + $0x6d8] sm:$0xff]  ;;  %v2875_v13 = vld [vmem:[#allocation8 + $0x6c0] sm:$0xff] }
 0x329   :  { %v9179_v62 = vpack.c.bf16 %v2864_v44, %v2860_v45  ;;  %v2882_v52 = vld [vmem:[#allocation8 + $0x6f8] sm:$0xff]  ;;  %v2879_v54 = vld [vmem:[#allocation8 + $0x6e0] sm:$0xff]  ;;  %v2877_v23 = vld [vmem:[#allocation8 + $0x6d0] sm:$0xff] }
 0x32a   :  { %v9315_v44 = vpack.c.bf16 %v2882_v52, %v2878_v2  ;;  %v2881_v49 = vld [vmem:[#allocation8 + $0x6f0] sm:$0xff] }
 0x32b   :  { %9170 = vmatpush1.bf16.msra.mxu0 %v9169_v14  ;;  %9298 = vmatpush1.bf16.msra.mxu1 %v9297_v46  ;;  %v2868_v14 = vld [vmem:[#allocation8 + $0x688] sm:$0xff]  ;;  %v2885_v18 = vld [vmem:[#allocation8 + $0x710] sm:$0xff] }
 0x32c   :  { %9172 = vmatprep.subr.bf16.mxu0 %v9171_v24  ;;  %9300 = vmatprep.subr.bf16.mxu1 %v9299_v37  ;;  %v2872_v46 = vld [vmem:[#allocation8 + $0x6a8] sm:$0xff]  ;;  %v9181_v24 = vpack.c.bf16 %v2863_v61, %v2859_v59  ;;  %v9309_v37 = vpack.c.bf16 %v2865_v43, %v2861_v4  ;;  %v2886_v59 = vld [vmem:[#allocation8 + $0x718] sm:$0xff]  ;;  %v2883_v4 = vld [vmem:[#allocation8 + $0x700] sm:$0xff] }
 0x32d   :  { %v9183_v50 = vpack.c.bf16 %v2872_v46, %v2868_v14  ;;  %v2890_v61 = vld [vmem:[#allocation8 + $0x738] sm:$0xff]  ;;  %v2887_v43 = vld [vmem:[#allocation8 + $0x720] sm:$0xff]  ;;  %v2889_v21 = vld [vmem:[#allocation8 + $0x730] sm:$0xff] }
 0x32e   :  { %v9319_v46 = vpack.c.bf16 %v2890_v61, %v2886_v59  ;;  %v2893_v2 = vld [vmem:[#allocation8 + $0x750] sm:$0xff] }
 0x32f   :  { %9174 = vmatpush1.bf16.msra.mxu0 %v9173_v22  ;;  %9302 = vmatpush1.bf16.msra.mxu1 %v9301_v33  ;;  %v2876_v22 = vld [vmem:[#allocation8 + $0x6c8] sm:$0xff]  ;;  %v2897_v52 = vld [vmem:[#allocation8 + $0x770] sm:$0xff] }
 0x330   :  { %9176 = vmatprep.subr.bf16.mxu0 %v9175_v42  ;;  %9304 = vmatprep.subr.bf16.mxu1 %v9303_v48  ;;  %v2880_v33 = vld [vmem:[#allocation8 + $0x6e8] sm:$0xff]  ;;  %v9185_v42 = vpack.c.bf16 %v2871_v28, %v2867_v8  ;;  %v9313_v48 = vpack.c.bf16 %v2873_v32, %v2869_v10  ;;  %v2894_v8 = vld [vmem:[#allocation8 + $0x758] sm:$0xff]  ;;  %v2891_v10 = vld [vmem:[#allocation8 + $0x740] sm:$0xff] }
 0x331   :  { %v9187_v45 = vpack.c.bf16 %v2880_v33, %v2876_v22  ;;  %v2898_v28 = vld [vmem:[#allocation8 + $0x778] sm:$0xff]  ;;  %v2895_v32 = vld [vmem:[#allocation8 + $0x760] sm:$0xff]  ;;  %v2901_v59 = vld [vmem:[#allocation8 + $0x790] sm:$0xff] }
 0x332   :  { %v9323_v33 = vpack.c.bf16 %v2898_v28, %v2894_v8  ;;  %v2905_v61 = vld [vmem:[#allocation8 + $0x7b0] sm:$0xff] }
 0x333   :  { %9178 = vmatpush1.bf16.msra.mxu0 %v9177_v20  ;;  %9306 = vmatpush1.bf16.msra.mxu1 %v9305_v6  ;;  %v2884_v20 = vld [vmem:[#allocation8 + $0x708] sm:$0xff]  ;;  %v2909_v8 = vld [vmem:[#allocation8 + $0x7d0] sm:$0xff] }
 0x334   :  { %9180 = vmatprep.subr.bf16.mxu0 %v9179_v62  ;;  %9308 = vmatprep.subr.bf16.mxu1 %v9307_v63  ;;  %v2888_v6 = vld [vmem:[#allocation8 + $0x728] sm:$0xff]  ;;  %v9189_v62 = vpack.c.bf16 %v2879_v54, %v2875_v13  ;;  %v9317_v63 = vpack.c.bf16 %v2881_v49, %v2877_v23  ;;  %v2902_v13 = vld [vmem:[#allocation8 + $0x798] sm:$0xff]  ;;  %v2899_v23 = vld [vmem:[#allocation8 + $0x780] sm:$0xff] }
 0x335   :  { %v9191_v14 = vpack.c.bf16 %v2888_v6, %v2884_v20  ;;  %v2906_v54 = vld [vmem:[#allocation8 + $0x7b8] sm:$0xff]  ;;  %v2903_v49 = vld [vmem:[#allocation8 + $0x7a0] sm:$0xff]  ;;  %v2913_v28 = vld [vmem:[#allocation8 + $0x7f0] sm:$0xff] }
 0x336   :  { %v9327_v6 = vpack.c.bf16 %v2906_v54, %v2902_v13  ;;  %v2327_v13 = vld [vmem:[#allocation8 + $0x820] sm:$0xff]  ;;  %v2597_v54 = vrot.slane %v11442_v0, 7 }
 0x337   :  { %9182 = vmatpush1.bf16.msra.mxu0 %v9181_v24  ;;  %9310 = vmatpush1.bf16.msra.mxu1 %v9309_v37  ;;  %v2892_v24 = vld [vmem:[#allocation8 + $0x748] sm:$0xff] }
 0x338   :  { %9184 = vmatprep.subr.bf16.mxu0 %v9183_v50  ;;  %9312 = vmatprep.subr.bf16.mxu1 %v9311_v53  ;;  %v2896_v37 = vld [vmem:[#allocation8 + $0x768] sm:$0xff]  ;;  %v9193_v50 = vpack.c.bf16 %v2887_v43, %v2883_v4  ;;  %v9321_v53 = vpack.c.bf16 %v2889_v21, %v2885_v18  ;;  %v2910_v4 = vld [vmem:[#allocation8 + $0x7d8] sm:$0xff]  ;;  %v2907_v18 = vld [vmem:[#allocation8 + $0x7c0] sm:$0xff] }
 0x339   :  { %v9195_v22 = vpack.c.bf16 %v2896_v37, %v2892_v24  ;;  %v2914_v43 = vld [vmem:[#allocation8 + $0x7f8] sm:$0xff]  ;;  %v2911_v21 = vld [vmem:[#allocation8 + $0x7e0] sm:$0xff] }
 0x33a   :  { %v9331_v37 = vpack.c.bf16 %v2914_v43, %v2910_v4  ;;  %v2335_v4 = vld [vmem:[#allocation8 + $0x860] sm:$0xff]  ;;  %v2641_v43 = vsel %vm511_vm0, 0.0, %v2597_v54 }
 0x33b   :  { %9186 = vmatpush1.bf16.msra.mxu0 %v9185_v42  ;;  %9314 = vmatpush1.bf16.msra.mxu1 %v9313_v48  ;;  %v2900_v42 = vld [vmem:[#allocation8 + $0x788] sm:$0xff] }
 0x33c   :  { %9188 = vmatprep.subr.bf16.mxu0 %v9187_v45  ;;  %9316 = vmatprep.subr.bf16.mxu1 %v9315_v44  ;;  %v2904_v48 = vld [vmem:[#allocation8 + $0x7a8] sm:$0xff]  ;;  %v9197_v45 = vpack.c.bf16 %v2895_v32, %v2891_v10  ;;  %v9325_v44 = vpack.c.bf16 %v2897_v52, %v2893_v2  ;;  %v2326_v10 = vld [vmem:[#allocation8 + $0x818] sm:$0xff]  ;;  %v9333_v2 = vpack.c.bf16 %v2913_v28, %v2909_v8 }
 0x33d   :  { %v9199_v20 = vpack.c.bf16 %v2904_v48, %v2900_v42  ;;  %v2330_v32 = vld [vmem:[#allocation8 + $0x838] sm:$0xff]  ;;  %v2323_v48 = vld [vmem:[#allocation8 + $0x800] sm:$0xff] }
 0x33e   :  { %v9463_v42 = vpack.c.bf16 %v2330_v32, %v2326_v10  ;;  %v2346_v10 = vld [vmem:[#allocation8 + $0x8b8] sm:$0xff]  ;;  %v2339_v32 = vld [vmem:[#allocation8 + $0x880] sm:$0xff] }
 0x33f   :  { %9190 = vmatpush1.bf16.msra.mxu0 %v9189_v62  ;;  %9318 = vmatpush1.bf16.msra.mxu1 %v9317_v63  ;;  %v2908_v62 = vld [vmem:[#allocation8 + $0x7c8] sm:$0xff] }
 0x340   :  { %9192 = vmatprep.subr.bf16.mxu0 %v9191_v14  ;;  %9320 = vmatprep.subr.bf16.mxu1 %v9319_v46  ;;  %v2912_v63 = vld [vmem:[#allocation8 + $0x7e8] sm:$0xff]  ;;  %v9201_v14 = vpack.c.bf16 %v2903_v49, %v2899_v23  ;;  %v9329_v46 = vpack.c.bf16 %v2905_v61, %v2901_v59  ;;  %v11548_v49 = vadd.f32 %v11479_v40, %v11498_v12  ;;  %v2338_v59 = vld [vmem:[#allocation8 + $0x878] sm:$0xff] }
 0x341   :  { %v9203_v24 = vpack.c.bf16 %v2912_v63, %v2908_v62  ;;  %v2332_v23 = vld [vmem:[#allocation8 + $0x848] sm:$0xff]  ;;  %v9337_v61 = vpack.c.bf16 %v2327_v13, %v2323_v48  ;;  %v2331_v63 = vld [vmem:[#allocation8 + $0x840] sm:$0xff]  ;;  %v2341_v48 = vld [vmem:[#allocation8 + $0x890] sm:$0xff] }
 0x342   :  { %v2613_v28 = vrot.slane %v11548_v49, 7  ;;  %v2345_v13 = vld [vmem:[#allocation8 + $0x8b0] sm:$0xff] }
 0x343   :  { %9194 = vmatpush1.bf16.msra.mxu0 %v9193_v50  ;;  %9322 = vmatpush1.bf16.msra.mxu1 %v9321_v53  ;;  %v2324_v50 = vld [vmem:[#allocation8 + $0x808] sm:$0xff] }
 0x344   :  { %9196 = vmatprep.subr.bf16.mxu0 %v9195_v22  ;;  %9324 = vmatprep.subr.bf16.mxu1 %v9323_v33  ;;  %v2328_v53 = vld [vmem:[#allocation8 + $0x828] sm:$0xff]  ;;  %v11543_v22 = vadd.f32 %v11479_v40, %v11469_v30  ;;  %v9205_v33 = vpack.c.bf16 %v2911_v21, %v2907_v18  ;;  %v2333_v18 = vld [vmem:[#allocation8 + $0x850] sm:$0xff] }
 0x345   :  { %v9335_v52 = vpack.c.bf16 %v2328_v53, %v2324_v50  ;;  %v2337_v21 = vld [vmem:[#allocation8 + $0x870] sm:$0xff]  ;;  %v2344_v50 = vld [vmem:[#allocation8 + $0x8a8] sm:$0xff]  ;;  %v2342_v53 = vld [vmem:[#allocation8 + $0x898] sm:$0xff] }
 0x346   :  { %v2605_v30 = vrot.slane %v11543_v22, 7 }
 0x347   :  { %9198 = vmatpush1.bf16.msra.mxu0 %v9197_v45  ;;  %9326 = vmatpush1.bf16.msra.mxu1 %v9325_v44  ;;  %v2325_v45 = vld [vmem:[#allocation8 + $0x810] sm:$0xff] }
 0x348   :  { %9200 = vmatprep.subr.bf16.mxu0 %v9199_v20  ;;  %9328 = vmatprep.subr.bf16.mxu1 %v9327_v6  ;;  %v2329_v44 = vld [vmem:[#allocation8 + $0x830] sm:$0xff]  ;;  %v2336_v20 = vld [vmem:[#allocation8 + $0x868] sm:$0xff]  ;;  %v2334_v6 = vld [vmem:[#allocation8 + $0x858] sm:$0xff]  ;;  %v2606_v8 = vsel %vm511_vm0, %v2598_v39, %v2605_v30 }
 0x349   :  { %v9465_v62 = vpack.c.bf16 %v2329_v44, %v2325_v45  ;;  %v9467_v12 = vpack.c.bf16 %v2338_v59, %v2334_v6  ;;  %v2348_v45 = vld [vmem:[#allocation8 + $0x8c8] sm:$0xff]  ;;  %v2614_v44 = vsel %vm511_vm0, %v2605_v30, %v2613_v28  ;;  %v2350_v6 = vld [vmem:[#allocation8 + $0x8d8] sm:$0xff]  ;;  %v2619_v30 = vrot.slane %v11512_v35, 7 }
 0x34a   :  { %v2354_v59 = vld [vmem:[#allocation8 + $0x8f8] sm:$0xff] }
 0x34b   :  { %9202 = vmatpush1.bf16.msra.mxu0 %v9201_v14  ;;  %9330 = vmatpush1.bf16.msra.mxu1 %v9329_v46  ;;  %v2603_v14 = vrot.slane %v11464_v55, 7  ;;  %v9339_v46 = vpack.c.bf16 %v2336_v20, %v2332_v23  ;;  %v2352_v20 = vld [vmem:[#allocation8 + $0x8e8] sm:$0xff] }
 0x34c   :  { %9204 = vmatprep.subr.bf16.mxu0 %v9203_v24  ;;  %9332 = vmatprep.subr.bf16.mxu1 %v9331_v37  ;;  %v2340_v24 = vld [vmem:[#allocation8 + $0x888] sm:$0xff]  ;;  %v11555_v37 = vadd.f32 %v11479_v40, %v11517_v38  ;;  %v9341_v40 = vpack.c.bf16 %v2335_v4, %v2331_v63  ;;  %v9469_v38 = vpack.c.bf16 %v2337_v21, %v2333_v18  ;;  %v2351_v63 = vld [vmem:[#allocation8 + $0x8e0] sm:$0xff]  ;;  %v2353_v18 = vld [vmem:[#allocation8 + $0x8f0] sm:$0xff] }
 0x34d   :  { %v9343_v39 = vpack.c.bf16 %v2344_v50, %v2340_v24  ;;  %v2356_v21 = vld [vmem:[#allocation8 + $0x908] sm:$0xff]  ;;  %v2358_v50 = vld [vmem:[#allocation8 + $0x918] sm:$0xff] }
 0x34e   :  { %v2621_v23 = vrot.slane %v11555_v37, 7 }
 0x34f   :  { %9206 = vmatpush1.bf16.msra.mxu0 %v9205_v33  ;;  %9334 = vmatpush1.bf16.msra.mxu1 %v9333_v2  ;;  %v2343_v33 = vld [vmem:[#allocation8 + $0x8a0] sm:$0xff]  ;;  %v2604_v2 = vsel %vm511_vm0, %v2597_v54, %v2603_v14 }
 0x350   :  { %9336 = vmatprep.subr.bf16.mxu0 %v9335_v52  ;;  %9464 = vmatprep.subr.bf16.mxu1 %v9463_v42  ;;  %v2611_v52 = vrot.slane %v11493_v5, 7  ;;  %v9471_v42 = vpack.c.bf16 %v2346_v10, %v2342_v53  ;;  %v9345_v54 = vpack.c.bf16 %v2343_v33, %v2339_v32  ;;  %v2622_v24 = vsel %vm511_vm0, %v2613_v28, %v2621_v23  ;;  %v2364_v28 = vld [vmem:[#allocation8 + $0x948] sm:$0xff]  ;;  %v2363_v23 = vld [vmem:[#allocation8 + $0x940] sm:$0xff] }
 0x352   :  { %8014 = vmatmul.mubr.msk.f32.vlgmr.msra.gmra.mrb[8].mxu0 %vm564_vm1, %v2641_v43  ;;  %8022 = vmatmul.mubr.msk.f32.vlgmr.msra.gmra.mrb[8].mxu1 %vm564_vm1, %v2641_v43  ;;  %v2612_v4 = vsel %vm511_vm0, %v2603_v14, %v2611_v52  ;;  %v9347_v43 = vpack.c.bf16 %v2352_v20, %v2348_v45  ;;  %v2362_v14 = vld [vmem:[#allocation8 + $0x938] sm:$0xff]  ;;  %v2620_v32 = vsel %vm511_vm0, %v2611_v52, %v2619_v30  ;;  %v2367_v20 = vld [vmem:[#allocation8 + $0x960] sm:$0xff] }
 0x353   :  { %3074 = vmatprep.mubr.f32.mxu0 %v2606_v8  ;;  %3252 = vmatprep.mubr.f32.mxu1 %v2606_v8  ;;  %v2360_v8 = vld [vmem:[#allocation8 + $0x928] sm:$0xff]  ;;  %v2370_v45 = vld [vmem:[#allocation8 + $0x978] sm:$0xff] }
 0x354   :  { %9338 = vmatpush1.bf16.msra.mxu0 %v9337_v61  ;;  %9466 = vmatpush1.bf16.msra.mxu1 %v9465_v62  ;;  %v9473_v61 = vpack.c.bf16 %v2345_v13, %v2341_v48  ;;  %v2347_v62 = vld [vmem:[#allocation8 + $0x8c0] sm:$0xff]  ;;  %v9351_v33 = vpack.c.bf16 %v2360_v8, %v2356_v21  ;;  %v2368_v48 = vld [vmem:[#allocation8 + $0x968] sm:$0xff]  ;;  %v2366_v13 = vld [vmem:[#allocation8 + $0x958] sm:$0xff] }
 0x355   :  { %9340 = vmatprep.subr.bf16.mxu0 %v9339_v46  ;;  %9468 = vmatprep.subr.bf16.mxu1 %v9467_v12  ;;  %v9475_v46 = vpack.c.bf16 %v2354_v59, %v2350_v6  ;;  %v2349_v12 = vld [vmem:[#allocation8 + $0x8d0] sm:$0xff]  ;;  %v9349_v53 = vpack.c.bf16 %v2351_v63, %v2347_v62  ;;  %v9355_v6 = vpack.c.bf16 %v2368_v48, %v2364_v28  ;;  %v2372_v62 = vld [vmem:[#allocation8 + $0x988] sm:$0xff]  ;;  %v2378_v30 = vld [vmem:[#allocation8 + $0x9b8] sm:$0xff] }
 0x356   :  { %3075 = vmatmul.mubr.f32.gmra.mrb[10].mxu0 %v2604_v2  ;;  %3253 = vmatmul.mubr.f32.gmra.mrb[10].mxu1 %v2604_v2  ;;  %v9477_v10 = vpack.c.bf16 %v2353_v18, %v2349_v12  ;;  %v9479_v2 = vpack.c.bf16 %v2362_v14, %v2358_v50  ;;  %v9483_v59 = vpack.c.bf16 %v2370_v45, %v2366_v13  ;;  %v2376_v63 = vld [vmem:[#allocation8 + $0x9a8] sm:$0xff]  ;;  %v2371_v12 = vld [vmem:[#allocation8 + $0x980] sm:$0xff]  ;;  %v2373_v8 = vld [vmem:[#allocation8 + $0x990] sm:$0xff] }
 0x357   :  { %8015 = vmatprep.mubr.msk.f32.mxu0 %vm566_vm2, %v2614_v44  ;;  %8023 = vmatprep.mubr.msk.f32.mxu1 %vm566_vm2, %v2614_v44  ;;  %v2375_v18 = vld [vmem:[#allocation8 + $0x9a0] sm:$0xff]  ;;  %v9359_v21 = vpack.c.bf16 %v2376_v63, %v2372_v62  ;;  %v2377_v50 = vld [vmem:[#allocation8 + $0x9b0] sm:$0xff]  ;;  %v2380_v14 = vld [vmem:[#allocation8 + $0x9c8] sm:$0xff] }
 0x358   :  { %9342 = vmatpush1.bf16.msra.mxu0 %v9341_v40  ;;  %9470 = vmatpush1.bf16.msra.mxu1 %v9469_v38  ;;  %v2355_v40 = vld [vmem:[#allocation8 + $0x900] sm:$0xff]  ;;  %v2381_v28 = vld [vmem:[#allocation8 + $0x9d0] sm:$0xff]  ;;  %v2388_v13 = vld [vmem:[#allocation8 + $0xa08] sm:$0xff] }
 0x359   :  { %9344 = vmatprep.subr.bf16.mxu0 %v9343_v39  ;;  %9472 = vmatprep.subr.bf16.mxu1 %v9471_v42  ;;  %v2359_v38 = vld [vmem:[#allocation8 + $0x920] sm:$0xff]  ;;  %v2357_v39 = vld [vmem:[#allocation8 + $0x910] sm:$0xff]  ;;  %v2392_v45 = vld [vmem:[#allocation8 + $0xa28] sm:$0xff] }
 0x35a   :  { %8016 = vmatmul.mubr.msk.f32.gmra.mrb[12].mxu0 %vm566_vm2, %v2612_v4  ;;  %8024 = vmatmul.mubr.msk.f32.gmra.mrb[12].mxu1 %vm566_vm2, %v2612_v4  ;;  %v2361_v42 = vld [vmem:[#allocation8 + $0x930] sm:$0xff]  ;;  %v9353_v44 = vpack.c.bf16 %v2359_v38, %v2355_v40  ;;  %v2374_v4 = vld [vmem:[#allocation8 + $0x998] sm:$0xff]  ;;  %v9361_v38 = vpack.c.bf16 %v2375_v18, %v2371_v12 }
 0x35b   :  { %3086 = vmatprep.mubr.f32.mxu0 %v2622_v24  ;;  %3264 = vmatprep.mubr.f32.mxu1 %v2622_v24  ;;  %v9481_v52 = vpack.c.bf16 %v2361_v42, %v2357_v39  ;;  %v9487_v24 = vpack.c.bf16 %v2378_v30, %v2374_v4  ;;  %v2386_v40 = vld [vmem:[#allocation8 + $0x9f8] sm:$0xff]  ;;  %v2385_v48 = vld [vmem:[#allocation8 + $0x9f0] sm:$0xff]  ;;  %v2396_v4 = vld [vmem:[#allocation8 + $0xa48] sm:$0xff] }
 0x35c   :  { %9346 = vmatpush1.bf16.msra.mxu0 %v9345_v54  ;;  %9474 = vmatpush1.bf16.msra.mxu1 %v9473_v61  ;;  %v2365_v54 = vld [vmem:[#allocation8 + $0x950] sm:$0xff]  ;;  %v2400_v30 = vld [vmem:[#allocation8 + $0xa68] sm:$0xff] }
 0x35d   :  { %9348 = vmatprep.subr.bf16.mxu0 %v9347_v43  ;;  %9476 = vmatprep.subr.bf16.mxu1 %v9475_v46  ;;  %v2369_v61 = vld [vmem:[#allocation8 + $0x970] sm:$0xff]  ;;  %v9357_v43 = vpack.c.bf16 %v2367_v20, %v2363_v23  ;;  %v9493_v20 = vpack.c.bf16 %v2385_v48, %v2381_v28 }
 0x35e   :  { %3087 = vmatmul.mubr.f32.gmra.mrb[14].mxu0 %v2620_v32  ;;  %3265 = vmatmul.mubr.f32.gmra.mrb[14].mxu1 %v2620_v32  ;;  %v9485_v46 = vpack.c.bf16 %v2369_v61, %v2365_v54  ;;  %v9489_v32 = vpack.c.bf16 %v2377_v50, %v2373_v8  ;;  %v9367_v54 = vpack.c.bf16 %v2392_v45, %v2388_v13  ;;  %v2389_v62 = vld [vmem:[#allocation8 + $0xa10] sm:$0xff] }
 0x35f   :  { %3335 = vmatprep.mubr.f32.mxu0 %v11445_v1  ;;  %3513 = vmatprep.mubr.f32.mxu1 %v11445_v1  ;;  %v2393_v63 = vld [vmem:[#allocation8 + $0xa30] sm:$0xff]  ;;  %v9371_v8 = vpack.c.bf16 %v2400_v30, %v2396_v4 }
 0x360   :  { %9350 = vmatpush1.bf16.msra.mxu0 %v9349_v53  ;;  %9478 = vmatpush1.bf16.msra.mxu1 %v9477_v10  ;;  %v2384_v53 = vld [vmem:[#allocation8 + $0x9e8] sm:$0xff]  ;;  %v2382_v10 = vld [vmem:[#allocation8 + $0x9d8] sm:$0xff]  ;;  %v9497_v18 = vpack.c.bf16 %v2393_v63, %v2389_v62  ;;  %v2405_v13 = vld [vmem:[#allocation8 + $0xa90] sm:$0xff] }
 0x361   :  { %9352 = vmatprep.subr.bf16.mxu0 %v9351_v33  ;;  %9480 = vmatprep.subr.bf16.mxu1 %v9479_v2  ;;  %v2379_v33 = vld [vmem:[#allocation8 + $0x9c0] sm:$0xff]  ;;  %v9363_v39 = vpack.c.bf16 %v2384_v53, %v2380_v14  ;;  %v9491_v42 = vpack.c.bf16 %v2386_v40, %v2382_v10  ;;  %v2397_v14 = vld [vmem:[#allocation8 + $0xa50] sm:$0xff]  ;;  %v2404_v10 = vld [vmem:[#allocation8 + $0xa88] sm:$0xff] }
 0x362   :  { %v2383_v2 = vld [vmem:[#allocation8 + $0x9e0] sm:$0xff]  ;;  %v2401_v53 = vld [vmem:[#allocation8 + $0xa70] sm:$0xff]  ;;  %v2408_v40 = vld [vmem:[#allocation8 + $0xaa8] sm:$0xff] }
 0x363   :  { %v9365_v23 = vpack.c.bf16 %v2383_v2, %v2379_v33  ;;  %v9501_v2 = vpack.c.bf16 %v2401_v53, %v2397_v14  ;;  %v9375_v28 = vpack.c.bf16 %v2408_v40, %v2404_v10  ;;  %v2409_v45 = vld [vmem:[#allocation8 + $0xab0] sm:$0xff] }
 0x364   :  { %9354 = vmatpush1.bf16.msra.mxu0 %v9353_v44  ;;  %9482 = vmatpush1.bf16.msra.mxu1 %v9481_v52  ;;  %v2390_v44 = vld [vmem:[#allocation8 + $0xa18] sm:$0xff]  ;;  %v2413_v4 = vld [vmem:[#allocation8 + $0xad0] sm:$0xff] }
 0x365   :  { %9356 = vmatprep.subr.bf16.mxu0 %v9355_v6  ;;  %9484 = vmatprep.subr.bf16.mxu1 %v9483_v59  ;;  %v2394_v52 = vld [vmem:[#allocation8 + $0xa38] sm:$0xff]  ;;  %v2387_v6 = vld [vmem:[#allocation8 + $0xa00] sm:$0xff]  ;;  %v2417_v30 = vld [vmem:[#allocation8 + $0xaf0] sm:$0xff] }
 0x366   :  { %v2391_v59 = vld [vmem:[#allocation8 + $0xa20] sm:$0xff]  ;;  %v9495_v61 = vpack.c.bf16 %v2394_v52, %v2390_v44  ;;  %v2412_v44 = vld [vmem:[#allocation8 + $0xac8] sm:$0xff]  ;;  %v2421_v10 = vld [vmem:[#allocation8 + $0xb10] sm:$0xff] }
 0x367   :  { %v9369_v12 = vpack.c.bf16 %v2391_v59, %v2387_v6  ;;  %v2416_v52 = vld [vmem:[#allocation8 + $0xae8] sm:$0xff]  ;;  %v9505_v59 = vpack.c.bf16 %v2409_v45, %v2405_v13  ;;  %v2425_v40 = vld [vmem:[#allocation8 + $0xb30] sm:$0xff] }
 0x368   :  { %9358 = vmatpush1.bf16.msra.mxu0 %v9357_v43  ;;  %9486 = vmatpush1.bf16.msra.mxu1 %v9485_v46  ;;  %v2398_v43 = vld [vmem:[#allocation8 + $0xa58] sm:$0xff]  ;;  %v9379_v62 = vpack.c.bf16 %v2416_v52, %v2412_v44  ;;  %v2429_v44 = vld [vmem:[#allocation8 + $0xb50] sm:$0xff] }
 0x369   :  { %9360 = vmatprep.subr.bf16.mxu0 %v9359_v21  ;;  %9488 = vmatprep.subr.bf16.mxu1 %v9487_v24  ;;  %v2402_v46 = vld [vmem:[#allocation8 + $0xa78] sm:$0xff]  ;;  %v2395_v21 = vld [vmem:[#allocation8 + $0xa40] sm:$0xff]  ;;  %v2433_v52 = vld [vmem:[#allocation8 + $0xb70] sm:$0xff] }
 0x36a   :  { %v2399_v24 = vld [vmem:[#allocation8 + $0xa60] sm:$0xff]  ;;  %v9499_v50 = vpack.c.bf16 %v2402_v46, %v2398_v43  ;;  %v2420_v43 = vld [vmem:[#allocation8 + $0xb08] sm:$0xff] }
 0x36b   :  { %v9373_v33 = vpack.c.bf16 %v2399_v24, %v2395_v21  ;;  %v2424_v46 = vld [vmem:[#allocation8 + $0xb28] sm:$0xff]  ;;  %v9509_v24 = vpack.c.bf16 %v2417_v30, %v2413_v4 }
 0x36c   :  { %9362 = vmatpush1.bf16.msra.mxu0 %v9361_v38  ;;  %9490 = vmatpush1.bf16.msra.mxu1 %v9489_v32  ;;  %v2406_v38 = vld [vmem:[#allocation8 + $0xa98] sm:$0xff]  ;;  %v9383_v14 = vpack.c.bf16 %v2424_v46, %v2420_v43  ;;  %v2437_v43 = vld [vmem:[#allocation8 + $0xb90] sm:$0xff] }
 0x36d   :  { %9364 = vmatprep.subr.bf16.mxu0 %v9363_v39  ;;  %9492 = vmatprep.subr.bf16.mxu1 %v9491_v42  ;;  %v2410_v32 = vld [vmem:[#allocation8 + $0xab8] sm:$0xff]  ;;  %v2403_v39 = vld [vmem:[#allocation8 + $0xa80] sm:$0xff]  ;;  %v2441_v46 = vld [vmem:[#allocation8 + $0xbb0] sm:$0xff] }
 0x36e   :  { %v2407_v42 = vld [vmem:[#allocation8 + $0xaa0] sm:$0xff]  ;;  %v9503_v48 = vpack.c.bf16 %v2410_v32, %v2406_v38  ;;  %v2428_v38 = vld [vmem:[#allocation8 + $0xb48] sm:$0xff] }
 0x36f   :  { %v9377_v6 = vpack.c.bf16 %v2407_v42, %v2403_v39  ;;  %v2432_v32 = vld [vmem:[#allocation8 + $0xb68] sm:$0xff]  ;;  %v9513_v42 = vpack.c.bf16 %v2425_v40, %v2421_v10 }
 0x370   :  { %9366 = vmatpush1.bf16.msra.mxu0 %v9365_v23  ;;  %9494 = vmatpush1.bf16.msra.mxu1 %v9493_v20  ;;  %v2414_v23 = vld [vmem:[#allocation8 + $0xad8] sm:$0xff]  ;;  %v9387_v13 = vpack.c.bf16 %v2432_v32, %v2428_v38  ;;  %v2445_v38 = vld [vmem:[#allocation8 + $0xbd0] sm:$0xff] }
 0x371   :  { %9368 = vmatprep.subr.bf16.mxu0 %v9367_v54  ;;  %9496 = vmatprep.subr.bf16.mxu1 %v9495_v61  ;;  %v2418_v20 = vld [vmem:[#allocation8 + $0xaf8] sm:$0xff]  ;;  %v2411_v54 = vld [vmem:[#allocation8 + $0xac0] sm:$0xff]  ;;  %v2449_v32 = vld [vmem:[#allocation8 + $0xbf0] sm:$0xff] }
 0x372   :  { %v2415_v61 = vld [vmem:[#allocation8 + $0xae0] sm:$0xff]  ;;  %v9507_v63 = vpack.c.bf16 %v2418_v20, %v2414_v23  ;;  %v2436_v23 = vld [vmem:[#allocation8 + $0xb88] sm:$0xff] }
 0x373   :  { %v9381_v21 = vpack.c.bf16 %v2415_v61, %v2411_v54  ;;  %v2440_v20 = vld [vmem:[#allocation8 + $0xba8] sm:$0xff]  ;;  %v9517_v61 = vpack.c.bf16 %v2433_v52, %v2429_v44  ;;  %v2451_v44 = vld [vmem:[#allocation8 + $0xc00] sm:$0xff] }
 0x374   :  { %9370 = vmatpush1.bf16.msra.mxu0 %v9369_v12  ;;  %9498 = vmatpush1.bf16.msra.mxu1 %v9497_v18  ;;  %v2422_v12 = vld [vmem:[#allocation8 + $0xb18] sm:$0xff]  ;;  %v9391_v4 = vpack.c.bf16 %v2440_v20, %v2436_v23  ;;  %v2455_v52 = vld [vmem:[#allocation8 + $0xc20] sm:$0xff]  ;;  %v2453_v23 = vld [vmem:[#allocation8 + $0xc10] sm:$0xff] }
 0x375   :  { %9372 = vmatprep.subr.bf16.mxu0 %v9371_v8  ;;  %9500 = vmatprep.subr.bf16.mxu1 %v9499_v50  ;;  %v2426_v18 = vld [vmem:[#allocation8 + $0xb38] sm:$0xff]  ;;  %v2419_v8 = vld [vmem:[#allocation8 + $0xb00] sm:$0xff]  ;;  %v2457_v20 = vld [vmem:[#allocation8 + $0xc30] sm:$0xff] }
 0x376   :  { %v2423_v50 = vld [vmem:[#allocation8 + $0xb20] sm:$0xff]  ;;  %v9511_v53 = vpack.c.bf16 %v2426_v18, %v2422_v12  ;;  %v2444_v12 = vld [vmem:[#allocation8 + $0xbc8] sm:$0xff] }
 0x377   :  { %v9385_v39 = vpack.c.bf16 %v2423_v50, %v2419_v8  ;;  %v2448_v18 = vld [vmem:[#allocation8 + $0xbe8] sm:$0xff]  ;;  %v9521_v50 = vpack.c.bf16 %v2441_v46, %v2437_v43 }
 0x378   :  { %9374 = vmatpush1.bf16.msra.mxu0 %v9373_v33  ;;  %9502 = vmatpush1.bf16.msra.mxu1 %v9501_v2  ;;  %v2430_v33 = vld [vmem:[#allocation8 + $0xb58] sm:$0xff]  ;;  %v9395_v10 = vpack.c.bf16 %v2448_v18, %v2444_v12  ;;  %v2461_v12 = vld [vmem:[#allocation8 + $0xc50] sm:$0xff] }
 0x379   :  { %9376 = vmatprep.subr.bf16.mxu0 %v9375_v28  ;;  %9504 = vmatprep.subr.bf16.mxu1 %v9503_v48  ;;  %v2434_v2 = vld [vmem:[#allocation8 + $0xb78] sm:$0xff]  ;;  %v2427_v28 = vld [vmem:[#allocation8 + $0xb40] sm:$0xff]  ;;  %v2465_v18 = vld [vmem:[#allocation8 + $0xc70] sm:$0xff] }
 0x37a   :  { %v2431_v48 = vld [vmem:[#allocation8 + $0xb60] sm:$0xff]  ;;  %v9515_v45 = vpack.c.bf16 %v2434_v2, %v2430_v33  ;;  %v2452_v33 = vld [vmem:[#allocation8 + $0xc08] sm:$0xff] }
 0x37b   :  { %v9389_v54 = vpack.c.bf16 %v2431_v48, %v2427_v28  ;;  %v2456_v2 = vld [vmem:[#allocation8 + $0xc28] sm:$0xff]  ;;  %v9525_v48 = vpack.c.bf16 %v2449_v32, %v2445_v38 }
 0x37c   :  { %9378 = vmatpush1.bf16.msra.mxu0 %v9377_v6  ;;  %9506 = vmatpush1.bf16.msra.mxu1 %v9505_v59  ;;  %v2438_v6 = vld [vmem:[#allocation8 + $0xb98] sm:$0xff] }
 0x37d   :  { %9380 = vmatprep.subr.bf16.mxu0 %v9379_v62  ;;  %9508 = vmatprep.subr.bf16.mxu1 %v9507_v63  ;;  %v2442_v59 = vld [vmem:[#allocation8 + $0xbb8] sm:$0xff]  ;;  %v2435_v62 = vld [vmem:[#allocation8 + $0xb80] sm:$0xff] }
 0x37e   :  { %v2439_v63 = vld [vmem:[#allocation8 + $0xba0] sm:$0xff]  ;;  %v9519_v30 = vpack.c.bf16 %v2442_v59, %v2438_v6  ;;  %v2460_v6 = vld [vmem:[#allocation8 + $0xc48] sm:$0xff] }
 0x37f   :  { %v9393_v8 = vpack.c.bf16 %v2439_v63, %v2435_v62  ;;  %v2464_v59 = vld [vmem:[#allocation8 + $0xc68] sm:$0xff]  ;;  %v9401_v62 = vpack.c.bf16 %v2455_v52, %v2451_v44  ;;  %v9529_v63 = vpack.c.bf16 %v2457_v20, %v2453_v23  ;;  %v2475_v44 = vld [vmem:[#allocation8 + $0xcc0] sm:$0xff] }
 0x380   :  { %9382 = vmatpush1.bf16.msra.mxu0 %v9381_v21  ;;  %9510 = vmatpush1.bf16.msra.mxu1 %v9509_v24  ;;  %v2446_v21 = vld [vmem:[#allocation8 + $0xbd8] sm:$0xff]  ;;  %v9403_v43 = vpack.c.bf16 %v2464_v59, %v2460_v6  ;;  %v2479_v52 = vld [vmem:[#allocation8 + $0xce0] sm:$0xff]  ;;  %v2477_v6 = vld [vmem:[#allocation8 + $0xcd0] sm:$0xff] }
 0x381   :  { %9384 = vmatprep.subr.bf16.mxu0 %v9383_v14  ;;  %9512 = vmatprep.subr.bf16.mxu1 %v9511_v53  ;;  %v2450_v24 = vld [vmem:[#allocation8 + $0xbf8] sm:$0xff]  ;;  %v2443_v14 = vld [vmem:[#allocation8 + $0xbc0] sm:$0xff]  ;;  %v2481_v59 = vld [vmem:[#allocation8 + $0xcf0] sm:$0xff] }
 0x382   :  { %v2447_v53 = vld [vmem:[#allocation8 + $0xbe0] sm:$0xff]  ;;  %v9523_v40 = vpack.c.bf16 %v2450_v24, %v2446_v21  ;;  %v2468_v21 = vld [vmem:[#allocation8 + $0xc88] sm:$0xff] }
 0x383   :  { %v9397_v28 = vpack.c.bf16 %v2447_v53, %v2443_v14  ;;  %v2472_v24 = vld [vmem:[#allocation8 + $0xca8] sm:$0xff]  ;;  %v9533_v53 = vpack.c.bf16 %v2465_v18, %v2461_v12  ;;  %v2485_v12 = vld [vmem:[#allocation8 + $0xd10] sm:$0xff] }
 0x384   :  { %9386 = vmatpush1.bf16.msra.mxu0 %v9385_v39  ;;  %9514 = vmatpush1.bf16.msra.mxu1 %v9513_v42  ;;  %v2454_v39 = vld [vmem:[#allocation8 + $0xc18] sm:$0xff]  ;;  %v9407_v38 = vpack.c.bf16 %v2472_v24, %v2468_v21  ;;  %v2489_v24 = vld [vmem:[#allocation8 + $0xd30] sm:$0xff] }
 0x385   :  { %9388 = vmatprep.subr.bf16.mxu0 %v9387_v13  ;;  %9516 = vmatprep.subr.bf16.mxu1 %v9515_v45  ;;  %v2458_v42 = vld [vmem:[#allocation8 + $0xc38] sm:$0xff]  ;;  %v9399_v13 = vpack.c.bf16 %v2456_v2, %v2452_v33  ;;  %v2469_v33 = vld [vmem:[#allocation8 + $0xc90] sm:$0xff] }
 0x386   :  { %v9527_v45 = vpack.c.bf16 %v2458_v42, %v2454_v39  ;;  %v2473_v2 = vld [vmem:[#allocation8 + $0xcb0] sm:$0xff]  ;;  %v2476_v39 = vld [vmem:[#allocation8 + $0xcc8] sm:$0xff] }
 0x387   :  { %v2480_v42 = vld [vmem:[#allocation8 + $0xce8] sm:$0xff] }
 0x388   :  { %9390 = vmatpush1.bf16.msra.mxu0 %v9389_v54  ;;  %9518 = vmatpush1.bf16.msra.mxu1 %v9517_v61  ;;  %v2462_v54 = vld [vmem:[#allocation8 + $0xc58] sm:$0xff]  ;;  %v9411_v23 = vpack.c.bf16 %v2480_v42, %v2476_v39  ;;  %v2497_v42 = vld [vmem:[#allocation8 + $0xd70] sm:$0xff] }
 0x389   :  { %9392 = vmatprep.subr.bf16.mxu0 %v9391_v4  ;;  %9520 = vmatprep.subr.bf16.mxu1 %v9519_v30  ;;  %v2466_v61 = vld [vmem:[#allocation8 + $0xc78] sm:$0xff]  ;;  %v2459_v4 = vld [vmem:[#allocation8 + $0xc40] sm:$0xff] }
 0x38a   :  { %v2463_v30 = vld [vmem:[#allocation8 + $0xc60] sm:$0xff]  ;;  %v9531_v46 = vpack.c.bf16 %v2466_v61, %v2462_v54  ;;  %v2484_v54 = vld [vmem:[#allocation8 + $0xd08] sm:$0xff] }
 0x38b   :  { %v9405_v14 = vpack.c.bf16 %v2463_v30, %v2459_v4  ;;  %v2488_v61 = vld [vmem:[#allocation8 + $0xd28] sm:$0xff]  ;;  %v9413_v4 = vpack.c.bf16 %v2479_v52, %v2475_v44  ;;  %v9541_v30 = vpack.c.bf16 %v2481_v59, %v2477_v6  ;;  %v2503_v6 = vld [vmem:[#allocation8 + $0xda0] sm:$0xff]  ;;  %v2501_v59 = vld [vmem:[#allocation8 + $0xd90] sm:$0xff] }
 0x38c   :  { %9394 = vmatpush1.bf16.msra.mxu0 %v9393_v8  ;;  %9522 = vmatpush1.bf16.msra.mxu1 %v9521_v50  ;;  %v2470_v8 = vld [vmem:[#allocation8 + $0xc98] sm:$0xff]  ;;  %v9415_v18 = vpack.c.bf16 %v2488_v61, %v2484_v54  ;;  %v2505_v61 = vld [vmem:[#allocation8 + $0xdb0] sm:$0xff] }
 0x38d   :  { %9396 = vmatprep.subr.bf16.mxu0 %v9395_v10  ;;  %9524 = vmatprep.subr.bf16.mxu1 %v9523_v40  ;;  %v2474_v50 = vld [vmem:[#allocation8 + $0xcb8] sm:$0xff]  ;;  %v2467_v10 = vld [vmem:[#allocation8 + $0xc80] sm:$0xff] }
 0x38e   :  { %v2471_v40 = vld [vmem:[#allocation8 + $0xca0] sm:$0xff]  ;;  %v9535_v32 = vpack.c.bf16 %v2474_v50, %v2470_v8  ;;  %v2492_v8 = vld [vmem:[#allocation8 + $0xd48] sm:$0xff] }
 0x38f   :  { %v2496_v50 = vld [vmem:[#allocation8 + $0xd68] sm:$0xff] }
 0x390   :  { %9398 = vmatpush1.bf16.msra.mxu0 %v9397_v28  ;;  %9526 = vmatpush1.bf16.msra.mxu1 %v9525_v48  ;;  %v2478_v28 = vld [vmem:[#allocation8 + $0xcd8] sm:$0xff] }
 0x391   :  { %9400 = vmatprep.subr.bf16.mxu0 %v9399_v13  ;;  %9528 = vmatprep.subr.bf16.mxu1 %v9527_v45  ;;  %v2482_v48 = vld [vmem:[#allocation8 + $0xcf8] sm:$0xff]  ;;  %v9409_v13 = vpack.c.bf16 %v2471_v40, %v2467_v10  ;;  %v9537_v45 = vpack.c.bf16 %v2473_v2, %v2469_v33  ;;  %v9545_v40 = vpack.c.bf16 %v2489_v24, %v2485_v12  ;;  %v2495_v33 = vld [vmem:[#allocation8 + $0xd60] sm:$0xff]  ;;  %v2493_v2 = vld [vmem:[#allocation8 + $0xd50] sm:$0xff] }
 0x392   :  { %v9539_v20 = vpack.c.bf16 %v2482_v48, %v2478_v28  ;;  %v2500_v28 = vld [vmem:[#allocation8 + $0xd88] sm:$0xff]  ;;  %v9549_v52 = vpack.c.bf16 %v2497_v42, %v2493_v2  ;;  %v2509_v24 = vld [vmem:[#allocation8 + $0xdd0] sm:$0xff]  ;;  %v2515_v2 = vld [vmem:[#allocation8 + $0xe00] sm:$0xff] }
 0x393   :  { %3336 = vmatmul.mubr.f32.vlgmr.msra.gmra.mrb[8].mxu0 %v11439_v57  ;;  %3514 = vmatmul.mubr.f32.vlgmr.msra.gmra.mrb[8].mxu1 %v11439_v57  ;;  %v2504_v48 = vld [vmem:[#allocation8 + $0xda8] sm:$0xff]  ;;  %v2517_v42 = vld [vmem:[#allocation8 + $0xe10] sm:$0xff] }
 0x394   :  { %3341 = vmatprep.mubr.f32.mxu0 %v11467_v26  ;;  %9402 = vmatpush1.bf16.msra.mxu0 %v9401_v62  ;;  %v2486_v62 = vld [vmem:[#allocation8 + $0xd18] sm:$0xff] }
 0x395   :  { %3519 = vmatprep.mubr.f32.mxu1 %v11467_v26  ;;  %9530 = vmatpush1.bf16.msra.mxu1 %v9529_v63  ;;  %v2490_v63 = vld [vmem:[#allocation8 + $0xd38] sm:$0xff] }
 0x396   :  { %9404 = vmatprep.subr.bf16.mxu0 %v9403_v43  ;;  %9532 = vmatprep.subr.bf16.mxu1 %v9531_v46  ;;  %v2483_v43 = vld [vmem:[#allocation8 + $0xd00] sm:$0xff]  ;;  %v9543_v21 = vpack.c.bf16 %v2490_v63, %v2486_v62  ;;  %v2508_v62 = vld [vmem:[#allocation8 + $0xdc8] sm:$0xff] }
 0x397   :  { %3342 = vmatmul.mubr.f32.gmra.mrb[10].mxu0 %v11459_v19  ;;  %3520 = vmatmul.mubr.f32.gmra.mrb[10].mxu1 %v11459_v19  ;;  %v2487_v46 = vld [vmem:[#allocation8 + $0xd20] sm:$0xff]  ;;  %v2512_v63 = vld [vmem:[#allocation8 + $0xde8] sm:$0xff] }
 0x398   :  { %3347 = vmatprep.mubr.f32.mxu0 %v11496_v11  ;;  %9406 = vmatpush1.bf16.msra.mxu0 %v9405_v14  ;;  %v2494_v14 = vld [vmem:[#allocation8 + $0xd58] sm:$0xff]  ;;  %v9417_v10 = vpack.c.bf16 %v2487_v46, %v2483_v43  ;;  %v9553_v46 = vpack.c.bf16 %v2505_v61, %v2501_v59  ;;  %v9427_v12 = vpack.c.bf16 %v2512_v63, %v2508_v62  ;;  %v2523_v59 = vld [vmem:[#allocation8 + $0xe40] sm:$0xff]  ;;  %v2525_v61 = vld [vmem:[#allocation8 + $0xe50] sm:$0xff] }
 0x399   :  { %3525 = vmatprep.mubr.f32.mxu1 %v11496_v11  ;;  %9534 = vmatpush1.bf16.msra.mxu1 %v9533_v53  ;;  %v2498_v53 = vld [vmem:[#allocation8 + $0xd78] sm:$0xff]  ;;  %v2529_v63 = vld [vmem:[#allocation8 + $0xe70] sm:$0xff] }
 0x39a   :  { %9408 = vmatprep.subr.bf16.mxu0 %v9407_v38  ;;  %9536 = vmatprep.subr.bf16.mxu1 %v9535_v32  ;;  %v9419_v38 = vpack.c.bf16 %v2496_v50, %v2492_v8  ;;  %v2491_v32 = vld [vmem:[#allocation8 + $0xd40] sm:$0xff]  ;;  %v9547_v39 = vpack.c.bf16 %v2498_v53, %v2494_v14  ;;  %v2513_v50 = vld [vmem:[#allocation8 + $0xdf0] sm:$0xff]  ;;  %v2516_v14 = vld [vmem:[#allocation8 + $0xe08] sm:$0xff] }
 0x39b   :  { %3348 = vmatmul.mubr.f32.gmra.mrb[12].mxu0 %v11489_v31  ;;  %3526 = vmatmul.mubr.f32.gmra.mrb[12].mxu1 %v11489_v31  ;;  %v9421_v44 = vpack.c.bf16 %v2495_v33, %v2491_v32  ;;  %v2520_v53 = vld [vmem:[#allocation8 + $0xe28] sm:$0xff]  ;;  %v9557_v32 = vpack.c.bf16 %v2513_v50, %v2509_v24  ;;  %v2531_v24 = vld [vmem:[#allocation8 + $0xe80] sm:$0xff]  ;;  %v2533_v50 = vld [vmem:[#allocation8 + $0xe90] sm:$0xff] }
 0x39c   :  { %3353 = vmatprep.mubr.f32.mxu0 %v11515_v56  ;;  %9410 = vmatpush1.bf16.msra.mxu0 %v9409_v13  ;;  %v2502_v13 = vld [vmem:[#allocation8 + $0xd98] sm:$0xff]  ;;  %v9431_v33 = vpack.c.bf16 %v2520_v53, %v2516_v14  ;;  %v2537_v53 = vld [vmem:[#allocation8 + $0xeb0] sm:$0xff] }
 0x39d   :  { %3531 = vmatprep.mubr.f32.mxu1 %v11515_v56  ;;  %9538 = vmatpush1.bf16.msra.mxu1 %v9537_v45  ;;  %v2506_v45 = vld [vmem:[#allocation8 + $0xdb8] sm:$0xff] }
 0x39e   :  { %9412 = vmatprep.subr.bf16.mxu0 %v9411_v23  ;;  %9540 = vmatprep.subr.bf16.mxu1 %v9539_v20  ;;  %v9423_v23 = vpack.c.bf16 %v2504_v48, %v2500_v28  ;;  %v2499_v20 = vld [vmem:[#allocation8 + $0xd80] sm:$0xff]  ;;  %v9551_v54 = vpack.c.bf16 %v2506_v45, %v2502_v13  ;;  %v2521_v48 = vld [vmem:[#allocation8 + $0xe30] sm:$0xff]  ;;  %v2524_v13 = vld [vmem:[#allocation8 + $0xe48] sm:$0xff] }
 0x39f   :  { %3354 = vmatmul.mubr.f32.gmra.mrb[14].mxu0 %v11509_v25  ;;  %3532 = vmatmul.mubr.f32.gmra.mrb[14].mxu1 %v11509_v25  ;;  %v9425_v43 = vpack.c.bf16 %v2503_v6, %v2499_v20  ;;  %v2528_v45 = vld [vmem:[#allocation8 + $0xe68] sm:$0xff]  ;;  %v9561_v20 = vpack.c.bf16 %v2521_v48, %v2517_v42  ;;  %v2539_v42 = vld [vmem:[#allocation8 + $0xec0] sm:$0xff]  ;;  %v2541_v48 = vld [vmem:[#allocation8 + $0xed0] sm:$0xff] }
 0x3a0   :  { %9414 = vmatpush1.bf16.msra.mxu0 %v9413_v4  ;;  %3424 = vmatprep.mubr.f32.mxu0 %v11506_v16  ;;  %v2510_v4 = vld [vmem:[#allocation8 + $0xdd8] sm:$0xff]  ;;  %v9435_v6 = vpack.c.bf16 %v2528_v45, %v2524_v13  ;;  %v2545_v45 = vld [vmem:[#allocation8 + $0xef0] sm:$0xff] }
 0x3a1   :  { %9542 = vmatpush1.bf16.msra.mxu1 %v9541_v30  ;;  %3602 = vmatprep.mubr.f32.mxu1 %v11506_v16  ;;  %v2514_v30 = vld [vmem:[#allocation8 + $0xdf8] sm:$0xff] }
 0x3a2   :  { %9416 = vmatprep.subr.bf16.mxu0 %v9415_v18  ;;  %9544 = vmatprep.subr.bf16.mxu1 %v9543_v21  ;;  %v2507_v18 = vld [vmem:[#allocation8 + $0xdc0] sm:$0xff]  ;;  %v9555_v8 = vpack.c.bf16 %v2514_v30, %v2510_v4  ;;  %v2532_v4 = vld [vmem:[#allocation8 + $0xe88] sm:$0xff] }
 0x3a3   :  { %v2511_v21 = vld [vmem:[#allocation8 + $0xde0] sm:$0xff]  ;;  %v2536_v30 = vld [vmem:[#allocation8 + $0xea8] sm:$0xff] }
 0x3a4   :  { %9418 = vmatpush1.bf16.msra.mxu0 %v9417_v10  ;;  %v2518_v10 = vld [vmem:[#allocation8 + $0xe18] sm:$0xff] }
 0x3a5   :  { %9546 = vmatpush1.bf16.msra.mxu1 %v9545_v40  ;;  %9420 = vmatprep.subr.bf16.mxu0 %v9419_v38  ;;  %v2522_v40 = vld [vmem:[#allocation8 + $0xe38] sm:$0xff]  ;;  %v9429_v38 = vpack.c.bf16 %v2511_v21, %v2507_v18  ;;  %v9565_v18 = vpack.c.bf16 %v2529_v63, %v2525_v61  ;;  %v9439_v21 = vpack.c.bf16 %v2536_v30, %v2532_v4  ;;  %v2547_v61 = vld [vmem:[#allocation8 + $0xf00] sm:$0xff]  ;;  %v2549_v63 = vld [vmem:[#allocation8 + $0xf10] sm:$0xff] }
 0x3a6   :  { %9548 = vmatprep.subr.bf16.mxu1 %v9547_v39  ;;  %v2519_v39 = vld [vmem:[#allocation8 + $0xe20] sm:$0xff]  ;;  %v9559_v28 = vpack.c.bf16 %v2522_v40, %v2518_v10  ;;  %v2540_v10 = vld [vmem:[#allocation8 + $0xec8] sm:$0xff]  ;;  %v2553_v30 = vld [vmem:[#allocation8 + $0xf30] sm:$0xff] }
 0x3a7   :  { %v2544_v40 = vld [vmem:[#allocation8 + $0xee8] sm:$0xff] }
 0x3a8   :  { %9422 = vmatpush1.bf16.msra.mxu0 %v9421_v44  ;;  %v2526_v44 = vld [vmem:[#allocation8 + $0xe58] sm:$0xff] }
 0x3a9   :  { %9550 = vmatpush1.bf16.msra.mxu1 %v9549_v52  ;;  %9424 = vmatprep.subr.bf16.mxu0 %v9423_v23  ;;  %v2530_v52 = vld [vmem:[#allocation8 + $0xe78] sm:$0xff]  ;;  %v9433_v23 = vpack.c.bf16 %v2519_v39, %v2515_v2  ;;  %v9569_v2 = vpack.c.bf16 %v2537_v53, %v2533_v50  ;;  %v9443_v39 = vpack.c.bf16 %v2544_v40, %v2540_v10  ;;  %v2555_v50 = vld [vmem:[#allocation8 + $0xf40] sm:$0xff]  ;;  %v2557_v53 = vld [vmem:[#allocation8 + $0xf50] sm:$0xff] }
 0x3aa   :  { %9552 = vmatprep.subr.bf16.mxu1 %v9551_v54  ;;  %v2527_v54 = vld [vmem:[#allocation8 + $0xe60] sm:$0xff]  ;;  %v9563_v62 = vpack.c.bf16 %v2530_v52, %v2526_v44  ;;  %v2548_v44 = vld [vmem:[#allocation8 + $0xf08] sm:$0xff]  ;;  %v2561_v40 = vld [vmem:[#allocation8 + $0xf70] sm:$0xff] }
 0x3ab   :  { %v2552_v52 = vld [vmem:[#allocation8 + $0xf28] sm:$0xff] }
 0x3ac   :  { %9426 = vmatpush1.bf16.msra.mxu0 %v9425_v43  ;;  %v2534_v43 = vld [vmem:[#allocation8 + $0xe98] sm:$0xff] }
 0x3ad   :  { %9554 = vmatpush1.bf16.msra.mxu1 %v9553_v46  ;;  %9428 = vmatprep.subr.bf16.mxu0 %v9427_v12  ;;  %v2538_v46 = vld [vmem:[#allocation8 + $0xeb8] sm:$0xff]  ;;  %v9437_v12 = vpack.c.bf16 %v2527_v54, %v2523_v59  ;;  %v9573_v59 = vpack.c.bf16 %v2545_v45, %v2541_v48  ;;  %v9447_v54 = vpack.c.bf16 %v2552_v52, %v2548_v44  ;;  %v2563_v48 = vld [vmem:[#allocation8 + $0xf80] sm:$0xff]  ;;  %v2565_v45 = vld [vmem:[#allocation8 + $0xf90] sm:$0xff] }
 0x3ae   :  { %9556 = vmatprep.subr.bf16.mxu1 %v9555_v8  ;;  %v2535_v8 = vld [vmem:[#allocation8 + $0xea0] sm:$0xff]  ;;  %v9567_v14 = vpack.c.bf16 %v2538_v46, %v2534_v43  ;;  %v2556_v43 = vld [vmem:[#allocation8 + $0xf48] sm:$0xff]  ;;  %v2569_v52 = vld [vmem:[#allocation8 + $0xfb0] sm:$0xff] }
 0x3af   :  { %v2560_v46 = vld [vmem:[#allocation8 + $0xf68] sm:$0xff] }
 0x3b0   :  { %9430 = vmatpush1.bf16.msra.mxu0 %v9429_v38  ;;  %v2542_v38 = vld [vmem:[#allocation8 + $0xed8] sm:$0xff] }
 0x3b1   :  { %9558 = vmatpush1.bf16.msra.mxu1 %v9557_v32  ;;  %9432 = vmatprep.subr.bf16.mxu0 %v9431_v33  ;;  %v2546_v32 = vld [vmem:[#allocation8 + $0xef8] sm:$0xff]  ;;  %v9441_v33 = vpack.c.bf16 %v2535_v8, %v2531_v24  ;;  %v9577_v24 = vpack.c.bf16 %v2553_v30, %v2549_v63  ;;  %v9451_v8 = vpack.c.bf16 %v2560_v46, %v2556_v43  ;;  %v2571_v63 = vld [vmem:[#allocation8 + $0xfc0] sm:$0xff]  ;;  %v2573_v30 = vld [vmem:[#allocation8 + $0xfd0] sm:$0xff] }
 0x3b2   :  { %9560 = vmatprep.subr.bf16.mxu1 %v9559_v28  ;;  %v2543_v28 = vld [vmem:[#allocation8 + $0xee0] sm:$0xff]  ;;  %v9571_v13 = vpack.c.bf16 %v2546_v32, %v2542_v38  ;;  %v2564_v38 = vld [vmem:[#allocation8 + $0xf88] sm:$0xff]  ;;  %v2577_v46 = vld [vmem:[#allocation8 + $0xff0] sm:$0xff] }
 0x3b3   :  { %v2568_v32 = vld [vmem:[#allocation8 + $0xfa8] sm:$0xff] }
 0x3b4   :  { %9434 = vmatpush1.bf16.msra.mxu0 %v9433_v23  ;;  %v2550_v23 = vld [vmem:[#allocation8 + $0xf18] sm:$0xff] }
 0x3b5   :  { %9562 = vmatpush1.bf16.msra.mxu1 %v9561_v20  ;;  %9436 = vmatprep.subr.bf16.mxu0 %v9435_v6  ;;  %v2554_v20 = vld [vmem:[#allocation8 + $0xf38] sm:$0xff]  ;;  %v9445_v6 = vpack.c.bf16 %v2543_v28, %v2539_v42  ;;  %v9581_v42 = vpack.c.bf16 %v2561_v40, %v2557_v53  ;;  %v9455_v28 = vpack.c.bf16 %v2568_v32, %v2564_v38  ;;  %v3695_v40 = vld [vmem:[#allocation8 + $0x1020] sm:$0xff]  ;;  %v3693_v38 = vld [vmem:[#allocation8 + $0x1010] sm:$0xff] }
 0x3b6   :  { %9564 = vmatprep.subr.bf16.mxu1 %v9563_v62  ;;  %v2551_v62 = vld [vmem:[#allocation8 + $0xf20] sm:$0xff]  ;;  %v9575_v4 = vpack.c.bf16 %v2554_v20, %v2550_v23  ;;  %v2572_v23 = vld [vmem:[#allocation8 + $0xfc8] sm:$0xff]  ;;  %v3697_v32 = vld [vmem:[#allocation8 + $0x1030] sm:$0xff] }
 0x3b7   :  { %v2576_v20 = vld [vmem:[#allocation8 + $0xfe8] sm:$0xff] }
 0x3b8   :  { %9438 = vmatpush1.bf16.msra.mxu0 %v9437_v12  ;;  %v2558_v12 = vld [vmem:[#allocation8 + $0xf58] sm:$0xff] }
 0x3b9   :  { %9566 = vmatpush1.bf16.msra.mxu1 %v9565_v18  ;;  %9440 = vmatprep.subr.bf16.mxu0 %v9439_v21  ;;  %v2562_v18 = vld [vmem:[#allocation8 + $0xf78] sm:$0xff]  ;;  %v9449_v21 = vpack.c.bf16 %v2551_v62, %v2547_v61  ;;  %v9585_v61 = vpack.c.bf16 %v2569_v52, %v2565_v45  ;;  %v9459_v62 = vpack.c.bf16 %v2576_v20, %v2572_v23  ;;  %v3699_v45 = vld [vmem:[#allocation8 + $0x1040] sm:$0xff]  ;;  %v3701_v52 = vld [vmem:[#allocation8 + $0x1050] sm:$0xff] }
 0x3ba   :  { %9568 = vmatprep.subr.bf16.mxu1 %v9567_v14  ;;  %v2559_v14 = vld [vmem:[#allocation8 + $0xf60] sm:$0xff]  ;;  %v9579_v10 = vpack.c.bf16 %v2562_v18, %v2558_v12  ;;  %v3692_v12 = vld [vmem:[#allocation8 + $0x1008] sm:$0xff]  ;;  %v3705_v20 = vld [vmem:[#allocation8 + $0x1070] sm:$0xff] }
 0x3bb   :  { %v3696_v18 = vld [vmem:[#allocation8 + $0x1028] sm:$0xff] }
 0x3bc   :  { %9442 = vmatpush1.bf16.msra.mxu0 %v9441_v33  ;;  %v2566_v33 = vld [vmem:[#allocation8 + $0xf98] sm:$0xff] }
 0x3bd   :  { %9570 = vmatpush1.bf16.msra.mxu1 %v9569_v2  ;;  %9444 = vmatprep.subr.bf16.mxu0 %v9443_v39  ;;  %v2570_v2 = vld [vmem:[#allocation8 + $0xfb8] sm:$0xff]  ;;  %v9453_v39 = vpack.c.bf16 %v2559_v14, %v2555_v50  ;;  %v9589_v50 = vpack.c.bf16 %v2577_v46, %v2573_v30  ;;  %v9591_v14 = vpack.c.bf16 %v3696_v18, %v3692_v12  ;;  %v3707_v30 = vld [vmem:[#allocation8 + $0x1080] sm:$0xff]  ;;  %v3709_v46 = vld [vmem:[#allocation8 + $0x1090] sm:$0xff] }
 0x3be   :  { %9572 = vmatprep.subr.bf16.mxu1 %v9571_v13  ;;  %v2567_v13 = vld [vmem:[#allocation8 + $0xfa0] sm:$0xff]  ;;  %v9583_v44 = vpack.c.bf16 %v2570_v2, %v2566_v33  ;;  %v3700_v33 = vld [vmem:[#allocation8 + $0x1048] sm:$0xff]  ;;  %v3713_v18 = vld [vmem:[#allocation8 + $0x10b0] sm:$0xff] }
 0x3bf   :  { %v3704_v2 = vld [vmem:[#allocation8 + $0x1068] sm:$0xff] }
 0x3c0   :  { %9446 = vmatpush1.bf16.msra.mxu0 %v9445_v6  ;;  %v2574_v6 = vld [vmem:[#allocation8 + $0xfd8] sm:$0xff] }
 0x3c1   :  { %9574 = vmatpush1.bf16.msra.mxu1 %v9573_v59  ;;  %9448 = vmatprep.subr.bf16.mxu0 %v9447_v54  ;;  %v2578_v59 = vld [vmem:[#allocation8 + $0xff8] sm:$0xff]  ;;  %v9457_v54 = vpack.c.bf16 %v2567_v13, %v2563_v48  ;;  %v9721_v48 = vpack.c.bf16 %v3697_v32, %v3693_v38  ;;  %v9595_v13 = vpack.c.bf16 %v3704_v2, %v3700_v33  ;;  %v3719_v38 = vld [vmem:[#allocation8 + $0x10e0] sm:$0xff]  ;;  %v3717_v32 = vld [vmem:[#allocation8 + $0x10d0] sm:$0xff]  ;;  %v3631_v2 = vrot.slane %v11467_v26, 1 }
 0x3c2   :  { %9576 = vmatprep.subr.bf16.mxu1 %v9575_v4  ;;  %v2575_v4 = vld [vmem:[#allocation8 + $0xfe0] sm:$0xff]  ;;  %v9587_v43 = vpack.c.bf16 %v2578_v59, %v2574_v6  ;;  %v3708_v6 = vld [vmem:[#allocation8 + $0x1088] sm:$0xff] }
 0x3c3   :  { %v3712_v59 = vld [vmem:[#allocation8 + $0x10a8] sm:$0xff] }
 0x3c4   :  { %9450 = vmatpush1.bf16.msra.mxu0 %v9449_v21  ;;  %v3694_v21 = vld [vmem:[#allocation8 + $0x1018] sm:$0xff] }
 0x3c5   :  { %9578 = vmatpush1.bf16.msra.mxu1 %v9577_v24  ;;  %9452 = vmatprep.subr.bf16.mxu0 %v9451_v8  ;;  %v3698_v24 = vld [vmem:[#allocation8 + $0x1038] sm:$0xff]  ;;  %v9461_v8 = vpack.c.bf16 %v2575_v4, %v2571_v63  ;;  %v9725_v63 = vpack.c.bf16 %v3705_v20, %v3701_v52  ;;  %v9599_v4 = vpack.c.bf16 %v3712_v59, %v3708_v6  ;;  %v3723_v20 = vld [vmem:[#allocation8 + $0x1100] sm:$0xff]  ;;  %v3725_v59 = vld [vmem:[#allocation8 + $0x1110] sm:$0xff] }
 0x3c6   :  { %9580 = vmatprep.subr.bf16.mxu1 %v9579_v10  ;;  %v9719_v53 = vpack.c.bf16 %v3698_v24, %v3694_v21  ;;  %v3691_v10 = vld [vmem:[#allocation8 + $0x1000] sm:$0xff]  ;;  %v3716_v21 = vld [vmem:[#allocation8 + $0x10c8] sm:$0xff] }
 0x3c7   :  { %v3720_v24 = vld [vmem:[#allocation8 + $0x10e8] sm:$0xff]  ;;  %v3727_v6 = vld [vmem:[#allocation8 + $0x1120] sm:$0xff] }
 0x3c8   :  { %9454 = vmatpush1.bf16.msra.mxu0 %v9453_v39  ;;  %v3702_v39 = vld [vmem:[#allocation8 + $0x1058] sm:$0xff] }
 0x3c9   :  { %9582 = vmatpush1.bf16.msra.mxu1 %v9581_v42  ;;  %9456 = vmatprep.subr.bf16.mxu0 %v9455_v28  ;;  %v3706_v42 = vld [vmem:[#allocation8 + $0x1078] sm:$0xff]  ;;  %v9593_v28 = vpack.c.bf16 %v3695_v40, %v3691_v10  ;;  %v9603_v10 = vpack.c.bf16 %v3720_v24, %v3716_v21  ;;  %v3715_v40 = vld [vmem:[#allocation8 + $0x10c0] sm:$0xff]  ;;  %v3733_v24 = vld [vmem:[#allocation8 + $0x1150] sm:$0xff] }
 0x3ca   :  { %9584 = vmatprep.subr.bf16.mxu1 %v9583_v44  ;;  %v3703_v44 = vld [vmem:[#allocation8 + $0x1060] sm:$0xff]  ;;  %v9723_v23 = vpack.c.bf16 %v3706_v42, %v3702_v39  ;;  %v3721_v39 = vld [vmem:[#allocation8 + $0x10f0] sm:$0xff]  ;;  %v3724_v42 = vld [vmem:[#allocation8 + $0x1108] sm:$0xff] }
 0x3cb   :  { %v9733_v52 = vpack.c.bf16 %v3721_v39, %v3717_v32  ;;  %v3735_v21 = vld [vmem:[#allocation8 + $0x1160] sm:$0xff] }
 0x3cc   :  { %9458 = vmatpush1.bf16.msra.mxu0 %v9457_v54  ;;  %v3710_v54 = vld [vmem:[#allocation8 + $0x1098] sm:$0xff]  ;;  %v3739_v39 = vld [vmem:[#allocation8 + $0x1180] sm:$0xff] }
 0x3cd   :  { %9586 = vmatpush1.bf16.msra.mxu1 %v9585_v61  ;;  %9460 = vmatprep.subr.bf16.mxu0 %v9459_v62  ;;  %v3714_v61 = vld [vmem:[#allocation8 + $0x10b8] sm:$0xff]  ;;  %v9597_v62 = vpack.c.bf16 %v3703_v44, %v3699_v45  ;;  %v9605_v45 = vpack.c.bf16 %v3719_v38, %v3715_v40  ;;  %v3630_v44 = vrot.slane %v11445_v1, 1 }
 0x3ce   :  { %9588 = vmatprep.subr.bf16.mxu1 %v9587_v43  ;;  %v3711_v43 = vld [vmem:[#allocation8 + $0x10a0] sm:$0xff]  ;;  %v9727_v12 = vpack.c.bf16 %v3714_v61, %v3710_v54  ;;  %v3734_v1 = vld [vmem:[#allocation8 + $0x1158] sm:$0xff] }
 0x3cf   :  { %v3632_v54 = vsel %vm1568_vm3, %v3630_v44, %v3631_v2  ;;  %v3746_v40 = vld [vmem:[#allocation8 + $0x11b8] sm:$0xff]  ;;  %v3752_v44 = vld [vmem:[#allocation8 + $0x11e8] sm:$0xff] }
 0x3d0   :  { %9462 = vmatpush1.bf16.msra.mxu0 %v9461_v8  ;;  %v3718_v8 = vld [vmem:[#allocation8 + $0x10d8] sm:$0xff] }
 0x3d1   :  { %9590 = vmatpush1.bf16.msra.mxu1 %v9589_v50  ;;  %9592 = vmatprep.subr.bf16.mxu0 %v9591_v14  ;;  %v3722_v50 = vld [vmem:[#allocation8 + $0x10f8] sm:$0xff]  ;;  %v9601_v14 = vpack.c.bf16 %v3711_v43, %v3707_v30  ;;  %v9609_v43 = vpack.c.bf16 %v3727_v6, %v3723_v20 }
 0x3d2   :  { %9720 = vmatprep.subr.bf16.mxu1 %v9719_v53  ;;  %v9729_v53 = vpack.c.bf16 %v3713_v18, %v3709_v46  ;;  %v9731_v33 = vpack.c.bf16 %v3722_v50, %v3718_v8  ;;  %v3738_v30 = vld [vmem:[#allocation8 + $0x1178] sm:$0xff]  ;;  %v3731_v18 = vld [vmem:[#allocation8 + $0x1140] sm:$0xff]  ;;  %v3737_v50 = vld [vmem:[#allocation8 + $0x1170] sm:$0xff] }
 0x3d3   :  { %3425 = vmatmul.mubr.f32.vlgmr.msra.gmra.mrb[8].mxu0 %v11442_v0  ;;  %v9739_v8 = vpack.c.bf16 %v3738_v30, %v3734_v1  ;;  %v9613_v38 = vpack.c.bf16 %v3735_v21, %v3731_v18  ;;  %v9741_v32 = vpack.c.bf16 %v3737_v50, %v3733_v24  ;;  %v3756_v1 = vld [vmem:[#allocation8 + $0x1208] sm:$0xff]  ;;  %v3755_v24 = vld [vmem:[#allocation8 + $0x1200] sm:$0xff]  ;;  %v3757_v50 = vld [vmem:[#allocation8 + $0x1210] sm:$0xff] }
 0x3d4   :  { %3603 = vmatmul.mubr.f32.vlgmr.msra.gmra.mrb[8].mxu1 %v11442_v0  ;;  %3430 = vmatprep.mubr.f32.mxu0 %v11543_v22  ;;  %v3760_v30 = vld [vmem:[#allocation8 + $0x1228] sm:$0xff] }
 0x3d5   :  { %3608 = vmatprep.mubr.f32.mxu1 %v11543_v22  ;;  %9594 = vmatpush1.bf16.msra.mxu0 %v9593_v28  ;;  %v3728_v28 = vld [vmem:[#allocation8 + $0x1128] sm:$0xff]  ;;  %v9623_v21 = vpack.c.bf16 %v3760_v30, %v3756_v1  ;;  %v3777_v30 = vld [vmem:[#allocation8 + $0x12b0] sm:$0xff] }
 0x3d6   :  { %9722 = vmatpush1.bf16.msra.mxu1 %v9721_v48  ;;  %9596 = vmatprep.subr.bf16.mxu0 %v9595_v13  ;;  %v3726_v48 = vld [vmem:[#allocation8 + $0x1118] sm:$0xff] }
 0x3d7   :  { %3431 = vmatmul.mubr.f32.gmra.mrb[10].mxu0 %v11464_v55  ;;  %9724 = vmatprep.subr.bf16.mxu1 %v9723_v23  ;;  %v3730_v13 = vld [vmem:[#allocation8 + $0x1138] sm:$0xff]  ;;  %v9607_v23 = vpack.c.bf16 %v3728_v28, %v3724_v42  ;;  %v3743_v42 = vld [vmem:[#allocation8 + $0x11a0] sm:$0xff]  ;;  %v3741_v28 = vld [vmem:[#allocation8 + $0x1190] sm:$0xff] }
 0x3d8   :  { %3609 = vmatmul.mubr.f32.gmra.mrb[10].mxu1 %v11464_v55  ;;  %3436 = vmatprep.mubr.f32.mxu0 %v11548_v49  ;;  %v9735_v61 = vpack.c.bf16 %v3730_v13, %v3726_v48  ;;  %v3745_v13 = vld [vmem:[#allocation8 + $0x11b0] sm:$0xff]  ;;  %v9617_v20 = vpack.c.bf16 %v3743_v42, %v3739_v39 }
 0x3d9   :  { %3614 = vmatprep.mubr.f32.mxu1 %v11548_v49  ;;  %9598 = vmatpush1.bf16.msra.mxu0 %v9597_v62  ;;  %v3729_v62 = vld [vmem:[#allocation8 + $0x1130] sm:$0xff]  ;;  %v9745_v6 = vpack.c.bf16 %v3745_v13, %v3741_v28  ;;  %v3763_v28 = vld [vmem:[#allocation8 + $0x1240] sm:$0xff] }
 0x3da   :  { %9726 = vmatpush1.bf16.msra.mxu1 %v9725_v63  ;;  %9600 = vmatprep.subr.bf16.mxu0 %v9599_v4  ;;  %v3732_v63 = vld [vmem:[#allocation8 + $0x1148] sm:$0xff]  ;;  %v9737_v46 = vpack.c.bf16 %v3729_v62, %v3725_v59  ;;  %v3749_v62 = vld [vmem:[#allocation8 + $0x11d0] sm:$0xff] }
 0x3db   :  { %3437 = vmatmul.mubr.f32.gmra.mrb[12].mxu0 %v11493_v5  ;;  %9728 = vmatprep.subr.bf16.mxu1 %v9727_v12  ;;  %v3736_v4 = vld [vmem:[#allocation8 + $0x1168] sm:$0xff]  ;;  %v3765_v13 = vld [vmem:[#allocation8 + $0x1250] sm:$0xff] }
 0x3dc   :  { %3615 = vmatmul.mubr.f32.gmra.mrb[12].mxu1 %v11493_v5  ;;  %3442 = vmatprep.mubr.f32.mxu0 %v11555_v37  ;;  %v9611_v12 = vpack.c.bf16 %v3736_v4, %v3732_v63  ;;  %v3753_v4 = vld [vmem:[#allocation8 + $0x11f0] sm:$0xff] }
 0x3dd   :  { %3620 = vmatprep.mubr.f32.mxu1 %v11555_v37  ;;  %9602 = vmatpush1.bf16.msra.mxu0 %v9601_v14  ;;  %v3740_v14 = vld [vmem:[#allocation8 + $0x1188] sm:$0xff]  ;;  %v9749_v18 = vpack.c.bf16 %v3753_v4, %v3749_v62  ;;  %v3771_v62 = vld [vmem:[#allocation8 + $0x1280] sm:$0xff]  ;;  %v3773_v4 = vld [vmem:[#allocation8 + $0x1290] sm:$0xff] }
 0x3de   :  { %9730 = vmatpush1.bf16.msra.mxu1 %v9729_v53  ;;  %9604 = vmatprep.subr.bf16.mxu0 %v9603_v10  ;;  %v3744_v53 = vld [vmem:[#allocation8 + $0x11a8] sm:$0xff]  ;;  %v3742_v10 = vld [vmem:[#allocation8 + $0x1198] sm:$0xff] }
 0x3df   :  { %3443 = vmatmul.mubr.f32.gmra.mrb[14].mxu0 %v11512_v35  ;;  %9732 = vmatprep.subr.bf16.mxu1 %v9731_v33  ;;  %v9615_v33 = vpack.c.bf16 %v3744_v53, %v3740_v14  ;;  %v9743_v48 = vpack.c.bf16 %v3746_v40, %v3742_v10  ;;  %v3761_v53 = vld [vmem:[#allocation8 + $0x1230] sm:$0xff]  ;;  %v3764_v10 = vld [vmem:[#allocation8 + $0x1248] sm:$0xff] }
 0x3e0   :  { %3621 = vmatmul.mubr.f32.gmra.mrb[14].mxu1 %v11512_v35  ;;  %4011 = vmatprep.mubr.f32.mxu0 %v3632_v54  ;;  %v3768_v40 = vld [vmem:[#allocation8 + $0x1268] sm:$0xff]  ;;  %v9753_v39 = vpack.c.bf16 %v3761_v53, %v3757_v50  ;;  %v3779_v50 = vld [vmem:[#allocation8 + $0x12c0] sm:$0xff]  ;;  %v3781_v53 = vld [vmem:[#allocation8 + $0x12d0] sm:$0xff] }
 0x3e1   :  { %9606 = vmatpush1.bf16.msra.mxu0 %v9605_v45  ;;  %4189 = vmatprep.mubr.f32.mxu1 %v3632_v54  ;;  %v3748_v45 = vld [vmem:[#allocation8 + $0x11c8] sm:$0xff]  ;;  %v3747_v54 = vld [vmem:[#allocation8 + $0x11c0] sm:$0xff]  ;;  %v9627_v42 = vpack.c.bf16 %v3768_v40, %v3764_v10  ;;  %v3785_v40 = vld [vmem:[#allocation8 + $0x12f0] sm:$0xff] }
 0x3e2   :  { %9734 = vmatpush1.bf16.msra.mxu1 %v9733_v52  ;;  %9608 = vmatprep.subr.bf16.mxu0 %v9607_v23  ;;  %v3750_v52 = vld [vmem:[#allocation8 + $0x11d8] sm:$0xff]  ;;  %v9619_v59 = vpack.c.bf16 %v3752_v44, %v3748_v45  ;;  %v3769_v44 = vld [vmem:[#allocation8 + $0x1270] sm:$0xff] }
 0x3e3   :  { %9736 = vmatprep.subr.bf16.mxu1 %v9735_v61  ;;  %v3754_v23 = vld [vmem:[#allocation8 + $0x11f8] sm:$0xff]  ;;  %v3751_v61 = vld [vmem:[#allocation8 + $0x11e0] sm:$0xff] }
 0x3e4   :  { %v9747_v63 = vpack.c.bf16 %v3754_v23, %v3750_v52  ;;  %v3772_v52 = vld [vmem:[#allocation8 + $0x1288] sm:$0xff] }
 0x3e5   :  { %9610 = vmatpush1.bf16.msra.mxu0 %v9609_v43  ;;  %v3758_v43 = vld [vmem:[#allocation8 + $0x1218] sm:$0xff]  ;;  %v3776_v23 = vld [vmem:[#allocation8 + $0x12a8] sm:$0xff] }
 0x3e6   :  { %9738 = vmatpush1.bf16.msra.mxu1 %v9737_v46  ;;  %9612 = vmatprep.subr.bf16.mxu0 %v9611_v12  ;;  %v3762_v46 = vld [vmem:[#allocation8 + $0x1238] sm:$0xff]  ;;  %v9621_v12 = vpack.c.bf16 %v3751_v61, %v3747_v54  ;;  %v9757_v54 = vpack.c.bf16 %v3769_v44, %v3765_v13  ;;  %v9631_v61 = vpack.c.bf16 %v3776_v23, %v3772_v52  ;;  %v3787_v13 = vld [vmem:[#allocation8 + $0x1300] sm:$0xff]  ;;  %v3789_v44 = vld [vmem:[#allocation8 + $0x1310] sm:$0xff] }
 0x3e7   :  { %9740 = vmatprep.subr.bf16.mxu1 %v9739_v8  ;;  %v3759_v8 = vld [vmem:[#allocation8 + $0x1220] sm:$0xff]  ;;  %v9751_v14 = vpack.c.bf16 %v3762_v46, %v3758_v43  ;;  %v3780_v43 = vld [vmem:[#allocation8 + $0x12c8] sm:$0xff]  ;;  %v3793_v23 = vld [vmem:[#allocation8 + $0x1330] sm:$0xff] }
 0x3e8   :  { %v3784_v46 = vld [vmem:[#allocation8 + $0x12e8] sm:$0xff] }
 0x3e9   :  { %9614 = vmatpush1.bf16.msra.mxu0 %v9613_v38  ;;  %v3766_v38 = vld [vmem:[#allocation8 + $0x1258] sm:$0xff] }
 0x3ea   :  { %9742 = vmatpush1.bf16.msra.mxu1 %v9741_v32  ;;  %9616 = vmatprep.subr.bf16.mxu0 %v9615_v33  ;;  %v3770_v32 = vld [vmem:[#allocation8 + $0x1278] sm:$0xff]  ;;  %v9625_v33 = vpack.c.bf16 %v3759_v8, %v3755_v24  ;;  %v9761_v24 = vpack.c.bf16 %v3777_v30, %v3773_v4  ;;  %v9635_v8 = vpack.c.bf16 %v3784_v46, %v3780_v43  ;;  %v3795_v4 = vld [vmem:[#allocation8 + $0x1340] sm:$0xff]  ;;  %v3797_v30 = vld [vmem:[#allocation8 + $0x1350] sm:$0xff] }
 0x3eb   :  { %9744 = vmatprep.subr.bf16.mxu1 %v9743_v48  ;;  %v3767_v48 = vld [vmem:[#allocation8 + $0x1260] sm:$0xff]  ;;  %v9755_v45 = vpack.c.bf16 %v3770_v32, %v3766_v38  ;;  %v3788_v38 = vld [vmem:[#allocation8 + $0x1308] sm:$0xff]  ;;  %v3801_v46 = vld [vmem:[#allocation8 + $0x1370] sm:$0xff] }
 0x3ec   :  { %v3792_v32 = vld [vmem:[#allocation8 + $0x1328] sm:$0xff] }
 0x3ed   :  { %9618 = vmatpush1.bf16.msra.mxu0 %v9617_v20  ;;  %v3774_v20 = vld [vmem:[#allocation8 + $0x1298] sm:$0xff] }
 0x3ee   :  { %9746 = vmatpush1.bf16.msra.mxu1 %v9745_v6  ;;  %9620 = vmatprep.subr.bf16.mxu0 %v9619_v59  ;;  %v3778_v6 = vld [vmem:[#allocation8 + $0x12b8] sm:$0xff]  ;;  %v9629_v59 = vpack.c.bf16 %v3767_v48, %v3763_v28  ;;  %v9765_v28 = vpack.c.bf16 %v3785_v40, %v3781_v53  ;;  %v9639_v48 = vpack.c.bf16 %v3792_v32, %v3788_v38  ;;  %v3803_v53 = vld [vmem:[#allocation8 + $0x1380] sm:$0xff]  ;;  %v3805_v40 = vld [vmem:[#allocation8 + $0x1390] sm:$0xff] }
 0x3ef   :  { %9748 = vmatprep.subr.bf16.mxu1 %v9747_v63  ;;  %v3775_v63 = vld [vmem:[#allocation8 + $0x12a0] sm:$0xff]  ;;  %v9759_v1 = vpack.c.bf16 %v3778_v6, %v3774_v20  ;;  %v3796_v20 = vld [vmem:[#allocation8 + $0x1348] sm:$0xff]  ;;  %v3809_v32 = vld [vmem:[#allocation8 + $0x13b0] sm:$0xff] }
 0x3f0   :  { %v3800_v6 = vld [vmem:[#allocation8 + $0x1368] sm:$0xff] }
 0x3f1   :  { %9622 = vmatpush1.bf16.msra.mxu0 %v9621_v12  ;;  %v3782_v12 = vld [vmem:[#allocation8 + $0x12d8] sm:$0xff] }
 0x3f2   :  { %9750 = vmatpush1.bf16.msra.mxu1 %v9749_v18  ;;  %9624 = vmatprep.subr.bf16.mxu0 %v9623_v21  ;;  %v3786_v18 = vld [vmem:[#allocation8 + $0x12f8] sm:$0xff]  ;;  %v9633_v21 = vpack.c.bf16 %v3775_v63, %v3771_v62  ;;  %v9769_v62 = vpack.c.bf16 %v3793_v23, %v3789_v44  ;;  %v9643_v63 = vpack.c.bf16 %v3800_v6, %v3796_v20  ;;  %v3811_v44 = vld [vmem:[#allocation8 + $0x13c0] sm:$0xff]  ;;  %v3813_v23 = vld [vmem:[#allocation8 + $0x13d0] sm:$0xff] }
 0x3f3   :  { %9752 = vmatprep.subr.bf16.mxu1 %v9751_v14  ;;  %v3783_v14 = vld [vmem:[#allocation8 + $0x12e0] sm:$0xff]  ;;  %v9763_v10 = vpack.c.bf16 %v3786_v18, %v3782_v12  ;;  %v3804_v12 = vld [vmem:[#allocation8 + $0x1388] sm:$0xff]  ;;  %v3817_v6 = vld [vmem:[#allocation8 + $0x13f0] sm:$0xff] }
 0x3f4   :  { %v3808_v18 = vld [vmem:[#allocation8 + $0x13a8] sm:$0xff] }
 0x3f5   :  { %9626 = vmatpush1.bf16.msra.mxu0 %v9625_v33  ;;  %v3790_v33 = vld [vmem:[#allocation8 + $0x1318] sm:$0xff] }
 0x3f6   :  { %9754 = vmatpush1.bf16.msra.mxu1 %v9753_v39  ;;  %9628 = vmatprep.subr.bf16.mxu0 %v9627_v42  ;;  %v3794_v39 = vld [vmem:[#allocation8 + $0x1338] sm:$0xff]  ;;  %v9637_v42 = vpack.c.bf16 %v3783_v14, %v3779_v50  ;;  %v9773_v50 = vpack.c.bf16 %v3801_v46, %v3797_v30  ;;  %v9647_v14 = vpack.c.bf16 %v3808_v18, %v3804_v12  ;;  %v3628_v30 = vrot.slane %v11459_v19, 1  ;;  %v3819_v46 = vld [vmem:[#allocation8 + $0x1400] sm:$0xff]  ;;  %v3821_v18 = vld [vmem:[#allocation8 + $0x1410] sm:$0xff] }
 0x3f7   :  { %9756 = vmatprep.subr.bf16.mxu1 %v9755_v45  ;;  %v3791_v45 = vld [vmem:[#allocation8 + $0x1320] sm:$0xff]  ;;  %v9767_v52 = vpack.c.bf16 %v3794_v39, %v3790_v33  ;;  %v3812_v33 = vld [vmem:[#allocation8 + $0x13c8] sm:$0xff] }
 0x3f8   :  { %v3816_v39 = vld [vmem:[#allocation8 + $0x13e8] sm:$0xff]  ;;  %v3823_v12 = vld [vmem:[#allocation8 + $0x1420] sm:$0xff] }
 0x3f9   :  { %9630 = vmatpush1.bf16.msra.mxu0 %v9629_v59  ;;  %v3798_v59 = vld [vmem:[#allocation8 + $0x1358] sm:$0xff] }
 0x3fa   :  { %9758 = vmatpush1.bf16.msra.mxu1 %v9757_v54  ;;  %9632 = vmatprep.subr.bf16.mxu0 %v9631_v61  ;;  %v3802_v54 = vld [vmem:[#allocation8 + $0x1378] sm:$0xff]  ;;  %v9641_v61 = vpack.c.bf16 %v3791_v45, %v3787_v13  ;;  %v9777_v13 = vpack.c.bf16 %v3809_v32, %v3805_v40  ;;  %v9651_v45 = vpack.c.bf16 %v3816_v39, %v3812_v33  ;;  %v3639_v32 = vrot.slane %v11489_v31, 1  ;;  %v3827_v39 = vld [vmem:[#allocation8 + $0x1440] sm:$0xff] }
 0x3fb   :  { %9760 = vmatprep.subr.bf16.mxu1 %v9759_v1  ;;  %v3799_v1 = vld [vmem:[#allocation8 + $0x1360] sm:$0xff]  ;;  %v9771_v43 = vpack.c.bf16 %v3802_v54, %v3798_v59  ;;  %v3820_v59 = vld [vmem:[#allocation8 + $0x1408] sm:$0xff]  ;;  %v9657_v40 = vpack.c.bf16 %v3823_v12, %v3819_v46  ;;  %v3838_v31 = vld [vmem:[#allocation8 + $0x1498] sm:$0xff] }
 0x3fc   :  { %v3824_v54 = vld [vmem:[#allocation8 + $0x1428] sm:$0xff]  ;;  %v3640_v26 = vsel %vm1568_vm3, %v3628_v30, %v3639_v32 }
 0x3fd   :  { %9634 = vmatpush1.bf16.msra.mxu0 %v9633_v21  ;;  %v3806_v21 = vld [vmem:[#allocation8 + $0x1398] sm:$0xff] }
 0x3fe   :  { %9762 = vmatpush1.bf16.msra.mxu1 %v9761_v24  ;;  %9636 = vmatprep.subr.bf16.mxu0 %v9635_v8  ;;  %v3810_v24 = vld [vmem:[#allocation8 + $0x13b8] sm:$0xff]  ;;  %v9645_v8 = vpack.c.bf16 %v3799_v1, %v3795_v4  ;;  %v9781_v4 = vpack.c.bf16 %v3817_v6, %v3813_v23  ;;  %v9655_v1 = vpack.c.bf16 %v3824_v54, %v3820_v59  ;;  %v3835_v6 = vld [vmem:[#allocation8 + $0x1480] sm:$0xff]  ;;  %v3837_v54 = vld [vmem:[#allocation8 + $0x1490] sm:$0xff] }
 0x3ff   :  { %9764 = vmatprep.subr.bf16.mxu1 %v9763_v10  ;;  %v3807_v10 = vld [vmem:[#allocation8 + $0x13a0] sm:$0xff]  ;;  %v9775_v38 = vpack.c.bf16 %v3810_v24, %v3806_v21  ;;  %v3641_v21 = vrot.slane %v11496_v11, 1  ;;  %v3825_v24 = vld [vmem:[#allocation8 + $0x1430] sm:$0xff] }
 0x400   :  { %v3831_v11 = vld [vmem:[#allocation8 + $0x1460] sm:$0xff] }
 0x401   :  { %9638 = vmatpush1.bf16.msra.mxu0 %v9637_v42  ;;  %v3814_v42 = vld [vmem:[#allocation8 + $0x13d8] sm:$0xff]  ;;  %v9661_v23 = vpack.c.bf16 %v3831_v11, %v3827_v39  ;;  %v3839_v59 = vld [vmem:[#allocation8 + $0x14a0] sm:$0xff]  ;;  %v3636_v39 = vrot.slane %v11506_v16, 1  ;;  %v3860_v16 = vld [vmem:[#allocation8 + $0x1548] sm:$0xff] }
 0x402   :  { %9766 = vmatpush1.bf16.msra.mxu1 %v9765_v28  ;;  %9640 = vmatprep.subr.bf16.mxu0 %v9639_v48  ;;  %v3818_v28 = vld [vmem:[#allocation8 + $0x13f8] sm:$0xff]  ;;  %v9649_v48 = vpack.c.bf16 %v3807_v10, %v3803_v53 }
 0x403   :  { %9768 = vmatprep.subr.bf16.mxu1 %v9767_v52  ;;  %v3815_v52 = vld [vmem:[#allocation8 + $0x13e0] sm:$0xff]  ;;  %v9779_v20 = vpack.c.bf16 %v3818_v28, %v3814_v42  ;;  %v3830_v53 = vld [vmem:[#allocation8 + $0x1458] sm:$0xff]  ;;  %v3829_v42 = vld [vmem:[#allocation8 + $0x1450] sm:$0xff] }
 0x404   :  { %v3834_v10 = vld [vmem:[#allocation8 + $0x1478] sm:$0xff] }
 0x405   :  { %9642 = vmatpush1.bf16.msra.mxu0 %v9641_v61  ;;  %v3822_v61 = vld [vmem:[#allocation8 + $0x1418] sm:$0xff]  ;;  %v9787_v28 = vpack.c.bf16 %v3834_v10, %v3830_v53  ;;  %v3637_v53 = vrot.slane %v11543_v22, 1  ;;  %v3849_v10 = vld [vmem:[#allocation8 + $0x14f0] sm:$0xff] }
 0x406   :  { %9770 = vmatpush1.bf16.msra.mxu1 %v9769_v62  ;;  %9644 = vmatprep.subr.bf16.mxu0 %v9643_v63  ;;  %v3826_v62 = vld [vmem:[#allocation8 + $0x1438] sm:$0xff]  ;;  %v9653_v63 = vpack.c.bf16 %v3815_v52, %v3811_v44  ;;  %v3840_v44 = vld [vmem:[#allocation8 + $0x14a8] sm:$0xff] }
 0x407   :  { %9772 = vmatprep.subr.bf16.mxu1 %v9771_v43  ;;  %v9783_v43 = vpack.c.bf16 %v3826_v62, %v3822_v61  ;;  %v3842_v52 = vld [vmem:[#allocation8 + $0x14b8] sm:$0xff] }
 0x408   :  { %v9791_v62 = vpack.c.bf16 %v3842_v52, %v3838_v31  ;;  %v3857_v31 = vld [vmem:[#allocation8 + $0x1530] sm:$0xff]  ;;  %v3864_v52 = vld [vmem:[#allocation8 + $0x1568] sm:$0xff] }
 0x409   :  { %9646 = vmatpush1.bf16.msra.mxu0 %v9645_v8  ;;  %v3828_v8 = vld [vmem:[#allocation8 + $0x1448] sm:$0xff] }
 0x40a   :  { %9774 = vmatpush1.bf16.msra.mxu1 %v9773_v50  ;;  %9648 = vmatprep.subr.bf16.mxu0 %v9647_v14  ;;  %v3832_v50 = vld [vmem:[#allocation8 + $0x1468] sm:$0xff]  ;;  %v3627_v14 = vrot.slane %v11439_v57, 1  ;;  %v3642_v57 = vsel %vm1568_vm3, %v3631_v2, %v3641_v21 }
 0x40b   :  { %9776 = vmatprep.subr.bf16.mxu1 %v9775_v38  ;;  %v9785_v38 = vpack.c.bf16 %v3825_v24, %v3821_v18  ;;  %v9659_v33 = vpack.c.bf16 %v3832_v50, %v3828_v8  ;;  %v3847_v24 = vld [vmem:[#allocation8 + $0x14e0] sm:$0xff]  ;;  %v3845_v8 = vld [vmem:[#allocation8 + $0x14d0] sm:$0xff] }
 0x40c   :  { %v3629_v19 = vsel %vm1568_vm3, %v3627_v14, %v3628_v30  ;;  %v3846_v30 = vld [vmem:[#allocation8 + $0x14d8] sm:$0xff] }
 0x40d   :  { %9650 = vmatpush1.bf16.msra.mxu0 %v9649_v48  ;;  %v3649_v48 = vrot.slane %v11515_v56, 1  ;;  %v3647_v56 = vrot.slane %v11509_v25, 1  ;;  %v3850_v25 = vld [vmem:[#allocation8 + $0x14f8] sm:$0xff] }
 0x40e   :  { %9778 = vmatpush1.bf16.msra.mxu1 %v9777_v13  ;;  %9652 = vmatprep.subr.bf16.mxu0 %v9651_v45  ;;  %v3833_v13 = vld [vmem:[#allocation8 + $0x1470] sm:$0xff]  ;;  %v3836_v45 = vld [vmem:[#allocation8 + $0x1488] sm:$0xff]  ;;  %v9795_v14 = vpack.c.bf16 %v3850_v25, %v3846_v30  ;;  %v3874_v30 = vld [vmem:[#allocation8 + $0x15b8] sm:$0xff] }
 0x40f   :  { %9780 = vmatprep.subr.bf16.mxu1 %v9779_v20  ;;  %v9789_v2 = vpack.c.bf16 %v3833_v13, %v3829_v42  ;;  %v9663_v20 = vpack.c.bf16 %v3840_v44, %v3836_v45  ;;  %v3650_v61 = vsel %vm1568_vm3, %v3641_v21, %v3649_v48  ;;  %v3648_v46 = vsel %vm1568_vm3, %v3639_v32, %v3647_v56  ;;  %v3843_v21 = vld [vmem:[#allocation8 + $0x14c0] sm:$0xff]  ;;  %v3858_v32 = vld [vmem:[#allocation8 + $0x1538] sm:$0xff]  ;;  %v3853_v13 = vld [vmem:[#allocation8 + $0x1510] sm:$0xff] }
 0x410   :  { %v3672_v50 = vsel %vm1568_vm3, %v3649_v48, 0.0  ;;  %v3671_v11 = vsel %vm1568_vm3, %v3647_v56, 0.0  ;;  %v9797_v42 = vpack.c.bf16 %v3849_v10, %v3845_v8  ;;  %v3855_v48 = vld [vmem:[#allocation8 + $0x1520] sm:$0xff]  ;;  %v3638_v45 = vsel %vm1568_vm3, %v3636_v39, %v3637_v53  ;;  %v3873_v8 = vld [vmem:[#allocation8 + $0x15b0] sm:$0xff]  ;;  %v3878_v10 = vld [vmem:[#allocation8 + $0x15d8] sm:$0xff] }
 0x411   :  { %9654 = vmatpush1.bf16.msra.mxu0 %v9653_v63  ;;  %v3841_v63 = vld [vmem:[#allocation8 + $0x14b0] sm:$0xff]  ;;  %v9801_v56 = vpack.c.bf16 %v3857_v31, %v3853_v13  ;;  %v3879_v39 = vld [vmem:[#allocation8 + $0x15e0] sm:$0xff]  ;;  %v3886_v13 = vld [vmem:[#allocation8 + $0x1618] sm:$0xff] }
 0x412   :  { %9782 = vmatpush1.bf16.msra.mxu1 %v9781_v4  ;;  %9656 = vmatprep.subr.bf16.mxu0 %v9655_v1  ;;  %v3844_v4 = vld [vmem:[#allocation8 + $0x14c8] sm:$0xff]  ;;  %v9793_v12 = vpack.c.bf16 %v3841_v63, %v3837_v54  ;;  %v3861_v54 = vld [vmem:[#allocation8 + $0x1550] sm:$0xff] }
 0x413   :  { %9784 = vmatprep.subr.bf16.mxu1 %v9783_v43  ;;  %v3848_v1 = vld [vmem:[#allocation8 + $0x14e8] sm:$0xff]  ;;  %v9665_v43 = vpack.c.bf16 %v3839_v59, %v3835_v6  ;;  %v3859_v6 = vld [vmem:[#allocation8 + $0x1540] sm:$0xff] }
 0x414   :  { %4012 = vmatmul.mubr.f32.vlgmr.msra.gmra.mrb[8].mxu0 %v3629_v19  ;;  %v9667_v18 = vpack.c.bf16 %v3848_v1, %v3844_v4  ;;  %v3863_v59 = vld [vmem:[#allocation8 + $0x1560] sm:$0xff]  ;;  %v3868_v63 = vld [vmem:[#allocation8 + $0x1588] sm:$0xff]  ;;  %v3870_v1 = vld [vmem:[#allocation8 + $0x1598] sm:$0xff] }
 0x415   :  { %4190 = vmatmul.mubr.f32.vlgmr.msra.gmra.mrb[8].mxu1 %v3629_v19  ;;  %8025 = vmatprep.mubr.msk.f32.mxu0 %vm1626_vm4, %v3642_v57  ;;  %v3856_v19 = vld [vmem:[#allocation8 + $0x1528] sm:$0xff]  ;;  %v9677_v25 = vpack.c.bf16 %v3863_v59, %v3859_v6  ;;  %v3894_v59 = vld [vmem:[#allocation8 + $0x1658] sm:$0xff] }
 0x416   :  { %9658 = vmatpush1.bf16.msra.mxu0 %v9657_v40  ;;  %8033 = vmatprep.mubr.msk.f32.mxu1 %vm1626_vm4, %v3642_v57  ;;  %v3852_v40 = vld [vmem:[#allocation8 + $0x1508] sm:$0xff] }
 0x417   :  { %9786 = vmatpush1.bf16.msra.mxu1 %v9785_v38  ;;  %9660 = vmatprep.subr.bf16.mxu0 %v9659_v33  ;;  %v3854_v38 = vld [vmem:[#allocation8 + $0x1518] sm:$0xff]  ;;  %v9669_v33 = vpack.c.bf16 %v3847_v24, %v3843_v21  ;;  %v9671_v57 = vpack.c.bf16 %v3856_v19, %v3852_v40  ;;  %v3872_v4 = vld [vmem:[#allocation8 + $0x15a8] sm:$0xff]  ;;  %v3869_v21 = vld [vmem:[#allocation8 + $0x1590] sm:$0xff]  ;;  %v9807_v24 = vpack.c.bf16 %v3874_v30, %v3870_v1 }
 0x418   :  { %8026 = vmatmul.mubr.msk.f32.gmra.mrb[10].mxu0 %vm1626_vm4, %v3640_v26  ;;  %9788 = vmatprep.subr.bf16.mxu1 %v9787_v28  ;;  %v3851_v28 = vld [vmem:[#allocation8 + $0x1500] sm:$0xff]  ;;  %v9799_v44 = vpack.c.bf16 %v3858_v32, %v3854_v38  ;;  %v3882_v40 = vld [vmem:[#allocation8 + $0x15f8] sm:$0xff]  ;;  %v9809_v38 = vpack.c.bf16 %v3873_v8, %v3869_v21  ;;  %v3896_v6 = vld [vmem:[#allocation8 + $0x1668] sm:$0xff] }
 0x419   :  { %8034 = vmatmul.mubr.msk.f32.gmra.mrb[10].mxu1 %vm1626_vm4, %v3640_v26  ;;  %4023 = vmatprep.mubr.f32.mxu0 %v3650_v61  ;;  %v3866_v26 = vld [vmem:[#allocation8 + $0x1578] sm:$0xff]  ;;  %v3895_v1 = vld [vmem:[#allocation8 + $0x1660] sm:$0xff]  ;;  %v3893_v30 = vld [vmem:[#allocation8 + $0x1650] sm:$0xff] }
 0x41a   :  { %9662 = vmatpush1.bf16.msra.mxu0 %v9661_v23  ;;  %4201 = vmatprep.mubr.f32.mxu1 %v3650_v61  ;;  %v3862_v23 = vld [vmem:[#allocation8 + $0x1558] sm:$0xff] }
 0x41b   :  { %9790 = vmatpush1.bf16.msra.mxu1 %v9789_v2  ;;  %9664 = vmatprep.subr.bf16.mxu0 %v9663_v20  ;;  %v9673_v2 = vpack.c.bf16 %v3855_v48, %v3851_v28  ;;  %v9675_v20 = vpack.c.bf16 %v3864_v52, %v3860_v16  ;;  %v9803_v61 = vpack.c.bf16 %v3866_v26, %v3862_v23  ;;  %v3884_v28 = vld [vmem:[#allocation8 + $0x1608] sm:$0xff]  ;;  %v3883_v52 = vld [vmem:[#allocation8 + $0x1600] sm:$0xff]  ;;  %v3885_v26 = vld [vmem:[#allocation8 + $0x1610] sm:$0xff] }
 0x41c   :  { %4024 = vmatmul.mubr.f32.gmra.mrb[12].mxu0 %v3648_v46  ;;  %9792 = vmatprep.subr.bf16.mxu1 %v9791_v62  ;;  %v3865_v62 = vld [vmem:[#allocation8 + $0x1570] sm:$0xff]  ;;  %v3888_v48 = vld [vmem:[#allocation8 + $0x1628] sm:$0xff]  ;;  %v3887_v23 = vld [vmem:[#allocation8 + $0x1620] sm:$0xff] }
 0x41d   :  { %4202 = vmatmul.mubr.f32.gmra.mrb[12].mxu1 %v3648_v46  ;;  %8027 = vmatprep.mubr.msk.f32.mxu0 %vm1628_vm5, %v3672_v50  ;;  %v9679_v46 = vpack.c.bf16 %v3872_v4, %v3868_v63  ;;  %v9687_v16 = vpack.c.bf16 %v3888_v48, %v3884_v28  ;;  %v3891_v4 = vld [vmem:[#allocation8 + $0x1640] sm:$0xff]  ;;  %v3906_v21 = vld [vmem:[#allocation8 + $0x16b8] sm:$0xff] }
 0x41e   :  { %9666 = vmatpush1.bf16.msra.mxu0 %v9665_v43  ;;  %8035 = vmatprep.mubr.msk.f32.mxu1 %vm1628_vm5, %v3672_v50  ;;  %v9805_v43 = vpack.c.bf16 %v3865_v62, %v3861_v54  ;;  %v3876_v50 = vld [vmem:[#allocation8 + $0x15c8] sm:$0xff]  ;;  %v3898_v54 = vld [vmem:[#allocation8 + $0x1678] sm:$0xff]  ;;  %v3907_v48 = vld [vmem:[#allocation8 + $0x16c0] sm:$0xff] }
 0x41f   :  { %9794 = vmatpush1.bf16.msra.mxu1 %v9793_v12  ;;  %9668 = vmatprep.subr.bf16.mxu0 %v9667_v18  ;;  %v3867_v12 = vld [vmem:[#allocation8 + $0x1580] sm:$0xff] }
 0x420   :  { %8028 = vmatmul.mubr.msk.f32.gmra.mrb[14].mxu0 %vm1628_vm5, %v3671_v11  ;;  %9796 = vmatprep.subr.bf16.mxu1 %v9795_v14  ;;  %v3871_v18 = vld [vmem:[#allocation8 + $0x15a0] sm:$0xff]  ;;  %v3880_v14 = vld [vmem:[#allocation8 + $0x15e8] sm:$0xff] }
 0x421   :  { %8036 = vmatmul.mubr.msk.f32.gmra.mrb[14].mxu1 %vm1628_vm5, %v3671_v11  ;;  %4100 = vmatprep.mubr.f32.mxu0 %v3638_v45  ;;  %v9681_v19 = vpack.c.bf16 %v3871_v18, %v3867_v12  ;;  %v9683_v32 = vpack.c.bf16 %v3880_v14, %v3876_v50  ;;  %v3877_v11 = vld [vmem:[#allocation8 + $0x15d0] sm:$0xff]  ;;  %v3904_v12 = vld [vmem:[#allocation8 + $0x16a8] sm:$0xff]  ;;  %v3902_v18 = vld [vmem:[#allocation8 + $0x1698] sm:$0xff] }
 0x422   :  { %9670 = vmatpush1.bf16.msra.mxu0 %v9669_v33  ;;  %4278 = vmatprep.mubr.f32.mxu1 %v3638_v45  ;;  %v3875_v33 = vld [vmem:[#allocation8 + $0x15c0] sm:$0xff]  ;;  %v3890_v45 = vld [vmem:[#allocation8 + $0x1638] sm:$0xff] }
 0x423   :  { %9798 = vmatpush1.bf16.msra.mxu1 %v9797_v42  ;;  %9672 = vmatprep.subr.bf16.mxu0 %v9671_v57  ;;  %v9811_v42 = vpack.c.bf16 %v3882_v40, %v3878_v10  ;;  %v3881_v57 = vld [vmem:[#allocation8 + $0x15f0] sm:$0xff]  ;;  %v3899_v14 = vld [vmem:[#allocation8 + $0x1680] sm:$0xff] }
 0x424   :  { %9800 = vmatprep.subr.bf16.mxu1 %v9799_v44  ;;  %v9685_v44 = vpack.c.bf16 %v3879_v39, %v3875_v33  ;;  %v9813_v31 = vpack.c.bf16 %v3881_v57, %v3877_v11  ;;  %v3903_v10 = vld [vmem:[#allocation8 + $0x16a0] sm:$0xff]  ;;  %v3901_v40 = vld [vmem:[#allocation8 + $0x1690] sm:$0xff]  ;;  %v3912_v33 = vld [vmem:[#allocation8 + $0x16e8] sm:$0xff] }
 0x425   :  { %v3910_v39 = vld [vmem:[#allocation8 + $0x16d8] sm:$0xff] }
 0x426   :  { %9674 = vmatpush1.bf16.msra.mxu0 %v9673_v2  ;;  %v9815_v2 = vpack.c.bf16 %v3890_v45, %v3886_v13  ;;  %v3914_v11 = vld [vmem:[#allocation8 + $0x16f8] sm:$0xff]  ;;  %v3911_v13 = vld [vmem:[#allocation8 + $0x16e0] sm:$0xff]  ;;  %v3909_v45 = vld [vmem:[#allocation8 + $0x16d0] sm:$0xff] }
 0x427   :  { %9802 = vmatpush1.bf16.msra.mxu1 %v9801_v56  ;;  %9676 = vmatprep.subr.bf16.mxu0 %v9675_v20  ;;  %v3889_v56 = vld [vmem:[#allocation8 + $0x1630] sm:$0xff]  ;;  %v3892_v20 = vld [vmem:[#allocation8 + $0x1648] sm:$0xff] }
 0x428   :  { %9804 = vmatprep.subr.bf16.mxu1 %v9803_v61  ;;  %v9689_v61 = vpack.c.bf16 %v3887_v23, %v3883_v52  ;;  %v9817_v62 = vpack.c.bf16 %v3889_v56, %v3885_v26  ;;  %v9691_v63 = vpack.c.bf16 %v3896_v6, %v3892_v20  ;;  %v3920_v52 = vld [vmem:[#allocation8 + $0x1728] sm:$0xff]  ;;  %v3918_v23 = vld [vmem:[#allocation8 + $0x1718] sm:$0xff]  ;;  %v3915_v6 = vld [vmem:[#allocation8 + $0x1700] sm:$0xff] }
 0x429   :  { %v3922_v26 = vld [vmem:[#allocation8 + $0x1738] sm:$0xff] }
 0x42a   :  { %9678 = vmatpush1.bf16.msra.mxu0 %v9677_v25  ;;  %v9819_v25 = vpack.c.bf16 %v3898_v54, %v3894_v59  ;;  %v3919_v59 = vld [vmem:[#allocation8 + $0x1720] sm:$0xff]  ;;  %v3917_v54 = vld [vmem:[#allocation8 + $0x1710] sm:$0xff] }
 0x42b   :  { %9806 = vmatpush1.bf16.msra.mxu1 %v9805_v43  ;;  %9680 = vmatprep.subr.bf16.mxu0 %v9679_v46  ;;  %v3897_v43 = vld [vmem:[#allocation8 + $0x1670] sm:$0xff]  ;;  %v3900_v46 = vld [vmem:[#allocation8 + $0x1688] sm:$0xff] }
 0x42c   :  { %9808 = vmatprep.subr.bf16.mxu1 %v9807_v24  ;;  %v9693_v24 = vpack.c.bf16 %v3895_v1, %v3891_v4  ;;  %v9821_v8 = vpack.c.bf16 %v3897_v43, %v3893_v30  ;;  %v9695_v50 = vpack.c.bf16 %v3904_v12, %v3900_v46  ;;  %v3928_v4 = vld [vmem:[#allocation8 + $0x1768] sm:$0xff]  ;;  %v3926_v1 = vld [vmem:[#allocation8 + $0x1758] sm:$0xff]  ;;  %v3923_v12 = vld [vmem:[#allocation8 + $0x1740] sm:$0xff] }
 0x42d   :  { %v3930_v30 = vld [vmem:[#allocation8 + $0x1778] sm:$0xff] }
 0x42e   :  { %9682 = vmatpush1.bf16.msra.mxu0 %v9681_v19  ;;  %v9823_v19 = vpack.c.bf16 %v3906_v21, %v3902_v18  ;;  %v3927_v18 = vld [vmem:[#allocation8 + $0x1760] sm:$0xff]  ;;  %v3925_v21 = vld [vmem:[#allocation8 + $0x1750] sm:$0xff] }
 0x42f   :  { %9810 = vmatpush1.bf16.msra.mxu1 %v9809_v38  ;;  %9684 = vmatprep.subr.bf16.mxu0 %v9683_v32  ;;  %v3905_v38 = vld [vmem:[#allocation8 + $0x16b0] sm:$0xff]  ;;  %v3908_v32 = vld [vmem:[#allocation8 + $0x16c8] sm:$0xff] }
 0x430   :  { %9812 = vmatprep.subr.bf16.mxu1 %v9811_v42  ;;  %v9697_v42 = vpack.c.bf16 %v3903_v10, %v3899_v14  ;;  %v9825_v57 = vpack.c.bf16 %v3905_v38, %v3901_v40  ;;  %v9699_v28 = vpack.c.bf16 %v3912_v33, %v3908_v32  ;;  %v3936_v14 = vld [vmem:[#allocation8 + $0x17a8] sm:$0xff]  ;;  %v3934_v10 = vld [vmem:[#allocation8 + $0x1798] sm:$0xff]  ;;  %v3931_v33 = vld [vmem:[#allocation8 + $0x1780] sm:$0xff] }
 0x431   :  { %v3938_v40 = vld [vmem:[#allocation8 + $0x17b8] sm:$0xff] }
 0x432   :  { %9686 = vmatpush1.bf16.msra.mxu0 %v9685_v44  ;;  %v9827_v44 = vpack.c.bf16 %v3914_v11, %v3910_v39  ;;  %v3935_v39 = vld [vmem:[#allocation8 + $0x17a0] sm:$0xff]  ;;  %v3933_v11 = vld [vmem:[#allocation8 + $0x1790] sm:$0xff] }
 0x433   :  { %9814 = vmatpush1.bf16.msra.mxu1 %v9813_v31  ;;  %9688 = vmatprep.subr.bf16.mxu0 %v9687_v16  ;;  %v3913_v31 = vld [vmem:[#allocation8 + $0x16f0] sm:$0xff]  ;;  %v3916_v16 = vld [vmem:[#allocation8 + $0x1708] sm:$0xff] }
 0x434   :  { %9816 = vmatprep.subr.bf16.mxu1 %v9815_v2  ;;  %v9701_v2 = vpack.c.bf16 %v3911_v13, %v3907_v48  ;;  %v9829_v56 = vpack.c.bf16 %v3913_v31, %v3909_v45  ;;  %v9703_v20 = vpack.c.bf16 %v3920_v52, %v3916_v16  ;;  %v3944_v48 = vld [vmem:[#allocation8 + $0x17e8] sm:$0xff]  ;;  %v3942_v13 = vld [vmem:[#allocation8 + $0x17d8] sm:$0xff]  ;;  %v3939_v52 = vld [vmem:[#allocation8 + $0x17c0] sm:$0xff] }
 0x435   :  { %v3946_v45 = vld [vmem:[#allocation8 + $0x17f8] sm:$0xff] }
 0x436   :  { %9690 = vmatpush1.bf16.msra.mxu0 %v9689_v61  ;;  %v9831_v61 = vpack.c.bf16 %v3922_v26, %v3918_v23  ;;  %v3943_v23 = vld [vmem:[#allocation8 + $0x17e0] sm:$0xff]  ;;  %v9843_v26 = vpack.c.bf16 %v3946_v45, %v3942_v13 }
 0x437   :  { %9818 = vmatpush1.bf16.msra.mxu1 %v9817_v62  ;;  %9692 = vmatprep.subr.bf16.mxu0 %v9691_v63  ;;  %v3921_v62 = vld [vmem:[#allocation8 + $0x1730] sm:$0xff]  ;;  %v3924_v63 = vld [vmem:[#allocation8 + $0x1748] sm:$0xff] }
 0x438   :  { %9820 = vmatprep.subr.bf16.mxu1 %v9819_v25  ;;  %v9705_v25 = vpack.c.bf16 %v3919_v59, %v3915_v6  ;;  %v9833_v43 = vpack.c.bf16 %v3921_v62, %v3917_v54  ;;  %v9707_v46 = vpack.c.bf16 %v3928_v4, %v3924_v63  ;;  %v3634_v59 = vrot.slane %v11464_v55, 1 }
 0x439   :  { %v3645_v54 = vrot.slane %v11548_v49, 1  ;;  %v3643_v63 = vrot.slane %v11493_v5, 1  ;;  %v3651_v55 = vrot.slane %v11512_v35, 1 }
 0x43a   :  { %9694 = vmatpush1.bf16.msra.mxu0 %v9693_v24  ;;  %v9835_v24 = vpack.c.bf16 %v3930_v30, %v3926_v1  ;;  %v3653_v1 = vrot.slane %v11555_v37, 1  ;;  %v2322_v37 = vld [vmem:[#allocation10] sm:$0xf] }
 0x43b   :  { %9822 = vmatpush1.bf16.msra.mxu1 %v9821_v8  ;;  %9696 = vmatprep.subr.bf16.mxu0 %v9695_v50  ;;  %v3929_v8 = vld [vmem:[#allocation8 + $0x1770] sm:$0xff]  ;;  %v3932_v50 = vld [vmem:[#allocation8 + $0x1788] sm:$0xff]  ;;  %v3646_v4 = vsel %vm1568_vm3, %v3637_v53, %v3645_v54  ;;  %v3652_v22 = vsel %vm1568_vm3, %v3643_v63, %v3651_v55  ;;  %v3673_v35 = vsel %vm1568_vm3, %v3651_v55, 0.0  ;;  %v4323_v30 = vrot.slane %v2322_v37, %v11421_v51 }
 0x43c   :  { %9824 = vmatprep.subr.bf16.mxu1 %v9823_v19  ;;  %v9709_v19 = vpack.c.bf16 %v3927_v18, %v3923_v12  ;;  %v9837_v38 = vpack.c.bf16 %v3929_v8, %v3925_v21  ;;  %v9711_v32 = vpack.c.bf16 %v3936_v14, %v3932_v50  ;;  %v3654_v5 = vsel %vm1568_vm3, %v3645_v54, %v3653_v1 }
 0x43d   :  { %v3674_v49 = vsel %vm1568_vm3, %v3653_v1, 0.0  ;;  %v4327_v12 = vrot.slane %v2322_v37, %v11427_v3  ;;  %v4335_v21 = vrot.slane %v2322_v37, %v11451_v29 }
 0x43e   :  { %9698 = vmatpush1.bf16.msra.mxu0 %v9697_v42  ;;  %v9839_v42 = vpack.c.bf16 %v3938_v40, %v3934_v10 }
 0x43f   :  { %9826 = vmatpush1.bf16.msra.mxu1 %v9825_v57  ;;  %9700 = vmatprep.subr.bf16.mxu0 %v9699_v28  ;;  %v3937_v57 = vld [vmem:[#allocation8 + $0x17b0] sm:$0xff]  ;;  %v3940_v28 = vld [vmem:[#allocation8 + $0x17c8] sm:$0xff] }
 0x440   :  { %9828 = vmatprep.subr.bf16.mxu1 %v9827_v44  ;;  %v9713_v44 = vpack.c.bf16 %v3935_v39, %v3931_v33  ;;  %v9841_v31 = vpack.c.bf16 %v3937_v57, %v3933_v11  ;;  %v9715_v16 = vpack.c.bf16 %v3944_v48, %v3940_v28 }
 0x442   :  { %9702 = vmatpush1.bf16.msra.mxu0 %v9701_v2  ;;  %v3941_v2 = vld [vmem:[#allocation8 + $0x17d0] sm:$0xff] }
 0x443   :  { %9830 = vmatpush1.bf16.msra.mxu1 %v9829_v56  ;;  %9704 = vmatprep.subr.bf16.mxu0 %v9703_v20  ;;  %v3945_v56 = vld [vmem:[#allocation8 + $0x17f0] sm:$0xff]  ;;  %v9717_v20 = vpack.c.bf16 %v3943_v23, %v3939_v52 }
 0x444   :  { %9832 = vmatprep.subr.bf16.mxu1 %v9831_v61  ;;  %v9845_v6 = vpack.c.bf16 %v3945_v56, %v3941_v2  ;;  %v3633_v61 = vrot.slane %v11442_v0, 1  ;;  %v3644_v0 = vsel %vm1568_vm3, %v3634_v59, %v3643_v63 }
 0x446   :  { %9706 = vmatpush1.bf16.msra.mxu0 %v9705_v25  ;;  %v3635_v62 = vsel %vm1568_vm3, %v3633_v61, %v3634_v59 }
 0x447   :  { %9834 = vmatpush1.bf16.msra.mxu1 %v9833_v43  ;;  %9708 = vmatprep.subr.bf16.mxu0 %v9707_v46  ;;  %v4331_v46 = vrot.slane %v2322_v37, %v11424_v15 }
 0x448   :  { %9836 = vmatprep.subr.bf16.mxu1 %v9835_v24 }
 0x44a   :  { %9710 = vmatpush1.bf16.msra.mxu0 %v9709_v19 }
 0x44b   :  { %9838 = vmatpush1.bf16.msra.mxu1 %v9837_v38  ;;  %9712 = vmatprep.subr.bf16.mxu0 %v9711_v32 }
 0x44c   :  { %9840 = vmatprep.subr.bf16.mxu1 %v9839_v42 }
 0x44e   :  { %9714 = vmatpush1.bf16.msra.mxu0 %v9713_v44 }
 0x44f   :  { %9842 = vmatpush1.bf16.msra.mxu1 %v9841_v31  ;;  %9716 = vmatprep.subr.bf16.mxu0 %v9715_v16 }
 0x450   :  { %9844 = vmatprep.subr.bf16.mxu1 %v9843_v26 }
 0x452   :  { %9718 = vmatpush1.bf16.msra.mxu0 %v9717_v20 }
 0x453   :  { %9846 = vmatpush1.bf16.msra.mxu1 %v9845_v6 }
 0x455   :  { %4101 = vmatmul.mubr.f32.vlgmr.msra.gmra.mrb[8].mxu0 %v3635_v62 }
 0x456   :  { %4279 = vmatmul.mubr.f32.vlgmr.msra.gmra.mrb[8].mxu1 %v3635_v62  ;;  %8029 = vmatprep.mubr.msk.f32.mxu0 %vm1626_vm4, %v3646_v4 }
 0x457   :  { %8037 = vmatprep.mubr.msk.f32.mxu1 %vm1626_vm4, %v3646_v4 }
 0x459   :  { %8030 = vmatmul.mubr.msk.f32.gmra.mrb[10].mxu0 %vm1626_vm4, %v3644_v0 }
 0x45a   :  { %8038 = vmatmul.mubr.msk.f32.gmra.mrb[10].mxu1 %vm1626_vm4, %v3644_v0  ;;  %4112 = vmatprep.mubr.f32.mxu0 %v3654_v5 }
 0x45b   :  { %4290 = vmatprep.mubr.f32.mxu1 %v3654_v5 }
 0x45d   :  { %4113 = vmatmul.mubr.f32.gmra.mrb[12].mxu0 %v3652_v22 }
 0x45e   :  { %4291 = vmatmul.mubr.f32.gmra.mrb[12].mxu1 %v3652_v22  ;;  %8031 = vmatprep.mubr.msk.f32.mxu0 %vm1628_vm5, %v3674_v49 }
 0x45f   :  { %8039 = vmatprep.mubr.msk.f32.mxu1 %vm1628_vm5, %v3674_v49 }
 0x461   :  { %8032 = vmatmul.mubr.msk.f32.gmra.mrb[14].mxu0 %vm1628_vm5, %v3673_v35 }
 0x462   :  { %8040 = vmatmul.mubr.msk.f32.gmra.mrb[14].mxu1 %vm1628_vm5, %v3673_v35 }
 0x528   :  { %v4102_v53 = vpop.f32.mrb[8].mxu0 }
 0x529   :  { %v4280_v25 = vpop.f32.mrb[8].mxu1  ;;  %v4104_v43 = vpop.f32.mrb[9].mxu0  ;;  %v11689_v8 = vadd.f32 %v4323_v30, %v4102_v53 }
 0x52a   :  { %v4282_v18 = vpop.f32.mrb[9].mxu1  ;;  %v11693_v40 = vadd.f32 %v4331_v46, %v4280_v25  ;;  %v11695_v19 = vadd.f32 %v4327_v12, %v4104_v43 }
 0x52b   :  { %v11701_v39 = vadd.f32 %v4335_v21, %v4282_v18 }
 0x52c   :  { %v4108_v24 = vpop.f32.mrb[10].mxu0 }
 0x52d   :  { %v11691_v50 = vadd.f32 %v4323_v30, %v4108_v24  ;;  %v4286_v14 = vpop.f32.mrb[10].mxu1  ;;  %v4110_v10 = vpop.f32.mrb[11].mxu0 }
 0x52e   :  { %v11697_v38 = vadd.f32 %v4331_v46, %v4286_v14  ;;  %v11699_v32 = vadd.f32 %v4327_v12, %v4110_v10  ;;  %v4288_v33 = vpop.f32.mrb[11].mxu1 }
 0x52f   :  { %v4356_v11 = vadd.f32 %v11691_v50, %v11689_v8  ;;  %v4421_v42 = vmax.f32 %v11689_v8, %v11691_v50  ;;  %v11707_v57 = vadd.f32 %v4335_v21, %v4288_v33 }
 0x530   :  { %v4370_v28 = vadd.f32 %v11697_v38, %v11693_v40  ;;  %v4435_v48 = vmax.f32 %v11693_v40, %v11697_v38  ;;  %v4363_v13 = vadd.f32 %v11699_v32, %v11695_v19  ;;  %v4428_v45 = vmax.f32 %v11695_v19, %v11699_v32  ;;  %v4114_v44 = vpop.f32.mrb[12].mxu0 }
 0x531   :  { %v4357_v31 = vrot.slane %v4356_v11, 4  ;;  %v4422_v16 = vrot.slane %v4421_v42, 4  ;;  %v4377_v52 = vadd.f32 %v11707_v57, %v11701_v39  ;;  %v4442_v23 = vmax.f32 %v11701_v39, %v11707_v57  ;;  %v4292_v26 = vpop.f32.mrb[12].mxu1  ;;  %v4116_v2 = vpop.f32.mrb[13].mxu0 }
 0x532   :  { %v4371_v56 = vrot.slane %v4370_v28, 4  ;;  %v4436_v20 = vrot.slane %v4435_v48, 4  ;;  %v4364_v6 = vrot.slane %v4363_v13, 4  ;;  %v4429_v59 = vrot.slane %v4428_v45, 4  ;;  %v4294_v54 = vpop.f32.mrb[13].mxu1 }
 0x533   :  { %v4358_v61 = vadd.f32 %v4357_v31, %v4356_v11  ;;  %v4378_v62 = vrot.slane %v4377_v52, 4  ;;  %v4443_v63 = vrot.slane %v4442_v23, 4  ;;  %v4423_v4 = vmax.f32 %v4421_v42, %v4422_v16 }
 0x534   :  { %v11721_v1 = vadd.f32 %v4371_v56, %v4370_v28  ;;  %v11723_v0 = vmax.f32 %v4435_v48, %v4436_v20  ;;  %v4365_v55 = vadd.f32 %v4364_v6, %v4363_v13  ;;  %v4120_v5 = vpop.f32.mrb[14].mxu0  ;;  %v11725_v22 = vmax.f32 %v4428_v45, %v4429_v59 }
 0x535   :  { %v4379_v49 = vadd.f32 %v4378_v62, %v4377_v52  ;;  %v11727_v35 = vmax.f32 %v4442_v23, %v4443_v63  ;;  %v11729_v37 = vadd.f32 %v4323_v30, %v4114_v44  ;;  %v4298_v53 = vpop.f32.mrb[14].mxu1  ;;  %v4122_v25 = vpop.f32.mrb[15].mxu0  ;;  %v11732_v24 = vadd.f32 %v4331_v46, %v4292_v26 }
 0x536   :  { %v4366_v18 = vrot.slane %v4365_v55, 2  ;;  %v11734_v14 = vadd.f32 %v4327_v12, %v4116_v2  ;;  %v4300_v10 = vpop.f32.mrb[15].mxu1  ;;  %v11736_v33 = vadd.f32 %v4335_v21, %v4294_v54  ;;  %v11738_v11 = vadd.f32 %v4323_v30, %v4120_v5 }
 0x537   :  { %v11740_v42 = vadd.f32 %v4331_v46, %v4298_v53  ;;  %v11742_v28 = vadd.f32 %v4327_v12, %v4122_v25  ;;  %v4380_v48 = vrot.slane %v4379_v49, 2  ;;  %v11744_v13 = vadd.f32 %v4335_v21, %v4300_v10 }
 0x538   :  { %13249 = vst [vmem:[#allocation35_spill] sm:$0xff] %v11738_v11  ;;  %v4424_v45 = vrot.slane %v4423_v4, 2  ;;  %v4359_v44 = vrot.slane %v4358_v61, 2  ;;  %v4384_v31 = vadd.f32 %v11738_v11, %v11729_v37  ;;  %v4449_v16 = vmax.f32 %v11729_v37, %v11738_v11 }
 0x539   :  { %13250 = vst [vmem:[#allocation36_spill] sm:$0xff] %v11742_v28  ;;  %13251 = vst [vmem:[#allocation37_spill] sm:$0xff] %v11744_v13  ;;  %v4398_v52 = vadd.f32 %v11740_v42, %v11732_v24  ;;  %v4463_v30 = vmax.f32 %v11732_v24, %v11740_v42  ;;  %v4391_v46 = vadd.f32 %v11742_v28, %v11734_v14 }
 0x53a   :  { %v4456_v12 = vmax.f32 %v11734_v14, %v11742_v28  ;;  %v4405_v21 = vadd.f32 %v11744_v13, %v11736_v33  ;;  %v4470_v23 = vmax.f32 %v11736_v33, %v11744_v13  ;;  %v4385_v26 = vrot.slane %v4384_v31, 4 }
 0x53b   :  { %v4450_v2 = vrot.slane %v4449_v16, 4  ;;  %v4399_v56 = vrot.slane %v4398_v52, 4  ;;  %v4464_v20 = vrot.slane %v4463_v30, 4  ;;  %v4392_v6 = vrot.slane %v4391_v46, 4 }
 0x53c   :  { %v4457_v59 = vrot.slane %v4456_v12, 4  ;;  %v4406_v54 = vrot.slane %v4405_v21, 4  ;;  %v4471_v62 = vrot.slane %v4470_v23, 4  ;;  %v4386_v63 = vadd.f32 %v4385_v26, %v4384_v31 }
 0x53d   :  { %v4451_v5 = vmax.f32 %v4449_v16, %v4450_v2  ;;  %v11762_v53 = vadd.f32 %v4399_v56, %v4398_v52  ;;  %v4367_v25 = vadd.f32 %v4366_v18, %v4365_v55  ;;  %v11764_v10 = vmax.f32 %v4463_v30, %v4464_v20 }
 0x53e   :  { %v4393_v34 = vadd.f32 %v4392_v6, %v4391_v46  ;;  %v4458_v43 = vmax.f32 %v4456_v12, %v4457_v59  ;;  %v4407_v17 = vadd.f32 %v4406_v54, %v4405_v21  ;;  %v4472_v41 = vmax.f32 %v4470_v23, %v4471_v62 }
 0x53f   :  { %v4425_v36 = vmax.f32 %v4423_v4, %v4424_v45  ;;  %v4452_v58 = vrot.slane %v4451_v5, 2  ;;  %v4360_v27 = vadd.f32 %v4359_v44, %v4358_v61  ;;  %v4387_v60 = vrot.slane %v4386_v63, 2 }
 0x540   :  { %v4394_v9 = vrot.slane %v4393_v34, 2  ;;  %v4408_v7 = vrot.slane %v4407_v17, 2  ;;  %v4381_v28 = vadd.f32 %v4380_v48, %v4379_v49  ;;  %v4368_v16 = vrot.slane %v4367_v25, 1 }
 0x541   :  { %v4426_v11 = vrot.slane %v4425_v36, 1  ;;  %v4453_v13 = vmax.f32 %v4451_v5, %v4452_v58  ;;  %v4361_v31 = vrot.slane %v4360_v27, 1  ;;  %v4388_v52 = vadd.f32 %v4387_v60, %v4386_v63 }
 0x542   :  { %v4382_v26 = vrot.slane %v4381_v28, 1  ;;  %v4409_v55 = vadd.f32 %v4408_v7, %v4407_v17  ;;  %v4395_v18 = vadd.f32 %v4394_v9, %v4393_v34  ;;  %v4401_v30 = vrot.slane %v11762_v53, 2 }
 0x543   :  { %v11767_v46 = vmax.f32 %v4425_v36, %v4426_v11  ;;  %v4454_v12 = vrot.slane %v4453_v13, 1  ;;  %v4362_v4 = vadd.f32 %v4361_v31, %v4360_v27  ;;  %v4389_v45 = vrot.slane %v4388_v52, 1 }
 0x544   :  { %v4383_v61 = vadd.f32 %v4382_v26, %v4381_v28  ;;  %v4410_v44 = vrot.slane %v4409_v55, 1  ;;  %v4396_v21 = vrot.slane %v4395_v18, 1  ;;  %v4369_v58 = vadd.f32 %v4368_v16, %v4367_v25 }
 0x545   :  { %v11769_v23 = vmax.f32 %v4453_v13, %v4454_v12  ;;  %v11771_v49 = vmul.f32 0.0625, %v4362_v4  ;;  %v4445_v60 = vrot.slane %v11727_v35, 2  ;;  %v4390_v48 = vadd.f32 %v4389_v45, %v4388_v52 }
 0x546   :  { %v4411_v7 = vadd.f32 %v4410_v44, %v4409_v55  ;;  %v11774_v34 = vmul.f32 0.0625, %v4383_v61  ;;  %v4397_v9 = vadd.f32 %v4396_v21, %v4395_v18  ;;  %v4473_v36 = vrot.slane %v4472_v41, 2 }
 0x547   :  { %v4541_v27 = vsel %vm4485_vm6, %v11769_v23, %v11767_v46  ;;  %v4446_v17 = vmax.f32 %v11727_v35, %v4445_v60  ;;  %v4431_v11 = vrot.slane %v11725_v22, 2  ;;  %v4417_v28 = vmul.f32 0.0625, %v4390_v48 }
 0x548   :  { %4549 = vrot.lane.b32.xlu1 %v4541_v27, %s10974_s21  ;;  %v11782_v13 = vmul.f32 0.0625, %v4411_v7  ;;  %v11784_v2 = vmul.f32 0.0625, %v4397_v9  ;;  %v4459_v56 = vrot.slane %v4458_v43, 2  ;;  %v4474_v6 = vmax.f32 %v4472_v41, %v4473_v36 }
 0x549   :  { %v4447_v20 = vrot.slane %v4446_v17, 1  ;;  %v4432_v59 = vmax.f32 %v11725_v22, %v4431_v11  ;;  %v4438_v54 = vrot.slane %v11723_v0, 2  ;;  %v4486_v35 = vsel %vm4485_vm6, %v4417_v28, %v11771_v49 }
 0x54a   :  { %v4489_v62 = vsel %vm4485_vm6, %v11782_v13, %v11774_v34  ;;  %v4460_v63 = vmax.f32 %v4458_v43, %v4459_v56  ;;  %4494 = vrot.lane.b32.xlu0 %v4486_v35, %s10974_s21  ;;  %v11794_v5 = vmul.f32 0.0625, %v4369_v58  ;;  %v4475_v25 = vrot.slane %v4474_v6, 1 }
 0x54b   :  { %v4433_v31 = vrot.slane %v4432_v59, 1  ;;  %v4439_v41 = vmax.f32 %v11723_v0, %v4438_v54  ;;  %v4466_v16 = vrot.slane %v11764_v10, 2  ;;  %v13252_v52 = vrot.slane %v11721_v1, 2 }
 0x54c   :  { %4500 = vrot.lane.b32.xlu1 %v4489_v62, %s10974_s21  ;;  %v4461_v22 = vrot.slane %v4460_v63, 1  ;;  %v4402_v55 = vadd.f32 %v4401_v30, %v11762_v53  ;;  %v4487_v43 = vsel %vm4485_vm6, %v11784_v2, %v11794_v5  ;;  %v11806_v18 = vmax.f32 %v4446_v17, %v4447_v20 }
 0x54d   :  { %v4374_v26 = vadd.f32 %v13252_v52, %v11721_v1  ;;  %v11808_v12 = vmax.f32 %v4474_v6, %v4475_v25  ;;  %v4440_v0 = vrot.slane %v4439_v41, 1  ;;  %v4467_v45 = vmax.f32 %v11764_v10, %v4466_v16 }
 0x54e   :  { %v4462_v4 = vmax.f32 %v4460_v63, %v4461_v22  ;;  %v4403_v44 = vrot.slane %v4402_v55, 1  ;;  %4496 = vrot.lane.b32.xlu0 %v4487_v43, %s10974_s21  ;;  %v4434_v53 = vmax.f32 %v4432_v59, %v4433_v31  ;;  %v13253_v36 = vlaneseq }
 0x54f   :  { %v4375_v61 = vrot.slane %v4374_v26, 1  ;;  %v4544_v1 = vsel %vm4485_vm6, %v11808_v12, %v11806_v18  ;;  %v4468_v30 = vrot.slane %v4467_v45, 1  ;;  %v11817_v48 = vmax.f32 %v4439_v41, %v4440_v0 }
 0x550   :  { %4555 = vrot.lane.b32.xlu1 %v4544_v1, %s10974_s21  ;;  %v4404_v58 = vadd.f32 %v4403_v44, %v4402_v55  ;;  %v4542_v60 = vsel %vm4485_vm6, %v4462_v4, %v4434_v53  ;;  %v11826_v11 = vand.u32 127, %v13253_v36 }
 0x551   :  { %v4376_v21 = vadd.f32 %v4375_v61, %v4374_v26  ;;  %v4469_v7 = vmax.f32 %v4467_v45, %v4468_v30 }
 0x552   :  { %v4419_v10 = vmul.f32 0.0625, %v4404_v58  ;;  %4551 = vrot.lane.b32.xlu0 %v4542_v60, %s10974_s21  ;;  %vm4504_vm7 = vcmp.lt.s32.totalorder %v11826_v11, 32  ;;  %vm4613_vm9 = vcmp.lt.s32.totalorder %v11826_v11, 64 }
 0x553   :  { %v4543_v9 = vsel %vm4485_vm6, %v4469_v7, %v11817_v48  ;;  %v4415_v27 = vmul.f32 0.0625, %v4376_v21 }
 0x554   :  { %4553 = vrot.lane.b32.xlu1 %v4543_v9, %s10974_s21 }
 0x555   :  { %v4488_v17 = vsel %vm4485_vm6, %v4419_v10, %v4415_v27 }
 0x556   :  { %4498 = vrot.lane.b32.xlu0 %v4488_v17, %s10974_s21 }
 0x5ba   :  { %v4550_v56 = vpop.permute.xlu1 %4549 }
 0x5bc   :  { %v4495_v20 = vpop.permute.xlu0 %4494 }
 0x5be   :  { %v4501_v6 = vpop.permute.xlu1 %4500 }
 0x5bf   :  { %v4508_v59 = vsel %vm4504_vm7, %v4501_v6, %v4495_v20 }
 0x5c0   :  { %v4513_v54 = vrot.slane %v4508_v59, 1  ;;  %v4497_v35 = vpop.permute.xlu0 %4496 }
 0x5c1   :  { %v4507_v62 = vsel %vm4504_vm7, %v4495_v20, %v4497_v35 }
 0x5c2   :  { %v4556_v63 = vpop.permute.xlu1 %4555  ;;  %v11835_v41 = vadd.f32 %v4513_v54, %v4417_v28  ;;  %v4514_v22 = vrot.slane %v4507_v62, 1 }
 0x5c3   :  { %v4560_v25 = vsel %vm4504_vm7, %v4556_v63, %v4550_v56 }
 0x5c4   :  { %v4565_v31 = vrot.slane %v4560_v25, 1  ;;  %v4552_v16 = vpop.permute.xlu0 %4551  ;;  %v11843_v0 = vmax.f32 %v11767_v46, %v4560_v25  ;;  %v11849_v28 = vadd.f32 %v4514_v22, %v11784_v2  ;;  %v4593_v30 = vrot.slane %v11835_v41, 7 }
 0x5c5   :  { %v4559_v26 = vsel %vm4504_vm7, %v4550_v56, %v4552_v16  ;;  %v11863_v2 = vadd.f32 %v4508_v59, %v11771_v49 }
 0x5c6   :  { %v11838_v52 = vmax.f32 %v11769_v23, %v4565_v31  ;;  %v4566_v55 = vrot.slane %v4559_v26, 1  ;;  %v4554_v43 = vpop.permute.xlu1 %4553  ;;  %v11866_v17 = vmax.f32 %v4434_v53, %v4559_v26 }
 0x5c7   :  { %v4558_v45 = vsel %vm4504_vm7, %v4552_v16, %v4554_v43  ;;  %v4557_v23 = vsel %vm4504_vm7, %v4554_v43, %v4556_v63  ;;  %v4770_v43 = vld [vmem:[%s13213_s5 + $0x10] sm:$0xff] }
 0x5c8   :  { %v4650_v61 = vrot.slane %v11838_v52, 7  ;;  %v11851_v44 = vmax.f32 %v4462_v4, %v4566_v55  ;;  %v4499_v1 = vpop.permute.xlu0 %4498  ;;  %v4567_v21 = vrot.slane %v4558_v45, 1  ;;  %v4568_v56 = vrot.slane %v4557_v23, 1  ;;  %v4769_v55 = vld [vmem:[%s13213_s5 + $0x8] sm:$0xff] }
 0x5c9   :  { %v4505_v46 = vsel %vm4504_vm7, %v4499_v1, %v4501_v6  ;;  %v4506_v58 = vsel %vm4504_vm7, %v4497_v35, %v4499_v1  ;;  %v4594_v6 = vsel %vm4485_vm6, %v4593_v30, %v11863_v2  ;;  %v4595_v35 = vrot.slane %v11849_v28, 7 }
 0x5ca   :  { %v4651_v60 = vsel %vm4485_vm6, %v4650_v61, %v11843_v0  ;;  %v4515_v4 = vrot.slane %v4506_v58, 1  ;;  %v4516_v9 = vrot.slane %v4505_v46, 1  ;;  %v4652_v36 = vrot.slane %v11851_v44, 7  ;;  %v4771_v61 = vld [vmem:[%s13213_s5 + $0x18] sm:$0xff] }
 0x5cb   :  { %4662 = vrot.lane.b32.xlu0 %v4651_v60, %s10983_s12  ;;  %v11873_v54 = vmax.f32 %v4469_v7, %v4567_v21  ;;  %v11885_v63 = vadd.f32 %v4506_v58, %v4415_v27  ;;  %v11888_v7 = vmax.f32 %v11808_v12, %v4568_v56  ;;  %v4528_v27 = vadd.f32 %v4505_v46, %v11774_v34  ;;  %v4768_v34 = vld [vmem:[%s13213_s5] sm:$0xff]  ;;  %s10990_s5 = smov 127  }
 0x5cc   :  { %v11869_v20 = vadd.f32 %v4515_v4, %v4419_v10  ;;  %v11876_v49 = vadd.f32 %v4516_v9, %v11782_v13  ;;  %v4653_v59 = vsel %vm4485_vm6, %v4652_v36, %v11866_v17  ;;  %v4526_v10 = vadd.f32 %v4507_v62, %v11794_v5 }
 0x5cd   :  { %4664 = vrot.lane.b32.xlu1 %v4653_v59, %s10983_s12  ;;  %v4654_v22 = vrot.slane %v11873_v54, 7  ;;  %v11898_v5 = vmax.f32 %v11817_v48, %v4558_v45  ;;  %v4656_v16 = vrot.slane %v11888_v7, 7  ;;  %v11908_v26 = vmax.f32 %v11806_v18, %v4557_v23 }
 0x5ce   :  { %v4597_v53 = vrot.slane %v11869_v20, 7  ;;  %v4596_v13 = vsel %vm4485_vm6, %v4595_v35, %v4526_v10  ;;  %v4599_v31 = vrot.slane %v11876_v49, 7  ;;  %v10984_v45 = vmov 0.0|0.0  }
 0x5cf   :  { %4605 = vrot.lane.b32.xlu0 %v4594_v6, %s10983_s12  ;;  %v4655_v62 = vsel %vm4485_vm6, %v4654_v22, %v11898_v5  ;;  %v4657_v48 = vsel %vm4485_vm6, %v4656_v16, %v11908_v26  ;;  %9847 = vmatprep.subr.bf16.mxu0 %v10984_v45  ;;  %v9848_v18 = vpack.c.bf16 %v4769_v55, %v4768_v34  ;;  %v13239_v23 = vmov 0.0  }
 0x5d0   :  { %v4598_v25 = vsel %vm4485_vm6, %v4597_v53, %v11885_v63  ;;  %v4600_v12 = vsel %vm4485_vm6, %v4599_v31, %v4528_v27  ;;  %8308 = vmatprep.mubr.msk.f32.mxu0 %vm10985_vm8, %v13239_v23  ;;  %v9851_v1 = vpack.c.bf16 %v4771_v61, %v4770_v43  ;;  %vm5519_vm7 = vcmask 916480  }
 0x5d1   :  { %4607 = vrot.lane.b32.xlu1 %v4596_v13, %s10983_s12  ;;  %9849 = vmatpush3.bf16.msra.mxu0 %v9848_v18  ;;  %vm6045_vm8 = vcmask 1042432  }
 0x5d2   :  { %9850 = vmatprep.subr.bf16.mxu0 %v10984_v45 }
 0x5d3   :  { %4609 = vrot.lane.b32.xlu0 %v4598_v25, %s10983_s12 }
 0x5d5   :  { %4611 = vrot.lane.b32.xlu1 %v4600_v12, %s10983_s12  ;;  %9852 = vmatpush3.bf16.msra.mxu0 %v9851_v1 }
 0x5d7   :  { %4666 = vrot.lane.b32.xlu0 %v4655_v62, %s10983_s12 }
 0x5d9   :  { %4668 = vrot.lane.b32.xlu1 %v4657_v48, %s10983_s12 }
 0x63d   :  { %v4663_v30 = vpop.permute.xlu0 %4662 }
 0x63f   :  { %v4665_v21 = vpop.permute.xlu1 %4664 }
 0x640   :  { %v4672_v58 = vsel %vm4613_vm9, %v4663_v30, %v4665_v21 }
 0x641   :  { %v4606_v46 = vpop.permute.xlu0 %4605  ;;  %v4679_v60 = vrot.slane %v4672_v58, 1  ;;  %v4691_v53 = vmax.f32 %v11866_v17, %v4672_v58 }
 0x643   :  { %v4695_v4 = vmax.f32 %v11851_v44, %v4679_v60  ;;  %v4608_v9 = vpop.permute.xlu1 %4607 }
 0x644   :  { %v4616_v56 = vsel %vm4613_vm9, %v4606_v46, %v4608_v9 }
 0x645   :  { %v4610_v36 = vpop.permute.xlu0 %4609  ;;  %v4720_v59 = vrot.slane %v4695_v4, 7  ;;  %v4623_v35 = vrot.slane %v4616_v56, 1  ;;  %v4635_v12 = vadd.f32 %v4616_v56, %v4526_v10 }
 0x646   :  { %v4615_v6 = vsel %vm4613_vm9, %v4608_v9, %v4610_v36 }
 0x647   :  { %v4639_v13 = vadd.f32 %v4623_v35, %v11849_v28  ;;  %v4624_v25 = vrot.slane %v4615_v6, 1  ;;  %v4612_v31 = vpop.permute.xlu1 %4611  ;;  %v4721_v55 = vsel %vm4485_vm6, %v4720_v59, %v4691_v53  ;;  %v4636_v4 = vadd.f32 %v4615_v6, %v11885_v63 }
 0x648   :  { %v4614_v44 = vsel %vm4613_vm9, %v4610_v36, %v4612_v31  ;;  %v4617_v48 = vsel %vm4613_vm9, %v4612_v31, %v4606_v46  ;;  %v4725_v1 = vrot.slane %v4721_v55, 1 }
 0x649   :  { %v4667_v22 = vpop.permute.xlu0 %4666  ;;  %v4702_v16 = vrot.slane %v4639_v13, 7  ;;  %v4625_v34 = vrot.slane %v4614_v44, 1  ;;  %v4640_v43 = vadd.f32 %v4624_v25, %v11869_v20  ;;  %v4622_v61 = vrot.slane %v4617_v48, 1 }
 0x64a   :  { %v4671_v62 = vsel %vm4613_vm9, %v4665_v21, %v4667_v22  ;;  %v4637_v58 = vadd.f32 %v4614_v44, %v4528_v27  ;;  %v4634_v20 = vadd.f32 %v4617_v48, %v11863_v2 }
 0x64b   :  { %v4680_v17 = vrot.slane %v4671_v62, 1  ;;  %v4703_v28 = vsel %vm4485_vm6, %v4702_v16, %v4635_v12  ;;  %v4641_v10 = vadd.f32 %v4625_v34, %v11876_v49  ;;  %v4669_v45 = vpop.permute.xlu1 %4668  ;;  %v4692_v59 = vmax.f32 %v11898_v5, %v4671_v62 }
 0x64c   :  { %v4707_v18 = vrot.slane %v4703_v28, 1  ;;  %v4670_v46 = vsel %vm4613_vm9, %v4667_v22, %v4669_v45  ;;  %v4673_v35 = vsel %vm4613_vm9, %v4669_v45, %v4663_v30  ;;  %v4638_v53 = vadd.f32 %v4622_v61, %v11835_v41 }
 0x64d   :  { %v4696_v21 = vmax.f32 %v11873_v54, %v4680_v17  ;;  %v4704_v60 = vrot.slane %v4641_v10, 7  ;;  %v4681_v56 = vrot.slane %v4670_v46, 1  ;;  %v4713_v54 = vadd.f32 %v4703_v28, %v4636_v4 }
 0x64e   :  { %v4715_v9 = vadd.f32 %v4707_v18, %v4640_v43  ;;  %v4678_v2 = vrot.slane %v4673_v35, 1  ;;  %v4731_v44 = vmax.f32 %v4692_v59, %v4721_v55  ;;  %v4693_v5 = vmax.f32 %v11908_v26, %v4670_v46  ;;  %v8041_v46 = vld [vmem:[#allocation11] ss:$0 sm:$0xff]  ;;  %v4858_v59 = vld [vmem:[#allocation14] sm:$0xf] }
 0x64f   :  { %v4733_v36 = vmax.f32 %v4696_v21, %v4725_v1  ;;  %v4705_v49 = vsel %vm4485_vm6, %v4704_v60, %v4637_v58  ;;  %v4697_v63 = vmax.f32 %v11888_v7, %v4681_v56  ;;  %v4690_v11 = vmax.f32 %v11843_v0, %v4673_v35  ;;  %v4860_v35 = vld [vmem:[#allocation13] ss:$2 sm:$0xf] }
 0x650   :  { %v4736_v27 = vrot.slane %v4715_v9, 7  ;;  %v4706_v13 = vrot.slane %v4705_v49, 1  ;;  %v4712_v6 = vadd.f32 %v4705_v49, %v4634_v20  ;;  %v4694_v7 = vmax.f32 %v11838_v52, %v4678_v2 }
 0x651   :  { %v4745_v25 = vrot.slane %v4733_v36, 7  ;;  %v4722_v62 = vrot.slane %v4697_v63, 7  ;;  %v10987_v52 = vmov 1   ;;  %v10988_v60 = vmov 0  }
 0x652   :  { %v4714_v31 = vadd.f32 %v4706_v13, %v4638_v53  ;;  %v4737_v22 = vsel %vm4485_vm6, %v4736_v27, %v4713_v54  ;;  %10395 = vset.pattern.permute.xlu1 %v10987_v52  ;;  %10394 = vset.pattern.permute.xlu0 %v10988_v60  ;;  %v4917_v54 = vld [vmem:[#allocation13 + $0x1] ss:$2 sm:$0xf]  ;;  %v4859_v27 = vmul.f32 2.0, %v4858_v59  ;;  %v4870_v53 = vrot.slane %v4860_v35, %v11421_v51 }
 0x653   :  { %v4738_v12 = vrot.slane %v4737_v22, 1  ;;  %v4723_v16 = vsel %vm4485_vm6, %v4722_v62, %v4693_v5  ;;  %v4746_v41 = vsel %vm4485_vm6, %v4745_v25, %v4731_v44  ;;  %v4741_v48 = vadd.f32 %v4737_v22, %v4712_v6 }
 0x654   :  { %v4724_v34 = vrot.slane %v4723_v16, 1  ;;  %v4730_v17 = vmax.f32 %v4690_v11, %v4723_v16  ;;  %v4747_v10 = vrot.slane %v4746_v41, 1  ;;  %v4874_v13 = vrot.slane %v4860_v35, %v11427_v3 }
 0x655   :  { %v4742_v30 = vadd.f32 %v4738_v12, %v4714_v31  ;;  %v4752_v18 = vmul.f32 0.0625, %v4741_v48  ;;  %v4878_v25 = vrot.slane %v4860_v35, %v11424_v15  ;;  %v4882_v63 = vrot.slane %v4860_v35, %v11451_v29 }
 0x656   :  { %v4732_v43 = vmax.f32 %v4694_v7, %v4724_v34  ;;  %v4750_v45 = vmax.f32 %v4730_v17, %v4746_v41  ;;  %v4926_v6 = vrot.slane %v4917_v54, %v11421_v51  ;;  %v4930_v31 = vrot.slane %v4917_v54, %v11427_v3 }
 0x657   :  { %v4753_v28 = vmul.f32 0.0625, %v4742_v30  ;;  %v4934_v22 = vrot.slane %v4917_v54, %v11424_v15  ;;  %v4938_v2 = vrot.slane %v4917_v54, %v11451_v29  ;;  %v4895_v44 = vrot.slane %v4859_v27, %v11421_v51 }
 0x658   :  { %v4751_v26 = vmax.f32 %v4732_v43, %v4747_v10  ;;  %v4761_v61 = vrot.slane %v4750_v45, 6  ;;  %v4899_v5 = vrot.slane %v4859_v27, %v11427_v3  ;;  %v4903_v62 = vrot.slane %v4859_v27, %v11424_v15 }
 0x659   :  { %v4756_v55 = vrot.slane %v4753_v28, 7  ;;  %v4907_v11 = vrot.slane %v4859_v27, %v11451_v29  ;;  %v10989_v35 = vmov 1966171168  }
 0x65a   :  { %v4762_v0 = vrot.slane %v4751_v26, 5  ;;  %v4982_v54 = vunpack.c.l.s4 %v10989_v35 }
 0x65b   :  { %v4757_v1 = vsel %vm4485_vm6, %v4756_v55, %v4752_v18  ;;  %vm5418_vm6 = vcmask 982016  }
 0x65c   :  { %v4764_v21 = vsel %vm4763_vm10, %v4762_v0, %v4761_v61  ;;  %v4983_v27 = vunpack.c.0.s8 %v4982_v54 }
 0x65d   :  { %v4767_v58 = vsel %vm4766_vm11, %v4757_v1, %v4764_v21 }
 0x65e   :  { %8309 = vmatmul.mubr.msk.f32.vlgmr.msra.gmra.mrb[16].mxu0 %vm4779_vm12, %v4767_v58 }
 0x731   :  { %v4849_v4 = vpop.f32.mrb[16].mxu0 }
 0x732   :  { %v4850_v9 = vadd.f32 %v8041_v46, %v4849_v4  ;;  %v8310_v36 = vpop.f32.mrb[17].mxu0 }
 0x734   :  { %v4853_v56 = vmax.f32 %v4850_v9, 0.0 }
 0x736   :  { %v4855_v20 = vrot.slane %v4853_v56, 2 }
 0x738   :  { %v4857_v49 = vadd.f32 %v4855_v20, %v4853_v56 }
 0x73a   :  { %4919 = vperm.xlu1 %10395, %v4857_v49   ;;  %4863 = vperm.xlu0 %10394, %v4857_v49  }
 0x73e   :  { %10596 = vset.pattern.permute.xlu0 %v10987_v52 }
 0x7b9   :  { %v4920_v12 = vpop.permute.xlu1 %4919  ;;  %v4864_v30 = vpop.permute.xlu0 %4863 }
 0x7ba   :  { %v4887_v16 = vmul.f32 %v4870_v53, %v4864_v30  ;;  %v4888_v41 = vmul.f32 %v4874_v13, %v4864_v30  ;;  %v4889_v48 = vmul.f32 %v4878_v25, %v4864_v30  ;;  %v4890_v7 = vmul.f32 %v4882_v63, %v4864_v30 }
 0x7bb   :  { %v4943_v34 = vmul.f32 %v4926_v6, %v4920_v12  ;;  %v4944_v17 = vmul.f32 %v4930_v31, %v4920_v12  ;;  %v4945_v28 = vmul.f32 %v4934_v22, %v4920_v12  ;;  %v4946_v43 = vmul.f32 %v4938_v2, %v4920_v12 }
 0x7bc   :  { %v4912_v10 = vadd.f32 %v4895_v44, %v4887_v16  ;;  %v4913_v45 = vadd.f32 %v4899_v5, %v4888_v41  ;;  %v4914_v55 = vadd.f32 %v4903_v62, %v4889_v48  ;;  %v4915_v18 = vadd.f32 %v4907_v11, %v4890_v7 }
 0x7bd   :  { %v4986_v13 = vsub.s32 %v4983_v27, %v11206_v47 }
 0x7be   :  { %v4947_v26 = vadd.f32 %v4943_v34, %v4912_v10  ;;  %v4948_v61 = vadd.f32 %v4944_v17, %v4913_v45  ;;  %v4949_v0 = vadd.f32 %v4945_v28, %v4914_v55  ;;  %v4950_v1 = vadd.f32 %v4946_v43, %v4915_v18 }
 0x7c0   :  { %v8043_v21 = vmul.f32 -1.442695, %v4947_v26  ;;  %v8044_v58 = vmul.f32 -1.442695, %v4948_v61  ;;  %v8045_v52 = vmul.f32 -1.442695, %v4949_v0 }
 0x7c1   :  { %v8046_v60 = vmul.f32 -1.442695, %v4950_v1  ;;  %v13254_v1 = vld [vmem:[#allocation37_spill] sm:$0xff] }
 0x7c2   :  { %10597 = vpow2.f32 %v8043_v21 }
 0x7c3   :  { %10599 = vpow2.f32 %v8044_v58  ;;  %v13255_v58 = vld [vmem:[#allocation35_spill] sm:$0xff] }
 0x7c4   :  { %10601 = vpow2.f32 %v8045_v52  ;;  %v13256_v52 = vld [vmem:[#allocation36_spill] sm:$0xff] }
 0x7c5   :  { %10603 = vpow2.f32 %v8046_v60 }
 0x7cc   :  { %v10598_v46 = vpop.eup %10597 }
 0x7cd   :  { %v10600_v4 = vpop.eup %10599  ;;  %v4963_v9 = vadd.f32 1.0, %v10598_v46 }
 0x7ce   :  { %v10602_v36 = vpop.eup %10601  ;;  %v4964_v56 = vadd.f32 1.0, %v10600_v4 }
 0x7cf   :  { %v10604_v20 = vpop.eup %10603  ;;  %v4965_v49 = vadd.f32 1.0, %v10602_v36  ;;  %10605 = vrcp.f32 %v4963_v9 }
 0x7d0   :  { %v4966_v59 = vadd.f32 1.0, %v10604_v20  ;;  %10607 = vrcp.f32 %v4964_v56 }
 0x7d1   :  { %10609 = vrcp.f32 %v4965_v49 }
 0x7d2   :  { %10611 = vrcp.f32 %v4966_v59 }
 0x7d9   :  { %v10606_v53 = vpop.eup %10605 }
 0x7da   :  { %v10608_v25 = vpop.eup %10607 }
 0x7db   :  { %v10610_v63 = vpop.eup %10609  ;;  %v4979_v6 = vcombine.low %v10606_v53, %v10608_v25 }
 0x7dc   :  { %v10612_v31 = vpop.eup %10611 }
 0x7dd   :  { %v4980_v22 = vcombine.low %v10610_v63, %v10612_v31  ;;  %v4987_v2 = vrot.slane %v4979_v6, %v4986_v13 }
 0x7df   :  { %v4994_v12 = vrot.slane %v4980_v22, %v4986_v13 }
 0x7e1   :  { %v4995_v44 = vcombine.low %v4987_v2, %v4994_v12  ;;  %v4996_v5 = vcombine.high %v4987_v2, %v4994_v12 }
 0x7e3   :  { %v5003_v62 = vrot.slane %v4995_v44, %v4986_v13  ;;  %v5010_v11 = vrot.slane %v4996_v5, %v4986_v13 }
 0x7e5   :  { %v5022_v30 = vrot.slane %v5003_v62, %v11424_v15  ;;  %v5026_v16 = vrot.slane %v5003_v62, %v11451_v29  ;;  %v5014_v41 = vrot.slane %v5003_v62, %v11421_v51  ;;  %v5018_v48 = vrot.slane %v5003_v62, %v11427_v3 }
 0x7e6   :  { %v5038_v47 = vrot.slane %v5010_v11, %v11424_v15  ;;  %v5042_v7 = vrot.slane %v5010_v11, %v11451_v29  ;;  %v5030_v55 = vrot.slane %v5010_v11, %v11421_v51 }
 0x7e7   :  { %v11986_v34 = vmul.f32 %v5022_v30, %v11693_v40  ;;  %v11989_v17 = vmul.f32 %v5026_v16, %v11701_v39  ;;  %v11992_v28 = vmul.f32 %v5014_v41, %v11689_v8  ;;  %v11995_v43 = vmul.f32 %v5018_v48, %v11695_v19 }
 0x7e8   :  { %v11998_v10 = vmul.f32 %v5022_v30, %v11697_v38  ;;  %v12001_v45 = vmul.f32 %v5026_v16, %v11707_v57  ;;  %v5034_v40 = vrot.slane %v5010_v11, %v11427_v3  ;;  %v12010_v18 = vmul.f32 %v5014_v41, %v11691_v50 }
 0x7e9   :  { %v10401_v39 = vpack.i.bf16 %v11989_v17, %v11986_v34  ;;  %v10396_v8 = vpack.i.bf16 %v11995_v43, %v11992_v28  ;;  %v12013_v19 = vmul.f32 %v5018_v48, %v11699_v32  ;;  %v12016_v38 = vmul.f32 %v5038_v47, %v11732_v24 }
 0x7ea   :  { %v12019_v57 = vmul.f32 %v5042_v7, %v11736_v33  ;;  %v10411_v26 = vpack.i.bf16 %v12001_v45, %v11998_v10  ;;  %v12026_v50 = vmul.f32 %v5030_v55, %v11729_v37  ;;  %v12029_v32 = vmul.f32 %v5034_v40, %v11734_v14 }
 0x7eb   :  { %10402 = vrot.lane.b32.xlu0 %v10401_v39, %s10990_s5  ;;  %10397 = vrot.lane.b32.xlu1 %v10396_v8, %s10990_s5  ;;  %v10406_v61 = vpack.i.bf16 %v12013_v19, %v12010_v18  ;;  %v12034_v33 = vmul.f32 %v5038_v47, %v11740_v42  ;;  %v12039_v21 = vmul.f32 %v5042_v7, %v13254_v1 }
 0x7ec   :  { %v10421_v24 = vpack.i.bf16 %v12019_v57, %v12016_v38  ;;  %v10416_v0 = vpack.i.bf16 %v12029_v32, %v12026_v50  ;;  %v12042_v37 = vmul.f32 %v5030_v55, %v13255_v58  ;;  %v12045_v14 = vmul.f32 %v5034_v40, %v13256_v52 }
 0x7ed   :  { %v10431_v60 = vpack.i.bf16 %v12039_v21, %v12034_v33 }
 0x7ee   :  { %v10426_v42 = vpack.i.bf16 %v12045_v14, %v12042_v37 }
 0x7ef   :  { %10412 = vrot.lane.b32.xlu0 %v10411_v26, %s10990_s5  ;;  %10407 = vrot.lane.b32.xlu1 %v10406_v61, %s10990_s5 }
 0x7f3   :  { %10422 = vrot.lane.b32.xlu0 %v10421_v24, %s10990_s5  ;;  %10417 = vrot.lane.b32.xlu1 %v10416_v0, %s10990_s5 }
 0x7f7   :  { %10432 = vrot.lane.b32.xlu0 %v10431_v60, %s10990_s5  ;;  %10427 = vrot.lane.b32.xlu1 %v10426_v42, %s10990_s5 }
 0x85d   :  { %v10403_v46 = vpop.permute.xlu0 %10402  ;;  %v10398_v4 = vpop.permute.xlu1 %10397 }
 0x85e   :  { %v10405_v9 = vunpack.i.h.bf16 %v10403_v46  ;;  %v10404_v36 = vunpack.i.l.bf16 %v10403_v46  ;;  %v10400_v56 = vunpack.i.h.bf16 %v10398_v4  ;;  %v10399_v20 = vunpack.i.l.bf16 %v10398_v4 }
 0x860   :  { %v5118_v49 = vsel %vm5115_vm13, %v10404_v36, %v10405_v9  ;;  %v5117_v59 = vsel %vm5115_vm13, %v10400_v56, %v10404_v36  ;;  %v5116_v35 = vsel %vm5115_vm13, %v10399_v20, %v10400_v56  ;;  %v5148_v54 = vsel %vm5115_vm13, %v10405_v9, %v10399_v20 }
 0x861   :  { %v10413_v27 = vpop.permute.xlu0 %10412  ;;  %v10408_v53 = vpop.permute.xlu1 %10407  ;;  %v12056_v13 = vmax.f32 %v11986_v34, %v5118_v49  ;;  %v12059_v25 = vmax.f32 %v11989_v17, %v5148_v54  ;;  %v12062_v63 = vmax.f32 %v11992_v28, %v5116_v35  ;;  %v12065_v6 = vmax.f32 %v11995_v43, %v5117_v59 }
 0x862   :  { %v10415_v31 = vunpack.i.h.bf16 %v10413_v27  ;;  %v10414_v22 = vunpack.i.l.bf16 %v10413_v27  ;;  %v10410_v2 = vunpack.i.h.bf16 %v10408_v53  ;;  %v10409_v12 = vunpack.i.l.bf16 %v10408_v53 }
 0x863   :  { %v10441_v44 = vpack.i.bf16 %v12059_v25, %v12056_v13  ;;  %v10436_v5 = vpack.i.bf16 %v12065_v6, %v12062_v63 }
 0x864   :  { %v5121_v62 = vsel %vm5115_vm13, %v10414_v22, %v10415_v31  ;;  %v5120_v11 = vsel %vm5115_vm13, %v10410_v2, %v10414_v22  ;;  %v5119_v30 = vsel %vm5115_vm13, %v10409_v12, %v10410_v2  ;;  %v5149_v16 = vsel %vm5115_vm13, %v10415_v31, %v10409_v12 }
 0x865   :  { %v10423_v41 = vpop.permute.xlu0 %10422  ;;  %v10418_v48 = vpop.permute.xlu1 %10417  ;;  %10442 = vrot.lane.b32.xlu0 %v10441_v44, %s10991_s2  ;;  %10437 = vrot.lane.b32.xlu1 %v10436_v5, %s10991_s2  ;;  %v12078_v47 = vmax.f32 %v11998_v10, %v5121_v62  ;;  %v12081_v7 = vmax.f32 %v12001_v45, %v5149_v16  ;;  %v12084_v55 = vmax.f32 %v12010_v18, %v5119_v30 }
 0x866   :  { %v10425_v40 = vunpack.i.h.bf16 %v10423_v41  ;;  %v10424_v39 = vunpack.i.l.bf16 %v10423_v41  ;;  %v10420_v8 = vunpack.i.h.bf16 %v10418_v48  ;;  %v10419_v26 = vunpack.i.l.bf16 %v10418_v48 }
 0x867   :  { %v10451_v61 = vpack.i.bf16 %v12081_v7, %v12078_v47  ;;  %v12089_v24 = vmax.f32 %v12013_v19, %v5120_v11 }
 0x868   :  { %v5124_v0 = vsel %vm5115_vm13, %v10424_v39, %v10425_v40  ;;  %v5123_v1 = vsel %vm5115_vm13, %v10420_v8, %v10424_v39  ;;  %v5122_v58 = vsel %vm5115_vm13, %v10419_v26, %v10420_v8  ;;  %v5150_v52 = vsel %vm5115_vm13, %v10425_v40, %v10419_v26 }
 0x869   :  { %v10433_v60 = vpop.permute.xlu0 %10432  ;;  %v10428_v42 = vpop.permute.xlu1 %10427  ;;  %10452 = vrot.lane.b32.xlu0 %v10451_v61, %s10991_s2  ;;  %v10446_v46 = vpack.i.bf16 %v12089_v24, %v12084_v55  ;;  %v12099_v4 = vmax.f32 %v12016_v38, %v5124_v0  ;;  %v12102_v9 = vmax.f32 %v12019_v57, %v5150_v52  ;;  %v12105_v36 = vmax.f32 %v12026_v50, %v5122_v58 }
 0x86a   :  { %v10435_v56 = vunpack.i.h.bf16 %v10433_v60  ;;  %v10434_v20 = vunpack.i.l.bf16 %v10433_v60  ;;  %v10430_v49 = vunpack.i.h.bf16 %v10428_v42  ;;  %v10429_v59 = vunpack.i.l.bf16 %v10428_v42 }
 0x86b   :  { %10447 = vrot.lane.b32.xlu1 %v10446_v46, %s10991_s2  ;;  %v10461_v35 = vpack.i.bf16 %v12102_v9, %v12099_v4  ;;  %v12111_v54 = vmax.f32 %v12029_v32, %v5123_v1 }
 0x86c   :  { %v5127_v27 = vsel %vm5115_vm13, %v10434_v20, %v10435_v56  ;;  %v5126_v53 = vsel %vm5115_vm13, %v10430_v49, %v10434_v20  ;;  %v5125_v31 = vsel %vm5115_vm13, %v10429_v59, %v10430_v49  ;;  %v5151_v22 = vsel %vm5115_vm13, %v10435_v56, %v10429_v59 }
 0x86d   :  { %10462 = vrot.lane.b32.xlu0 %v10461_v35, %s10991_s2  ;;  %v10456_v2 = vpack.i.bf16 %v12111_v54, %v12105_v36  ;;  %v12121_v12 = vmax.f32 %v12034_v33, %v5127_v27  ;;  %v12124_v44 = vmax.f32 %v12039_v21, %v5151_v22  ;;  %v12127_v5 = vmax.f32 %v12042_v37, %v5125_v31 }
 0x86e   :  { %v12130_v62 = vmax.f32 %v12045_v14, %v5126_v53 }
 0x86f   :  { %10457 = vrot.lane.b32.xlu1 %v10456_v2, %s10991_s2  ;;  %v10471_v11 = vpack.i.bf16 %v12124_v44, %v12121_v12 }
 0x870   :  { %v10466_v30 = vpack.i.bf16 %v12130_v62, %v12127_v5 }
 0x871   :  { %10472 = vrot.lane.b32.xlu0 %v10471_v11, %s10991_s2 }
 0x873   :  { %10467 = vrot.lane.b32.xlu1 %v10466_v30, %s10991_s2 }
 0x8d7   :  { %v10443_v16 = vpop.permute.xlu0 %10442  ;;  %v10438_v41 = vpop.permute.xlu1 %10437 }
 0x8d8   :  { %v10445_v48 = vunpack.i.h.bf16 %v10443_v16  ;;  %v10444_v40 = vunpack.i.l.bf16 %v10443_v16  ;;  %v10440_v39 = vunpack.i.h.bf16 %v10438_v41  ;;  %v10439_v8 = vunpack.i.l.bf16 %v10438_v41 }
 0x8da   :  { %v5219_v26 = vsel %vm5216_vm14, %v10444_v40, %v10445_v48  ;;  %v5218_v61 = vsel %vm5216_vm14, %v10440_v39, %v10444_v40  ;;  %v5217_v0 = vsel %vm5216_vm14, %v10439_v8, %v10440_v39  ;;  %v5249_v1 = vsel %vm5216_vm14, %v10445_v48, %v10439_v8 }
 0x8db   :  { %v10453_v58 = vpop.permute.xlu0 %10452  ;;  %v12144_v52 = vmax.f32 %v12056_v13, %v5219_v26  ;;  %v12147_v60 = vmax.f32 %v12059_v25, %v5249_v1  ;;  %v12150_v42 = vmax.f32 %v12062_v63, %v5217_v0  ;;  %v12153_v46 = vmax.f32 %v12065_v6, %v5218_v61 }
 0x8dc   :  { %v10455_v56 = vunpack.i.h.bf16 %v10453_v58  ;;  %v10454_v20 = vunpack.i.l.bf16 %v10453_v58 }
 0x8dd   :  { %v10448_v49 = vpop.permute.xlu1 %10447  ;;  %v10481_v59 = vpack.i.bf16 %v12147_v60, %v12144_v52  ;;  %v10476_v35 = vpack.i.bf16 %v12153_v46, %v12150_v42 }
 0x8de   :  { %v5222_v13 = vsel %vm5216_vm14, %v10454_v20, %v10455_v56  ;;  %v10450_v27 = vunpack.i.h.bf16 %v10448_v49  ;;  %v10449_v25 = vunpack.i.l.bf16 %v10448_v49 }
 0x8df   :  { %v10463_v53 = vpop.permute.xlu0 %10462  ;;  %10482 = vrot.lane.b32.xlu0 %v10481_v59, %s10992_s3  ;;  %10477 = vrot.lane.b32.xlu1 %v10476_v35, %s10992_s3  ;;  %v12163_v63 = vmax.f32 %v12078_v47, %v5222_v13 }
 0x8e0   :  { %v5221_v6 = vsel %vm5216_vm14, %v10450_v27, %v10454_v20  ;;  %v5220_v31 = vsel %vm5216_vm14, %v10449_v25, %v10450_v27  ;;  %v5250_v22 = vsel %vm5216_vm14, %v10455_v56, %v10449_v25  ;;  %v10465_v2 = vunpack.i.h.bf16 %v10463_v53 }
 0x8e1   :  { %v10464_v11 = vunpack.i.l.bf16 %v10463_v53  ;;  %v10458_v30 = vpop.permute.xlu1 %10457  ;;  %v12169_v16 = vmax.f32 %v12081_v7, %v5250_v22  ;;  %v12172_v41 = vmax.f32 %v12084_v55, %v5220_v31  ;;  %v12175_v48 = vmax.f32 %v12089_v24, %v5221_v6 }
 0x8e2   :  { %v10460_v47 = vunpack.i.h.bf16 %v10458_v30  ;;  %v10459_v40 = vunpack.i.l.bf16 %v10458_v30 }
 0x8e3   :  { %v5225_v39 = vsel %vm5216_vm14, %v10464_v11, %v10465_v2  ;;  %v10473_v8 = vpop.permute.xlu0 %10472  ;;  %v10491_v26 = vpack.i.bf16 %v12169_v16, %v12163_v63  ;;  %v10486_v61 = vpack.i.bf16 %v12175_v48, %v12172_v41 }
 0x8e4   :  { %v5224_v7 = vsel %vm5216_vm14, %v10460_v47, %v10464_v11  ;;  %v5223_v0 = vsel %vm5216_vm14, %v10459_v40, %v10460_v47  ;;  %v5251_v55 = vsel %vm5216_vm14, %v10465_v2, %v10459_v40  ;;  %v10475_v1 = vunpack.i.h.bf16 %v10473_v8 }
 0x8e5   :  { %v10474_v24 = vunpack.i.l.bf16 %v10473_v8  ;;  %v10468_v58 = vpop.permute.xlu1 %10467  ;;  %10492 = vrot.lane.b32.xlu0 %v10491_v26, %s10992_s3  ;;  %10487 = vrot.lane.b32.xlu1 %v10486_v61, %s10992_s3  ;;  %v12188_v56 = vmax.f32 %v12099_v4, %v5225_v39  ;;  %v12191_v20 = vmax.f32 %v12102_v9, %v5251_v55  ;;  %v12194_v49 = vmax.f32 %v12105_v36, %v5223_v0 }
 0x8e6   :  { %v10470_v59 = vunpack.i.h.bf16 %v10468_v58  ;;  %v10469_v35 = vunpack.i.l.bf16 %v10468_v58  ;;  %v12197_v13 = vmax.f32 %v12111_v54, %v5224_v7 }
 0x8e7   :  { %v5228_v27 = vsel %vm5216_vm14, %v10474_v24, %v10475_v1  ;;  %v10501_v25 = vpack.i.bf16 %v12191_v20, %v12188_v56 }
 0x8e8   :  { %v5227_v53 = vsel %vm5216_vm14, %v10470_v59, %v10474_v24  ;;  %v5226_v4 = vsel %vm5216_vm14, %v10469_v35, %v10470_v59  ;;  %v5252_v9 = vsel %vm5216_vm14, %v10475_v1, %v10469_v35  ;;  %v10496_v36 = vpack.i.bf16 %v12197_v13, %v12194_v49 }
 0x8e9   :  { %10502 = vrot.lane.b32.xlu0 %v10501_v25, %s10992_s3  ;;  %v12209_v6 = vmax.f32 %v12121_v12, %v5228_v27  ;;  %v12212_v54 = vmax.f32 %v12124_v44, %v5252_v9  ;;  %v12215_v31 = vmax.f32 %v12127_v5, %v5226_v4  ;;  %v12218_v22 = vmax.f32 %v12130_v62, %v5227_v53 }
 0x8ea   :  { %10497 = vrot.lane.b32.xlu1 %v10496_v36, %s10992_s3  ;;  %vm7285_vm14 = vcmask 1045504  }
 0x8eb   :  { %v10511_v2 = vpack.i.bf16 %v12212_v54, %v12209_v6  ;;  %v10506_v11 = vpack.i.bf16 %v12218_v22, %v12215_v31 }
 0x8ed   :  { %10512 = vrot.lane.b32.xlu0 %v10511_v2, %s10992_s3 }
 0x8ee   :  { %10507 = vrot.lane.b32.xlu1 %v10506_v11, %s10992_s3 }
 0x951   :  { %v10483_v12 = vpop.permute.xlu0 %10482  ;;  %v10478_v44 = vpop.permute.xlu1 %10477 }
 0x952   :  { %v10485_v5 = vunpack.i.h.bf16 %v10483_v12  ;;  %v10484_v30 = vunpack.i.l.bf16 %v10483_v12  ;;  %v10480_v47 = vunpack.i.h.bf16 %v10478_v44  ;;  %v10479_v62 = vunpack.i.l.bf16 %v10478_v44 }
 0x954   :  { %v5320_v40 = vsel %vm5317_vm15, %v10484_v30, %v10485_v5  ;;  %v5319_v39 = vsel %vm5317_vm15, %v10480_v47, %v10484_v30  ;;  %v5318_v8 = vsel %vm5317_vm15, %v10479_v62, %v10480_v47  ;;  %v5350_v26 = vsel %vm5317_vm15, %v10485_v5, %v10479_v62 }
 0x955   :  { %v12232_v61 = vmax.f32 %v12153_v46, %v5319_v39  ;;  %v12235_v7 = vmax.f32 %v12144_v52, %v5320_v40  ;;  %v12238_v0 = vmax.f32 %v12150_v42, %v5318_v8  ;;  %v12241_v55 = vmax.f32 %v12147_v60, %v5350_v26 }
 0x957   :  { %v10493_v1 = vpop.permute.xlu0 %10492  ;;  %v10488_v24 = vpop.permute.xlu1 %10487  ;;  %v10516_v58 = vpack.i.bf16 %v12235_v7, %v12232_v61  ;;  %v10521_v59 = vpack.i.bf16 %v12238_v0, %v12241_v55 }
 0x958   :  { %v10495_v35 = vunpack.i.h.bf16 %v10493_v1  ;;  %v10494_v46 = vunpack.i.l.bf16 %v10493_v1  ;;  %v10490_v27 = vunpack.i.h.bf16 %v10488_v24  ;;  %v10489_v25 = vunpack.i.l.bf16 %v10488_v24 }
 0x959   :  { %10517 = vrot.lane.b32.xlu1 %v10516_v58, %s10993_s27  ;;  %10522 = vrot.lane.b32.xlu0 %v10521_v59, %s10993_s27 }
 0x95a   :  { %v5323_v52 = vsel %vm5317_vm15, %v10494_v46, %v10495_v35  ;;  %v5322_v60 = vsel %vm5317_vm15, %v10490_v27, %v10494_v46  ;;  %v5321_v42 = vsel %vm5317_vm15, %v10489_v25, %v10490_v27  ;;  %v5351_v53 = vsel %vm5317_vm15, %v10495_v35, %v10489_v25 }
 0x95b   :  { %v10503_v4 = vpop.permute.xlu0 %10502  ;;  %v12254_v9 = vmax.f32 %v12175_v48, %v5322_v60  ;;  %v12257_v36 = vmax.f32 %v12163_v63, %v5323_v52  ;;  %v12260_v2 = vmax.f32 %v12172_v41, %v5321_v42  ;;  %v12263_v11 = vmax.f32 %v12169_v16, %v5351_v53 }
 0x95c   :  { %v10505_v12 = vunpack.i.h.bf16 %v10503_v4  ;;  %v10504_v44 = vunpack.i.l.bf16 %v10503_v4  ;;  %v10498_v5 = vpop.permute.xlu1 %10497 }
 0x95d   :  { %v10500_v30 = vunpack.i.h.bf16 %v10498_v5  ;;  %v10499_v47 = vunpack.i.l.bf16 %v10498_v5  ;;  %v10526_v62 = vpack.i.bf16 %v12257_v36, %v12254_v9  ;;  %v10531_v48 = vpack.i.bf16 %v12260_v2, %v12263_v11  ;;  %v5637_v5 = vld [vmem:[%s13218_s10 + $0x8] sm:$0xff] }
 0x95e   :  { %v5326_v63 = vsel %vm5317_vm15, %v10504_v44, %v10505_v12 }
 0x95f   :  { %v5325_v40 = vsel %vm5317_vm15, %v10500_v30, %v10504_v44  ;;  %v5324_v41 = vsel %vm5317_vm15, %v10499_v47, %v10500_v30  ;;  %v5352_v16 = vsel %vm5317_vm15, %v10505_v12, %v10499_v47  ;;  %v10513_v39 = vpop.permute.xlu0 %10512  ;;  %10527 = vrot.lane.b32.xlu1 %v10526_v62, %s10993_s27  ;;  %10532 = vrot.lane.b32.xlu0 %v10531_v48, %s10993_s27  ;;  %v5652_v12 = vld [vmem:[%s13218_s10 + $0x80] sm:$0xff]  ;;  %v5653_v44 = vld [vmem:[%s13218_s10 + $0x88] sm:$0xff] }
 0x960   :  { %v10515_v8 = vunpack.i.h.bf16 %v10513_v39  ;;  %v10514_v26 = vunpack.i.l.bf16 %v10513_v39  ;;  %v10508_v1 = vpop.permute.xlu1 %10507  ;;  %v12276_v24 = vmax.f32 %v12197_v13, %v5325_v40  ;;  %v12279_v58 = vmax.f32 %v12188_v56, %v5326_v63  ;;  %v5668_v63 = vld [vmem:[%s13218_s10 + $0x100] sm:$0xff]  ;;  %v5669_v40 = vld [vmem:[%s13218_s10 + $0x108] sm:$0xff]  ;;  %v5655_v39 = vld [vmem:[%s13218_s10 + $0x98] sm:$0xff] }
 0x961   :  { %v10510_v59 = vunpack.i.h.bf16 %v10508_v1  ;;  %v10509_v35 = vunpack.i.l.bf16 %v10508_v1  ;;  %v12282_v46 = vmax.f32 %v12194_v49, %v5324_v41  ;;  %v12285_v27 = vmax.f32 %v12191_v20, %v5352_v16  ;;  %v5654_v41 = vld [vmem:[%s13218_s10 + $0x90] sm:$0xff] }
 0x962   :  { %v5329_v25 = vsel %vm5317_vm15, %v10514_v26, %v10515_v8  ;;  %v10536_v52 = vpack.i.bf16 %v12279_v58, %v12276_v24  ;;  %v9887_v16 = vpack.c.bf16 %v5669_v40, %v5668_v63  ;;  %v9857_v1 = vpack.c.bf16 %v5655_v39, %v5654_v41  ;;  %v5690_v63 = vld [vmem:[%s13218_s10 + $0x1b0] sm:$0xff]  ;;  %v5691_v41 = vld [vmem:[%s13218_s10 + $0x1b8] sm:$0xff] }
 0x963   :  { %v5328_v60 = vsel %vm5317_vm15, %v10510_v59, %v10514_v26  ;;  %v5327_v13 = vsel %vm5317_vm15, %v10509_v35, %v10510_v59  ;;  %v5353_v56 = vsel %vm5317_vm15, %v10515_v8, %v10509_v35  ;;  %v10541_v42 = vpack.i.bf16 %v12282_v46, %v12285_v27  ;;  %v5686_v8 = vld [vmem:[%s13218_s10 + $0x190] sm:$0xff]  ;;  %v5687_v26 = vld [vmem:[%s13218_s10 + $0x198] sm:$0xff] }
 0x964   :  { %10537 = vrot.lane.b32.xlu1 %v10536_v52, %s10993_s27  ;;  %v12297_v49 = vmax.f32 %v12218_v22, %v5328_v60  ;;  %v12300_v20 = vmax.f32 %v12209_v6, %v5329_v25  ;;  %v12303_v53 = vmax.f32 %v12215_v31, %v5327_v13  ;;  %v12306_v4 = vmax.f32 %v12212_v54, %v5353_v56  ;;  %v5684_v22 = vld [vmem:[%s13218_s10 + $0x180] sm:$0xff]  ;;  %v5685_v54 = vld [vmem:[%s13218_s10 + $0x188] sm:$0xff]  ;;  %v5638_v35 = vld [vmem:[%s13218_s10 + $0x10] sm:$0xff] }
 0x965   :  { %10542 = vrot.lane.b32.xlu0 %v10541_v42, %s10993_s27  ;;  %v9853_v6 = vpack.c.bf16 %v5653_v44, %v5652_v12  ;;  %v5636_v31 = vld [vmem:[%s13218_s10] sm:$0xff]  ;;  %v9885_v62 = vpack.c.bf16 %v5685_v54, %v5684_v22  ;;  %v9889_v59 = vpack.c.bf16 %v5687_v26, %v5686_v8  ;;  %v5639_v25 = vld [vmem:[%s13218_s10 + $0x18] sm:$0xff]  ;;  %v5670_v52 = vld [vmem:[%s13218_s10 + $0x110] sm:$0xff]  ;;  %vm7548_vm15 = vcmask 1044480  }
 0x966   :  { %v10546_v30 = vpack.i.bf16 %v12300_v20, %v12297_v49  ;;  %v10551_v47 = vpack.i.bf16 %v12303_v53, %v12306_v4  ;;  %v9855_v48 = vpack.c.bf16 %v5637_v5, %v5636_v31  ;;  %v9859_v60 = vpack.c.bf16 %v5639_v25, %v5638_v35  ;;  %v5671_v13 = vld [vmem:[%s13218_s10 + $0x118] sm:$0xff]  ;;  %v5656_v56 = vld [vmem:[%s13218_s10 + $0xa0] sm:$0xff]  ;;  %v5657_v42 = vld [vmem:[%s13218_s10 + $0xa8] sm:$0xff] }
 0x967   :  { %9854 = vmatprep.subr.bf16.mxu1 %v9853_v6  ;;  %9886 = vmatprep.subr.bf16.mxu0 %v9885_v62  ;;  %v9891_v12 = vpack.c.bf16 %v5671_v13, %v5670_v52  ;;  %v9861_v44 = vpack.c.bf16 %v5657_v42, %v5656_v56  ;;  %v5688_v22 = vld [vmem:[%s13218_s10 + $0x1a0] sm:$0xff]  ;;  %v5689_v6 = vld [vmem:[%s13218_s10 + $0x1a8] sm:$0xff]  ;;  %v5658_v62 = vld [vmem:[%s13218_s10 + $0xb0] sm:$0xff] }
 0x968   :  { %10547 = vrot.lane.b32.xlu1 %v10546_v30, %s10993_s27  ;;  %9856 = vmatpush3.bf16.msra.mxu1 %v9855_v48  ;;  %v5640_v54 = vld [vmem:[%s13218_s10 + $0x20] sm:$0xff]  ;;  %v9893_v31 = vpack.c.bf16 %v5689_v6, %v5688_v22  ;;  %v5641_v5 = vld [vmem:[%s13218_s10 + $0x28] sm:$0xff]  ;;  %v5659_v48 = vld [vmem:[%s13218_s10 + $0xb8] sm:$0xff] }
 0x969   :  { %10552 = vrot.lane.b32.xlu0 %v10551_v47, %s10993_s27  ;;  %9888 = vmatpush3.bf16.msra.mxu0 %v9887_v16  ;;  %v5672_v30 = vld [vmem:[%s13218_s10 + $0x120] sm:$0xff]  ;;  %v5673_v47 = vld [vmem:[%s13218_s10 + $0x128] sm:$0xff]  ;;  %v9863_v40 = vpack.c.bf16 %v5641_v5, %v5640_v54  ;;  %v9865_v39 = vpack.c.bf16 %v5659_v48, %v5658_v62  ;;  %v5642_v8 = vld [vmem:[%s13218_s10 + $0x30] sm:$0xff] }
 0x96a   :  { %9858 = vmatprep.subr.bf16.mxu1 %v9857_v1  ;;  %9890 = vmatprep.subr.bf16.mxu0 %v9889_v59  ;;  %v9895_v16 = vpack.c.bf16 %v5673_v47, %v5672_v30  ;;  %v5643_v26 = vld [vmem:[%s13218_s10 + $0x38] sm:$0xff]  ;;  %v5674_v1 = vld [vmem:[%s13218_s10 + $0x130] sm:$0xff]  ;;  %v9897_v59 = vpack.c.bf16 %v5691_v41, %v5690_v63  ;;  %v5660_v25 = vld [vmem:[%s13218_s10 + $0xc0] sm:$0xff] }
 0x96b   :  { %v5675_v35 = vld [vmem:[%s13218_s10 + $0x138] sm:$0xff]  ;;  %v5661_v52 = vld [vmem:[%s13218_s10 + $0xc8] sm:$0xff]  ;;  %v9867_v56 = vpack.c.bf16 %v5643_v26, %v5642_v8  ;;  %v5676_v6 = vld [vmem:[%s13218_s10 + $0x140] sm:$0xff] }
 0x96c   :  { %9860 = vmatpush3.bf16.msra.mxu1 %v9859_v60  ;;  %v5692_v60 = vld [vmem:[%s13218_s10 + $0x1c0] sm:$0xff]  ;;  %v5693_v13 = vld [vmem:[%s13218_s10 + $0x1c8] sm:$0xff]  ;;  %v9899_v42 = vpack.c.bf16 %v5675_v35, %v5674_v1  ;;  %v5662_v5 = vld [vmem:[%s13218_s10 + $0xd0] sm:$0xff] }
 0x96d   :  { %9892 = vmatpush3.bf16.msra.mxu0 %v9891_v12  ;;  %9862 = vmatprep.subr.bf16.mxu1 %v9861_v44  ;;  %v9869_v12 = vpack.c.bf16 %v5661_v52, %v5660_v25  ;;  %v5644_v44 = vld [vmem:[%s13218_s10 + $0x40] sm:$0xff]  ;;  %v5645_v22 = vld [vmem:[%s13218_s10 + $0x48] sm:$0xff]  ;;  %v9901_v54 = vpack.c.bf16 %v5693_v13, %v5692_v60  ;;  %v5663_v30 = vld [vmem:[%s13218_s10 + $0xd8] sm:$0xff] }
 0x96e   :  { %9894 = vmatprep.subr.bf16.mxu0 %v9893_v31  ;;  %v5677_v31 = vld [vmem:[%s13218_s10 + $0x148] sm:$0xff]  ;;  %v5694_v47 = vld [vmem:[%s13218_s10 + $0x1d0] sm:$0xff]  ;;  %v5695_v62 = vld [vmem:[%s13218_s10 + $0x1d8] sm:$0xff]  ;;  %v9871_v48 = vpack.c.bf16 %v5645_v22, %v5644_v44 }
 0x96f   :  { %v9903_v63 = vpack.c.bf16 %v5677_v31, %v5676_v6  ;;  %v5646_v41 = vld [vmem:[%s13218_s10 + $0x50] sm:$0xff]  ;;  %v9905_v8 = vpack.c.bf16 %v5695_v62, %v5694_v47  ;;  %v5679_v26 = vld [vmem:[%s13218_s10 + $0x158] sm:$0xff]  ;;  %v5664_v1 = vld [vmem:[%s13218_s10 + $0xe0] sm:$0xff] }
 0x970   :  { %9864 = vmatpush3.bf16.msra.mxu1 %v9863_v40  ;;  %v9873_v40 = vpack.c.bf16 %v5663_v30, %v5662_v5  ;;  %v5696_v35 = vld [vmem:[%s13218_s10 + $0x1e0] sm:$0xff]  ;;  %v5697_v25 = vld [vmem:[%s13218_s10 + $0x1e8] sm:$0xff]  ;;  %v5666_v31 = vld [vmem:[%s13218_s10 + $0xf0] sm:$0xff] }
 0x971   :  { %9896 = vmatpush3.bf16.msra.mxu0 %v9895_v16  ;;  %9866 = vmatprep.subr.bf16.mxu1 %v9865_v39  ;;  %v5647_v16 = vld [vmem:[%s13218_s10 + $0x58] sm:$0xff]  ;;  %v5678_v39 = vld [vmem:[%s13218_s10 + $0x150] sm:$0xff]  ;;  %v5680_v44 = vld [vmem:[%s13218_s10 + $0x160] sm:$0xff] }
 0x972   :  { %9898 = vmatprep.subr.bf16.mxu0 %v9897_v59  ;;  %v5665_v59 = vld [vmem:[%s13218_s10 + $0xe8] sm:$0xff]  ;;  %v9875_v52 = vpack.c.bf16 %v5647_v16, %v5646_v41  ;;  %v9907_v60 = vpack.c.bf16 %v5679_v26, %v5678_v39  ;;  %v5667_v5 = vld [vmem:[%s13218_s10 + $0xf8] sm:$0xff]  ;;  %v5698_v30 = vld [vmem:[%s13218_s10 + $0x1f0] sm:$0xff] }
 0x973   :  { %v9877_v13 = vpack.c.bf16 %v5665_v59, %v5664_v1  ;;  %v5681_v22 = vld [vmem:[%s13218_s10 + $0x168] sm:$0xff]  ;;  %v9881_v47 = vpack.c.bf16 %v5667_v5, %v5666_v31  ;;  %v5699_v62 = vld [vmem:[%s13218_s10 + $0x1f8] sm:$0xff] }
 0x974   :  { %9868 = vmatpush3.bf16.msra.mxu1 %v9867_v56  ;;  %v5648_v56 = vld [vmem:[%s13218_s10 + $0x60] sm:$0xff]  ;;  %v9913_v16 = vpack.c.bf16 %v5699_v62, %v5698_v30  ;;  %v5683_v26 = vld [vmem:[%s13218_s10 + $0x178] sm:$0xff] }
 0x975   :  { %9900 = vmatpush3.bf16.msra.mxu0 %v9899_v42  ;;  %9870 = vmatprep.subr.bf16.mxu1 %v9869_v12  ;;  %v5649_v42 = vld [vmem:[%s13218_s10 + $0x68] sm:$0xff]  ;;  %v9909_v12 = vpack.c.bf16 %v5697_v25, %v5696_v35 }
 0x976   :  { %9902 = vmatprep.subr.bf16.mxu0 %v9901_v54  ;;  %v9879_v6 = vpack.c.bf16 %v5649_v42, %v5648_v56  ;;  %v9911_v54 = vpack.c.bf16 %v5681_v22, %v5680_v44  ;;  %v5620_v42 = vld [vmem:[%s13217_s9 + $0x180] sm:$0xff] }
 0x978   :  { %9872 = vmatpush3.bf16.msra.mxu1 %v9871_v48  ;;  %v5650_v48 = vld [vmem:[%s13218_s10 + $0x70] sm:$0xff] }
 0x979   :  { %9904 = vmatpush3.bf16.msra.mxu0 %v9903_v63  ;;  %9874 = vmatprep.subr.bf16.mxu1 %v9873_v40  ;;  %v5651_v63 = vld [vmem:[%s13218_s10 + $0x78] sm:$0xff] }
 0x97a   :  { %9906 = vmatprep.subr.bf16.mxu0 %v9905_v8  ;;  %v9883_v39 = vpack.c.bf16 %v5651_v63, %v5650_v48  ;;  %v5682_v8 = vld [vmem:[%s13218_s10 + $0x170] sm:$0xff] }
 0x97c   :  { %9876 = vmatpush3.bf16.msra.mxu1 %v9875_v52  ;;  %v5588_v52 = vld [vmem:[%s13217_s9 + $0x80] sm:$0xff] }
 0x97d   :  { %9908 = vmatpush3.bf16.msra.mxu0 %v9907_v60  ;;  %9878 = vmatprep.subr.bf16.mxu1 %v9877_v13  ;;  %v5589_v60 = vld [vmem:[%s13217_s9 + $0x88] sm:$0xff]  ;;  %v9915_v13 = vpack.c.bf16 %v5683_v26, %v5682_v8 }
 0x97e   :  { %9910 = vmatprep.subr.bf16.mxu0 %v9909_v12  ;;  %v9917_v56 = vpack.c.bf16 %v5589_v60, %v5588_v52  ;;  %v5621_v12 = vld [vmem:[%s13217_s9 + $0x188] sm:$0xff] }
 0x97f   :  { %v9949_v62 = vpack.c.bf16 %v5621_v12, %v5620_v42 }
 0x980   :  { %9880 = vmatpush3.bf16.msra.mxu1 %v9879_v6 }
 0x981   :  { %9912 = vmatpush3.bf16.msra.mxu0 %v9911_v54  ;;  %9882 = vmatprep.subr.bf16.mxu1 %v9881_v47 }
 0x982   :  { %9914 = vmatprep.subr.bf16.mxu0 %v9913_v16 }
 0x984   :  { %9884 = vmatpush3.bf16.msra.mxu1 %v9883_v39 }
 0x985   :  { %9916 = vmatpush3.bf16.msra.mxu0 %v9915_v13  ;;  %9918 = vmatprep.subr.bf16.mxu1 %v9917_v56 }
 0x986   :  { %9950 = vmatprep.subr.bf16.mxu0 %v9949_v62 }
 0x9cb   :  { %v10518_v40 = vpop.permute.xlu1 %10517  ;;  %v10523_v41 = vpop.permute.xlu0 %10522 }
 0x9cc   :  { %v10520_v1 = vunpack.i.h.bf16 %v10518_v40  ;;  %v10519_v59 = vunpack.i.l.bf16 %v10518_v40  ;;  %v10525_v35 = vunpack.i.h.bf16 %v10523_v41  ;;  %v10524_v25 = vunpack.i.l.bf16 %v10523_v41 }
 0x9ce   :  { %v5420_v44 = vsel %vm5418_vm6, %v10519_v59, %v10520_v1  ;;  %v5419_v22 = vsel %vm5418_vm6, %v10525_v35, %v10519_v59  ;;  %v5421_v6 = vsel %vm5418_vm6, %v10520_v1, %v10524_v25  ;;  %v5451_v54 = vsel %vm5418_vm6, %v10524_v25, %v10525_v35 }
 0x9cf   :  { %v12524_v31 = vmax.f32 %v12238_v0, %v5419_v22  ;;  %v12527_v5 = vmax.f32 %v12241_v55, %v5451_v54  ;;  %v12530_v30 = vmax.f32 %v12232_v61, %v5420_v44  ;;  %v12533_v47 = vmax.f32 %v12235_v7, %v5421_v6 }
 0x9d1   :  { %v10528_v48 = vpop.permute.xlu1 %10527  ;;  %v10533_v63 = vpop.permute.xlu0 %10532  ;;  %v10561_v40 = vpack.i.bf16 %v12527_v5, %v12524_v31  ;;  %v10556_v0 = vpack.i.bf16 %v12533_v47, %v12530_v30 }
 0x9d2   :  { %v10530_v41 = vunpack.i.h.bf16 %v10528_v48  ;;  %v10529_v55 = vunpack.i.l.bf16 %v10528_v48  ;;  %v10535_v16 = vunpack.i.h.bf16 %v10533_v63  ;;  %v10534_v39 = vunpack.i.l.bf16 %v10533_v63 }
 0x9d3   :  { %10562 = vrot.lane.b32.xlu0 %v10561_v40, %s10994_s28  ;;  %10557 = vrot.lane.b32.xlu1 %v10556_v0, %s10994_s28 }
 0x9d4   :  { %v5423_v61 = vsel %vm5418_vm6, %v10529_v55, %v10530_v41  ;;  %v5422_v7 = vsel %vm5418_vm6, %v10535_v16, %v10529_v55  ;;  %v5424_v8 = vsel %vm5418_vm6, %v10530_v41, %v10534_v39  ;;  %v5452_v26 = vsel %vm5418_vm6, %v10534_v39, %v10535_v16 }
 0x9d5   :  { %v12546_v1 = vmax.f32 %v12260_v2, %v5422_v7  ;;  %v12549_v59 = vmax.f32 %v12263_v11, %v5452_v26  ;;  %v12552_v35 = vmax.f32 %v12254_v9, %v5423_v61  ;;  %v12555_v25 = vmax.f32 %v12257_v36, %v5424_v8 }
 0x9d6   :  { %v10538_v52 = vpop.permute.xlu1 %10537 }
 0x9d7   :  { %v10540_v60 = vunpack.i.h.bf16 %v10538_v52  ;;  %v10539_v13 = vunpack.i.l.bf16 %v10538_v52  ;;  %v10543_v56 = vpop.permute.xlu0 %10542  ;;  %v10571_v42 = vpack.i.bf16 %v12549_v59, %v12546_v1  ;;  %v10566_v2 = vpack.i.bf16 %v12555_v25, %v12552_v35 }
 0x9d8   :  { %v10545_v12 = vunpack.i.h.bf16 %v10543_v56  ;;  %v10544_v44 = vunpack.i.l.bf16 %v10543_v56 }
 0x9d9   :  { %v5426_v11 = vsel %vm5418_vm6, %v10539_v13, %v10540_v60  ;;  %10572 = vrot.lane.b32.xlu0 %v10571_v42, %s10994_s28  ;;  %10567 = vrot.lane.b32.xlu1 %v10566_v2, %s10994_s28 }
 0x9da   :  { %v5425_v9 = vsel %vm5418_vm6, %v10545_v12, %v10539_v13  ;;  %v5427_v36 = vsel %vm5418_vm6, %v10540_v60, %v10544_v44  ;;  %v5453_v22 = vsel %vm5418_vm6, %v10544_v44, %v10545_v12  ;;  %v10548_v6 = vpop.permute.xlu1 %10547  ;;  %v12568_v54 = vmax.f32 %v12276_v24, %v5426_v11 }
 0x9db   :  { %v10550_v62 = vunpack.i.h.bf16 %v10548_v6  ;;  %v10549_v48 = vunpack.i.l.bf16 %v10548_v6  ;;  %v10553_v63 = vpop.permute.xlu0 %10552  ;;  %v12571_v40 = vmax.f32 %v12282_v46, %v5425_v9  ;;  %v12574_v0 = vmax.f32 %v12285_v27, %v5453_v22  ;;  %v5590_v9 = vld [vmem:[%s13217_s9 + $0x90] sm:$0xff]  ;;  %v5591_v6 = vld [vmem:[%s13217_s9 + $0x98] sm:$0xff] }
 0x9dc   :  { %v10555_v41 = vunpack.i.h.bf16 %v10553_v63  ;;  %v10554_v55 = vunpack.i.l.bf16 %v10553_v63  ;;  %v12577_v16 = vmax.f32 %v12279_v58, %v5427_v36 }
 0x9dd   :  { %v5429_v39 = vsel %vm5418_vm6, %v10549_v48, %v10550_v62  ;;  %v10581_v24 = vpack.i.bf16 %v12574_v0, %v12571_v40 }
 0x9de   :  { %v5428_v61 = vsel %vm5418_vm6, %v10555_v41, %v10549_v48  ;;  %v5430_v7 = vsel %vm5418_vm6, %v10550_v62, %v10554_v55  ;;  %v5454_v46 = vsel %vm5418_vm6, %v10554_v55, %v10555_v41  ;;  %v10576_v27 = vpack.i.bf16 %v12577_v16, %v12568_v54  ;;  %v5622_v62 = vld [vmem:[%s13217_s9 + $0x190] sm:$0xff]  ;;  %v5623_v48 = vld [vmem:[%s13217_s9 + $0x198] sm:$0xff] }
 0x9df   :  { %10582 = vrot.lane.b32.xlu0 %v10581_v24, %s10994_s28  ;;  %v12589_v8 = vmax.f32 %v12303_v53, %v5428_v61  ;;  %v12592_v58 = vmax.f32 %v12306_v4, %v5454_v46  ;;  %v12595_v26 = vmax.f32 %v12297_v49, %v5429_v39  ;;  %v12598_v52 = vmax.f32 %v12300_v20, %v5430_v7  ;;  %v5572_v49 = vld [vmem:[%s13217_s9] sm:$0xff]  ;;  %v5573_v20 = vld [vmem:[%s13217_s9 + $0x8] sm:$0xff] }
 0x9e0   :  { %10577 = vrot.lane.b32.xlu1 %v10576_v27, %s10994_s28  ;;  %v5604_v53 = vld [vmem:[%s13217_s9 + $0x100] sm:$0xff]  ;;  %v5605_v4 = vld [vmem:[%s13217_s9 + $0x108] sm:$0xff]  ;;  %v9919_v36 = vpack.c.bf16 %v5573_v20, %v5572_v49  ;;  %v5574_v27 = vld [vmem:[%s13217_s9 + $0x10] sm:$0xff] }
 0x9e1   :  { %v10591_v60 = vpack.i.bf16 %v12592_v58, %v12589_v8  ;;  %v10586_v13 = vpack.i.bf16 %v12598_v52, %v12595_v26  ;;  %v9951_v22 = vpack.c.bf16 %v5605_v4, %v5604_v53  ;;  %v5575_v49 = vld [vmem:[%s13217_s9 + $0x18] sm:$0xff] }
 0x9e3   :  { %10592 = vrot.lane.b32.xlu0 %v10591_v60, %s10994_s28  ;;  %v9921_v60 = vpack.c.bf16 %v5591_v6, %v5590_v9  ;;  %v5625_v9 = vld [vmem:[%s13217_s9 + $0x1a8] sm:$0xff] }
 0x9e4   :  { %10587 = vrot.lane.b32.xlu1 %v10586_v13, %s10994_s28  ;;  %v9953_v13 = vpack.c.bf16 %v5623_v48, %v5622_v62 }
 0xa45   :  { %v10563_v56 = vpop.permute.xlu0 %10562  ;;  %v10558_v42 = vpop.permute.xlu1 %10557 }
 0xa46   :  { %v10565_v2 = vunpack.i.h.bf16 %v10563_v56  ;;  %v10564_v12 = vunpack.i.l.bf16 %v10563_v56  ;;  %v10560_v44 = vunpack.i.h.bf16 %v10558_v42  ;;  %v10559_v11 = vunpack.i.l.bf16 %v10558_v42  ;;  %v5592_v42 = vld [vmem:[%s13217_s9 + $0xa0] sm:$0xff] }
 0xa48   :  { %v5522_v63 = vsel %vm5519_vm7, %v10560_v44, %v10565_v2  ;;  %v5520_v41 = vsel %vm5519_vm7, %v10564_v12, %v10559_v11  ;;  %v5521_v55 = vsel %vm5519_vm7, %v10559_v11, %v10560_v44  ;;  %v5552_v39 = vsel %vm5519_vm7, %v10565_v2, %v10564_v12  ;;  %v5593_v44 = vld [vmem:[%s13217_s9 + $0xa8] sm:$0xff]  ;;  %v5624_v11 = vld [vmem:[%s13217_s9 + $0x1a0] sm:$0xff] }
 0xa49   :  { %v5558_v24 = vmax.f32 %v12533_v47, %v5522_v63  ;;  %v5556_v61 = vmax.f32 %v12524_v31, %v5520_v41  ;;  %v5557_v7 = vmax.f32 %v12530_v30, %v5521_v55  ;;  %v5559_v46 = vmax.f32 %v12527_v5, %v5552_v39  ;;  %v5606_v47 = vld [vmem:[%s13217_s9 + $0x110] sm:$0xff]  ;;  %v5607_v31 = vld [vmem:[%s13217_s9 + $0x118] sm:$0xff]  ;;  %v5576_v55 = vld [vmem:[%s13217_s9 + $0x20] sm:$0xff] }
 0xa4a   :  { %v9923_v2 = vpack.c.bf16 %v5575_v49, %v5574_v27  ;;  %v9955_v12 = vpack.c.bf16 %v5607_v31, %v5606_v47  ;;  %v5577_v39 = vld [vmem:[%s13217_s9 + $0x28] sm:$0xff]  ;;  %v5626_v27 = vld [vmem:[%s13217_s9 + $0x1b0] sm:$0xff] }
 0xa4b   :  { %v10573_v30 = vpop.permute.xlu0 %10572  ;;  %v10568_v5 = vpop.permute.xlu1 %10567  ;;  %5764 = vmatprep.mubr.f32.mxu1 %v5557_v7  ;;  %5849 = vmatprep.mubr.f32.mxu0 %v5559_v46  ;;  %v9957_v7 = vpack.c.bf16 %v5625_v9, %v5624_v11 }
 0xa4c   :  { %v10575_v20 = vunpack.i.h.bf16 %v10573_v30  ;;  %v10574_v53 = vunpack.i.l.bf16 %v10573_v30  ;;  %v10570_v4 = vunpack.i.h.bf16 %v10568_v5  ;;  %v10569_v56 = vunpack.i.l.bf16 %v10568_v5  ;;  %5765 = vmatmul.mubr.f32.vlgmr.msra.gmra.mrb[16].mxu1 %v5556_v61  ;;  %5850 = vmatmul.mubr.f32.vlgmr.msra.gmra.mrb[18].mxu0 %v5558_v24 }
 0xa4d   :  { %9920 = vmatpush3.bf16.msra.mxu1 %v9919_v36  ;;  %9952 = vmatpush3.bf16.msra.mxu0 %v9951_v22  ;;  %v9925_v61 = vpack.c.bf16 %v5593_v44, %v5592_v42  ;;  %v9927_v5 = vpack.c.bf16 %v5577_v39, %v5576_v55  ;;  %v5578_v42 = vld [vmem:[%s13217_s9 + $0x30] sm:$0xff]  ;;  %v5579_v44 = vld [vmem:[%s13217_s9 + $0x38] sm:$0xff] }
 0xa4e   :  { %v5524_v6 = vsel %vm5519_vm7, %v10569_v56, %v10570_v4  ;;  %v5553_v62 = vsel %vm5519_vm7, %v10575_v20, %v10574_v53  ;;  %9922 = vmatprep.subr.bf16.mxu1 %v9921_v60  ;;  %9954 = vmatprep.subr.bf16.mxu0 %v9953_v13  ;;  %v5523_v36 = vsel %vm5519_vm7, %v10574_v53, %v10569_v56  ;;  %v5627_v60 = vld [vmem:[%s13217_s9 + $0x1b8] sm:$0xff] }
 0xa4f   :  { %v5561_v22 = vmax.f32 %v12552_v35, %v5524_v6  ;;  %v5563_v48 = vmax.f32 %v12549_v59, %v5553_v62  ;;  %v5560_v63 = vmax.f32 %v12546_v1, %v5523_v36  ;;  %v5525_v41 = vsel %vm5519_vm7, %v10570_v4, %v10575_v20  ;;  %v5608_v59 = vld [vmem:[%s13217_s9 + $0x120] sm:$0xff]  ;;  %v5609_v1 = vld [vmem:[%s13217_s9 + $0x128] sm:$0xff]  ;;  %v5594_v35 = vld [vmem:[%s13217_s9 + $0xb0] sm:$0xff] }
 0xa50   :  { %v5562_v24 = vmax.f32 %v12555_v25, %v5525_v41  ;;  %v5595_v25 = vld [vmem:[%s13217_s9 + $0xb8] sm:$0xff]  ;;  %v9959_v20 = vpack.c.bf16 %v5609_v1, %v5608_v59  ;;  %v9961_v56 = vpack.c.bf16 %v5627_v60, %v5626_v27  ;;  %v5610_v62 = vld [vmem:[%s13217_s9 + $0x130] sm:$0xff]  ;;  %v5597_v59 = vld [vmem:[%s13217_s9 + $0xc8] sm:$0xff] }
 0xa51   :  { %v10583_v46 = vpop.permute.xlu0 %10582  ;;  %5769 = vmatprep.mubr.f32.mxu1 %v5561_v22  ;;  %5854 = vmatprep.mubr.f32.mxu0 %v5563_v48  ;;  %v9929_v4 = vpack.c.bf16 %v5595_v25, %v5594_v35  ;;  %v5611_v36 = vld [vmem:[%s13217_s9 + $0x138] sm:$0xff]  ;;  %v5580_v35 = vld [vmem:[%s13217_s9 + $0x40] sm:$0xff] }
 0xa52   :  { %v10585_v13 = vunpack.i.h.bf16 %v10583_v46  ;;  %v10584_v49 = vunpack.i.l.bf16 %v10583_v46  ;;  %v10578_v47 = vpop.permute.xlu1 %10577  ;;  %5770 = vmatmul.mubr.f32.gmra.mrb[18].mxu1 %v5560_v63  ;;  %5855 = vmatmul.mubr.f32.gmra.mrb[20].mxu0 %v5562_v24  ;;  %v9963_v1 = vpack.c.bf16 %v5611_v36, %v5610_v62  ;;  %v5581_v46 = vld [vmem:[%s13217_s9 + $0x48] sm:$0xff]  ;;  %v5632_v36 = vld [vmem:[%s13217_s9 + $0x1e0] sm:$0xff] }
 0xa53   :  { %v10580_v31 = vunpack.i.h.bf16 %v10578_v47  ;;  %v10579_v30 = vunpack.i.l.bf16 %v10578_v47  ;;  %9924 = vmatpush3.bf16.msra.mxu1 %v9923_v2  ;;  %9956 = vmatpush3.bf16.msra.mxu0 %v9955_v12  ;;  %v5598_v47 = vld [vmem:[%s13217_s9 + $0xd0] sm:$0xff]  ;;  %v5601_v62 = vld [vmem:[%s13217_s9 + $0xe8] sm:$0xff] }
 0xa54   :  { %v5554_v53 = vsel %vm5519_vm7, %v10585_v13, %v10584_v49  ;;  %9926 = vmatprep.subr.bf16.mxu1 %v9925_v61  ;;  %9958 = vmatprep.subr.bf16.mxu0 %v9957_v7  ;;  %v9931_v61 = vpack.c.bf16 %v5579_v44, %v5578_v42  ;;  %v5596_v7 = vld [vmem:[%s13217_s9 + $0xc0] sm:$0xff]  ;;  %v5582_v44 = vld [vmem:[%s13217_s9 + $0x50] sm:$0xff] }
 0xa55   :  { %v10593_v11 = vpop.permute.xlu0 %10592  ;;  %v5527_v2 = vsel %vm5519_vm7, %v10579_v30, %v10580_v31  ;;  %v5567_v12 = vmax.f32 %v12574_v0, %v5554_v53  ;;  %v5526_v9 = vsel %vm5519_vm7, %v10584_v49, %v10579_v30  ;;  %v5528_v6 = vsel %vm5519_vm7, %v10580_v31, %v10585_v13  ;;  %v5612_v13 = vld [vmem:[%s13217_s9 + $0x140] sm:$0xff]  ;;  %v5613_v49 = vld [vmem:[%s13217_s9 + $0x148] sm:$0xff]  ;;  %v5631_v53 = vld [vmem:[%s13217_s9 + $0x1d8] sm:$0xff] }
 0xa56   :  { %v10595_v22 = vunpack.i.h.bf16 %v10593_v11  ;;  %v10594_v48 = vunpack.i.l.bf16 %v10593_v11  ;;  %v10588_v63 = vpop.permute.xlu1 %10587  ;;  %v5565_v41 = vmax.f32 %v12568_v54, %v5527_v2  ;;  %v5564_v55 = vmax.f32 %v12571_v40, %v5526_v9  ;;  %v5628_v54 = vld [vmem:[%s13217_s9 + $0x1c0] sm:$0xff]  ;;  %v5583_v11 = vld [vmem:[%s13217_s9 + $0x58] sm:$0xff] }
 0xa57   :  { %v10590_v0 = vunpack.i.h.bf16 %v10588_v63  ;;  %v10589_v39 = vunpack.i.l.bf16 %v10588_v63  ;;  %5859 = vmatprep.mubr.f32.mxu0 %v5567_v12  ;;  %v5566_v24 = vmax.f32 %v12577_v16, %v5528_v6  ;;  %9928 = vmatpush3.bf16.msra.mxu1 %v9927_v5  ;;  %v5629_v16 = vld [vmem:[%s13217_s9 + $0x1c8] sm:$0xff]  ;;  %v5599_v5 = vld [vmem:[%s13217_s9 + $0xd8] sm:$0xff]  ;;  %v9967_v42 = vpack.c.bf16 %v5613_v49, %v5612_v13  ;;  %v5600_v6 = vld [vmem:[%s13217_s9 + $0xe0] sm:$0xff] }
 0xa58   :  { %5774 = vmatprep.mubr.f32.mxu1 %v5565_v41  ;;  %9960 = vmatpush3.bf16.msra.mxu0 %v9959_v20  ;;  %v5555_v40 = vsel %vm5519_vm7, %v10595_v22, %v10594_v48  ;;  %v5630_v20 = vld [vmem:[%s13217_s9 + $0x1d0] sm:$0xff]  ;;  %v9937_v2 = vpack.c.bf16 %v5599_v5, %v5598_v47  ;;  %v5615_v9 = vld [vmem:[%s13217_s9 + $0x158] sm:$0xff]  ;;  %v5584_v41 = vld [vmem:[%s13217_s9 + $0x60] sm:$0xff] }
 0xa59   :  { %5775 = vmatmul.mubr.f32.gmra.mrb[20].mxu1 %v5564_v55  ;;  %5860 = vmatmul.mubr.f32.gmra.mrb[22].mxu0 %v5566_v24  ;;  %v5530_v25 = vsel %vm5519_vm7, %v10589_v39, %v10590_v0  ;;  %v5571_v27 = vmax.f32 %v12592_v58, %v5555_v40  ;;  %v5529_v60 = vsel %vm5519_vm7, %v10594_v48, %v10589_v39  ;;  %v5585_v55 = vld [vmem:[%s13217_s9 + $0x68] sm:$0xff]  ;;  %v5616_v24 = vld [vmem:[%s13217_s9 + $0x160] sm:$0xff]  ;;  %v5635_v40 = vld [vmem:[%s13217_s9 + $0x1f8] sm:$0xff] }
 0xa5a   :  { %v5569_v31 = vmax.f32 %v12595_v26, %v5530_v25  ;;  %9930 = vmatprep.subr.bf16.mxu1 %v9929_v4  ;;  %9962 = vmatprep.subr.bf16.mxu0 %v9961_v56  ;;  %v5568_v58 = vmax.f32 %v12589_v8, %v5529_v60  ;;  %v5531_v30 = vsel %vm5519_vm7, %v10590_v0, %v10595_v22  ;;  %v5633_v22 = vld [vmem:[%s13217_s9 + $0x1e8] sm:$0xff]  ;;  %v5618_v60 = vld [vmem:[%s13217_s9 + $0x170] sm:$0xff]  ;;  %v5619_v13 = vld [vmem:[%s13217_s9 + $0x178] sm:$0xff] }
 0xa5b   :  { %5864 = vmatprep.mubr.f32.mxu0 %v5571_v27  ;;  %v5570_v26 = vmax.f32 %v12598_v52, %v5531_v30  ;;  %9932 = vmatpush3.bf16.msra.mxu1 %v9931_v61  ;;  %v9933_v4 = vpack.c.bf16 %v5597_v59, %v5596_v7  ;;  %v9965_v8 = vpack.c.bf16 %v5629_v16, %v5628_v54  ;;  %v5614_v52 = vld [vmem:[%s13217_s9 + $0x150] sm:$0xff]  ;;  %v5617_v61 = vld [vmem:[%s13217_s9 + $0x168] sm:$0xff]  ;;  %v5603_v59 = vld [vmem:[%s13217_s9 + $0xf8] sm:$0xff] }
 0xa5c   :  { %5779 = vmatprep.mubr.f32.mxu1 %v5569_v31  ;;  %9964 = vmatpush3.bf16.msra.mxu0 %v9963_v1  ;;  %v9935_v56 = vpack.c.bf16 %v5581_v46, %v5580_v35  ;;  %v9969_v12 = vpack.c.bf16 %v5631_v53, %v5630_v20  ;;  %v9939_v48 = vpack.c.bf16 %v5583_v11, %v5582_v44  ;;  %v5602_v7 = vld [vmem:[%s13217_s9 + $0xf0] sm:$0xff]  ;;  %v5587_v27 = vld [vmem:[%s13217_s9 + $0x78] sm:$0xff] }
 0xa5d   :  { %5780 = vmatmul.mubr.f32.gmra.mrb[22].mxu1 %v5568_v58  ;;  %5865 = vmatmul.mubr.f32.gmra.mrb[24].mxu0 %v5570_v26  ;;  %v9971_v63 = vpack.c.bf16 %v5615_v9, %v5614_v52  ;;  %v9941_v0 = vpack.c.bf16 %v5601_v62, %v5600_v6  ;;  %v9973_v39 = vpack.c.bf16 %v5633_v22, %v5632_v36  ;;  %v5634_v54 = vld [vmem:[%s13217_s9 + $0x1f0] sm:$0xff]  ;;  %v6087_v31 = vld [vmem:[#allocation16 + $0x8] sm:$0xff]  ;;  %v6088_v52 = vld [vmem:[#allocation16 + $0x10] sm:$0xff] }
 0xa5e   :  { %5934 = vmatprep.mubr.f32.mxu1 %v11995_v43  ;;  %6019 = vmatprep.mubr.f32.mxu0 %v11989_v17  ;;  %v9943_v1 = vpack.c.bf16 %v5585_v55, %v5584_v41  ;;  %v9975_v16 = vpack.c.bf16 %v5617_v61, %v5616_v24  ;;  %v5586_v35 = vld [vmem:[%s13217_s9 + $0x70] sm:$0xff]  ;;  %v9945_v46 = vpack.c.bf16 %v5603_v59, %v5602_v7  ;;  %v6091_v58 = vld [vmem:[#allocation16 + $0x28] sm:$0xff]  ;;  %v6092_v9 = vld [vmem:[#allocation16 + $0x30] sm:$0xff]  ;;  %s10995_s9 = smov [#allocation19]  }
 0xa5f   :  { %9934 = vmatprep.subr.bf16.mxu1 %v9933_v4  ;;  %9966 = vmatprep.subr.bf16.mxu0 %v9965_v8  ;;  %v9977_v25 = vpack.c.bf16 %v5635_v40, %v5634_v54  ;;  %v9947_v49 = vpack.c.bf16 %v5587_v27, %v5586_v35  ;;  %v9979_v47 = vpack.c.bf16 %v5619_v13, %v5618_v60  ;;  %v6086_v30 = vld [vmem:[#allocation16] sm:$0xff]  ;;  %v6095_v26 = vld [vmem:[#allocation16 + $0x48] sm:$0xff]  ;;  %v6089_v44 = vld [vmem:[#allocation16 + $0x18] sm:$0xff]  ;;  %s7960_s22 = sshll.u32 %s10995_s9, 4  ;;  %s7961_s22 = int_to_ptr.vmem [resolvable:$true] %s7960_s22 }
 0xa60   :  { %9936 = vmatpush3.bf16.msra.mxu1 %v9935_v56  ;;  %9968 = vmatpush3.bf16.msra.mxu0 %v9967_v42  ;;  %v9981_v5 = vpack.c.bf16 %v6091_v58, %v6087_v31  ;;  %v6090_v20 = vld [vmem:[#allocation16 + $0x20] sm:$0xff]  ;;  %v6099_v4 = vld [vmem:[#allocation16 + $0x68] sm:$0xff]  ;;  %v6093_v11 = vld [vmem:[#allocation16 + $0x38] sm:$0xff]  ;;  %v12837_v6 = vpack.c.bf16 %v6092_v9, %v6088_v52  ;;  %s10935_s23 = scalar_lea.vmem %s7961_s22, 2048  ;;  %p10940_p11 = scmp.lt.s32.totalorder %s7961_s22, %s7961_s22 }
 0xa61   :  { %9938 = vmatprep.subr.bf16.mxu1 %v9937_v2  ;;  %9970 = vmatprep.subr.bf16.mxu0 %v9969_v12  ;;  %v9983_v53 = vpack.c.bf16 %v6090_v20, %v6086_v30  ;;  %v6094_v8 = vld [vmem:[#allocation16 + $0x40] sm:$0xff]  ;;  %v9985_v56 = vpack.c.bf16 %v6099_v4, %v6095_v26  ;;  %v9989_v12 = vpack.c.bf16 %v6093_v11, %v6089_v44  ;;  %v6097_v62 = vld [vmem:[#allocation16 + $0x58] sm:$0xff]  ;;  %p10936_p10 = scmp.ne.s32.totalorder %s7961_s22, %s10935_s23  ;;  %p10941_p12 = scmp.lt.s32.totalorder %s10935_s23, %s10935_s23 }
 0xa62   :  { %v6098_v42 = vld [vmem:[#allocation16 + $0x60] sm:$0xff]  ;;  %v6101_v36 = vld [vmem:[#allocation16 + $0x78] sm:$0xff] }
 0xa63   :  { %v9987_v2 = vpack.c.bf16 %v6098_v42, %v6094_v8  ;;  %v12839_v22 = vpack.c.bf16 %v6101_v36, %v6097_v62  ;;  %v6372_v55 = vld [vmem:[#allocation16 + $0x98] sm:$0xff]  ;;  %v13257_v36 = vld [vmem:[#allocation27_spill] sm:$0xff]  ;;  %p10942_p13 = por %p10941_p12, %p10940_p11 }
 0xa64   :  { %9940 = vmatpush3.bf16.msra.mxu1 %v9939_v48  ;;  %9972 = vmatpush3.bf16.msra.mxu0 %v9971_v63  ;;  %v6096_v48 = vld [vmem:[#allocation16 + $0x50] sm:$0xff] }
 0xa65   :  { %9942 = vmatprep.subr.bf16.mxu1 %v9941_v0  ;;  %9974 = vmatprep.subr.bf16.mxu0 %v9973_v39  ;;  %v6100_v63 = vld [vmem:[#allocation16 + $0x70] sm:$0xff]  ;;  %v6376_v0 = vld [vmem:[#allocation16 + $0xb8] sm:$0xff]  ;;  %p10943_p0 = pnand %p10942_p13, %p10936_p10 }
 0xa66   :  { %v12843_v41 = vpack.c.bf16 %v6100_v63, %v6096_v48  ;;  %v10005_v39 = vpack.c.bf16 %v6376_v0, %v6372_v55  ;;  %v6058_v48 = vadd.s32 4294967293, %v13257_v36  ;;  %v6371_v63 = vld [vmem:[#allocation16 + $0x90] sm:$0xff]  ;;  %v12852_v55 = vadd.s32 4294967294, %v13257_v36 }
 0xa68   :  { %9944 = vmatpush3.bf16.msra.mxu1 %v9943_v1  ;;  %9976 = vmatpush3.bf16.msra.mxu0 %v9975_v16  ;;  %vm6062_vm9 = vcmp.ge.s32.totalorder %v6058_v48, 0  ;;  %vm6345_vm10 = vcmp.ge.s32.totalorder %v12852_v55, 0 }
 0xa69   :  { %9946 = vmatprep.subr.bf16.mxu1 %v9945_v46  ;;  %9978 = vmatprep.subr.bf16.mxu0 %v9977_v25 }
 0xa6c   :  { %9948 = vmatpush3.bf16.msra.mxu1 %v9947_v49  ;;  %9980 = vmatpush3.bf16.msra.mxu0 %v9979_v47 }
 0xa6d   :  { %9982 = vmatprep.subr.bf16.mxu1 %v9981_v5  ;;  %9990 = vmatprep.subr.bf16.mxu0 %v9989_v12 }
 0xa6f   :  { %5935 = vmatmul.mubr.f32.vlgmr.msra.gmra.mrb[24].mxu1 %v11992_v28  ;;  %6020 = vmatmul.mubr.f32.vlgmr.msra.gmra.mrb[26].mxu0 %v11986_v34 }
 0xa70   :  { %5939 = vmatprep.mubr.f32.mxu1 %v12013_v19  ;;  %6024 = vmatprep.mubr.f32.mxu0 %v12001_v45 }
 0xa71   :  { %9984 = vmatpush1.bf16.msra.mxu1 %v9983_v53  ;;  %9992 = vmatpush1.bf16.msra.mxu0 %v12837_v6 }
 0xa72   :  { %9986 = vmatprep.subr.bf16.mxu1 %v9985_v56  ;;  %9994 = vmatprep.subr.bf16.mxu0 %v12839_v22 }
 0xa73   :  { %5940 = vmatmul.mubr.f32.gmra.mrb[26].mxu1 %v12010_v18  ;;  %6025 = vmatmul.mubr.f32.gmra.mrb[28].mxu0 %v11998_v10 }
 0xa74   :  { %5944 = vmatprep.mubr.f32.mxu1 %v12029_v32  ;;  %6029 = vmatprep.mubr.f32.mxu0 %v12019_v57 }
 0xa75   :  { %9988 = vmatpush1.bf16.msra.mxu1 %v9987_v2  ;;  %9996 = vmatpush1.bf16.msra.mxu0 %v12843_v41 }
 0xa76   :  { %10093 = vmatprep.subr.bf16.mxu1 %v9989_v12  ;;  %10006 = vmatprep.subr.bf16.mxu0 %v10005_v39 }
 0xa77   :  { %5945 = vmatmul.mubr.f32.gmra.mrb[28].mxu1 %v12026_v50  ;;  %6030 = vmatmul.mubr.f32.gmra.mrb[30].mxu0 %v12016_v38 }
 0xa78   :  { %5949 = vmatprep.mubr.f32.mxu1 %v12045_v14  ;;  %6034 = vmatprep.mubr.f32.mxu0 %v12039_v21 }
 0xa7b   :  { %5950 = vmatmul.mubr.f32.gmra.mrb[30].mxu1 %v12042_v37  ;;  %6035 = vmatmul.mubr.f32.gmra.mrb[32].mxu0 %v12034_v33 }
 0xa7c   :  { %6178 = vmatprep.mubr.f32.mxu1 %v13239_v23  ;;  %6267 = vmatprep.mubr.f32.mxu0 %v13239_v23 }
 0xb1f   :  { %v8156_v24 = vpop.f32.mrb[16].mxu1  ;;  %v8200_v61 = vpop.f32.mrb[18].mxu0 }
 0xb20   :  { %v8157_v7 = vpop.f32.mrb[17].mxu1  ;;  %v8201_v59 = vpop.f32.mrb[19].mxu0 }
 0xb21   :  { %v8158_v54 = vadd.f32 %v8157_v7, %v8156_v24  ;;  %v8202_v40 = vadd.f32 %v8201_v59, %v8200_v61  ;;  %v6375_v61 = vld [vmem:[#allocation16 + $0xb0] sm:$0xff]  ;;  %v12854_v7 = vld [vmem:[#allocation16 + $0xd8] sm:$0xff] }
 0xb22   :  { %v12856_v59 = vld [vmem:[#allocation16 + $0xf8] sm:$0xff] }
 0xb23   :  { %v5852_v1 = vadd.f32 %v8202_v40, %v8158_v54  ;;  %v13258_v54 = vld [vmem:[#allocation29_spill] sm:$0xff] }
 0xb24   :  { %v12859_v40 = vadd.s32 4294967293, %v13258_v54 }
 0xb25   :  { %v8159_v16 = vpop.f32.mrb[18].mxu1  ;;  %v8203_v35 = vpop.f32.mrb[20].mxu0 }
 0xb26   :  { %v8160_v46 = vpop.f32.mrb[19].mxu1  ;;  %v8204_v25 = vpop.f32.mrb[21].mxu0  ;;  %vm6064_vm13 = vcmp.ge.s32.totalorder %v12859_v40, 0 }
 0xb27   :  { %v8161_v27 = vadd.f32 %v8160_v46, %v8159_v16  ;;  %v8205_v60 = vadd.f32 %v8204_v25, %v8203_v35  ;;  %v12861_v46 = vld [vmem:[#allocation16 + $0xd0] sm:$0xff] }
 0xb28   :  { %v12863_v25 = vld [vmem:[#allocation16 + $0xf0] sm:$0xff] }
 0xb29   :  { %v5857_v13 = vadd.f32 %v8205_v60, %v8161_v27  ;;  %v12865_v27 = vld [vmem:[#allocation16 + $0x88] sm:$0xff] }
 0xb2c   :  { %v8162_v49 = vpop.f32.mrb[20].mxu1  ;;  %v8206_v47 = vpop.f32.mrb[22].mxu0 }
 0xb2d   :  { %v8163_v31 = vpop.f32.mrb[21].mxu1  ;;  %v8207_v58 = vpop.f32.mrb[23].mxu0 }
 0xb2e   :  { %v8164_v30 = vadd.f32 %v8163_v31, %v8162_v49  ;;  %v8208_v5 = vadd.f32 %v8207_v58, %v8206_v47  ;;  %v12869_v47 = vld [vmem:[#allocation16 + $0xa8] sm:$0xff]  ;;  %v12871_v31 = vld [vmem:[#allocation16 + $0x118] sm:$0xff] }
 0xb2f   :  { %v12873_v58 = vld [vmem:[#allocation16 + $0x138] sm:$0xff] }
 0xb30   :  { %v12846_v20 = vadd.f32 %v8208_v5, %v8164_v30  ;;  %v8165_v53 = vpop.f32.mrb[22].mxu1  ;;  %v8209_v26 = vpop.f32.mrb[24].mxu0  ;;  %v10007_v30 = vpack.c.bf16 %v6375_v61, %v6371_v63  ;;  %v12876_v5 = vld [vmem:[#allocation16 + $0x110] sm:$0xff]  ;;  %v10021_v36 = vpack.c.bf16 %v12873_v58, %v12871_v31 }
 0xb31   :  { %v8166_v4 = vpop.f32.mrb[23].mxu1  ;;  %v8210_v8 = vpop.f32.mrb[25].mxu0 }
 0xb32   :  { %v8167_v56 = vadd.f32 %v8166_v4, %v8165_v53  ;;  %v8211_v42 = vadd.f32 %v8210_v8, %v8209_v26 }
 0xb34   :  { %v12848_v44 = vadd.f32 %v8211_v42, %v8167_v56  ;;  %v10009_v56 = vpack.c.bf16 %v12856_v59, %v12854_v7  ;;  %v10011_v42 = vpack.c.bf16 %v12863_v25, %v12861_v46 }
 0xb42   :  { %v8244_v11 = vpop.f32.mrb[24].mxu1  ;;  %v8288_v2 = vpop.f32.mrb[26].mxu0 }
 0xb43   :  { %v8245_v12 = vpop.f32.mrb[25].mxu1  ;;  %v8289_v52 = vpop.f32.mrb[27].mxu0 }
 0xb44   :  { %v8246_v9 = vadd.f32 %v8245_v12, %v8244_v11  ;;  %v8290_v62 = vadd.f32 %v8289_v52, %v8288_v2  ;;  %v12884_v11 = vld [vmem:[#allocation16 + $0x130] sm:$0xff]  ;;  %v12886_v2 = vld [vmem:[#allocation16 + $0x158] sm:$0xff] }
 0xb45   :  { %v12888_v12 = vld [vmem:[#allocation16 + $0x178] sm:$0xff]  ;;  %v10023_v59 = vpack.c.bf16 %v12884_v11, %v12876_v5 }
 0xb46   :  { %v5937_v0 = vadd.f32 %v8246_v9, %v5852_v1  ;;  %v8247_v39 = vpop.f32.mrb[26].mxu1  ;;  %v8291_v24 = vpop.f32.mrb[28].mxu0  ;;  %v9997_v9 = vpack.c.bf16 %v12869_v47, %v12865_v27 }
 0xb47   :  { %v8248_v16 = vpop.f32.mrb[27].mxu1  ;;  %v8292_v35 = vpop.f32.mrb[29].mxu0 }
 0xb48   :  { %v12867_v60 = vadd.f32 %v8290_v62, %v5937_v0  ;;  %v8249_v1 = vadd.f32 %v8248_v16, %v8247_v39  ;;  %v8293_v49 = vadd.f32 %v8292_v35, %v8291_v24  ;;  %v12893_v62 = vadd.s32 4294967294, %v13258_v54 }
 0xb49   :  { %v10025_v54 = vpack.c.bf16 %v12888_v12, %v12886_v2 }
 0xb4a   :  { %v5942_v53 = vadd.f32 %v8249_v1, %v5857_v13  ;;  %v8250_v26 = vpop.f32.mrb[28].mxu1  ;;  %v8294_v4 = vpop.f32.mrb[30].mxu0  ;;  %v6046_v8 = vrot.slane %v12867_v60, 5  ;;  %v6329_v7 = vrot.slane %v12867_v60, 6  ;;  %v13238_v27 = vrot.slane %v12867_v60, 7 }
 0xb4b   :  { %v8251_v52 = vpop.f32.mrb[29].mxu1  ;;  %v8295_v13 = vpop.f32.mrb[31].mxu0 }
 0xb4c   :  { %v12897_v63 = vadd.f32 %v8293_v49, %v5942_v53  ;;  %v8252_v0 = vadd.f32 %v8251_v52, %v8250_v26  ;;  %v8296_v39 = vadd.f32 %v8295_v13, %v8294_v4  ;;  %v6057_v24 = vsel %vm6045_vm8, 0.0, %v6046_v8 }
 0xb4d   :  { %v6082_v61 = vsel %vm6062_vm9, %v6057_v24, 0.0  ;;  %v6340_v52 = vsel %vm4766_vm11, 0.0, %v6329_v7 }
 0xb4e   :  { %v5947_v16 = vadd.f32 %v8252_v0, %v12846_v20  ;;  %v8253_v35 = vpop.f32.mrb[30].mxu1  ;;  %v8297_v46 = vpop.f32.mrb[32].mxu0  ;;  %8047 = vmatmul.mubr.msk.f32.vlgmr.msra.gmra.mrb[32].mxu1 %vm4779_vm12, %v6082_v61  ;;  %8051 = vmatmul.mubr.msk.f32.vlgmr.msra.gmra.mrb[34].mxu0 %vm4779_vm12, %v6082_v61  ;;  %v6047_v25 = vrot.slane %v12897_v63, 5  ;;  %v6330_v48 = vrot.slane %v12897_v63, 6  ;;  %v6592_v47 = vrot.slane %v12897_v63, 7 }
 0xb4f   :  { %10095 = vmatpush1.bf16.msra.mxu1 %v12837_v6  ;;  %v8254_v1 = vpop.f32.mrb[31].mxu1  ;;  %v8298_v49 = vpop.f32.mrb[33].mxu0  ;;  %10008 = vmatpush1.bf16.msra.mxu0 %v10007_v30  ;;  %v7047_v20 = vrot.slane %v12867_v60, 1  ;;  %v7048_v31 = vrot.slane %v12897_v63, 1  ;;  %v7287_v58 = vrot.slane %v12897_v63, 2  ;;  %v7286_v6 = vrot.slane %v12867_v60, 2 }
 0xb50   :  { %v12917_v53 = vadd.f32 %v8296_v39, %v5947_v16  ;;  %v8255_v26 = vadd.f32 %v8254_v1, %v8253_v35  ;;  %v8299_v4 = vadd.f32 %v8298_v49, %v8297_v46  ;;  %6184 = vmatprep.mubr.f32.mxu1 %v13239_v23  ;;  %6273 = vmatprep.mubr.f32.mxu0 %v13239_v23  ;;  %v6617_v1 = vld [vmem:[#allocation16 + $0x150] sm:$0xff] }
 0xb51   :  { %v6048_v30 = vsel %vm6045_vm8, %v6046_v8, %v6047_v25  ;;  %10010 = vmatprep.subr.bf16.mxu0 %v10009_v56  ;;  %10094 = vmatprep.subr.bf16.mxu1 %v12839_v22  ;;  %v12926_v13 = vsel %vm4766_vm11, %v6329_v7, %v6330_v48  ;;  %v12931_v0 = vsel %vm511_vm0, %v13238_v27, %v6592_v47  ;;  %v6621_v49 = vld [vmem:[#allocation16 + $0x170] sm:$0xff] }
 0xb52   :  { %v5952_v39 = vadd.f32 %v8255_v26, %v12848_v44  ;;  %8048 = vmatmul.mubr.msk.f32.gmra.mrb[34].mxu1 %vm4779_vm12, %v6048_v30  ;;  %8052 = vmatmul.mubr.msk.f32.gmra.mrb[36].mxu0 %vm4779_vm12, %v6048_v30  ;;  %v6049_v8 = vrot.slane %v12917_v53, 5  ;;  %v6332_v22 = vrot.slane %v12917_v53, 6  ;;  %v6594_v56 = vrot.slane %v12917_v53, 7 }
 0xb53   :  { %10012 = vmatpush1.bf16.msra.mxu0 %v10011_v42  ;;  %6190 = vmatprep.mubr.f32.mxu1 %v13239_v23  ;;  %v12941_v24 = vsel %vm1568_vm3, %v7047_v20, %v7048_v31  ;;  %v7050_v61 = vrot.slane %v12917_v53, 1  ;;  %v12945_v44 = vsel %vm7285_vm14, %v7286_v6, %v7287_v58  ;;  %v7289_v7 = vrot.slane %v12917_v53, 2 }
 0xb54   :  { %v12948_v16 = vadd.f32 %v8299_v4, %v5952_v39  ;;  %6550 = vmatprep.mubr.f32.mxu0 %v13239_v23  ;;  %v6050_v35 = vsel %vm6045_vm8, %v6047_v25, %v6049_v8  ;;  %10096 = vmatpush1.bf16.msra.mxu1 %v12843_v41  ;;  %v12955_v42 = vsel %vm6345_vm10, %v6340_v52, 0.0  ;;  %v6333_v46 = vsel %vm4766_vm11, %v6330_v48, %v6332_v22  ;;  %v6832_v48 = vld [vmem:[#allocation16 + $0x198] sm:$0xff]  ;;  %v6369_v39 = vld [vmem:[#allocation16 + $0x80] sm:$0xff] }
 0xb55   :  { %v6084_v20 = vsel %vm6064_vm13, %v6050_v35, 0.0  ;;  %9998 = vmatprep.subr.bf16.mxu1 %v9997_v9  ;;  %10022 = vmatprep.subr.bf16.mxu0 %v10021_v36  ;;  %v12961_v26 = vsel %vm511_vm0, %v6592_v47, %v6594_v56  ;;  %v12964_v25 = vsel %vm1568_vm3, %v7048_v31, %v7050_v61  ;;  %v7550_v41 = vrot.slane %v12897_v63, 3  ;;  %v6836_v9 = vld [vmem:[#allocation16 + $0x1b8] sm:$0xff]  ;;  %v6373_v35 = vld [vmem:[#allocation16 + $0xa0] sm:$0xff] }
 0xb56   :  { %8049 = vmatmul.mubr.msk.f32.gmra.mrb[36].mxu1 %vm4779_vm12, %v6084_v20  ;;  %8059 = vmatmul.mubr.msk.f32.vlgmr.msra.gmra.mrb[34].mxu0 %vm4779_vm12, %v12955_v42  ;;  %v6051_v55 = vrot.slane %v12948_v16, 5  ;;  %v6334_v40 = vrot.slane %v12948_v16, 6  ;;  %v6596_v36 = vrot.slane %v12948_v16, 7  ;;  %v7552_v47 = vrot.slane %v12917_v53, 3 }
 0xb57   :  { %6196 = vmatprep.mubr.f32.mxu1 %v13239_v23  ;;  %6556 = vmatprep.mubr.f32.mxu0 %v13239_v23  ;;  %v10027_v31 = vpack.c.bf16 %v6621_v49, %v6617_v1  ;;  %v7052_v4 = vrot.slane %v12948_v16, 1  ;;  %v12978_v6 = vsel %vm7285_vm14, %v7287_v58, %v7289_v7  ;;  %v7291_v30 = vrot.slane %v12948_v16, 2  ;;  %v6378_v58 = vld [vmem:[#allocation16 + $0xc8] sm:$0xff] }
 0xb58   :  { %v6052_v52 = vsel %vm6045_vm8, %v6049_v8, %v6051_v55  ;;  %10024 = vmatpush1.bf16.msra.mxu0 %v10023_v59  ;;  %v12986_v27 = vsel %vm4766_vm11, %v6332_v22, %v6334_v40  ;;  %v12989_v1 = vsel %vm511_vm0, %v6594_v56, %v6596_v36  ;;  %v7549_v49 = vrot.slane %v12867_v60, 3  ;;  %v6382_v23 = vld [vmem:[#allocation16 + $0xe8] sm:$0xff] }
 0xb59   :  { %10026 = vmatprep.subr.bf16.mxu0 %v10025_v54  ;;  %v10037_v8 = vpack.c.bf16 %v6836_v9, %v6832_v48  ;;  %v12998_v5 = vsel %vm1568_vm3, %v7050_v61, %v7052_v4  ;;  %v13003_v11 = vsel %vm7285_vm14, %v7289_v7, %v7291_v30  ;;  %vm6347_vm11 = vcmp.ge.s32.totalorder %v12893_v62, 0  ;;  %v6377_v61 = vld [vmem:[#allocation16 + $0xc0] sm:$0xff]  ;;  %v6608_v40 = vld [vmem:[#allocation16 + $0x108] sm:$0xff] }
 0xb5a   :  { %8050 = vmatmul.mubr.msk.f32.gmra.mrb[38].mxu1 %vm4779_vm12, %v6052_v52  ;;  %8060 = vmatmul.mubr.msk.f32.gmra.mrb[36].mxu0 %vm4779_vm12, %v12926_v13  ;;  %v13010_v2 = vsel %vm7548_vm15, %v7549_v49, %v7550_v41  ;;  %v13013_v12 = vsel %vm7548_vm15, %v7550_v41, %v7552_v47  ;;  %v13259_v59 = vmov 0.0   ;;  %v9999_v54 = vpack.c.bf16 %v6373_v35, %v6369_v39  ;;  %v6381_v7 = vld [vmem:[#allocation16 + $0xe0] sm:$0xff]  ;;  %v6612_v62 = vld [vmem:[#allocation16 + $0x128] sm:$0xff]  ;;  %v6831_v39 = vld [vmem:[#allocation16 + $0x190] sm:$0xff] }
 0xb5b   :  { %6279 = vmatprep.mubr.f32.mxu1 %v13259_v59  ;;  %6562 = vmatprep.mubr.f32.mxu0 %v13259_v59  ;;  %v7554_v22 = vrot.slane %v12948_v16, 3  ;;  %v10001_v56 = vpack.c.bf16 %v6382_v23, %v6378_v58  ;;  %v6367_v55 = vsel %vm6347_vm11, %v6333_v46, 0.0  ;;  %v10003_v23 = vpack.c.bf16 %v6381_v7, %v6377_v61  ;;  %v6607_v48 = vld [vmem:[#allocation16 + $0x100] sm:$0xff]  ;;  %v6616_v36 = vld [vmem:[#allocation16 + $0x148] sm:$0xff]  ;;  %v6835_v35 = vld [vmem:[#allocation16 + $0x1b0] sm:$0xff] }
 0xb5c   :  { %10028 = vmatpush1.bf16.msra.mxu0 %v10027_v31  ;;  %v10013_v46 = vpack.c.bf16 %v6612_v62, %v6608_v40  ;;  %v6611_v9 = vld [vmem:[#allocation16 + $0x120] sm:$0xff]  ;;  %v6620_v31 = vld [vmem:[#allocation16 + $0x168] sm:$0xff]  ;;  %v10039_v61 = vpack.c.bf16 %v6835_v35, %v6831_v39  ;;  %v6840_v7 = vld [vmem:[#allocation16 + $0x1d8] sm:$0xff] }
 0xb5d   :  { %10038 = vmatprep.subr.bf16.mxu0 %v10037_v8  ;;  %v13021_v41 = vsel %vm7548_vm15, %v7552_v47, %v7554_v22  ;;  %v10015_v49 = vpack.c.bf16 %v6611_v9, %v6607_v48  ;;  %v10017_v58 = vpack.c.bf16 %v6620_v31, %v6616_v36  ;;  %v6615_v8 = vld [vmem:[#allocation16 + $0x140] sm:$0xff]  ;;  %v6844_v40 = vld [vmem:[#allocation16 + $0x1f8] sm:$0xff]  ;;  %v6839_v62 = vld [vmem:[#allocation16 + $0x1d0] sm:$0xff] }
 0xb5e   :  { %8053 = vmatmul.mubr.msk.f32.vlgmr.msra.gmra.mrb[40].mxu1 %vm4779_vm12, %v6084_v20  ;;  %8061 = vmatmul.mubr.msk.f32.gmra.mrb[38].mxu0 %vm4779_vm12, %v6367_v55  ;;  %v13260_v20 = vrot.slane %v12867_v60, 7  ;;  %v6830_v48 = vld [vmem:[#allocation16 + $0x188] sm:$0xff]  ;;  %v10041_v36 = vpack.c.bf16 %v6844_v40, %v6840_v7  ;;  %v7070_v39 = vld [vmem:[#allocation16 + $0x238] sm:$0xff]  ;;  %v6837_v7 = vld [vmem:[#allocation16 + $0x1c0] sm:$0xff] }
 0xb5f   :  { %10000 = vmatpush1.bf16.msra.mxu1 %v9999_v54  ;;  %6285 = vmatprep.mubr.f32.mxu1 %v13259_v59  ;;  %v6619_v54 = vld [vmem:[#allocation16 + $0x160] sm:$0xff]  ;;  %v7333_v35 = vld [vmem:[#allocation16 + $0x2b8] sm:$0xff] }
 0xb60   :  { %10002 = vmatprep.subr.bf16.mxu1 %v10001_v56  ;;  %6568 = vmatprep.mubr.f32.mxu0 %v13259_v59  ;;  %v6602_v47 = vsel %vm511_vm0, 0.0, %v13260_v20  ;;  %v10019_v9 = vpack.c.bf16 %v6619_v54, %v6615_v8  ;;  %v6838_v8 = vld [vmem:[#allocation16 + $0x1c8] sm:$0xff]  ;;  %v6841_v40 = vld [vmem:[#allocation16 + $0x1e0] sm:$0xff] }
 0xb61   :  { %v6603_v56 = vsel %vm564_vm1, %v6602_v47, 0.0  ;;  %v7066_v47 = vld [vmem:[#allocation16 + $0x218] sm:$0xff]  ;;  %v6842_v54 = vld [vmem:[#allocation16 + $0x1e8] sm:$0xff] }
 0xb62   :  { %8054 = vmatmul.mubr.msk.f32.gmra.mrb[42].mxu1 %vm4779_vm12, %v6052_v52  ;;  %8062 = vmatmul.mubr.msk.f32.gmra.mrb[40].mxu0 %vm4779_vm12, %v12986_v27  ;;  %v7069_v52 = vld [vmem:[#allocation16 + $0x230] sm:$0xff] }
 0xb63   :  { %10004 = vmatpush1.bf16.msra.mxu1 %v10003_v23  ;;  %6461 = vmatprep.mubr.f32.mxu1 %v13259_v59  ;;  %v6843_v23 = vld [vmem:[#allocation16 + $0x1f0] sm:$0xff] }
 0xb64   :  { %10014 = vmatprep.subr.bf16.mxu1 %v10013_v46  ;;  %6788 = vmatprep.mubr.f32.mxu0 %v13259_v59  ;;  %v6834_v46 = vld [vmem:[#allocation16 + $0x1a8] sm:$0xff]  ;;  %v10043_v31 = vpack.c.bf16 %v6843_v23, %v6839_v62  ;;  %v7074_v23 = vld [vmem:[#allocation16 + $0x258] sm:$0xff] }
 0xb65   :  { %v10029_v20 = vpack.c.bf16 %v6834_v46, %v6830_v48  ;;  %v7078_v48 = vld [vmem:[#allocation16 + $0x278] sm:$0xff]  ;;  %v7073_v46 = vld [vmem:[#allocation16 + $0x250] sm:$0xff] }
 0xb66   :  { %8055 = vmatmul.mubr.msk.f32.vlgmr.msra.gmra.mrb[32].mxu1 %vm4779_vm12, %v12955_v42  ;;  %8067 = vmatmul.mubr.msk.f32.vlgmr.msra.gmra.mrb[34].mxu0 %vm4779_vm12, %v6603_v56  ;;  %v10053_v42 = vpack.c.bf16 %v7070_v39, %v7066_v47 }
 0xb67   :  { %10016 = vmatpush1.bf16.msra.mxu1 %v10015_v49  ;;  %6467 = vmatprep.mubr.f32.mxu1 %v13259_v59  ;;  %v6605_v49 = vsel %vm566_vm2, %v12961_v26, 0.0  ;;  %v7065_v26 = vld [vmem:[#allocation16 + $0x210] sm:$0xff] }
 0xb68   :  { %6794 = vmatprep.mubr.f32.mxu0 %v13259_v59  ;;  %10018 = vmatprep.subr.bf16.mxu1 %v10017_v58  ;;  %v6833_v58 = vld [vmem:[#allocation16 + $0x1a0] sm:$0xff]  ;;  %v10055_v62 = vpack.c.bf16 %v7069_v52, %v7065_v26 }
 0xb69   :  { %10040 = vmatpush1.bf16.msra.mxu0 %v10039_v61  ;;  %v10033_v61 = vpack.c.bf16 %v6842_v54, %v6838_v8  ;;  %v7076_v8 = vld [vmem:[#allocation16 + $0x268] sm:$0xff]  ;;  %v7328_v54 = vld [vmem:[#allocation16 + $0x290] sm:$0xff] }
 0xb6a   :  { %8056 = vmatmul.mubr.msk.f32.gmra.mrb[34].mxu1 %vm4779_vm12, %v12926_v13  ;;  %8068 = vmatmul.mubr.msk.f32.gmra.mrb[36].mxu0 %vm4779_vm12, %v12931_v0  ;;  %v6829_v13 = vld [vmem:[#allocation16 + $0x180] sm:$0xff] }
 0xb6b   :  { %6473 = vmatprep.mubr.f32.mxu1 %v13259_v59  ;;  %6800 = vmatprep.mubr.f32.mxu0 %v13259_v59 }
 0xb6c   :  { %10020 = vmatpush1.bf16.msra.mxu1 %v10019_v9  ;;  %10042 = vmatprep.subr.bf16.mxu0 %v10041_v36  ;;  %v7064_v9 = vld [vmem:[#allocation16 + $0x208] sm:$0xff] }
 0xb6d   :  { %10044 = vmatpush1.bf16.msra.mxu0 %v10043_v31  ;;  %10030 = vmatprep.subr.bf16.mxu1 %v10029_v20  ;;  %v7068_v36 = vld [vmem:[#allocation16 + $0x228] sm:$0xff]  ;;  %v10035_v31 = vpack.c.bf16 %v6841_v40, %v6837_v7  ;;  %v10057_v20 = vpack.c.bf16 %v7078_v48, %v7074_v23  ;;  %v7337_v40 = vld [vmem:[#allocation16 + $0x2d8] sm:$0xff]  ;;  %v7336_v23 = vld [vmem:[#allocation16 + $0x2d0] sm:$0xff] }
 0xb6e   :  { %8057 = vmatmul.mubr.msk.f32.gmra.mrb[36].mxu1 %vm4779_vm12, %v6367_v55  ;;  %8069 = vmatmul.mubr.msk.f32.gmra.mrb[38].mxu0 %vm4779_vm12, %v6605_v49  ;;  %v10031_v55 = vpack.c.bf16 %v6833_v58, %v6829_v13  ;;  %v10045_v39 = vpack.c.bf16 %v7068_v36, %v7064_v9  ;;  %v7067_v13 = vld [vmem:[#allocation16 + $0x220] sm:$0xff]  ;;  %v7072_v58 = vld [vmem:[#allocation16 + $0x248] sm:$0xff] }
 0xb6f   :  { %6479 = vmatprep.mubr.f32.mxu1 %v13259_v59  ;;  %6806 = vmatprep.mubr.f32.mxu0 %v13259_v59  ;;  %v10049_v52 = vpack.c.bf16 %v7076_v8, %v7072_v58  ;;  %v7327_v48 = vld [vmem:[#allocation16 + $0x288] sm:$0xff] }
 0xb70   :  { %10054 = vmatprep.subr.bf16.mxu0 %v10053_v42  ;;  %v7329_v42 = vld [vmem:[#allocation16 + $0x298] sm:$0xff]  ;;  %v7339_v58 = vld [vmem:[#allocation16 + $0x2e8] sm:$0xff] }
 0xb72   :  { %8058 = vmatmul.mubr.msk.f32.gmra.mrb[38].mxu1 %vm4779_vm12, %v12986_v27  ;;  %8070 = vmatmul.mubr.msk.f32.gmra.mrb[40].mxu0 %vm4779_vm12, %v12989_v1  ;;  %v7077_v27 = vld [vmem:[#allocation16 + $0x270] sm:$0xff] }
 0xb73   :  { %6699 = vmatprep.mubr.f32.mxu1 %v13259_v59  ;;  %7006 = vmatprep.mubr.f32.mxu0 %v13259_v59  ;;  %v10059_v47 = vpack.c.bf16 %v7077_v27, %v7073_v46  ;;  %v7331_v46 = vld [vmem:[#allocation16 + $0x2a8] sm:$0xff] }
 0xb76   :  { %8063 = vmatmul.mubr.msk.f32.vlgmr.msra.gmra.mrb[32].mxu1 %vm4779_vm12, %v6603_v56  ;;  %8075 = vmatmul.mubr.msk.f32.vlgmr.msra.gmra.mrb[34].mxu0 %vm4779_vm12, %v12867_v60  ;;  %v10069_v56 = vpack.c.bf16 %v7333_v35, %v7329_v42  ;;  %v7330_v35 = vld [vmem:[#allocation16 + $0x2a0] sm:$0xff] }
 0xb77   :  { %10032 = vmatpush1.bf16.msra.mxu1 %v10031_v55  ;;  %6705 = vmatprep.mubr.f32.mxu1 %v13259_v59  ;;  %v7071_v55 = vld [vmem:[#allocation16 + $0x240] sm:$0xff] }
 0xb78   :  { %7012 = vmatprep.mubr.f32.mxu0 %v13259_v59  ;;  %10034 = vmatprep.subr.bf16.mxu1 %v10033_v61  ;;  %v7075_v61 = vld [vmem:[#allocation16 + $0x260] sm:$0xff] }
 0xb79   :  { %10056 = vmatpush1.bf16.msra.mxu0 %v10055_v62  ;;  %v7341_v62 = vld [vmem:[#allocation16 + $0x2f8] sm:$0xff]  ;;  %v10051_v27 = vpack.c.bf16 %v7075_v61, %v7071_v55  ;;  %v7338_v55 = vld [vmem:[#allocation16 + $0x2e0] sm:$0xff] }
 0xb7a   :  { %8064 = vmatmul.mubr.msk.f32.gmra.mrb[34].mxu1 %vm4779_vm12, %v12931_v0  ;;  %8076 = vmatmul.mubr.msk.f32.gmra.mrb[36].mxu0 %vm4779_vm12, %v12897_v63  ;;  %v7063_v0 = vld [vmem:[#allocation16 + $0x200] sm:$0xff]  ;;  %v10073_v9 = vpack.c.bf16 %v7341_v62, %v7337_v40  ;;  %v7604_v40 = vld [vmem:[#allocation16 + $0x378] sm:$0xff]  ;;  %v7599_v62 = vld [vmem:[#allocation16 + $0x350] sm:$0xff] }
 0xb7b   :  { %6711 = vmatprep.mubr.f32.mxu1 %v13259_v59  ;;  %7018 = vmatprep.mubr.f32.mxu0 %v13259_v59  ;;  %v10047_v26 = vpack.c.bf16 %v7067_v13, %v7063_v0  ;;  %v7335_v13 = vld [vmem:[#allocation16 + $0x2c8] sm:$0xff] }
 0xb7c   :  { %10036 = vmatpush1.bf16.msra.mxu1 %v10035_v31  ;;  %10058 = vmatprep.subr.bf16.mxu0 %v10057_v20  ;;  %v7060_v31 = vsel %vm1626_vm4, %v12964_v25, 0.0  ;;  %v10061_v20 = vpack.c.bf16 %v7331_v46, %v7327_v48  ;;  %v7326_v25 = vld [vmem:[#allocation16 + $0x280] sm:$0xff]  ;;  %v7594_v48 = vld [vmem:[#allocation16 + $0x328] sm:$0xff] }
 0xb7d   :  { %10060 = vmatpush1.bf16.msra.mxu0 %v10059_v47  ;;  %10046 = vmatprep.subr.bf16.mxu1 %v10045_v39  ;;  %v7592_v47 = vld [vmem:[#allocation16 + $0x318] sm:$0xff] }
 0xb7e   :  { %8065 = vmatmul.mubr.msk.f32.gmra.mrb[36].mxu1 %vm4779_vm12, %v6605_v49  ;;  %8077 = vmatmul.mubr.msk.f32.gmra.mrb[38].mxu0 %vm4779_vm12, %v12917_v53  ;;  %v7332_v49 = vld [vmem:[#allocation16 + $0x2b0] sm:$0xff]  ;;  %v7596_v39 = vld [vmem:[#allocation16 + $0x338] sm:$0xff] }
 0xb7f   :  { %6717 = vmatprep.mubr.f32.mxu1 %v13259_v59  ;;  %7024 = vmatprep.mubr.f32.mxu0 %v13259_v59  ;;  %v10071_v7 = vpack.c.bf16 %v7332_v49, %v7328_v54  ;;  %v10085_v42 = vpack.c.bf16 %v7596_v39, %v7592_v47  ;;  %v7595_v54 = vld [vmem:[#allocation16 + $0x330] sm:$0xff]  ;;  %v10063_v49 = vpack.c.bf16 %v7330_v35, %v7326_v25  ;;  %v7593_v47 = vld [vmem:[#allocation16 + $0x320] sm:$0xff] }
 0xb80   :  { %10070 = vmatprep.subr.bf16.mxu0 %v10069_v56  ;;  %v7597_v35 = vld [vmem:[#allocation16 + $0x340] sm:$0xff] }
 0xb81   :  { %v7601_v56 = vld [vmem:[#allocation16 + $0x360] sm:$0xff] }
 0xb82   :  { %8066 = vmatmul.mubr.msk.f32.gmra.mrb[38].mxu1 %vm4779_vm12, %v12989_v1  ;;  %8078 = vmatmul.mubr.msk.f32.gmra.mrb[40].mxu0 %vm4779_vm12, %v12948_v16  ;;  %v7340_v1 = vld [vmem:[#allocation16 + $0x2f0] sm:$0xff] }
 0xb83   :  { %6917 = vmatprep.mubr.f32.mxu1 %v13259_v59  ;;  %7244 = vmatprep.mubr.f32.mxu0 %v13259_v59 }
 0xb86   :  { %8071 = vmatmul.mubr.msk.f32.vlgmr.msra.gmra.mrb[32].mxu1 %vm4779_vm12, %v12867_v60  ;;  %8083 = vmatmul.mubr.msk.f32.vlgmr.msra.gmra.mrb[34].mxu0 %vm4779_vm12, %v12941_v24  ;;  %v10075_v60 = vpack.c.bf16 %v7340_v1, %v7336_v23  ;;  %v7603_v23 = vld [vmem:[#allocation16 + $0x370] sm:$0xff]  ;;  %v7590_v1 = vld [vmem:[#allocation16 + $0x308] sm:$0xff] }
 0xb87   :  { %10048 = vmatpush1.bf16.msra.mxu1 %v10047_v26  ;;  %6923 = vmatprep.mubr.f32.mxu1 %v13259_v59  ;;  %v10065_v26 = vpack.c.bf16 %v7339_v58, %v7335_v13  ;;  %v10091_v36 = vpack.c.bf16 %v7603_v23, %v7599_v62 }
 0xb88   :  { %7250 = vmatprep.mubr.f32.mxu0 %v13259_v59  ;;  %10050 = vmatprep.subr.bf16.mxu1 %v10049_v52  ;;  %v7334_v52 = vld [vmem:[#allocation16 + $0x2c0] sm:$0xff] }
 0xb89   :  { %10072 = vmatpush1.bf16.msra.mxu0 %v10071_v7  ;;  %v7600_v7 = vld [vmem:[#allocation16 + $0x358] sm:$0xff]  ;;  %v10067_v46 = vpack.c.bf16 %v7338_v55, %v7334_v52 }
 0xb8a   :  { %8072 = vmatmul.mubr.msk.f32.gmra.mrb[34].mxu1 %vm4779_vm12, %v12897_v63  ;;  %8084 = vmatmul.mubr.msk.f32.gmra.mrb[36].mxu0 %vm4779_vm12, %v7060_v31  ;;  %v7058_v63 = vsel %vm1568_vm3, %v7052_v4, 0.0  ;;  %v7591_v4 = vld [vmem:[#allocation16 + $0x310] sm:$0xff] }
 0xb8b   :  { %6929 = vmatprep.mubr.f32.mxu1 %v13259_v59  ;;  %7256 = vmatprep.mubr.f32.mxu0 %v13259_v59  ;;  %v7062_v0 = vsel %vm1628_vm5, %v7058_v63, 0.0  ;;  %v10087_v61 = vpack.c.bf16 %v7595_v54, %v7591_v4  ;;  %v7602_v63 = vld [vmem:[#allocation16 + $0x368] sm:$0xff] }
 0xb8c   :  { %10052 = vmatpush1.bf16.msra.mxu1 %v10051_v27  ;;  %10074 = vmatprep.subr.bf16.mxu0 %v10073_v9  ;;  %v10089_v27 = vpack.c.bf16 %v7604_v40, %v7600_v7 }
 0xb8d   :  { %10076 = vmatpush1.bf16.msra.mxu0 %v10075_v60  ;;  %10062 = vmatprep.subr.bf16.mxu1 %v10061_v20  ;;  %v13266_v60 = vld [vmem:[#allocation33_spill] sm:$0xff] }
 0xb8e   :  { %8073 = vmatmul.mubr.msk.f32.gmra.mrb[36].mxu1 %vm4779_vm12, %v12917_v53  ;;  %8085 = vmatmul.mubr.msk.f32.gmra.mrb[38].mxu0 %vm4779_vm12, %v12998_v5  ;;  %v13265_v53 = vld [vmem:[#allocation31_spill] sm:$0xff]  ;;  %v7301_v20 = vadd.s32 2, %v13266_v60  ;;  %v7564_v58 = vadd.s32 3, %v13266_v60 }
 0xb8f   :  { %6935 = vmatprep.mubr.f32.mxu1 %v13259_v59  ;;  %7262 = vmatprep.mubr.f32.mxu0 %v13259_v59  ;;  %v7299_v8 = vadd.s32 2, %v13265_v53 }
 0xb90   :  { %10086 = vmatprep.subr.bf16.mxu0 %v10085_v42  ;;  %vm7309_vm1 = vcmp.le.s32.totalorder %v7301_v20, 15  ;;  %v7598_v42 = vld [vmem:[#allocation16 + $0x348] sm:$0xff]  ;;  %vm7572_vm3 = vcmp.le.s32.totalorder %v7564_v58, 15 }
 0xb91   :  { %vm7307_vm0 = vcmp.le.s32.totalorder %v7299_v8, 15  ;;  %v10081_v25 = vpack.c.bf16 %v7602_v63, %v7598_v42  ;;  %v6040_v8 = vld [vmem:[#allocation17] sm:$0xf] }
 0xb92   :  { %8074 = vmatmul.mubr.msk.f32.gmra.mrb[38].mxu1 %vm4779_vm12, %v12948_v16  ;;  %8086 = vmatmul.mubr.msk.f32.gmra.mrb[40].mxu0 %vm4779_vm12, %v7062_v0  ;;  %v7323_v9 = vsel %vm7307_vm0, %v12978_v6, 0.0  ;;  %v7297_v6 = vsel %vm7285_vm14, %v7291_v30, 0.0  ;;  %v6308_v4 = vrot.slane %v6040_v8, %v11451_v29  ;;  %v6300_v42 = vrot.slane %v6040_v8, %v11427_v3 }
 0xb93   :  { %7155 = vmatprep.mubr.f32.mxu1 %v13259_v59  ;;  %7507 = vmatprep.mubr.f32.mxu0 %v13259_v59  ;;  %v7325_v39 = vsel %vm7309_vm1, %v7297_v6, 0.0 }
 0xb96   :  { %8079 = vmatmul.mubr.msk.f32.vlgmr.msra.gmra.mrb[32].mxu1 %vm4779_vm12, %v12941_v24  ;;  %8091 = vmatmul.mubr.msk.f32.vlgmr.msra.gmra.mrb[34].mxu0 %vm4779_vm12, %v12945_v44  ;;  %v10077_v24 = vpack.c.bf16 %v7594_v48, %v7590_v1 }
 0xb97   :  { %10064 = vmatpush1.bf16.msra.mxu1 %v10063_v49  ;;  %7161 = vmatprep.mubr.f32.mxu1 %v13259_v59 }
 0xb98   :  { %7513 = vmatprep.mubr.f32.mxu0 %v13259_v59  ;;  %10066 = vmatprep.subr.bf16.mxu1 %v10065_v26 }
 0xb99   :  { %10088 = vmatpush1.bf16.msra.mxu0 %v10087_v61 }
 0xb9a   :  { %8080 = vmatmul.mubr.msk.f32.gmra.mrb[34].mxu1 %vm4779_vm12, %v7060_v31  ;;  %8092 = vmatmul.mubr.msk.f32.gmra.mrb[36].mxu0 %vm4779_vm12, %v7323_v9  ;;  %v7589_v31 = vld [vmem:[#allocation16 + $0x300] sm:$0xff] }
 0xb9b   :  { %7167 = vmatprep.mubr.f32.mxu1 %v13259_v59  ;;  %7519 = vmatprep.mubr.f32.mxu0 %v13259_v59  ;;  %v10079_v30 = vpack.c.bf16 %v7593_v47, %v7589_v31  ;;  %v6296_v47 = vrot.slane %v6040_v8, %v11421_v51 }
 0xb9c   :  { %10068 = vmatpush1.bf16.msra.mxu1 %v10067_v46  ;;  %10090 = vmatprep.subr.bf16.mxu0 %v10089_v27 }
 0xb9d   :  { %10092 = vmatpush1.bf16.msra.mxu0 %v10091_v36  ;;  %10078 = vmatprep.subr.bf16.mxu1 %v10077_v24 }
 0xb9e   :  { %8081 = vmatmul.mubr.msk.f32.gmra.mrb[36].mxu1 %vm4779_vm12, %v12998_v5  ;;  %8093 = vmatmul.mubr.msk.f32.gmra.mrb[38].mxu0 %vm4779_vm12, %v13003_v11  ;;  %v7562_v5 = vadd.s32 3, %v13265_v53 }
 0xb9f   :  { %7173 = vmatprep.mubr.f32.mxu1 %v13259_v59  ;;  %7525 = vmatprep.mubr.f32.mxu0 %v13259_v59 }
 0xba0   :  { %vm7570_vm2 = vcmp.le.s32.totalorder %v7562_v5, 15 }
 0xba1   :  { %v7586_v13 = vsel %vm7570_vm2, %v13013_v12, 0.0 }
 0xba2   :  { %8082 = vmatmul.mubr.msk.f32.gmra.mrb[38].mxu1 %vm4779_vm12, %v7062_v0  ;;  %8094 = vmatmul.mubr.msk.f32.gmra.mrb[40].mxu0 %vm4779_vm12, %v7325_v39  ;;  %v10083_v0 = vpack.c.bf16 %v7601_v56, %v7597_v35 }
 0xba3   :  { %7418 = vmatprep.mubr.f32.mxu1 %v13259_v59  ;;  %7770 = vmatprep.mubr.f32.mxu0 %v13259_v59 }
 0xba6   :  { %8087 = vmatmul.mubr.msk.f32.vlgmr.msra.gmra.mrb[32].mxu1 %vm4779_vm12, %v12945_v44  ;;  %8099 = vmatmul.mubr.msk.f32.vlgmr.msra.gmra.mrb[34].mxu0 %vm4779_vm12, %v13010_v2  ;;  %v7560_v44 = vsel %vm7548_vm15, %v7554_v22, 0.0 }
 0xba7   :  { %10080 = vmatpush1.bf16.msra.mxu1 %v10079_v30  ;;  %7424 = vmatprep.mubr.f32.mxu1 %v13259_v59  ;;  %v7588_v12 = vsel %vm7572_vm3, %v7560_v44, 0.0 }
 0xba8   :  { %7776 = vmatprep.mubr.f32.mxu0 %v13259_v59  ;;  %10082 = vmatprep.subr.bf16.mxu1 %v10081_v25 }
 0xbaa   :  { %8088 = vmatmul.mubr.msk.f32.gmra.mrb[34].mxu1 %vm4779_vm12, %v7323_v9  ;;  %8100 = vmatmul.mubr.msk.f32.gmra.mrb[36].mxu0 %vm4779_vm12, %v7586_v13 }
 0xbab   :  { %7430 = vmatprep.mubr.f32.mxu1 %v13259_v59  ;;  %7782 = vmatprep.mubr.f32.mxu0 %v13259_v59 }
 0xbac   :  { %10084 = vmatpush1.bf16.msra.mxu1 %v10083_v0 }
 0xbae   :  { %8089 = vmatmul.mubr.msk.f32.gmra.mrb[36].mxu1 %vm4779_vm12, %v13003_v11  ;;  %8101 = vmatmul.mubr.msk.f32.gmra.mrb[38].mxu0 %vm4779_vm12, %v13021_v41 }
 0xbaf   :  { %7436 = vmatprep.mubr.f32.mxu1 %v13259_v59  ;;  %7788 = vmatprep.mubr.f32.mxu0 %v13259_v59 }
 0xbb2   :  { %8090 = vmatmul.mubr.msk.f32.gmra.mrb[38].mxu1 %vm4779_vm12, %v7325_v39  ;;  %8102 = vmatmul.mubr.msk.f32.gmra.mrb[40].mxu0 %vm4779_vm12, %v7588_v12 }
 0xbb3   :  { %7681 = vmatprep.mubr.f32.mxu1 %v13259_v59 }
 0xbb6   :  { %8095 = vmatmul.mubr.msk.f32.vlgmr.msra.gmra.mrb[32].mxu1 %vm4779_vm12, %v13010_v2  ;;  %v6304_v2 = vrot.slane %v6040_v8, %v11424_v15 }
 0xbb7   :  { %7687 = vmatprep.mubr.f32.mxu1 %v13259_v59 }
 0xbba   :  { %8096 = vmatmul.mubr.msk.f32.gmra.mrb[34].mxu1 %vm4779_vm12, %v7586_v13 }
 0xbbb   :  { %7693 = vmatprep.mubr.f32.mxu1 %v13259_v59 }
 0xbbe   :  { %8097 = vmatmul.mubr.msk.f32.gmra.mrb[36].mxu1 %vm4779_vm12, %v13021_v41 }
 0xbbf   :  { %7699 = vmatprep.mubr.f32.mxu1 %v13259_v59 }
 0xbc2   :  { %8098 = vmatmul.mubr.msk.f32.gmra.mrb[38].mxu1 %vm4779_vm12, %v7588_v12 }
 0xc31   :  { %v6281_v16 = vpop.f32.mrb[40].mxu1 }
 0xc32   :  { %v6283_v11 = vpop.f32.mrb[41].mxu1  ;;  %v6323_v62 = vadd.f32 %v6304_v2, %v6281_v16 }
 0xc33   :  { %v6324_v1 = vadd.f32 %v6308_v4, %v6283_v11 }
 0xc35   :  { %v6287_v22 = vpop.f32.mrb[42].mxu1 }
 0xc36   :  { %v6289_v53 = vpop.f32.mrb[43].mxu1  ;;  %v6327_v9 = vadd.f32 %v6304_v2, %v6287_v22 }
 0xc37   :  { %v6328_v24 = vadd.f32 %v6308_v4, %v6289_v53 }
 0xc79   :  { %v7772_v54 = vpop.f32.mrb[34].mxu0 }
 0xc7a   :  { %v10105_v49 = vadd.f32 %v7772_v54, %v6304_v2  ;;  %v7774_v26 = vpop.f32.mrb[35].mxu0 }
 0xc7b   :  { %v10106_v52 = vadd.f32 %v7774_v26, %v6308_v4 }
 0xc7c   :  { %v8105_v55 = vmul.f32 -1.442695, %v10105_v49 }
 0xc7d   :  { %v8106_v61 = vmul.f32 -1.442695, %v10106_v52  ;;  %v7778_v41 = vpop.f32.mrb[36].mxu0 }
 0xc7e   :  { %10613 = vpow2.f32 %v8105_v55  ;;  %v10107_v59 = vadd.f32 %v7778_v41, %v6304_v2  ;;  %v7780_v7 = vpop.f32.mrb[37].mxu0 }
 0xc7f   :  { %10615 = vpow2.f32 %v8106_v61  ;;  %v10108_v40 = vadd.f32 %v7780_v7, %v6308_v4 }
 0xc80   :  { %v8109_v23 = vmul.f32 -1.442695, %v10107_v59 }
 0xc81   :  { %v8110_v48 = vmul.f32 -1.442695, %v10108_v40  ;;  %v7784_v46 = vpop.f32.mrb[38].mxu0 }
 0xc82   :  { %10617 = vpow2.f32 %v8109_v23  ;;  %v10110_v15 = vadd.f32 %v7784_v46, %v6323_v62  ;;  %v7786_v29 = vpop.f32.mrb[39].mxu0 }
 0xc83   :  { %10619 = vpow2.f32 %v8110_v48  ;;  %v10112_v27 = vadd.f32 %v7786_v29, %v6324_v1 }
 0xc84   :  { %v8113_v36 = vmul.f32 -1.442695, %v10110_v15 }
 0xc85   :  { %v8114_v60 = vmul.f32 -1.442695, %v10112_v27  ;;  %v7790_v20 = vpop.f32.mrb[40].mxu0 }
 0xc86   :  { %10621 = vpow2.f32 %v8113_v36  ;;  %v10114_v6 = vadd.f32 %v7790_v20, %v6327_v9  ;;  %v7792_v31 = vpop.f32.mrb[41].mxu0 }
 0xc87   :  { %10623 = vpow2.f32 %v8114_v60  ;;  %v10116_v39 = vadd.f32 %v7792_v31, %v6328_v24  ;;  %v10699_v31 = vld [vmem:[#allocation2 + $0x10] sm:$0xff] }
 0xc88   :  { %v10614_v63 = vpop.eup %10613  ;;  %v8117_v5 = vmul.f32 -1.442695, %v10114_v6 }
 0xc89   :  { %v10616_v30 = vpop.eup %10615  ;;  %v7861_v25 = vadd.f32 1.0, %v10614_v63  ;;  %v8118_v35 = vmul.f32 -1.442695, %v10116_v39  ;;  %v7683_v56 = vpop.f32.mrb[32].mxu1 }
 0xc8a   :  { %v7862_v0 = vadd.f32 1.0, %v10616_v30  ;;  %10625 = vpow2.f32 %v8117_v5  ;;  %v10097_v13 = vadd.f32 %v7683_v56, %v6296_v47  ;;  %v7685_v58 = vpop.f32.mrb[33].mxu1 }
 0xc8b   :  { %10627 = vrcp.f32 %v7861_v25  ;;  %v10098_v44 = vadd.f32 %v7685_v58, %v6300_v42  ;;  %v10700_v25 = vld [vmem:[#allocation2 + $0x18] sm:$0xff]  ;;  %v10701_v58 = vld [vmem:[#allocation2 + $0x30] sm:$0xff] }
 0xc8c   :  { %v10618_v12 = vpop.eup %10617  ;;  %10629 = vrcp.f32 %v7862_v0  ;;  %v8103_v16 = vmul.f32 -1.442695, %v10097_v13 }
 0xc8d   :  { %v10620_v51 = vpop.eup %10619  ;;  %v7865_v11 = vadd.f32 1.0, %v10618_v12  ;;  %10631 = vpow2.f32 %v8118_v35  ;;  %v8104_v22 = vmul.f32 -1.442695, %v10098_v44  ;;  %v7689_v3 = vpop.f32.mrb[34].mxu1 }
 0xc8e   :  { %v7866_v53 = vadd.f32 1.0, %v10620_v51  ;;  %10633 = vpow2.f32 %v8103_v16  ;;  %v10099_v8 = vadd.f32 %v7689_v3, %v6296_v47  ;;  %v7691_v2 = vpop.f32.mrb[35].mxu1  ;;  %v10702_v51 = vld [vmem:[#allocation2 + $0x38] sm:$0xff] }
 0xc8f   :  { %10635 = vrcp.f32 %v7865_v11  ;;  %v10100_v4 = vadd.f32 %v7691_v2, %v6300_v42  ;;  %v10703_v2 = vld [vmem:[#allocation2 + $0x50] sm:$0xff] }
 0xc90   :  { %v10622_v54 = vpop.eup %10621  ;;  %10637 = vrcp.f32 %v7866_v53  ;;  %v8107_v49 = vmul.f32 -1.442695, %v10099_v8 }
 0xc91   :  { %v10624_v26 = vpop.eup %10623  ;;  %v7869_v52 = vadd.f32 1.0, %v10622_v54  ;;  %10639 = vpow2.f32 %v8104_v22  ;;  %v8108_v55 = vmul.f32 -1.442695, %v10100_v4  ;;  %v7695_v61 = vpop.f32.mrb[36].mxu1 }
 0xc92   :  { %v7870_v41 = vadd.f32 1.0, %v10624_v26  ;;  %10641 = vpow2.f32 %v8107_v49  ;;  %v10101_v59 = vadd.f32 %v7695_v61, %v6296_v47  ;;  %v7697_v7 = vpop.f32.mrb[37].mxu1  ;;  %v10704_v26 = vld [vmem:[#allocation2 + $0x58] sm:$0xff] }
 0xc93   :  { %10643 = vrcp.f32 %v7869_v52  ;;  %v10102_v40 = vadd.f32 %v7697_v7, %v6300_v42  ;;  %v10705_v7 = vld [vmem:[#allocation2 + $0x70] sm:$0xff] }
 0xc94   :  { %v10626_v62 = vpop.eup %10625  ;;  %10645 = vrcp.f32 %v7870_v41  ;;  %v8111_v23 = vmul.f32 -1.442695, %v10101_v59 }
 0xc95   :  { %v10628_v1 = vpop.eup %10627  ;;  %v7873_v48 = vadd.f32 1.0, %v10626_v62  ;;  %10647 = vpow2.f32 %v8108_v55  ;;  %v8112_v46 = vmul.f32 -1.442695, %v10102_v40  ;;  %v7701_v15 = vpop.f32.mrb[38].mxu1 }
 0xc96   :  { %v10630_v29 = vpop.eup %10629  ;;  %v7909_v27 = vmul.f32 %v10628_v1, %v11986_v34  ;;  %10649 = vpow2.f32 %v8111_v23  ;;  %v10103_v9 = vadd.f32 %v7701_v15, %v6296_v47  ;;  %v7703_v36 = vpop.f32.mrb[39].mxu1 }
 0xc97   :  { %v10632_v24 = vpop.eup %10631  ;;  %v7910_v60 = vmul.f32 %v10630_v29, %v11989_v17  ;;  %10651 = vrcp.f32 %v7873_v48  ;;  %v10104_v20 = vadd.f32 %v7703_v36, %v6300_v42 }
 0xc98   :  { %v10634_v6 = vpop.eup %10633  ;;  %v7925_v39 = vadd.f32 %v10699_v31, %v7909_v27  ;;  %v7874_v63 = vadd.f32 1.0, %v10632_v24  ;;  %10653 = vpow2.f32 %v8112_v46  ;;  %v8115_v5 = vmul.f32 -1.442695, %v10103_v9  ;;  %v10706_v46 = vld [vmem:[#allocation2 + $0x78] sm:$0xff]  ;;  %v10707_v27 = vld [vmem:[#allocation2] sm:$0xff] }
 0xc99   :  { %v10636_v30 = vpop.eup %10635  ;;  %v7926_v35 = vadd.f32 %v10700_v25, %v7910_v60  ;;  %v7859_v56 = vadd.f32 1.0, %v10634_v6  ;;  %v8116_v0 = vmul.f32 -1.442695, %v10104_v20  ;;  %v10708_v20 = vld [vmem:[#allocation2 + $0x8] sm:$0xff]  ;;  %v10709_v31 = vld [vmem:[#allocation2 + $0x20] sm:$0xff] }
 0xc9a   :  { %v10638_v34 = vpop.eup %10637  ;;  %7941 = vst [vmem:[#allocation19 + $0x10] sm:$0xff] %v7925_v39  ;;  %v7913_v47 = vmul.f32 %v10636_v30, %v11998_v10  ;;  %10655 = vrcp.f32 %v7874_v63 }
 0xc9b   :  { %v10640_v13 = vpop.eup %10639  ;;  %7942 = vst [vmem:[#allocation19 + $0x18] sm:$0xff] %v7926_v35  ;;  %v7914_v17 = vmul.f32 %v10638_v34, %v12001_v45  ;;  %10657 = vrcp.f32 %v7859_v56  ;;  %v10710_v35 = vld [vmem:[#allocation2 + $0x28] sm:$0xff]  ;;  %v10711_v56 = vld [vmem:[#allocation2 + $0x40] sm:$0xff] }
 0xc9c   :  { %v10642_v42 = vpop.eup %10641  ;;  %v7929_v44 = vadd.f32 %v10701_v58, %v7913_v47  ;;  %v7860_v12 = vadd.f32 1.0, %v10640_v13  ;;  %10659 = vpow2.f32 %v8115_v5  ;;  %v10712_v34 = vld [vmem:[#allocation2 + $0x48] sm:$0xff] }
 0xc9d   :  { %v10644_v16 = vpop.eup %10643  ;;  %v7930_v11 = vadd.f32 %v10702_v51, %v7914_v17  ;;  %v7863_v22 = vadd.f32 1.0, %v10642_v42  ;;  %10661 = vpow2.f32 %v8116_v0 }
 0xc9e   :  { %v10646_v3 = vpop.eup %10645  ;;  %7945 = vst [vmem:[#allocation19 + $0x30] sm:$0xff] %v7929_v44  ;;  %v7917_v10 = vmul.f32 %v10644_v16, %v12016_v38  ;;  %10663 = vrcp.f32 %v7860_v12  ;;  %v10714_v44 = vld [vmem:[#allocation2 + $0x68] sm:$0xff] }
 0xc9f   :  { %v10648_v53 = vpop.eup %10647  ;;  %7946 = vst [vmem:[#allocation19 + $0x38] sm:$0xff] %v7930_v11  ;;  %v7918_v45 = vmul.f32 %v10646_v3, %v12019_v57  ;;  %10665 = vrcp.f32 %v7863_v22 }
 0xca0   :  { %v10650_v8 = vpop.eup %10649  ;;  %v7933_v4 = vadd.f32 %v10703_v2, %v7917_v10  ;;  %v7864_v54 = vadd.f32 1.0, %v10648_v53 }
 0xca1   :  { %v10652_v49 = vpop.eup %10651  ;;  %v7934_v52 = vadd.f32 %v10704_v26, %v7918_v45  ;;  %v7867_v55 = vadd.f32 1.0, %v10650_v8 }
 0xca2   :  { %v10654_v61 = vpop.eup %10653  ;;  %7949 = vst [vmem:[#allocation19 + $0x50] sm:$0xff] %v7933_v4  ;;  %v7921_v41 = vmul.f32 %v10652_v49, %v12034_v33  ;;  %10667 = vrcp.f32 %v7864_v54 }
 0xca3   :  { %7950 = vst [vmem:[#allocation19 + $0x58] sm:$0xff] %v7934_v52  ;;  %10669 = vrcp.f32 %v7867_v55  ;;  %v7868_v38 = vadd.f32 1.0, %v10654_v61 }
 0xca4   :  { %v10656_v59 = vpop.eup %10655  ;;  %v7937_v57 = vadd.f32 %v10705_v7, %v7921_v41 }
 0xca5   :  { %v10658_v40 = vpop.eup %10657  ;;  %v7922_v62 = vmul.f32 %v10656_v59, %v12039_v21  ;;  %10671 = vrcp.f32 %v7868_v38 }
 0xca6   :  { %v10660_v23 = vpop.eup %10659  ;;  %7953 = vst [vmem:[#allocation19 + $0x70] sm:$0xff] %v7937_v57  ;;  %v7907_v1 = vmul.f32 %v10658_v40, %v11992_v28 }
 0xca7   :  { %v10662_v48 = vpop.eup %10661  ;;  %v7938_v15 = vadd.f32 %v10706_v46, %v7922_v62  ;;  %v7871_v29 = vadd.f32 1.0, %v10660_v23 }
 0xca8   :  { %v10664_v33 = vpop.eup %10663  ;;  %v7923_v9 = vadd.f32 %v10707_v27, %v7907_v1  ;;  %v7872_v36 = vadd.f32 1.0, %v10662_v48 }
 0xca9   :  { %v10666_v24 = vpop.eup %10665  ;;  %7954 = vst [vmem:[#allocation19 + $0x78] sm:$0xff] %v7938_v15  ;;  %v7908_v60 = vmul.f32 %v10664_v33, %v11995_v43  ;;  %10673 = vrcp.f32 %v7871_v29 }
 0xcaa   :  { %7939 = vst [vmem:[#allocation19] sm:$0xff] %v7923_v9  ;;  %v7911_v21 = vmul.f32 %v10666_v24, %v12010_v18  ;;  %10675 = vrcp.f32 %v7872_v36 }
 0xcab   :  { %v7924_v6 = vadd.f32 %v10708_v20, %v7908_v60 }
 0xcac   :  { %v10668_v28 = vpop.eup %10667  ;;  %v7927_v39 = vadd.f32 %v10709_v31, %v7911_v21 }
 0xcad   :  { %v10670_v63 = vpop.eup %10669  ;;  %7940 = vst [vmem:[#allocation19 + $0x8] sm:$0xff] %v7924_v6  ;;  %v7912_v5 = vmul.f32 %v10668_v28, %v12013_v19 }
 0xcae   :  { %7943 = vst [vmem:[#allocation19 + $0x20] sm:$0xff] %v7927_v39  ;;  %v7915_v30 = vmul.f32 %v10670_v63, %v12026_v50  ;;  %v10713_v50 = vld [vmem:[#allocation2 + $0x60] sm:$0xff] }
 0xcaf   :  { %v10672_v25 = vpop.eup %10671  ;;  %v7928_v43 = vadd.f32 %v10710_v35, %v7912_v5 }
 0xcb0   :  { %v7931_v0 = vadd.f32 %v10711_v56, %v7915_v30  ;;  %v7916_v18 = vmul.f32 %v10672_v25, %v12029_v32 }
 0xcb1   :  { %7944 = vst [vmem:[#allocation19 + $0x28] sm:$0xff] %v7928_v43 }
 0xcb2   :  { %7947 = vst [vmem:[#allocation19 + $0x40] sm:$0xff] %v7931_v0  ;;  %v7932_v47 = vadd.f32 %v10712_v34, %v7916_v18 }
 0xcb3   :  { %v10674_v13 = vpop.eup %10673 }
 0xcb4   :  { %v10676_v17 = vpop.eup %10675  ;;  %7948 = vst [vmem:[#allocation19 + $0x48] sm:$0xff] %v7932_v47  ;;  %v7919_v42 = vmul.f32 %v10674_v13, %v12042_v37 }
 0xcb5   :  { %v7920_v19 = vmul.f32 %v10676_v17, %v12045_v14 }
 0xcb6   :  { %v7935_v58 = vadd.f32 %v10713_v50, %v7919_v42 }
 0xcb7   :  { %v7936_v12 = vadd.f32 %v10714_v44, %v7920_v19 }
 0xcb8   :  { %7951 = vst [vmem:[#allocation19 + $0x60] sm:$0xff] %v7935_v58 }
 0xcb9   :  { %7952 = vst [vmem:[#allocation19 + $0x68] sm:$0xff] %v7936_v12 }
 0xcba   :  { %10946 = shalt.err (!%p10943_p0)
}
 0xcbb   :  { %s10947_s5 = scalar_lea.hbm %s13221_s13, 2048 }
 0xcbc   :  { %p10948_p1 = scmp.ne.s32.totalorder %s13221_s13, %s10947_s5  ;;  %p10951_p2 = scmp.lt.u32.totalorder %s10947_s5, %s13221_s13 }
 0xcbe   :  { %p10953_p3 = pnand %p10951_p2, %p10948_p1 }
 0xcc0   :  { %10956 = shalt.err (!%p10953_p3)
}
 0xcc1   :  { %7966 = dma.vmem_to_hbm [thread:$0]  %s7961_s22, 2048, %s13221_s13, [#allocation4], %s10973_s20, %s10973_s20, %s10974_s21  }
 0xcc2   :  { %10969 = dma.done.wait [#allocation4], 2048  }
 0xcc3   :  { %10970 = vsyncadd [#allocation4], 4294965248 }
 0xcc4   :  { %7970 = vsyncpa [#allocation3], 1 }
 0xcc5   :  { %7971 = vsyncpa [#allocation6], 1 }
 0xcc6   :  { %7972 = vsyncpa [#allocation9], 1 }
 0xcc7   :  { %7973 = vsyncpa [#allocation12], 1 }
 0xcc8   :  { %7974 = vsyncpa [#allocation15], 1 }
 0xcc9   :  { %7975 = vsyncpa [#allocation18], 1 }
 0xcca   :  { %7976 = vsyncpa [#allocation4], 1 }

</bundles_post_ra>
